<compile_context>
chip_gen: v7x
topology: tpu7x:2x2x1
jax: 0.10.0
libtpu: 0.0.40
codegen_flags: <defaults>
</compile_context>

<pallas_src>
import functools

import jax
import jax.numpy as jnp
from jax.experimental import pallas as pl
from jax.experimental.pallas import tpu as pltpu

LANES = 128


def _ceil_to(x, m):
    return ((x + m - 1) // m) * m


def _pick_row_tile(rows, cap=512):
    """Largest multiple-of-8 divisor of `rows` that is <= cap (rows itself if small)."""
    if rows <= cap:
        return rows
    for tm in range(cap - cap % 8, 7, -8):
        if rows % tm == 0:
            return tm
    return 8


# --------------------------- Pallas kernels ----------------------------------
def _conv3x3_stats_kernel(mask_ref, a_ref, b_ref, x_ref, w_ref,
                          y_ref, sum_ref, ssq_ref, xin_ref, *, H, W, fuse_in):
    """3x3 conv (no bias) of one image in padded-flattened layout + BN partials.

    mask_ref : (R, 1)      f32   1.0 at valid interior pixels, 0.0 elsewhere
    a_ref    : (1, CP)     f32   folded BN scale of the previous layer (fuse_in)
    b_ref    : (1, CP)     f32   folded BN shift of the previous layer (fuse_in)
    x_ref    : (1, R, CP)  bf16  input activation (pre-BN if fuse_in)
    w_ref    : (9, CP, CP) bf16  tap weights, w_ref[3*kh+kw][cin, cout]
    y_ref    : (1, R, CP)  bf16  pre-BN conv output (same layout as the input)
    sum_ref, ssq_ref : (1, 1, CP) f32  per-image BN partial statistics
    xin_ref  : (R, CP)     bf16  VMEM scratch for the BN+ReLU'd input (fuse_in)
    """
    Wp = W + 2
    HWp = H * Wp               # conv output rows computed per image (incl. junk cols)
    base = Wp + 1              # flat offset of output pixel (0, 0)

    if fuse_in:
        # Fused BatchNorm + ReLU of the previous layer, applied ONCE to the whole
        # input block (not per tap). Halo / junk / unwritten rows are forced back
        # to zero (jnp.where, so stale-HBM garbage cannot leak through as NaN).
        xin = x_ref[0].astype(jnp.float32)
        act = jnp.maximum(xin * a_ref[...] + b_ref[...], 0.0)
        keep = mask_ref[...] > 0.0
        xin_ref[...] = jnp.where(keep, act, 0.0).astype(xin_ref.dtype)

        def tap(d):
            return xin_ref[d:d + HWp, :]
    else:
        def tap(d):
            return x_ref[0, d:d + HWp, :]

    # 9 shifted contiguous row slices, accumulated in a traced f32 value so the
    # MXU accumulation chains (no per-tap VMEM RMW, no scratch->output copy).
    acc = jnp.dot(tap(0), w_ref[0], preferred_element_type=jnp.float32)
    for kh in range(3):
        for kw in range(3):
            if kh == 0 and kw == 0:
                continue
            d = kh * Wp + kw
            acc = acc + jnp.dot(tap(d), w_ref[3 * kh + kw],
                                preferred_element_type=jnp.float32)

    y_ref[0, base:base + HWp, :] = acc.astype(y_ref.dtype)

    # Per-image BN partials from the f32 accumulator; junk columns masked out.
    valid = mask_ref[base:base + HWp, :] > 0.0
    yv = jnp.where(valid, acc, 0.0)
    sum_ref[0] = jnp.sum(yv, axis=0, keepdims=True)
    ssq_ref[0] = jnp.sum(yv * yv, axis=0, keepdims=True)


def _bn_relu_kernel(mask_ref, a_ref, b_ref, y_ref, o_ref):
    """Final epilogue: o = relu(y * a + b) at valid pixels, 0 elsewhere."""
    y = y_ref[0].astype(jnp.float32)
    act = jnp.maximum(y * a_ref[...] + b_ref[...], 0.0)
    o_ref[0] = jnp.where(mask_ref[...] > 0.0, act, 0.0)


# --------------------------- layer wrappers -----------------------------------
def _conv_layer(x_flat, w9, a_in, b_in, mask, *, H, W, fuse_in):
    """One conv (+ optional fused input BN+ReLU). x_flat: (N, R, CP) bf16."""
    N, R, CP = x_flat.shape
    kernel = functools.partial(_conv3x3_stats_kernel, H=H, W=W, fuse_in=fuse_in)
    y_pre, psum, pssq = pl.pallas_call(
        kernel,
        grid=(N,),
        in_specs=[
            pl.BlockSpec((R, 1), lambda n: (0, 0)),
            pl.BlockSpec((1, CP), lambda n: (0, 0)),
            pl.BlockSpec((1, CP), lambda n: (0, 0)),
            pl.BlockSpec((1, R, CP), lambda n: (n, 0, 0)),
            pl.BlockSpec((9, CP, CP), lambda n: (0, 0, 0)),  # constant -> fetched once
        ],
        out_specs=[
            pl.BlockSpec((1, R, CP), lambda n: (n, 0, 0)),
            pl.BlockSpec((1, 1, CP), lambda n: (n, 0, 0)),
            pl.BlockSpec((1, 1, CP), lambda n: (n, 0, 0)),
        ],
        out_shape=[
            jax.ShapeDtypeStruct((N, R, CP), jnp.bfloat16),
            jax.ShapeDtypeStruct((N, 1, CP), jnp.float32),
            jax.ShapeDtypeStruct((N, 1, CP), jnp.float32),
        ],
        scratch_shapes=[pltpu.VMEM((R, CP), jnp.bfloat16)],
        compiler_params=pltpu.CompilerParams(
            dimension_semantics=("parallel",)),
    )(mask, a_in, b_in, x_flat, w9)
    return y_pre, psum, pssq


def _fold_bn(psum, pssq, gamma_p, beta_p, count, eps=1e-5):
    """Combine per-image partials into folded BN scale/shift (f32)."""
    mean = jnp.sum(psum, axis=0) / count                         # (1, CP)
    var = jnp.maximum(jnp.sum(pssq, axis=0) / count - mean * mean, 0.0)
    inv = jax.lax.rsqrt(var + eps)
    a = gamma_p.reshape(1, -1) * inv
    b = beta_p.reshape(1, -1) - a * mean
    return a.astype(jnp.float32), b.astype(jnp.float32)


def _bn_relu_epilogue(y_pre, a, b, mask):
    N, R, CP = y_pre.shape
    TM = _pick_row_tile(R)
    return pl.pallas_call(
        _bn_relu_kernel,
        grid=(N, R // TM),
        in_specs=[
            pl.BlockSpec((TM, 1), lambda n, m: (m, 0)),
            pl.BlockSpec((1, CP), lambda n, m: (0, 0)),
            pl.BlockSpec((1, CP), lambda n, m: (0, 0)),
            pl.BlockSpec((1, TM, CP), lambda n, m: (n, m, 0)),
        ],
        out_specs=pl.BlockSpec((1, TM, CP), lambda n, m: (n, m, 0)),
        out_shape=jax.ShapeDtypeStruct((N, R, CP), jnp.float32),
        compiler_params=pltpu.CompilerParams(
            dimension_semantics=("parallel", "parallel")),
    )(mask, a, b, y_pre)


# --------------------------- parameter plumbing -------------------------------
def _weights_to_k9(w_oihw, cp):
    """(Cout, Cin, 3, 3) -> (9, cp, cp) bf16, index 3*kh+kw, zero-padded channels."""
    co, ci = w_oihw.shape[0], w_oihw.shape[1]
    w = jnp.transpose(w_oihw, (2, 3, 1, 0))                      # (3, 3, ci, co)
    w = jnp.pad(w, ((0, 0), (0, 0), (0, cp - ci), (0, cp - co)))
    return w.reshape(9, cp, cp).astype(jnp.bfloat16)


def _pad_last(v, cp):
    return jnp.pad(v, [(0, 0)] * (v.ndim - 1) + [(0, cp - v.shape[-1])])


def conv_block_forward(x_nchw, params, eps=1e-5):
    """Pallas forward of conv_block: (Conv3x3 -> BN(train) -> ReLU) x 2, NCHW in/out."""
    N, cin, H, W = x_nchw.shape
    cout = params["w1"].shape[0]
    CP = _ceil_to(max(cin, cout, LANES), LANES)                  # lane-dense channels
    Hp, Wp = H + 2, W + 2
    # +2 rows so the bottom-right taps of the trailing junk rows stay in bounds,
    # rounded up to a multiple of 16 for clean bf16 sublane packing.
    R = _ceil_to(Hp * Wp + 2, 16)

    # Valid-pixel mask over the padded-flattened layout (shared by both layers).
    q = jnp.arange(R)
    row, col = q // Wp, q % Wp
    mask = (((row >= 1) & (row <= H) & (col >= 1) & (col <= W))
            .astype(jnp.float32)[:, None])                       # (R, 1)

    # One-time layout of the raw input into padded-flattened (N, R, CP) bf16;
    # all intermediate activations are produced directly in this layout.
    x = jnp.transpose(x_nchw, (0, 2, 3, 1)).astype(jnp.float32)  # (N, H, W, cin)
    x = jnp.pad(x, ((0, 0), (1, 1), (1, 1), (0, CP - cin)))      # (N, Hp, Wp, CP)
    x = x.reshape(N, Hp * Wp, CP)
    x = jnp.pad(x, ((0, 0), (0, R - Hp * Wp), (0, 0))).astype(jnp.bfloat16)

    w1 = _weights_to_k9(params["w1"], CP)
    w2 = _weights_to_k9(params["w2"], CP)
    g1, be1 = _pad_last(params["g1"], CP), _pad_last(params["beta1"], CP)
    g2, be2 = _pad_last(params["g2"], CP), _pad_last(params["beta2"], CP)

    one = jnp.ones((1, CP), jnp.float32)
    zero = jnp.zeros((1, CP), jnp.float32)
    count = float(N * H * W)

    # Layer 1: conv only (input already usable). Conv bias intentionally dropped:
    # training-mode BN subtracts the batch mean, which cancels it exactly.
    y1, s1, q1 = _conv_layer(x, w1, one, zero, mask, H=H, W=W, fuse_in=False)
    a1, b1 = _fold_bn(s1, q1, g1, be1, count, eps)

    # Layer 2: conv with layer-1's BN + ReLU fused into the input read.
    y2, s2, q2 = _conv_layer(y1, w2, a1, b1, mask, H=H, W=W, fuse_in=True)
    a2, b2 = _fold_bn(s2, q2, g2, be2, count, eps)

    # Small epilogue for layer-2's BN + ReLU, then strip the layout padding.
    act = _bn_relu_epilogue(y2, a2, b2, mask)                    # (N, R, CP) f32
    act = act[:, :Hp * Wp, :].reshape(N, Hp, Wp, CP)[:, 1:H + 1, 1:W + 1, :cout]
    return jnp.transpose(act, (0, 3, 1, 2))                      # NCHW


# --------------------------- references (for checking) ------------------------
def _conv3x3_bf16(x_nhwc, w_oihw):
    w_hwio = jnp.transpose(w_oihw, (2, 3, 1, 0)).astype(jnp.bfloat16)
    return jax.lax.conv_general_dilated(
        x_nhwc.astype(jnp.bfloat16), w_hwio,
        window_strides=(1, 1), padding="SAME",
        dimension_numbers=("NHWC", "HWIO", "NHWC"),
        preferred_element_type=jnp.float32)


def conv_block_reference_matched(x_nchw, params, eps=1e-5):
    """Pure-JAX reference matching the kernel's precision points: bf16 MXU inputs,
    bf16 activation storage, f32 stats/normalization, no conv bias (training-mode
    BN subtracts the batch mean, cancelling a per-channel bias exactly)."""
    x = jnp.transpose(x_nchw, (0, 2, 3, 1)).astype(jnp.float32)

    def layer(x_act, w, gamma, beta):
        y = _conv3x3_bf16(x_act, w)                              # f32 accumulation
        mean = jnp.mean(y, axis=(0, 1, 2), keepdims=True)
        var = jnp.maximum(
            jnp.mean(y * y, axis=(0, 1, 2), keepdims=True) - mean * mean, 0.0)
        a = gamma * jax.lax.rsqrt(var + eps)
        b = beta - a * mean
        y = y.astype(jnp.bfloat16).astype(jnp.float32)           # bf16 HBM storage
        return jnp.maximum(y * a + b, 0.0)

    h = layer(x, params["w1"], params["g1"], params["beta1"])
    h = layer(h, params["w2"], params["g2"], params["beta2"])
    return jnp.transpose(h, (0, 3, 1, 2))


def conv_block_reference_f32(x_nchw, params, eps=1e-5):
    """PyTorch-faithful f32 reference (conv bias included, all math in f32)."""
    x = jnp.transpose(x_nchw, (0, 2, 3, 1)).astype(jnp.float32)

    def layer(x_act, w, bias, gamma, beta):
        w_hwio = jnp.transpose(w, (2, 3, 1, 0))
        y = jax.lax.conv_general_dilated(
            x_act, w_hwio, window_strides=(1, 1), padding="SAME",
            dimension_numbers=("NHWC", "HWIO", "NHWC")) + bias
        mean = jnp.mean(y, axis=(0, 1, 2), keepdims=True)
        var = jnp.mean((y - mean) ** 2, axis=(0, 1, 2), keepdims=True)
        yhat = (y - mean) * jax.lax.rsqrt(var + eps) * gamma + beta
        return jnp.maximum(yhat, 0.0)

    h = layer(x, params["w1"], params["b1"], params["g1"], params["beta1"])
    h = layer(h, params["w2"], params["b2"], params["g2"], params["beta2"])
    return jnp.transpose(h, (0, 3, 1, 2))


# --------------------------- main ---------------------------------------------
if __name__ == "__main__":
    key = jax.random.PRNGKey(0)
    N, CH_IN, CH_OUT, H, W = 2, 4, 8, 16, 16

    k = jax.random.split(key, 5)
    params = {
        # conv1: (Cout, Cin, 3, 3) + bias; BN1: gamma=1, beta=0 (PyTorch defaults)
        "w1": 0.1 * jax.random.normal(k[0], (CH_OUT, CH_IN, 3, 3), jnp.float32),
        "b1": 0.1 * jax.random.normal(k[1], (CH_OUT,), jnp.float32),
        "g1": jnp.ones((CH_OUT,), jnp.float32),
        "beta1": jnp.zeros((CH_OUT,), jnp.float32),
        # conv2: (Cout, Cout, 3, 3) + bias; BN2 defaults
        "w2": 0.1 * jax.random.normal(k[2], (CH_OUT, CH_OUT, 3, 3), jnp.float32),
        "b2": 0.1 * jax.random.normal(k[3], (CH_OUT,), jnp.float32),
        "g2": jnp.ones((CH_OUT,), jnp.float32),
        "beta2": jnp.zeros((CH_OUT,), jnp.float32),
    }

    x = jax.random.normal(k[4], (N, CH_IN, H, W), jnp.float32)   # NCHW like PyTorch

    fwd = jax.jit(conv_block_forward)
    out = jax.block_until_ready(fwd(x, params))
    assert out.shape == (N, CH_OUT, H, W)
    assert bool(jnp.all(jnp.isfinite(out)))

    # Strict check vs. a precision-matched reference. Tolerance accounts for the
    # bf16 activation storage: a one-ulp rounding-boundary flip (different f32
    # accumulation order) scaled by 1/sigma in BN can reach a few 1e-2.
    ref_m = jax.block_until_ready(conv_block_reference_matched(x, params))
    err_m = float(jnp.max(jnp.abs(out - ref_m)))
    assert err_m < 5e-2, f"matched-precision reference mismatch: {err_m}"

    # Loose check vs. a PyTorch-faithful f32 reference WITH the conv bias; the gap
    # is bf16 compute/storage error only (training-mode BN cancels the bias).
    ref_f = jax.block_until_ready(conv_block_reference_f32(x, params))
    err_f = float(jnp.max(jnp.abs(out - ref_f)))
    assert err_f < 1.5e-1, f"f32 reference mismatch: {err_f}"

    print("KERNEL_OK")
</pallas_src>

<mosaic_0001>
module attributes {stable_mosaic.version = 11 : i64} {
  func.func @_conv3x3_stats_kernel(%arg0: i32, %arg1: memref<336x1xf32, #tpu.memory_space<vmem>>, %arg2: memref<1x128xf32, #tpu.memory_space<vmem>>, %arg3: memref<1x128xf32, #tpu.memory_space<vmem>>, %arg4: memref<1x336x128xbf16, #tpu.memory_space<vmem>>, %arg5: memref<9x128x128xbf16, #tpu.memory_space<vmem>>, %arg6: memref<1x336x128xbf16, #tpu.memory_space<vmem>>, %arg7: memref<1x1x128xf32, #tpu.memory_space<vmem>>, %arg8: memref<1x1x128xf32, #tpu.memory_space<vmem>>, %arg9: memref<336x128xbf16, #tpu.memory_space<vmem>>) attributes {dimension_semantics = [#tpu.dimension_semantics<parallel>], iteration_bounds = array<i64: 2>, scalar_prefetch = 0 : i64, scratch_operands = 1 : i64, tpu.core_type = #tpu.core_type<tc>, window_params = [{pipeline_mode = #tpu.pipeline_mode<synchronous>, transform_indices = @transform_0, window_bounds = array<i64: 336, 1>}, {pipeline_mode = #tpu.pipeline_mode<synchronous>, transform_indices = @transform_1, window_bounds = array<i64: 1, 128>}, {pipeline_mode = #tpu.pipeline_mode<synchronous>, transform_indices = @transform_2, window_bounds = array<i64: 1, 128>}, {transform_indices = @transform_3, window_bounds = array<i64: 1, 336, 128>}, {pipeline_mode = #tpu.pipeline_mode<synchronous>, transform_indices = @transform_4, window_bounds = array<i64: 9, 128, 128>}, {transform_indices = @transform_5, window_bounds = array<i64: 1, 336, 128>}, {transform_indices = @transform_6, window_bounds = array<i64: 1, 1, 128>}, {transform_indices = @transform_7, window_bounds = array<i64: 1, 1, 128>}]} {
    %c0 = arith.constant 0 : index
    %c0_0 = arith.constant 0 : index
    %c0_1 = arith.constant 0 : index
    %0 = vector.load %arg4[%c0, %c0_0, %c0_1] : memref<1x336x128xbf16, #tpu.memory_space<vmem>>, vector<1x288x128xbf16>
    %1 = vector.shape_cast %0 : vector<1x288x128xbf16> to vector<288x128xbf16>
    %c0_2 = arith.constant 0 : index
    %c0_3 = arith.constant 0 : index
    %c0_4 = arith.constant 0 : index
    %2 = vector.load %arg5[%c0_2, %c0_3, %c0_4] : memref<9x128x128xbf16, #tpu.memory_space<vmem>>, vector<1x128x128xbf16>
    %3 = vector.shape_cast %2 : vector<1x128x128xbf16> to vector<128x128xbf16>
    %cst = arith.constant dense<0.000000e+00> : vector<288x128xf32>
    %4 = tpu.matmul %1, %3, %cst {dimension_numbers = #tpu.dot_dimension_numbers<[1], [0], [0], [1], [0, 0, 1, 1], [], []>} : vector<288x128xbf16>, vector<128x128xbf16>, vector<288x128xf32> -> vector<288x128xf32>
    %c0_5 = arith.constant 0 : index
    %c1 = arith.constant 1 : index
    %c0_6 = arith.constant 0 : index
    %5 = vector.load %arg4[%c0_5, %c1, %c0_6] : memref<1x336x128xbf16, #tpu.memory_space<vmem>>, vector<1x288x128xbf16>
    %6 = vector.shape_cast %5 : vector<1x288x128xbf16> to vector<288x128xbf16>
    %c1_7 = arith.constant 1 : index
    %c0_8 = arith.constant 0 : index
    %c0_9 = arith.constant 0 : index
    %7 = vector.load %arg5[%c1_7, %c0_8, %c0_9] : memref<9x128x128xbf16, #tpu.memory_space<vmem>>, vector<1x128x128xbf16>
    %8 = vector.shape_cast %7 : vector<1x128x128xbf16> to vector<128x128xbf16>
    %cst_10 = arith.constant dense<0.000000e+00> : vector<288x128xf32>
    %9 = tpu.matmul %6, %8, %cst_10 {dimension_numbers = #tpu.dot_dimension_numbers<[1], [0], [0], [1], [0, 0, 1, 1], [], []>} : vector<288x128xbf16>, vector<128x128xbf16>, vector<288x128xf32> -> vector<288x128xf32>
    %10 = arith.addf %4, %9 : vector<288x128xf32>
    %c0_11 = arith.constant 0 : index
    %c2 = arith.constant 2 : index
    %c0_12 = arith.constant 0 : index
    %11 = vector.load %arg4[%c0_11, %c2, %c0_12] : memref<1x336x128xbf16, #tpu.memory_space<vmem>>, vector<1x288x128xbf16>
    %12 = vector.shape_cast %11 : vector<1x288x128xbf16> to vector<288x128xbf16>
    %c2_13 = arith.constant 2 : index
    %c0_14 = arith.constant 0 : index
    %c0_15 = arith.constant 0 : index
    %13 = vector.load %arg5[%c2_13, %c0_14, %c0_15] : memref<9x128x128xbf16, #tpu.memory_space<vmem>>, vector<1x128x128xbf16>
    %14 = vector.shape_cast %13 : vector<1x128x128xbf16> to vector<128x128xbf16>
    %cst_16 = arith.constant dense<0.000000e+00> : vector<288x128xf32>
    %15 = tpu.matmul %12, %14, %cst_16 {dimension_numbers = #tpu.dot_dimension_numbers<[1], [0], [0], [1], [0, 0, 1, 1], [], []>} : vector<288x128xbf16>, vector<128x128xbf16>, vector<288x128xf32> -> vector<288x128xf32>
    %16 = arith.addf %10, %15 : vector<288x128xf32>
    %c0_17 = arith.constant 0 : index
    %c18 = arith.constant 18 : index
    %c0_18 = arith.constant 0 : index
    %17 = vector.load %arg4[%c0_17, %c18, %c0_18] : memref<1x336x128xbf16, #tpu.memory_space<vmem>>, vector<1x288x128xbf16>
    %18 = vector.shape_cast %17 : vector<1x288x128xbf16> to vector<288x128xbf16>
    %c3 = arith.constant 3 : index
    %c0_19 = arith.constant 0 : index
    %c0_20 = arith.constant 0 : index
    %19 = vector.load %arg5[%c3, %c0_19, %c0_20] : memref<9x128x128xbf16, #tpu.memory_space<vmem>>, vector<1x128x128xbf16>
    %20 = vector.shape_cast %19 : vector<1x128x128xbf16> to vector<128x128xbf16>
    %cst_21 = arith.constant dense<0.000000e+00> : vector<288x128xf32>
    %21 = tpu.matmul %18, %20, %cst_21 {dimension_numbers = #tpu.dot_dimension_numbers<[1], [0], [0], [1], [0, 0, 1, 1], [], []>} : vector<288x128xbf16>, vector<128x128xbf16>, vector<288x128xf32> -> vector<288x128xf32>
    %22 = arith.addf %16, %21 : vector<288x128xf32>
    %c0_22 = arith.constant 0 : index
    %c19 = arith.constant 19 : index
    %c0_23 = arith.constant 0 : index
    %23 = vector.load %arg4[%c0_22, %c19, %c0_23] : memref<1x336x128xbf16, #tpu.memory_space<vmem>>, vector<1x288x128xbf16>
    %24 = vector.shape_cast %23 : vector<1x288x128xbf16> to vector<288x128xbf16>
    %c4 = arith.constant 4 : index
    %c0_24 = arith.constant 0 : index
    %c0_25 = arith.constant 0 : index
    %25 = vector.load %arg5[%c4, %c0_24, %c0_25] : memref<9x128x128xbf16, #tpu.memory_space<vmem>>, vector<1x128x128xbf16>
    %26 = vector.shape_cast %25 : vector<1x128x128xbf16> to vector<128x128xbf16>
    %cst_26 = arith.constant dense<0.000000e+00> : vector<288x128xf32>
    %27 = tpu.matmul %24, %26, %cst_26 {dimension_numbers = #tpu.dot_dimension_numbers<[1], [0], [0], [1], [0, 0, 1, 1], [], []>} : vector<288x128xbf16>, vector<128x128xbf16>, vector<288x128xf32> -> vector<288x128xf32>
    %28 = arith.addf %22, %27 : vector<288x128xf32>
    %c0_27 = arith.constant 0 : index
    %c20 = arith.constant 20 : index
    %c0_28 = arith.constant 0 : index
    %29 = vector.load %arg4[%c0_27, %c20, %c0_28] : memref<1x336x128xbf16, #tpu.memory_space<vmem>>, vector<1x288x128xbf16>
    %30 = vector.shape_cast %29 : vector<1x288x128xbf16> to vector<288x128xbf16>
    %c5 = arith.constant 5 : index
    %c0_29 = arith.constant 0 : index
    %c0_30 = arith.constant 0 : index
    %31 = vector.load %arg5[%c5, %c0_29, %c0_30] : memref<9x128x128xbf16, #tpu.memory_space<vmem>>, vector<1x128x128xbf16>
    %32 = vector.shape_cast %31 : vector<1x128x128xbf16> to vector<128x128xbf16>
    %cst_31 = arith.constant dense<0.000000e+00> : vector<288x128xf32>
    %33 = tpu.matmul %30, %32, %cst_31 {dimension_numbers = #tpu.dot_dimension_numbers<[1], [0], [0], [1], [0, 0, 1, 1], [], []>} : vector<288x128xbf16>, vector<128x128xbf16>, vector<288x128xf32> -> vector<288x128xf32>
    %34 = arith.addf %28, %33 : vector<288x128xf32>
    %c0_32 = arith.constant 0 : index
    %c36 = arith.constant 36 : index
    %c0_33 = arith.constant 0 : index
    %35 = vector.load %arg4[%c0_32, %c36, %c0_33] : memref<1x336x128xbf16, #tpu.memory_space<vmem>>, vector<1x288x128xbf16>
    %36 = vector.shape_cast %35 : vector<1x288x128xbf16> to vector<288x128xbf16>
    %c6 = arith.constant 6 : index
    %c0_34 = arith.constant 0 : index
    %c0_35 = arith.constant 0 : index
    %37 = vector.load %arg5[%c6, %c0_34, %c0_35] : memref<9x128x128xbf16, #tpu.memory_space<vmem>>, vector<1x128x128xbf16>
    %38 = vector.shape_cast %37 : vector<1x128x128xbf16> to vector<128x128xbf16>
    %cst_36 = arith.constant dense<0.000000e+00> : vector<288x128xf32>
    %39 = tpu.matmul %36, %38, %cst_36 {dimension_numbers = #tpu.dot_dimension_numbers<[1], [0], [0], [1], [0, 0, 1, 1], [], []>} : vector<288x128xbf16>, vector<128x128xbf16>, vector<288x128xf32> -> vector<288x128xf32>
    %40 = arith.addf %34, %39 : vector<288x128xf32>
    %c0_37 = arith.constant 0 : index
    %c37 = arith.constant 37 : index
    %c0_38 = arith.constant 0 : index
    %41 = vector.load %arg4[%c0_37, %c37, %c0_38] : memref<1x336x128xbf16, #tpu.memory_space<vmem>>, vector<1x288x128xbf16>
    %42 = vector.shape_cast %41 : vector<1x288x128xbf16> to vector<288x128xbf16>
    %c7 = arith.constant 7 : index
    %c0_39 = arith.constant 0 : index
    %c0_40 = arith.constant 0 : index
    %43 = vector.load %arg5[%c7, %c0_39, %c0_40] : memref<9x128x128xbf16, #tpu.memory_space<vmem>>, vector<1x128x128xbf16>
    %44 = vector.shape_cast %43 : vector<1x128x128xbf16> to vector<128x128xbf16>
    %cst_41 = arith.constant dense<0.000000e+00> : vector<288x128xf32>
    %45 = tpu.matmul %42, %44, %cst_41 {dimension_numbers = #tpu.dot_dimension_numbers<[1], [0], [0], [1], [0, 0, 1, 1], [], []>} : vector<288x128xbf16>, vector<128x128xbf16>, vector<288x128xf32> -> vector<288x128xf32>
    %46 = arith.addf %40, %45 : vector<288x128xf32>
    %c0_42 = arith.constant 0 : index
    %c38 = arith.constant 38 : index
    %c0_43 = arith.constant 0 : index
    %47 = vector.load %arg4[%c0_42, %c38, %c0_43] : memref<1x336x128xbf16, #tpu.memory_space<vmem>>, vector<1x288x128xbf16>
    %48 = vector.shape_cast %47 : vector<1x288x128xbf16> to vector<288x128xbf16>
    %c8 = arith.constant 8 : index
    %c0_44 = arith.constant 0 : index
    %c0_45 = arith.constant 0 : index
    %49 = vector.load %arg5[%c8, %c0_44, %c0_45] : memref<9x128x128xbf16, #tpu.memory_space<vmem>>, vector<1x128x128xbf16>
    %50 = vector.shape_cast %49 : vector<1x128x128xbf16> to vector<128x128xbf16>
    %cst_46 = arith.constant dense<0.000000e+00> : vector<288x128xf32>
    %51 = tpu.matmul %48, %50, %cst_46 {dimension_numbers = #tpu.dot_dimension_numbers<[1], [0], [0], [1], [0, 0, 1, 1], [], []>} : vector<288x128xbf16>, vector<128x128xbf16>, vector<288x128xf32> -> vector<288x128xf32>
    %52 = arith.addf %46, %51 : vector<288x128xf32>
    %53 = arith.truncf %52 : vector<288x128xf32> to vector<288x128xbf16>
    %c0_47 = arith.constant 0 : index
    %c19_48 = arith.constant 19 : index
    %c0_49 = arith.constant 0 : index
    %54 = vector.load %arg6[%c0_47, %c19_48, %c0_49] : memref<1x336x128xbf16, #tpu.memory_space<vmem>>, vector<1x288x128xbf16>
    %55 = vector.shape_cast %54 : vector<1x288x128xbf16> to vector<288x128xbf16>
    %56 = vector.shape_cast %53 : vector<288x128xbf16> to vector<1x288x128xbf16>
    tpu.vector_store %arg6[%c0_47, %c19_48, %c0_49], %56 {strides = array<i32>} : memref<1x336x128xbf16, #tpu.memory_space<vmem>>, vector<1x288x128xbf16>,
    %c19_50 = arith.constant 19 : index
    %c0_51 = arith.constant 0 : index
    %57 = vector.load %arg1[%c19_50, %c0_51] : memref<336x1xf32, #tpu.memory_space<vmem>>, vector<288x1xf32>
    %cst_52 = arith.constant 0.000000e+00 : f32
    %58 = vector.broadcast %cst_52 : f32 to vector<288x1xf32>
    %59 = arith.cmpf ogt, %57, %58 : vector<288x1xf32>
    %cst_53 = arith.constant 0.000000e+00 : f32
    %60 = vector.shape_cast %59 : vector<288x1xi1> to vector<288x1xi1>
    %61 = vector.broadcast %60 : vector<288x1xi1> to vector<288x128xi1>
    %62 = vector.broadcast %cst_53 : f32 to vector<288x128xf32>
    %63 = arith.select %61, %52, %62 : vector<288x128xi1>, vector<288x128xf32>
    %cst_54 = arith.constant dense<0.000000e+00> : vector<128xf32>
    %64 = vector.multi_reduction <add>, %63, %cst_54 [0] : vector<288x128xf32> to vector<128xf32>
    %65 = vector.shape_cast %64 : vector<128xf32> to vector<1x128xf32>
    %c0_55 = arith.constant 0 : index
    %c0_56 = arith.constant 0 : index
    %c0_57 = arith.constant 0 : index
    %66 = vector.load %arg7[%c0_55, %c0_56, %c0_57] : memref<1x1x128xf32, #tpu.memory_space<vmem>>, vector<1x1x128xf32>
    %67 = vector.shape_cast %66 : vector<1x1x128xf32> to vector<1x128xf32>
    %68 = vector.shape_cast %65 : vector<1x128xf32> to vector<1x1x128xf32>
    tpu.vector_store %arg7[%c0_55, %c0_56, %c0_57], %68 {strides = array<i32>} : memref<1x1x128xf32, #tpu.memory_space<vmem>>, vector<1x1x128xf32>,
    %69 = arith.mulf %63, %63 : vector<288x128xf32>
    %cst_58 = arith.constant dense<0.000000e+00> : vector<128xf32>
    %70 = vector.multi_reduction <add>, %69, %cst_58 [0] : vector<288x128xf32> to vector<128xf32>
    %71 = vector.shape_cast %70 : vector<128xf32> to vector<1x128xf32>
    %c0_59 = arith.constant 0 : index
    %c0_60 = arith.constant 0 : index
    %c0_61 = arith.constant 0 : index
    %72 = vector.load %arg8[%c0_59, %c0_60, %c0_61] : memref<1x1x128xf32, #tpu.memory_space<vmem>>, vector<1x1x128xf32>
    %73 = vector.shape_cast %72 : vector<1x1x128xf32> to vector<1x128xf32>
    %74 = vector.shape_cast %71 : vector<1x128xf32> to vector<1x1x128xf32>
    tpu.vector_store %arg8[%c0_59, %c0_60, %c0_61], %74 {strides = array<i32>} : memref<1x1x128xf32, #tpu.memory_space<vmem>>, vector<1x1x128xf32>,
    return
  }
  func.func @transform_0(%arg0: i32) -> (i32, i32) {
    %c0_i32 = arith.constant 0 : i32
    %c0_i32_0 = arith.constant 0 : i32
    %c0_i32_1 = arith.constant 0 : i32
    return %c0_i32, %c0_i32_0 : i32, i32
  }
  func.func @transform_1(%arg0: i32) -> (i32, i32) {
    %c0_i32 = arith.constant 0 : i32
    %c0_i32_0 = arith.constant 0 : i32
    %c0_i32_1 = arith.constant 0 : i32
    return %c0_i32, %c0_i32_0 : i32, i32
  }
  func.func @transform_2(%arg0: i32) -> (i32, i32) {
    %c0_i32 = arith.constant 0 : i32
    %c0_i32_0 = arith.constant 0 : i32
    %c0_i32_1 = arith.constant 0 : i32
    return %c0_i32, %c0_i32_0 : i32, i32
  }
  func.func @transform_3(%arg0: i32) -> (i32, i32, i32) {
    %c0_i32 = arith.constant 0 : i32
    %c0_i32_0 = arith.constant 0 : i32
    %c0_i32_1 = arith.constant 0 : i32
    return %arg0, %c0_i32, %c0_i32_0 : i32, i32, i32
  }
  func.func @transform_4(%arg0: i32) -> (i32, i32, i32) {
    %c0_i32 = arith.constant 0 : i32
    %c0_i32_0 = arith.constant 0 : i32
    %c0_i32_1 = arith.constant 0 : i32
    %c0_i32_2 = arith.constant 0 : i32
    return %c0_i32, %c0_i32_0, %c0_i32_1 : i32, i32, i32
  }
  func.func @transform_5(%arg0: i32) -> (i32, i32, i32) {
    %c0_i32 = arith.constant 0 : i32
    %c0_i32_0 = arith.constant 0 : i32
    %c0_i32_1 = arith.constant 0 : i32
    return %arg0, %c0_i32, %c0_i32_0 : i32, i32, i32
  }
  func.func @transform_6(%arg0: i32) -> (i32, i32, i32) {
    %c0_i32 = arith.constant 0 : i32
    %c0_i32_0 = arith.constant 0 : i32
    %c0_i32_1 = arith.constant 0 : i32
    return %arg0, %c0_i32, %c0_i32_0 : i32, i32, i32
  }
  func.func @transform_7(%arg0: i32) -> (i32, i32, i32) {
    %c0_i32 = arith.constant 0 : i32
    %c0_i32_0 = arith.constant 0 : i32
    %c0_i32_1 = arith.constant 0 : i32
    return %arg0, %c0_i32, %c0_i32_0 : i32, i32, i32
  }
}

module attributes {stable_mosaic.version = 11 : i64} {
  func.func @_conv3x3_stats_kernel(%arg0: i32, %arg1: memref<336x1xf32, #tpu.memory_space<vmem>>, %arg2: memref<1x128xf32, #tpu.memory_space<vmem>>, %arg3: memref<1x128xf32, #tpu.memory_space<vmem>>, %arg4: memref<1x336x128xbf16, #tpu.memory_space<vmem>>, %arg5: memref<9x128x128xbf16, #tpu.memory_space<vmem>>, %arg6: memref<1x336x128xbf16, #tpu.memory_space<vmem>>, %arg7: memref<1x1x128xf32, #tpu.memory_space<vmem>>, %arg8: memref<1x1x128xf32, #tpu.memory_space<vmem>>, %arg9: memref<336x128xbf16, #tpu.memory_space<vmem>>) attributes {dimension_semantics = [#tpu.dimension_semantics<parallel>], iteration_bounds = array<i64: 2>, scalar_prefetch = 0 : i64, scratch_operands = 1 : i64, tpu.core_type = #tpu.core_type<tc>, window_params = [{pipeline_mode = #tpu.pipeline_mode<synchronous>, transform_indices = @transform_0, window_bounds = array<i64: 336, 1>}, {pipeline_mode = #tpu.pipeline_mode<synchronous>, transform_indices = @transform_1, window_bounds = array<i64: 1, 128>}, {pipeline_mode = #tpu.pipeline_mode<synchronous>, transform_indices = @transform_2, window_bounds = array<i64: 1, 128>}, {transform_indices = @transform_3, window_bounds = array<i64: 1, 336, 128>}, {pipeline_mode = #tpu.pipeline_mode<synchronous>, transform_indices = @transform_4, window_bounds = array<i64: 9, 128, 128>}, {transform_indices = @transform_5, window_bounds = array<i64: 1, 336, 128>}, {transform_indices = @transform_6, window_bounds = array<i64: 1, 1, 128>}, {transform_indices = @transform_7, window_bounds = array<i64: 1, 1, 128>}]} {
    %c0 = arith.constant 0 : index
    %c0_0 = arith.constant 0 : index
    %c0_1 = arith.constant 0 : index
    %0 = vector.load %arg4[%c0, %c0_0, %c0_1] : memref<1x336x128xbf16, #tpu.memory_space<vmem>>, vector<1x336x128xbf16>
    %1 = vector.shape_cast %0 : vector<1x336x128xbf16> to vector<336x128xbf16>
    %2 = arith.extf %1 : vector<336x128xbf16> to vector<336x128xf32>
    %c0_2 = arith.constant 0 : index
    %c0_3 = arith.constant 0 : index
    %3 = vector.load %arg2[%c0_2, %c0_3] : memref<1x128xf32, #tpu.memory_space<vmem>>, vector<1x128xf32>
    %4 = vector.broadcast %3 : vector<1x128xf32> to vector<336x128xf32>
    %5 = arith.mulf %2, %4 : vector<336x128xf32>
    %c0_4 = arith.constant 0 : index
    %c0_5 = arith.constant 0 : index
    %6 = vector.load %arg3[%c0_4, %c0_5] : memref<1x128xf32, #tpu.memory_space<vmem>>, vector<1x128xf32>
    %7 = vector.broadcast %6 : vector<1x128xf32> to vector<336x128xf32>
    %8 = arith.addf %5, %7 : vector<336x128xf32>
    %cst = arith.constant 0.000000e+00 : f32
    %9 = vector.broadcast %cst : f32 to vector<336x128xf32>
    %10 = arith.maximumf %8, %9 : vector<336x128xf32>
    %c0_6 = arith.constant 0 : index
    %c0_7 = arith.constant 0 : index
    %11 = vector.load %arg1[%c0_6, %c0_7] : memref<336x1xf32, #tpu.memory_space<vmem>>, vector<336x1xf32>
    %cst_8 = arith.constant 0.000000e+00 : f32
    %12 = vector.broadcast %cst_8 : f32 to vector<336x1xf32>
    %13 = arith.cmpf ogt, %11, %12 : vector<336x1xf32>
    %cst_9 = arith.constant 0.000000e+00 : f32
    %14 = vector.shape_cast %13 : vector<336x1xi1> to vector<336x1xi1>
    %15 = vector.broadcast %14 : vector<336x1xi1> to vector<336x128xi1>
    %16 = vector.broadcast %cst_9 : f32 to vector<336x128xf32>
    %17 = arith.select %15, %10, %16 : vector<336x128xi1>, vector<336x128xf32>
    %18 = arith.truncf %17 : vector<336x128xf32> to vector<336x128xbf16>
    %c0_10 = arith.constant 0 : index
    %c0_11 = arith.constant 0 : index
    %19 = vector.load %arg9[%c0_10, %c0_11] : memref<336x128xbf16, #tpu.memory_space<vmem>>, vector<336x128xbf16>
    tpu.vector_store %arg9[%c0_10, %c0_11], %18 {strides = array<i32>} : memref<336x128xbf16, #tpu.memory_space<vmem>>, vector<336x128xbf16>,
    %c0_12 = arith.constant 0 : index
    %c0_13 = arith.constant 0 : index
    %20 = vector.load %arg9[%c0_12, %c0_13] : memref<336x128xbf16, #tpu.memory_space<vmem>>, vector<288x128xbf16>
    %c0_14 = arith.constant 0 : index
    %c0_15 = arith.constant 0 : index
    %c0_16 = arith.constant 0 : index
    %21 = vector.load %arg5[%c0_14, %c0_15, %c0_16] : memref<9x128x128xbf16, #tpu.memory_space<vmem>>, vector<1x128x128xbf16>
    %22 = vector.shape_cast %21 : vector<1x128x128xbf16> to vector<128x128xbf16>
    %cst_17 = arith.constant dense<0.000000e+00> : vector<288x128xf32>
    %23 = tpu.matmul %20, %22, %cst_17 {dimension_numbers = #tpu.dot_dimension_numbers<[1], [0], [0], [1], [0, 0, 1, 1], [], []>} : vector<288x128xbf16>, vector<128x128xbf16>, vector<288x128xf32> -> vector<288x128xf32>
    %c1 = arith.constant 1 : index
    %c0_18 = arith.constant 0 : index
    %24 = vector.load %arg9[%c1, %c0_18] : memref<336x128xbf16, #tpu.memory_space<vmem>>, vector<288x128xbf16>
    %c1_19 = arith.constant 1 : index
    %c0_20 = arith.constant 0 : index
    %c0_21 = arith.constant 0 : index
    %25 = vector.load %arg5[%c1_19, %c0_20, %c0_21] : memref<9x128x128xbf16, #tpu.memory_space<vmem>>, vector<1x128x128xbf16>
    %26 = vector.shape_cast %25 : vector<1x128x128xbf16> to vector<128x128xbf16>
    %cst_22 = arith.constant dense<0.000000e+00> : vector<288x128xf32>
    %27 = tpu.matmul %24, %26, %cst_22 {dimension_numbers = #tpu.dot_dimension_numbers<[1], [0], [0], [1], [0, 0, 1, 1], [], []>} : vector<288x128xbf16>, vector<128x128xbf16>, vector<288x128xf32> -> vector<288x128xf32>
    %28 = arith.addf %23, %27 : vector<288x128xf32>
    %c2 = arith.constant 2 : index
    %c0_23 = arith.constant 0 : index
    %29 = vector.load %arg9[%c2, %c0_23] : memref<336x128xbf16, #tpu.memory_space<vmem>>, vector<288x128xbf16>
    %c2_24 = arith.constant 2 : index
    %c0_25 = arith.constant 0 : index
    %c0_26 = arith.constant 0 : index
    %30 = vector.load %arg5[%c2_24, %c0_25, %c0_26] : memref<9x128x128xbf16, #tpu.memory_space<vmem>>, vector<1x128x128xbf16>
    %31 = vector.shape_cast %30 : vector<1x128x128xbf16> to vector<128x128xbf16>
    %cst_27 = arith.constant dense<0.000000e+00> : vector<288x128xf32>
    %32 = tpu.matmul %29, %31, %cst_27 {dimension_numbers = #tpu.dot_dimension_numbers<[1], [0], [0], [1], [0, 0, 1, 1], [], []>} : vector<288x128xbf16>, vector<128x128xbf16>, vector<288x128xf32> -> vector<288x128xf32>
    %33 = arith.addf %28, %32 : vector<288x128xf32>
    %c18 = arith.constant 18 : index
    %c0_28 = arith.constant 0 : index
    %34 = vector.load %arg9[%c18, %c0_28] : memref<336x128xbf16, #tpu.memory_space<vmem>>, vector<288x128xbf16>
    %c3 = arith.constant 3 : index
    %c0_29 = arith.constant 0 : index
    %c0_30 = arith.constant 0 : index
    %35 = vector.load %arg5[%c3, %c0_29, %c0_30] : memref<9x128x128xbf16, #tpu.memory_space<vmem>>, vector<1x128x128xbf16>
    %36 = vector.shape_cast %35 : vector<1x128x128xbf16> to vector<128x128xbf16>
    %cst_31 = arith.constant dense<0.000000e+00> : vector<288x128xf32>
    %37 = tpu.matmul %34, %36, %cst_31 {dimension_numbers = #tpu.dot_dimension_numbers<[1], [0], [0], [1], [0, 0, 1, 1], [], []>} : vector<288x128xbf16>, vector<128x128xbf16>, vector<288x128xf32> -> vector<288x128xf32>
    %38 = arith.addf %33, %37 : vector<288x128xf32>
    %c19 = arith.constant 19 : index
    %c0_32 = arith.constant 0 : index
    %39 = vector.load %arg9[%c19, %c0_32] : memref<336x128xbf16, #tpu.memory_space<vmem>>, vector<288x128xbf16>
    %c4 = arith.constant 4 : index
    %c0_33 = arith.constant 0 : index
    %c0_34 = arith.constant 0 : index
    %40 = vector.load %arg5[%c4, %c0_33, %c0_34] : memref<9x128x128xbf16, #tpu.memory_space<vmem>>, vector<1x128x128xbf16>
    %41 = vector.shape_cast %40 : vector<1x128x128xbf16> to vector<128x128xbf16>
    %cst_35 = arith.constant dense<0.000000e+00> : vector<288x128xf32>
    %42 = tpu.matmul %39, %41, %cst_35 {dimension_numbers = #tpu.dot_dimension_numbers<[1], [0], [0], [1], [0, 0, 1, 1], [], []>} : vector<288x128xbf16>, vector<128x128xbf16>, vector<288x128xf32> -> vector<288x128xf32>
    %43 = arith.addf %38, %42 : vector<288x128xf32>
    %c20 = arith.constant 20 : index
    %c0_36 = arith.constant 0 : index
    %44 = vector.load %arg9[%c20, %c0_36] : memref<336x128xbf16, #tpu.memory_space<vmem>>, vector<288x128xbf16>
    %c5 = arith.constant 5 : index
    %c0_37 = arith.constant 0 : index
    %c0_38 = arith.constant 0 : index
    %45 = vector.load %arg5[%c5, %c0_37, %c0_38] : memref<9x128x128xbf16, #tpu.memory_space<vmem>>, vector<1x128x128xbf16>
    %46 = vector.shape_cast %45 : vector<1x128x128xbf16> to vector<128x128xbf16>
    %cst_39 = arith.constant dense<0.000000e+00> : vector<288x128xf32>
    %47 = tpu.matmul %44, %46, %cst_39 {dimension_numbers = #tpu.dot_dimension_numbers<[1], [0], [0], [1], [0, 0, 1, 1], [], []>} : vector<288x128xbf16>, vector<128x128xbf16>, vector<288x128xf32> -> vector<288x128xf32>
    %48 = arith.addf %43, %47 : vector<288x128xf32>
    %c36 = arith.constant 36 : index
    %c0_40 = arith.constant 0 : index
    %49 = vector.load %arg9[%c36, %c0_40] : memref<336x128xbf16, #tpu.memory_space<vmem>>, vector<288x128xbf16>
    %c6 = arith.constant 6 : index
    %c0_41 = arith.constant 0 : index
    %c0_42 = arith.constant 0 : index
    %50 = vector.load %arg5[%c6, %c0_41, %c0_42] : memref<9x128x128xbf16, #tpu.memory_space<vmem>>, vector<1x128x128xbf16>
    %51 = vector.shape_cast %50 : vector<1x128x128xbf16> to vector<128x128xbf16>
    %cst_43 = arith.constant dense<0.000000e+00> : vector<288x128xf32>
    %52 = tpu.matmul %49, %51, %cst_43 {dimension_numbers = #tpu.dot_dimension_numbers<[1], [0], [0], [1], [0, 0, 1, 1], [], []>} : vector<288x128xbf16>, vector<128x128xbf16>, vector<288x128xf32> -> vector<288x128xf32>
    %53 = arith.addf %48, %52 : vector<288x128xf32>
    %c37 = arith.constant 37 : index
    %c0_44 = arith.constant 0 : index
    %54 = vector.load %arg9[%c37, %c0_44] : memref<336x128xbf16, #tpu.memory_space<vmem>>, vector<288x128xbf16>
    %c7 = arith.constant 7 : index
    %c0_45 = arith.constant 0 : index
    %c0_46 = arith.constant 0 : index
    %55 = vector.load %arg5[%c7, %c0_45, %c0_46] : memref<9x128x128xbf16, #tpu.memory_space<vmem>>, vector<1x128x128xbf16>
    %56 = vector.shape_cast %55 : vector<1x128x128xbf16> to vector<128x128xbf16>
    %cst_47 = arith.constant dense<0.000000e+00> : vector<288x128xf32>
    %57 = tpu.matmul %54, %56, %cst_47 {dimension_numbers = #tpu.dot_dimension_numbers<[1], [0], [0], [1], [0, 0, 1, 1], [], []>} : vector<288x128xbf16>, vector<128x128xbf16>, vector<288x128xf32> -> vector<288x128xf32>
    %58 = arith.addf %53, %57 : vector<288x128xf32>
    %c38 = arith.constant 38 : index
    %c0_48 = arith.constant 0 : index
    %59 = vector.load %arg9[%c38, %c0_48] : memref<336x128xbf16, #tpu.memory_space<vmem>>, vector<288x128xbf16>
    %c8 = arith.constant 8 : index
    %c0_49 = arith.constant 0 : index
    %c0_50 = arith.constant 0 : index
    %60 = vector.load %arg5[%c8, %c0_49, %c0_50] : memref<9x128x128xbf16, #tpu.memory_space<vmem>>, vector<1x128x128xbf16>
    %61 = vector.shape_cast %60 : vector<1x128x128xbf16> to vector<128x128xbf16>
    %cst_51 = arith.constant dense<0.000000e+00> : vector<288x128xf32>
    %62 = tpu.matmul %59, %61, %cst_51 {dimension_numbers = #tpu.dot_dimension_numbers<[1], [0], [0], [1], [0, 0, 1, 1], [], []>} : vector<288x128xbf16>, vector<128x128xbf16>, vector<288x128xf32> -> vector<288x128xf32>
    %63 = arith.addf %58, %62 : vector<288x128xf32>
    %64 = arith.truncf %63 : vector<288x128xf32> to vector<288x128xbf16>
    %c0_52 = arith.constant 0 : index
    %c19_53 = arith.constant 19 : index
    %c0_54 = arith.constant 0 : index
    %65 = vector.load %arg6[%c0_52, %c19_53, %c0_54] : memref<1x336x128xbf16, #tpu.memory_space<vmem>>, vector<1x288x128xbf16>
    %66 = vector.shape_cast %65 : vector<1x288x128xbf16> to vector<288x128xbf16>
    %67 = vector.shape_cast %64 : vector<288x128xbf16> to vector<1x288x128xbf16>
    tpu.vector_store %arg6[%c0_52, %c19_53, %c0_54], %67 {strides = array<i32>} : memref<1x336x128xbf16, #tpu.memory_space<vmem>>, vector<1x288x128xbf16>,
    %c19_55 = arith.constant 19 : index
    %c0_56 = arith.constant 0 : index
    %68 = vector.load %arg1[%c19_55, %c0_56] : memref<336x1xf32, #tpu.memory_space<vmem>>, vector<288x1xf32>
    %cst_57 = arith.constant 0.000000e+00 : f32
    %69 = vector.broadcast %cst_57 : f32 to vector<288x1xf32>
    %70 = arith.cmpf ogt, %68, %69 : vector<288x1xf32>
    %cst_58 = arith.constant 0.000000e+00 : f32
    %71 = vector.shape_cast %70 : vector<288x1xi1> to vector<288x1xi1>
    %72 = vector.broadcast %71 : vector<288x1xi1> to vector<288x128xi1>
    %73 = vector.broadcast %cst_58 : f32 to vector<288x128xf32>
    %74 = arith.select %72, %63, %73 : vector<288x128xi1>, vector<288x128xf32>
    %cst_59 = arith.constant dense<0.000000e+00> : vector<128xf32>
    %75 = vector.multi_reduction <add>, %74, %cst_59 [0] : vector<288x128xf32> to vector<128xf32>
    %76 = vector.shape_cast %75 : vector<128xf32> to vector<1x128xf32>
    %c0_60 = arith.constant 0 : index
    %c0_61 = arith.constant 0 : index
    %c0_62 = arith.constant 0 : index
    %77 = vector.load %arg7[%c0_60, %c0_61, %c0_62] : memref<1x1x128xf32, #tpu.memory_space<vmem>>, vector<1x1x128xf32>
    %78 = vector.shape_cast %77 : vector<1x1x128xf32> to vector<1x128xf32>
    %79 = vector.shape_cast %76 : vector<1x128xf32> to vector<1x1x128xf32>
    tpu.vector_store %arg7[%c0_60, %c0_61, %c0_62], %79 {strides = array<i32>} : memref<1x1x128xf32, #tpu.memory_space<vmem>>, vector<1x1x128xf32>,
    %80 = arith.mulf %74, %74 : vector<288x128xf32>
    %cst_63 = arith.constant dense<0.000000e+00> : vector<128xf32>
    %81 = vector.multi_reduction <add>, %80, %cst_63 [0] : vector<288x128xf32> to vector<128xf32>
    %82 = vector.shape_cast %81 : vector<128xf32> to vector<1x128xf32>
    %c0_64 = arith.constant 0 : index
    %c0_65 = arith.constant 0 : index
    %c0_66 = arith.constant 0 : index
    %83 = vector.load %arg8[%c0_64, %c0_65, %c0_66] : memref<1x1x128xf32, #tpu.memory_space<vmem>>, vector<1x1x128xf32>
    %84 = vector.shape_cast %83 : vector<1x1x128xf32> to vector<1x128xf32>
    %85 = vector.shape_cast %82 : vector<1x128xf32> to vector<1x1x128xf32>
    tpu.vector_store %arg8[%c0_64, %c0_65, %c0_66], %85 {strides = array<i32>} : memref<1x1x128xf32, #tpu.memory_space<vmem>>, vector<1x1x128xf32>,
    return
  }
  func.func @transform_0(%arg0: i32) -> (i32, i32) {
    %c0_i32 = arith.constant 0 : i32
    %c0_i32_0 = arith.constant 0 : i32
    %c0_i32_1 = arith.constant 0 : i32
    return %c0_i32, %c0_i32_0 : i32, i32
  }
  func.func @transform_1(%arg0: i32) -> (i32, i32) {
    %c0_i32 = arith.constant 0 : i32
    %c0_i32_0 = arith.constant 0 : i32
    %c0_i32_1 = arith.constant 0 : i32
    return %c0_i32, %c0_i32_0 : i32, i32
  }
  func.func @transform_2(%arg0: i32) -> (i32, i32) {
    %c0_i32 = arith.constant 0 : i32
    %c0_i32_0 = arith.constant 0 : i32
    %c0_i32_1 = arith.constant 0 : i32
    return %c0_i32, %c0_i32_0 : i32, i32
  }
  func.func @transform_3(%arg0: i32) -> (i32, i32, i32) {
    %c0_i32 = arith.constant 0 : i32
    %c0_i32_0 = arith.constant 0 : i32
    %c0_i32_1 = arith.constant 0 : i32
    return %arg0, %c0_i32, %c0_i32_0 : i32, i32, i32
  }
  func.func @transform_4(%arg0: i32) -> (i32, i32, i32) {
    %c0_i32 = arith.constant 0 : i32
    %c0_i32_0 = arith.constant 0 : i32
    %c0_i32_1 = arith.constant 0 : i32
    %c0_i32_2 = arith.constant 0 : i32
    return %c0_i32, %c0_i32_0, %c0_i32_1 : i32, i32, i32
  }
  func.func @transform_5(%arg0: i32) -> (i32, i32, i32) {
    %c0_i32 = arith.constant 0 : i32
    %c0_i32_0 = arith.constant 0 : i32
    %c0_i32_1 = arith.constant 0 : i32
    return %arg0, %c0_i32, %c0_i32_0 : i32, i32, i32
  }
  func.func @transform_6(%arg0: i32) -> (i32, i32, i32) {
    %c0_i32 = arith.constant 0 : i32
    %c0_i32_0 = arith.constant 0 : i32
    %c0_i32_1 = arith.constant 0 : i32
    return %arg0, %c0_i32, %c0_i32_0 : i32, i32, i32
  }
  func.func @transform_7(%arg0: i32) -> (i32, i32, i32) {
    %c0_i32 = arith.constant 0 : i32
    %c0_i32_0 = arith.constant 0 : i32
    %c0_i32_1 = arith.constant 0 : i32
    return %arg0, %c0_i32, %c0_i32_0 : i32, i32, i32
  }
}

module attributes {stable_mosaic.version = 11 : i64} {
  func.func @_bn_relu_kernel(%arg0: i32, %arg1: i32, %arg2: memref<336x1xf32, #tpu.memory_space<vmem>>, %arg3: memref<1x128xf32, #tpu.memory_space<vmem>>, %arg4: memref<1x128xf32, #tpu.memory_space<vmem>>, %arg5: memref<1x336x128xbf16, #tpu.memory_space<vmem>>, %arg6: memref<1x336x128xf32, #tpu.memory_space<vmem>>) attributes {dimension_semantics = [#tpu.dimension_semantics<parallel>, #tpu.dimension_semantics<parallel>], iteration_bounds = array<i64: 2, 1>, scalar_prefetch = 0 : i64, scratch_operands = 0 : i64, tpu.core_type = #tpu.core_type<tc>, window_params = [{transform_indices = @transform_0, window_bounds = array<i64: 336, 1>}, {pipeline_mode = #tpu.pipeline_mode<synchronous>, transform_indices = @transform_1, window_bounds = array<i64: 1, 128>}, {pipeline_mode = #tpu.pipeline_mode<synchronous>, transform_indices = @transform_2, window_bounds = array<i64: 1, 128>}, {transform_indices = @transform_3, window_bounds = array<i64: 1, 336, 128>}, {transform_indices = @transform_4, window_bounds = array<i64: 1, 336, 128>}]} {
    %c0 = arith.constant 0 : index
    %c0_0 = arith.constant 0 : index
    %c0_1 = arith.constant 0 : index
    %0 = vector.load %arg5[%c0, %c0_0, %c0_1] : memref<1x336x128xbf16, #tpu.memory_space<vmem>>, vector<1x336x128xbf16>
    %1 = vector.shape_cast %0 : vector<1x336x128xbf16> to vector<336x128xbf16>
    %2 = arith.extf %1 : vector<336x128xbf16> to vector<336x128xf32>
    %c0_2 = arith.constant 0 : index
    %c0_3 = arith.constant 0 : index
    %3 = vector.load %arg3[%c0_2, %c0_3] : memref<1x128xf32, #tpu.memory_space<vmem>>, vector<1x128xf32>
    %4 = vector.broadcast %3 : vector<1x128xf32> to vector<336x128xf32>
    %5 = arith.mulf %2, %4 : vector<336x128xf32>
    %c0_4 = arith.constant 0 : index
    %c0_5 = arith.constant 0 : index
    %6 = vector.load %arg4[%c0_4, %c0_5] : memref<1x128xf32, #tpu.memory_space<vmem>>, vector<1x128xf32>
    %7 = vector.broadcast %6 : vector<1x128xf32> to vector<336x128xf32>
    %8 = arith.addf %5, %7 : vector<336x128xf32>
    %cst = arith.constant 0.000000e+00 : f32
    %9 = vector.broadcast %cst : f32 to vector<336x128xf32>
    %10 = arith.maximumf %8, %9 : vector<336x128xf32>
    %c0_6 = arith.constant 0 : index
    %c0_7 = arith.constant 0 : index
    %11 = vector.load %arg2[%c0_6, %c0_7] : memref<336x1xf32, #tpu.memory_space<vmem>>, vector<336x1xf32>
    %cst_8 = arith.constant 0.000000e+00 : f32
    %12 = vector.broadcast %cst_8 : f32 to vector<336x1xf32>
    %13 = arith.cmpf ogt, %11, %12 : vector<336x1xf32>
    %cst_9 = arith.constant 0.000000e+00 : f32
    %14 = vector.shape_cast %13 : vector<336x1xi1> to vector<336x1xi1>
    %15 = vector.broadcast %14 : vector<336x1xi1> to vector<336x128xi1>
    %16 = vector.broadcast %cst_9 : f32 to vector<336x128xf32>
    %17 = arith.select %15, %10, %16 : vector<336x128xi1>, vector<336x128xf32>
    %c0_10 = arith.constant 0 : index
    %c0_11 = arith.constant 0 : index
    %c0_12 = arith.constant 0 : index
    %18 = vector.load %arg6[%c0_10, %c0_11, %c0_12] : memref<1x336x128xf32, #tpu.memory_space<vmem>>, vector<1x336x128xf32>
    %19 = vector.shape_cast %18 : vector<1x336x128xf32> to vector<336x128xf32>
    %20 = vector.shape_cast %17 : vector<336x128xf32> to vector<1x336x128xf32>
    tpu.vector_store %arg6[%c0_10, %c0_11, %c0_12], %20 {strides = array<i32>} : memref<1x336x128xf32, #tpu.memory_space<vmem>>, vector<1x336x128xf32>,
    return
  }
  func.func @transform_0(%arg0: i32, %arg1: i32) -> (i32, i32) {
    %c0_i32 = arith.constant 0 : i32
    %c0_i32_0 = arith.constant 0 : i32
    return %arg1, %c0_i32 : i32, i32
  }
  func.func @transform_1(%arg0: i32, %arg1: i32) -> (i32, i32) {
    %c0_i32 = arith.constant 0 : i32
    %c0_i32_0 = arith.constant 0 : i32
    %c0_i32_1 = arith.constant 0 : i32
    return %c0_i32, %c0_i32_0 : i32, i32
  }
  func.func @transform_2(%arg0: i32, %arg1: i32) -> (i32, i32) {
    %c0_i32 = arith.constant 0 : i32
    %c0_i32_0 = arith.constant 0 : i32
    %c0_i32_1 = arith.constant 0 : i32
    return %c0_i32, %c0_i32_0 : i32, i32
  }
  func.func @transform_3(%arg0: i32, %arg1: i32) -> (i32, i32, i32) {
    %c0_i32 = arith.constant 0 : i32
    %c0_i32_0 = arith.constant 0 : i32
    return %arg0, %arg1, %c0_i32 : i32, i32, i32
  }
  func.func @transform_4(%arg0: i32, %arg1: i32) -> (i32, i32, i32) {
    %c0_i32 = arith.constant 0 : i32
    %c0_i32_0 = arith.constant 0 : i32
    return %arg0, %arg1, %c0_i32 : i32, i32, i32
  }
}

</mosaic_0001>

<bundles_post_ra>
// kernel: conv_block_forward.5
= control target key start
LH: loop header
LB: loop body
LE: loop exit
PB: predicated region body
PF: predicated region fallthrough
CT: control target
= control target key end

     0   :  { %s1158_s15 = smov 0   ;;  %s1160_s16 = smov 0   ;;  %s1561_s0 = inlined_call_operand.vmem [shape: f32[336,1], index: 0, kind: input, shape index: {}]   ;;  %s1562_s1 = inlined_call_operand.vmem [shape: f32[1,128], index: 1, kind: input, shape index: {}]   ;;  %s1563_s2 = inlined_call_operand.vmem [shape: f32[1,128], index: 2, kind: input, shape index: {}]   ;;  %s1564_s3 = inlined_call_operand.vmem [shape: bf16[2,336,128], index: 3, kind: input, shape index: {}]   ;;  %s1565_s4 = inlined_call_operand.vmem [shape: f32[2,336,128], index: 4, kind: output, shape index: {}]  }
   0x1   :  { %s1162_s17 = smov 0  }
   0x2 LB: > { %s26_s18 = sadd.s32 1, %s1126_s16  ;;  %p968_p0 = scmp.ge.s32.totalorder %s1130_s17, 1  ;;  %s1130_s17 = sphi %s1162_s17, %s14_s17   ;;  %s1126_s16 = sphi %s1160_s16, %s1567_s16   ;;  %s1122_s15 = sphi %s1158_s15, %s1566_s15  }
   0x3   : > { %p28_p1 = scmp.ge.s32.totalorder %s26_s18, 2  ;;  %p194_p2 = scmp.lt.s32.totalorder %s1130_s17, 3 }
   0x5   : > { %s1569_s18 = smov (%p28_p1, %s26_s18), 0  ;;  %p195_p3 = pnand %p968_p0, %p194_p2 }
   0x6   : > { %v485_v0 = vld [vmem:[%s1561_s0 + $0x10] sm:$0xff] (!%p195_p3)  ;;  %v483_v1 = vld [vmem:[%s1561_s0] sm:$0xff] (!%p195_p3)  ;;  %v486_v2 = vld [vmem:[%s1561_s0 + $0x18] sm:$0xff] (!%p195_p3)  ;;  %v1132_v3 = vmov (!%p195_p3), 0   ;;  %p240_p4 = scmp.lt.s32.totalorder (!%p195_p3), %s1122_s15, 1 }
   0x7   : > { %198 = sbr.rel (%p195_p3) target bundleno = 220 (0xdc), region = 36  ;;  %1107 = vset.pattern.permute.xlu1 (!%p195_p3), %v1132_v3  ;;  %1106 = vset.pattern.permute.xlu0 (!%p195_p3), %v1132_v3  ;;  %vm527_vm0 = vcmp.gt.f32.partialorder (!%p195_p3), %v485_v0, 0.0  ;;  %vm525_vm1 = vcmp.gt.f32.partialorder (!%p195_p3), %v483_v1, 0.0  ;;  %vm528_vm2 = vcmp.gt.f32.partialorder (!%p195_p3), %v486_v2, 0.0  ;;  %v484_v4 = vld [vmem:[%s1561_s0 + $0x8] sm:$0xff] (!%p195_p3)  ;;  %v487_v8 = vld [vmem:[%s1561_s0 + $0x20] sm:$0xff] (!%p195_p3) }
   0x8   : > { %v569_v5 = vsel (!%p195_p3), %vm527_vm0, 1, %v1132_v3  ;;  %v567_v6 = vsel (!%p195_p3), %vm525_vm1, 1, %v1132_v3  ;;  %vm526_vm3 = vcmp.gt.f32.partialorder (!%p195_p3), %v484_v4, 0.0  ;;  %v488_v7 = vld [vmem:[%s1561_s0 + $0x28] sm:$0xff] (!%p195_p3)  ;;  %v570_v9 = vsel (!%p195_p3), %vm528_vm2, 1, %v1132_v3  ;;  %v490_v11 = vld [vmem:[%s1561_s0 + $0x38] sm:$0xff] (!%p195_p3) }
   0x9   : > { %616 = vperm.xlu1 (!%p195_p3), %1107, %v569_v5   ;;  %610 = vperm.xlu0 (!%p195_p3), %1106, %v567_v6   ;;  %v568_v10 = vsel (!%p195_p3), %vm526_vm3, 1, %v1132_v3  ;;  %vm530_vm4 = vcmp.gt.f32.partialorder (!%p195_p3), %v488_v7, 0.0  ;;  %vm529_vm5 = vcmp.gt.f32.partialorder (!%p195_p3), %v487_v8, 0.0  ;;  %v489_v12 = vld [vmem:[%s1561_s0 + $0x30] sm:$0xff] (!%p195_p3)  ;;  %vm532_vm6 = vcmp.gt.f32.partialorder (!%p195_p3), %v490_v11, 0.0  ;;  %v492_v15 = vld [vmem:[%s1561_s0 + $0x48] sm:$0xff] (!%p195_p3) }
   0xa   : > { %v572_v13 = vsel (!%p195_p3), %vm530_vm4, 1, %v1132_v3  ;;  %v571_v14 = vsel (!%p195_p3), %vm529_vm5, 1, %v1132_v3  ;;  %vm531_vm7 = vcmp.gt.f32.partialorder (!%p195_p3), %v489_v12, 0.0  ;;  %v491_v16 = vld [vmem:[%s1561_s0 + $0x40] sm:$0xff] (!%p195_p3)  ;;  %v574_v17 = vsel (!%p195_p3), %vm532_vm6, 1, %v1132_v3  ;;  %v494_v19 = vld [vmem:[%s1561_s0 + $0x58] sm:$0xff] (!%p195_p3) }
   0xb   : > { %v573_v18 = vsel (!%p195_p3), %vm531_vm7, 1, %v1132_v3  ;;  %vm534_vm8 = vcmp.gt.f32.partialorder (!%p195_p3), %v492_v15, 0.0  ;;  %vm533_vm9 = vcmp.gt.f32.partialorder (!%p195_p3), %v491_v16, 0.0  ;;  %v493_v20 = vld [vmem:[%s1561_s0 + $0x50] sm:$0xff] (!%p195_p3)  ;;  %vm536_vm10 = vcmp.gt.f32.partialorder (!%p195_p3), %v494_v19, 0.0  ;;  %v496_v23 = vld [vmem:[%s1561_s0 + $0x68] sm:$0xff] (!%p195_p3) }
   0xc   : > { %v576_v21 = vsel (!%p195_p3), %vm534_vm8, 1, %v1132_v3  ;;  %v575_v22 = vsel (!%p195_p3), %vm533_vm9, 1, %v1132_v3  ;;  %vm535_vm11 = vcmp.gt.f32.partialorder (!%p195_p3), %v493_v20, 0.0  ;;  %v495_v24 = vld [vmem:[%s1561_s0 + $0x60] sm:$0xff] (!%p195_p3)  ;;  %v578_v25 = vsel (!%p195_p3), %vm536_vm10, 1, %v1132_v3  ;;  %v498_v27 = vld [vmem:[%s1561_s0 + $0x78] sm:$0xff] (!%p195_p3) }
   0xd   : > { %619 = vperm.xlu1 (!%p195_p3), %1107, %v570_v9   ;;  %613 = vperm.xlu0 (!%p195_p3), %1106, %v568_v10   ;;  %v577_v26 = vsel (!%p195_p3), %vm535_vm11, 1, %v1132_v3  ;;  %vm538_vm12 = vcmp.gt.f32.partialorder (!%p195_p3), %v496_v23, 0.0  ;;  %vm537_vm13 = vcmp.gt.f32.partialorder (!%p195_p3), %v495_v24, 0.0  ;;  %v497_v28 = vld [vmem:[%s1561_s0 + $0x70] sm:$0xff] (!%p195_p3)  ;;  %vm540_vm14 = vcmp.gt.f32.partialorder (!%p195_p3), %v498_v27, 0.0  ;;  %v500_v31 = vld [vmem:[%s1561_s0 + $0x88] sm:$0xff] (!%p195_p3) }
   0xe   : > { %v580_v29 = vsel %vm538_vm12, 1, %v1132_v3  ;;  %v579_v30 = vsel %vm537_vm13, 1, %v1132_v3  ;;  %vm539_vm15 = vcmp.gt.f32.partialorder %v497_v28, 0.0  ;;  %v499_v32 = vld [vmem:[%s1561_s0 + $0x80] sm:$0xff]  ;;  %v582_v33 = vsel %vm540_vm14, 1, %v1132_v3  ;;  %v502_v35 = vld [vmem:[%s1561_s0 + $0x98] sm:$0xff] }
   0xf   : > { %v581_v34 = vsel %vm539_vm15, 1, %v1132_v3  ;;  %vm542_vm0 = vcmp.gt.f32.partialorder %v500_v31, 0.0  ;;  %vm541_vm1 = vcmp.gt.f32.partialorder %v499_v32, 0.0  ;;  %v501_v36 = vld [vmem:[%s1561_s0 + $0x90] sm:$0xff]  ;;  %vm544_vm2 = vcmp.gt.f32.partialorder %v502_v35, 0.0  ;;  %v504_v39 = vld [vmem:[%s1561_s0 + $0xa8] sm:$0xff] }
  0x10   : > { %v584_v37 = vsel %vm542_vm0, 1, %v1132_v3  ;;  %v583_v38 = vsel %vm541_vm1, 1, %v1132_v3  ;;  %vm543_vm3 = vcmp.gt.f32.partialorder %v501_v36, 0.0  ;;  %v503_v40 = vld [vmem:[%s1561_s0 + $0xa0] sm:$0xff]  ;;  %v586_v41 = vsel %vm544_vm2, 1, %v1132_v3  ;;  %v506_v43 = vld [vmem:[%s1561_s0 + $0xb8] sm:$0xff] }
  0x11   : > { %625 = vperm.xlu1 %1107, %v572_v13   ;;  %622 = vperm.xlu0 %1106, %v571_v14   ;;  %v585_v42 = vsel %vm543_vm3, 1, %v1132_v3  ;;  %vm546_vm4 = vcmp.gt.f32.partialorder %v504_v39, 0.0  ;;  %vm545_vm5 = vcmp.gt.f32.partialorder %v503_v40, 0.0  ;;  %v505_v44 = vld [vmem:[%s1561_s0 + $0xb0] sm:$0xff]  ;;  %vm548_vm6 = vcmp.gt.f32.partialorder %v506_v43, 0.0  ;;  %v508_v47 = vld [vmem:[%s1561_s0 + $0xc8] sm:$0xff] }
  0x12   : > { %v588_v45 = vsel %vm546_vm4, 1, %v1132_v3  ;;  %v587_v46 = vsel %vm545_vm5, 1, %v1132_v3  ;;  %vm547_vm7 = vcmp.gt.f32.partialorder %v505_v44, 0.0  ;;  %v507_v48 = vld [vmem:[%s1561_s0 + $0xc0] sm:$0xff]  ;;  %v590_v49 = vsel %vm548_vm6, 1, %v1132_v3  ;;  %v510_v51 = vld [vmem:[%s1561_s0 + $0xd8] sm:$0xff] }
  0x13   : > { %v589_v50 = vsel %vm547_vm7, 1, %v1132_v3  ;;  %vm550_vm8 = vcmp.gt.f32.partialorder %v508_v47, 0.0  ;;  %vm549_vm9 = vcmp.gt.f32.partialorder %v507_v48, 0.0  ;;  %v509_v52 = vld [vmem:[%s1561_s0 + $0xd0] sm:$0xff]  ;;  %vm552_vm10 = vcmp.gt.f32.partialorder %v510_v51, 0.0  ;;  %v512_v55 = vld [vmem:[%s1561_s0 + $0xe8] sm:$0xff] }
  0x14   : > { %v592_v53 = vsel %vm550_vm8, 1, %v1132_v3  ;;  %v591_v54 = vsel %vm549_vm9, 1, %v1132_v3  ;;  %vm551_vm11 = vcmp.gt.f32.partialorder %v509_v52, 0.0  ;;  %v511_v56 = vld [vmem:[%s1561_s0 + $0xe0] sm:$0xff]  ;;  %s1571_s15 = smov (!%p240_p4, %s1122_s15), 1  ;;  %v594_v57 = vsel %vm552_vm10, 1, %v1132_v3 }
  0x15   : > { %631 = vperm.xlu1 %1107, %v574_v17   ;;  %628 = vperm.xlu0 %1106, %v573_v18   ;;  %v593_v58 = vsel %vm551_vm11, 1, %v1132_v3  ;;  %vm554_vm12 = vcmp.gt.f32.partialorder %v512_v55, 0.0  ;;  %vm553_vm13 = vcmp.gt.f32.partialorder %v511_v56, 0.0  ;;  %v514_v59 = vld [vmem:[%s1561_s0 + $0xf8] sm:$0xff]  ;;  %v513_v60 = vld [vmem:[%s1561_s0 + $0xf0] sm:$0xff]  ;;  %s1079_s13 = smul.u32 168, %s1571_s15 }
  0x16   : > { %v596_v61 = vsel %vm554_vm12, 1, %v1132_v3  ;;  %v595_v62 = vsel %vm553_vm13, 1, %v1132_v3  ;;  %vm556_vm14 = vcmp.gt.f32.partialorder %v514_v59, 0.0  ;;  %vm555_vm15 = vcmp.gt.f32.partialorder %v513_v60, 0.0  ;;  %v516_v63 = vld [vmem:[%s1561_s0 + $0x108] sm:$0xff]  ;;  %v515_v0 = vld [vmem:[%s1561_s0 + $0x100] sm:$0xff] }
  0x17   : > { %s1320_s24 = scalar_lea.vmem %s1564_s3, %s1079_s13  ;;  %v598_v1 = vsel %vm556_vm14, 1, %v1132_v3  ;;  %v597_v2 = vsel %vm555_vm15, 1, %v1132_v3  ;;  %v518_v4 = vld [vmem:[%s1561_s0 + $0x118] sm:$0xff]  ;;  %vm558_vm0 = vcmp.gt.f32.partialorder %v516_v63, 0.0  ;;  %vm557_vm1 = vcmp.gt.f32.partialorder %v515_v0, 0.0  ;;  %v517_v6 = vld [vmem:[%s1561_s0 + $0x110] sm:$0xff] }
  0x18   : > { %v1074_v5 = vld [vmem:[%s1320_s24 + $0x80] sm:$0xff]   ;;  %vm560_vm2 = vcmp.gt.f32.partialorder %v518_v4, 0.0  ;;  %v600_v12 = vsel %vm558_vm0, 1, %v1132_v3  ;;  %v599_v13 = vsel %vm557_vm1, 1, %v1132_v3  ;;  %vm559_vm3 = vcmp.gt.f32.partialorder %v517_v6, 0.0  ;;  %v1075_v15 = vld [vmem:[%s1320_s24 + $0x88] sm:$0xff]  }
  0x19   : > { %637 = vperm.xlu1 %1107, %v576_v21   ;;  %634 = vperm.xlu0 %1106, %v575_v22   ;;  %v1042_v7 = vunpack.c.h.bf16 %v1074_v5  ;;  %v1041_v8 = vunpack.c.l.bf16 %v1074_v5  ;;  %v1334_v9 = vld [vmem:[%s1562_s1] ss:$0 sm:$0xff]  ;;  %v520_v16 = vld [vmem:[%s1561_s0 + $0x128] sm:$0xff]  ;;  %v1046_v20 = vunpack.c.h.bf16 %v1075_v15  ;;  %v1045_v21 = vunpack.c.l.bf16 %v1075_v15  ;;  %v522_v27 = vld [vmem:[%s1561_s0 + $0x138] sm:$0xff]  ;;  %s1080_s23 = smul.u32 336, %s1571_s15 }
  0x1a   : > { %v1343_v14 = vld [vmem:[%s1563_s2] ss:$0 sm:$0xff]  ;;  %v602_v24 = vsel %vm560_vm2, 1, %v1132_v3  ;;  %vm562_vm4 = vcmp.gt.f32.partialorder %v520_v16, 0.0  ;;  %v521_v28 = vld [vmem:[%s1561_s0 + $0x130] sm:$0xff]  ;;  %vm564_vm6 = vcmp.gt.f32.partialorder %v522_v27, 0.0 }
  0x1b   : > { %v383_v10 = vmul.f32 %v1042_v7, %v1334_v9  ;;  %v382_v11 = vmul.f32 %v1041_v8, %v1334_v9  ;;  %v519_v17 = vld [vmem:[%s1561_s0 + $0x120] sm:$0xff]  ;;  %v385_v22 = vmul.f32 %v1046_v20, %v1334_v9  ;;  %v384_v23 = vmul.f32 %v1045_v21, %v1334_v9  ;;  %v1059_v59 = vld [vmem:[%s1320_s24 + $0x8] sm:$0xff]   ;;  %v1060_v0 = vld [vmem:[%s1320_s24 + $0x10] sm:$0xff]   ;;  %s1433_s27 = scalar_lea.vmem %s1565_s4, %s1080_s23 }
  0x1c   : > { %vm561_vm5 = vcmp.gt.f32.partialorder %v519_v17, 0.0  ;;  %v604_v35 = vsel %vm562_vm4, 1, %v1132_v3  ;;  %vm563_vm7 = vcmp.gt.f32.partialorder %v521_v28, 0.0  ;;  %v523_v43 = vld [vmem:[%s1561_s0 + $0x140] sm:$0xff]  ;;  %v982_v63 = vunpack.c.h.bf16 %v1059_v59  ;;  %v1061_v7 = vld [vmem:[%s1320_s24 + $0x18] sm:$0xff]  }
  0x1d   : > { %643 = vperm.xlu1 %1107, %v578_v25   ;;  %640 = vperm.xlu0 %1106, %v577_v26   ;;  %v1353_v18 = vadd.f32 %v1343_v14, %v383_v10  ;;  %v1356_v19 = vadd.f32 %v1343_v14, %v382_v11  ;;  %v601_v25 = vsel %vm559_vm3, 1, %v1132_v3  ;;  %v1076_v26 = vld [vmem:[%s1320_s24 + $0x90] sm:$0xff]   ;;  %v603_v36 = vsel %vm561_vm5, 1, %v1132_v3  ;;  %v1078_v48 = vld [vmem:[%s1320_s24 + $0xa0] sm:$0xff]  }
  0x1e   : > { %v1050_v31 = vunpack.c.h.bf16 %v1076_v26  ;;  %v1049_v32 = vunpack.c.l.bf16 %v1076_v26  ;;  %v605_v47 = vsel %vm563_vm7, 1, %v1132_v3  ;;  %v1058_v51 = vunpack.c.h.bf16 %v1078_v48  ;;  %v976_v60 = vld [vmem:[%s1320_s24] sm:$0xff]  }
  0x1f   : > { %v1057_v52 = vunpack.c.l.bf16 %v1078_v48  ;;  %vm565_vm9 = vcmp.gt.f32.partialorder %v523_v43, 0.0  ;;  %v986_v4 = vunpack.c.h.bf16 %v1060_v0  ;;  %v985_v5 = vunpack.c.l.bf16 %v1060_v0 }
  0x20   : > { %v607_v56 = vsel %vm565_vm9, 1, %v1132_v3  ;;  %v353_v6 = vmul.f32 %v982_v63, %v1334_v9  ;;  %v990_v15 = vunpack.c.h.bf16 %v1061_v7  ;;  %v989_v16 = vunpack.c.l.bf16 %v1061_v7 }
  0x21   : > { %649 = vperm.xlu1 %1107, %v580_v29   ;;  %646 = vperm.xlu0 %1106, %v579_v30   ;;  %v1371_v29 = vadd.f32 %v1343_v14, %v385_v22  ;;  %v1374_v30 = vadd.f32 %v1343_v14, %v384_v23  ;;  %v1062_v23 = vld [vmem:[%s1320_s24 + $0x20] sm:$0xff]  }
  0x22   : > { %v402_v17 = vadd.f32 %v1343_v14, %v353_v6  ;;  %v357_v28 = vmul.f32 %v990_v15, %v1334_v9 }
  0x25   : > { %655 = vperm.xlu1 %1107, %v582_v33   ;;  %652 = vperm.xlu0 %1106, %v581_v34   ;;  %v387_v33 = vmul.f32 %v1050_v31, %v1334_v9  ;;  %v386_v34 = vmul.f32 %v1049_v32, %v1334_v9  ;;  %v356_v31 = vmul.f32 %v989_v16, %v1334_v9  ;;  %v444_v32 = vmax.f32 %v402_v17, 0.0  ;;  %v1066_v17 = vld [vmem:[%s1320_s24 + $0x40] sm:$0xff]  }
  0x27   : > { %v1385_v39 = vadd.f32 %v1343_v14, %v386_v34 }
  0x29   : > { %661 = vperm.xlu1 %1107, %v584_v37   ;;  %658 = vperm.xlu0 %1106, %v583_v38   ;;  %v1077_v37 = vld [vmem:[%s1320_s24 + $0x98] sm:$0xff]   ;;  %v1382_v38 = vadd.f32 %v1343_v14, %v387_v33  ;;  %v994_v33 = vunpack.c.h.bf16 %v1062_v23 }
  0x2a   : > { %v1054_v40 = vunpack.c.h.bf16 %v1077_v37 }
  0x2c   : > { %v389_v44 = vmul.f32 %v1054_v40, %v1334_v9  ;;  %v1063_v40 = vld [vmem:[%s1320_s24 + $0x28] sm:$0xff]  }
  0x2d   : > { %667 = vperm.xlu1 %1107, %v586_v41   ;;  %664 = vperm.xlu0 %1106, %v585_v42   ;;  %v1053_v41 = vunpack.c.l.bf16 %v1077_v37  ;;  %v524_v42 = vld [vmem:[%s1561_s0 + $0x148] sm:$0xff]  ;;  %v993_v37 = vunpack.c.l.bf16 %v1062_v23  ;;  %v997_v48 = vunpack.c.l.bf16 %v1063_v40 }
  0x2e   : > { %vm566_vm8 = vcmp.gt.f32.partialorder %v524_v42, 0.0 }
  0x2f   : > { %v608_v55 = vsel %vm566_vm8, 1, %v1132_v3 }
  0x31   : > { %673 = vperm.xlu1 %1107, %v588_v45   ;;  %670 = vperm.xlu0 %1106, %v587_v46   ;;  %v388_v45 = vmul.f32 %v1053_v41, %v1334_v9  ;;  %v606_v46 = vsel %vm564_vm6, 1, %v1132_v3 }
  0x35   : > { %679 = vperm.xlu1 %1107, %v590_v49   ;;  %676 = vperm.xlu0 %1106, %v589_v50   ;;  %v1399_v49 = vadd.f32 %v1343_v14, %v389_v44  ;;  %v1402_v50 = vadd.f32 %v1343_v14, %v388_v45  ;;  %v406_v45 = vadd.f32 %v1343_v14, %v357_v28 }
  0x39   : > { %685 = vperm.xlu1 %1107, %v592_v53   ;;  %682 = vperm.xlu0 %1106, %v591_v54   ;;  %v391_v53 = vmul.f32 %v1058_v51, %v1334_v9  ;;  %v390_v54 = vmul.f32 %v1057_v52, %v1334_v9  ;;  %v1064_v51 = vld [vmem:[%s1320_s24 + $0x30] sm:$0xff]  }
  0x3a   : > { %v1001_v63 = vunpack.c.l.bf16 %v1064_v51 }
  0x3d   : > { %691 = vperm.xlu1 %1107, %v594_v57   ;;  %688 = vperm.xlu0 %1106, %v593_v58   ;;  %v1409_v57 = vadd.f32 %v1343_v14, %v391_v53  ;;  %v1412_v58 = vadd.f32 %v1343_v14, %v390_v54  ;;  %v359_v54 = vmul.f32 %v994_v33, %v1334_v9 }
  0x41   : > { %697 = vperm.xlu1 %1107, %v596_v61   ;;  %694 = vperm.xlu0 %1106, %v595_v62   ;;  %v981_v61 = vunpack.c.l.bf16 %v1059_v59  ;;  %v977_v62 = vunpack.c.l.bf16 %v976_v60 }
  0x43   : > { %v350_v3 = vmul.f32 %v977_v62, %v1334_v9  ;;  %v1002_v62 = vunpack.c.h.bf16 %v1064_v51  ;;  %v1068_v51 = vld [vmem:[%s1320_s24 + $0x50] sm:$0xff]  }
  0x45   : > { %703 = vperm.xlu1 %1107, %v598_v1   ;;  %700 = vperm.xlu0 %1106, %v597_v2   ;;  %v352_v1 = vmul.f32 %v981_v61, %v1334_v9  ;;  %v978_v2 = vunpack.c.h.bf16 %v976_v60  ;;  %v399_v10 = vadd.f32 %v1343_v14, %v350_v3  ;;  %v448_v60 = vmax.f32 %v406_v45, 0.0  ;;  %v1065_v3 = vld [vmem:[%s1320_s24 + $0x38] sm:$0xff]  }
  0x47   : > { %v401_v8 = vadd.f32 %v1343_v14, %v352_v1  ;;  %v351_v11 = vmul.f32 %v978_v2, %v1334_v9  ;;  %v441_v21 = vmax.f32 %v399_v10, 0.0  ;;  %v360_v1 = vmul.f32 %v997_v48, %v1334_v9 }
  0x48   : > { %v363_v10 = vmul.f32 %v1002_v62, %v1334_v9  ;;  %v1018_v62 = vunpack.c.h.bf16 %v1068_v51 }
  0x49   : > { %709 = vperm.xlu1 %1107, %v600_v12   ;;  %706 = vperm.xlu0 %1106, %v599_v13   ;;  %v355_v12 = vmul.f32 %v986_v4, %v1334_v9  ;;  %v354_v13 = vmul.f32 %v985_v5, %v1334_v9  ;;  %v443_v20 = vmax.f32 %v401_v8, 0.0  ;;  %v400_v22 = vadd.f32 %v1343_v14, %v351_v11 }
  0x4a   : > { %v408_v5 = vadd.f32 %v1343_v14, %v359_v54  ;;  %v362_v11 = vmul.f32 %v1001_v63, %v1334_v9  ;;  %v409_v16 = vadd.f32 %v1343_v14, %v360_v1  ;;  %v1017_v63 = vunpack.c.l.bf16 %v1068_v51  ;;  %v1072_v51 = vld [vmem:[%s1320_s24 + $0x70] sm:$0xff]  }
  0x4b   : > { %v404_v26 = vadd.f32 %v1343_v14, %v355_v12  ;;  %v403_v27 = vadd.f32 %v1343_v14, %v354_v13  ;;  %v1006_v12 = vunpack.c.h.bf16 %v1065_v3  ;;  %v1005_v13 = vunpack.c.l.bf16 %v1065_v3  ;;  %v1069_v3 = vld [vmem:[%s1320_s24 + $0x58] sm:$0xff]  }
  0x4c   : > { %v451_v33 = vmax.f32 %v409_v16, 0.0 }
  0x4d   : > { %715 = vperm.xlu1 %1107, %v602_v24   ;;  %712 = vperm.xlu0 %1106, %v601_v25   ;;  %v446_v43 = vmax.f32 %v404_v26, 0.0  ;;  %v445_v44 = vmax.f32 %v403_v27, 0.0  ;;  %v412_v26 = vadd.f32 %v1343_v14, %v363_v10  ;;  %v411_v27 = vadd.f32 %v1343_v14, %v362_v11 }
  0x4e   : > { %v365_v28 = vmul.f32 %v1006_v12, %v1334_v9  ;;  %v371_v11 = vmul.f32 %v1018_v62, %v1334_v9  ;;  %v370_v12 = vmul.f32 %v1017_v63, %v1334_v9  ;;  %v1034_v63 = vunpack.c.h.bf16 %v1072_v51 }
  0x50   : > { %v414_v45 = vadd.f32 %v1343_v14, %v365_v28 }
  0x51   : > { %721 = vperm.xlu1 %1107, %v604_v35   ;;  %718 = vperm.xlu0 %1106, %v603_v36   ;;  %v442_v36 = vmax.f32 %v400_v22, 0.0  ;;  %v450_v22 = vmax.f32 %v408_v5, 0.0 }
  0x55   : > { %727 = vperm.xlu1 %1107, %v606_v46   ;;  %724 = vperm.xlu0 %1106, %v605_v47   ;;  %v405_v46 = vadd.f32 %v1343_v14, %v356_v31  ;;  %v998_v47 = vunpack.c.h.bf16 %v1063_v40  ;;  %v1010_v31 = vunpack.c.h.bf16 %v1066_v17  ;;  %v1067_v40 = vld [vmem:[%s1320_s24 + $0x48] sm:$0xff]  }
  0x56   : > { %v1013_v48 = vunpack.c.l.bf16 %v1067_v40 }
  0x57   : > { %v447_v61 = vmax.f32 %v405_v46, 0.0  ;;  %v361_v0 = vmul.f32 %v998_v47, %v1334_v9  ;;  %v367_v46 = vmul.f32 %v1010_v31, %v1334_v9  ;;  %v1014_v47 = vunpack.c.h.bf16 %v1067_v40 }
  0x58   : > { %v368_v1 = vmul.f32 %v1013_v48, %v1334_v9 }
  0x59   : > { %733 = vperm.xlu1 %1107, %v608_v55   ;;  %730 = vperm.xlu0 %1106, %v607_v56   ;;  %v358_v55 = vmul.f32 %v993_v37, %v1334_v9  ;;  %v410_v15 = vadd.f32 %v1343_v14, %v361_v0  ;;  %v1009_v37 = vunpack.c.l.bf16 %v1066_v17  ;;  %v369_v0 = vmul.f32 %v1014_v47, %v1334_v9  ;;  %v1070_v17 = vld [vmem:[%s1320_s24 + $0x60] sm:$0xff]  }
  0x5a   : > { %v417_v16 = vadd.f32 %v1343_v14, %v368_v1  ;;  %v1026_v31 = vunpack.c.h.bf16 %v1070_v17  ;;  %v1033_v1 = vunpack.c.l.bf16 %v1072_v51 }
  0x5b   : > { %v407_v6 = vadd.f32 %v1343_v14, %v358_v55  ;;  %v366_v55 = vmul.f32 %v1009_v37, %v1334_v9 }
  0x5c   : > { %v459_v37 = vmax.f32 %v417_v16, 0.0  ;;  %v378_v16 = vmul.f32 %v1033_v1, %v1334_v9 }
  0x5d   : > { %v449_v23 = vmax.f32 %v407_v6, 0.0  ;;  %v415_v6 = vadd.f32 %v1343_v14, %v366_v55 }
  0x88   : > { %v617_v24 = vpop.permute.xlu1 %616  ;;  %v611_v25 = vpop.permute.xlu0 %610 }
  0x89   : > { %vm737_vm10 = vcmp.eq.s32.totalorder %v617_v24, 1  ;;  %vm735_vm11 = vcmp.eq.s32.totalorder %v611_v25, 1 }
  0x8a   : > { %v779_v34 = vsel %vm737_vm10, %v443_v20, 0.0  ;;  %v777_v35 = vsel %vm735_vm11, %v441_v21, 0.0 }
  0x8b   : > { %821 = vst [vmem:[%s1433_s27 + $0x10] sm:$0xff] %v779_v34  ;;  %819 = vst [vmem:[%s1433_s27] sm:$0xff] %v777_v35 }
  0x8c   : > { %v620_v41 = vpop.permute.xlu1 %619  ;;  %v614_v42 = vpop.permute.xlu0 %613 }
  0x8d   : > { %vm738_vm12 = vcmp.eq.s32.totalorder %v620_v41, 1  ;;  %vm736_vm13 = vcmp.eq.s32.totalorder %v614_v42, 1 }
  0x8e   : > { %v780_v52 = vsel %vm738_vm12, %v444_v32, 0.0  ;;  %v778_v53 = vsel %vm736_vm13, %v442_v36, 0.0  ;;  %v452_v32 = vmax.f32 %v410_v15, 0.0  ;;  %v364_v36 = vmul.f32 %v1005_v13, %v1334_v9 }
  0x8f   : > { %822 = vst [vmem:[%s1433_s27 + $0x18] sm:$0xff] %v780_v52  ;;  %820 = vst [vmem:[%s1433_s27 + $0x8] sm:$0xff] %v778_v53  ;;  %v1022_v13 = vunpack.c.h.bf16 %v1069_v3  ;;  %v418_v15 = vadd.f32 %v1343_v14, %v369_v0 }
  0x90   : > { %v626_v56 = vpop.permute.xlu1 %625  ;;  %v623_v59 = vpop.permute.xlu0 %622  ;;  %v413_v54 = vadd.f32 %v1343_v14, %v364_v36 }
  0x91   : > { %vm740_vm14 = vcmp.eq.s32.totalorder %v626_v56, 1  ;;  %vm739_vm15 = vcmp.eq.s32.totalorder %v623_v59, 1  ;;  %v373_v28 = vmul.f32 %v1022_v13, %v1334_v9  ;;  %v379_v13 = vmul.f32 %v1034_v63, %v1334_v9 }
  0x92   : > { %v782_v2 = vsel %vm740_vm14, %v446_v43, 0.0  ;;  %v781_v4 = vsel %vm739_vm15, %v445_v44, 0.0  ;;  %v454_v43 = vmax.f32 %v412_v26, 0.0  ;;  %v453_v44 = vmax.f32 %v411_v27, 0.0 }
  0x93   : > { %824 = vst [vmem:[%s1433_s27 + $0x28] sm:$0xff] %v782_v2  ;;  %823 = vst [vmem:[%s1433_s27 + $0x20] sm:$0xff] %v781_v4  ;;  %v455_v5 = vmax.f32 %v413_v54, 0.0  ;;  %v420_v26 = vadd.f32 %v1343_v14, %v371_v11  ;;  %v419_v27 = vadd.f32 %v1343_v14, %v370_v12  ;;  %v476_v63 = vmax.f32 %v1371_v29, 0.0 }
  0x94   : > { %v632_v7 = vpop.permute.xlu1 %631  ;;  %v629_v8 = vpop.permute.xlu0 %628 }
  0x95   : > { %vm742_vm0 = vcmp.eq.s32.totalorder %v632_v7, 1  ;;  %vm741_vm1 = vcmp.eq.s32.totalorder %v629_v8, 1  ;;  %v462_v47 = vmax.f32 %v420_v26, 0.0  ;;  %v461_v54 = vmax.f32 %v419_v27, 0.0 }
  0x96   : > { %v784_v20 = vsel %vm742_vm0, %v448_v60, 0.0  ;;  %v783_v21 = vsel %vm741_vm1, %v447_v61, 0.0  ;;  %v456_v60 = vmax.f32 %v414_v45, 0.0  ;;  %v416_v61 = vadd.f32 %v1343_v14, %v367_v46 }
  0x97   : > { %826 = vst [vmem:[%s1433_s27 + $0x38] sm:$0xff] %v784_v20  ;;  %825 = vst [vmem:[%s1433_s27 + $0x30] sm:$0xff] %v783_v21  ;;  %v428_v27 = vadd.f32 %v1343_v14, %v379_v13  ;;  %v481_v13 = vmax.f32 %v1412_v58, 0.0 }
  0x98   : > { %v638_v24 = vpop.permute.xlu1 %637  ;;  %v635_v25 = vpop.permute.xlu0 %634  ;;  %v458_v10 = vmax.f32 %v416_v61, 0.0 }
  0x99   : > { %vm744_vm2 = vcmp.eq.s32.totalorder %v638_v24, 1  ;;  %vm743_vm3 = vcmp.eq.s32.totalorder %v635_v25, 1 }
  0x9a   : > { %v786_v34 = vsel %vm744_vm2, %v450_v22, 0.0  ;;  %v785_v35 = vsel %vm743_vm3, %v449_v23, 0.0  ;;  %v457_v22 = vmax.f32 %v415_v6, 0.0  ;;  %v1021_v23 = vunpack.c.l.bf16 %v1069_v3  ;;  %v1073_v6 = vld [vmem:[%s1320_s24 + $0x78] sm:$0xff]  }
  0x9b   : > { %828 = vst [vmem:[%s1433_s27 + $0x48] sm:$0xff] %v786_v34  ;;  %827 = vst [vmem:[%s1433_s27 + $0x40] sm:$0xff] %v785_v35  ;;  %v1071_v34 = vld [vmem:[%s1320_s24 + $0x68] sm:$0xff]  }
  0x9c   : > { %v644_v41 = vpop.permute.xlu1 %643  ;;  %v641_v42 = vpop.permute.xlu0 %640  ;;  %v372_v40 = vmul.f32 %v1021_v23, %v1334_v9  ;;  %v1030_v45 = vunpack.c.h.bf16 %v1071_v34  ;;  %v1029_v46 = vunpack.c.l.bf16 %v1071_v34 }
  0x9d   : > { %vm746_vm4 = vcmp.eq.s32.totalorder %v644_v41, 1  ;;  %vm745_vm5 = vcmp.eq.s32.totalorder %v641_v42, 1 }
  0x9e   : > { %v788_v52 = vsel %vm746_vm4, %v452_v32, 0.0  ;;  %v787_v53 = vsel %vm745_vm5, %v451_v33, 0.0  ;;  %v460_v32 = vmax.f32 %v418_v15, 0.0  ;;  %v1025_v33 = vunpack.c.l.bf16 %v1070_v17 }
  0x9f   : > { %830 = vst [vmem:[%s1433_s27 + $0x58] sm:$0xff] %v788_v52  ;;  %829 = vst [vmem:[%s1433_s27 + $0x50] sm:$0xff] %v787_v53  ;;  %v421_v55 = vadd.f32 %v1343_v14, %v372_v40  ;;  %v377_v61 = vmul.f32 %v1030_v45, %v1334_v9  ;;  %v376_v62 = vmul.f32 %v1029_v46, %v1334_v9 }
  0xa0   : > { %v650_v56 = vpop.permute.xlu1 %649  ;;  %v647_v59 = vpop.permute.xlu0 %646  ;;  %v374_v48 = vmul.f32 %v1025_v33, %v1334_v9 }
  0xa1   : > { %vm748_vm6 = vcmp.eq.s32.totalorder %v650_v56, 1  ;;  %vm747_vm7 = vcmp.eq.s32.totalorder %v647_v59, 1  ;;  %v426_v11 = vadd.f32 %v1343_v14, %v377_v61  ;;  %v425_v12 = vadd.f32 %v1343_v14, %v376_v62 }
  0xa2   : > { %v790_v2 = vsel %vm748_vm6, %v454_v43, 0.0  ;;  %v789_v4 = vsel %vm747_vm7, %v453_v44, 0.0  ;;  %v422_v43 = vadd.f32 %v1343_v14, %v373_v28  ;;  %v375_v44 = vmul.f32 %v1026_v31, %v1334_v9 }
  0xa3   : > { %832 = vst [vmem:[%s1433_s27 + $0x68] sm:$0xff] %v790_v2  ;;  %831 = vst [vmem:[%s1433_s27 + $0x60] sm:$0xff] %v789_v4  ;;  %v423_v0 = vadd.f32 %v1343_v14, %v374_v48  ;;  %v467_v26 = vmax.f32 %v425_v12, 0.0  ;;  %v427_v28 = vadd.f32 %v1343_v14, %v378_v16  ;;  %v482_v12 = vmax.f32 %v1409_v57, 0.0 }
  0xa4   : > { %v656_v7 = vpop.permute.xlu1 %655  ;;  %v653_v8 = vpop.permute.xlu0 %652  ;;  %v464_v4 = vmax.f32 %v422_v43, 0.0 }
  0xa5   : > { %vm750_vm8 = vcmp.eq.s32.totalorder %v656_v7, 1  ;;  %vm749_vm9 = vcmp.eq.s32.totalorder %v653_v8, 1  ;;  %v465_v15 = vmax.f32 %v423_v0, 0.0  ;;  %v469_v40 = vmax.f32 %v427_v28, 0.0 }
  0xa6   : > { %v792_v20 = vsel %vm750_vm8, %v456_v60, 0.0  ;;  %v791_v21 = vsel %vm749_vm9, %v455_v5, 0.0  ;;  %v424_v60 = vadd.f32 %v1343_v14, %v375_v44  ;;  %v463_v5 = vmax.f32 %v421_v55, 0.0 }
  0xa7   : > { %834 = vst [vmem:[%s1433_s27 + $0x78] sm:$0xff] %v792_v20  ;;  %833 = vst [vmem:[%s1433_s27 + $0x70] sm:$0xff] %v791_v21  ;;  %v1038_v21 = vunpack.c.h.bf16 %v1073_v6  ;;  %v474_v55 = vmax.f32 %v1353_v18, 0.0  ;;  %v475_v0 = vmax.f32 %v1374_v30, 0.0 }
  0xa8   : > { %v662_v24 = vpop.permute.xlu1 %661  ;;  %v659_v25 = vpop.permute.xlu0 %658 }
  0xa9   : > { %vm752_vm10 = vcmp.eq.s32.totalorder %v662_v24, 1  ;;  %vm751_vm11 = vcmp.eq.s32.totalorder %v659_v25, 1  ;;  %v468_v25 = vmax.f32 %v426_v11, 0.0  ;;  %v381_v33 = vmul.f32 %v1038_v21, %v1334_v9 }
  0xaa   : > { %v794_v35 = vsel %vm752_vm10, %v458_v10, 0.0  ;;  %v793_v36 = vsel %vm751_vm11, %v457_v22, 0.0  ;;  %v466_v10 = vmax.f32 %v424_v60, 0.0  ;;  %v1037_v22 = vunpack.c.l.bf16 %v1073_v6 }
  0xab   : > { %836 = vst [vmem:[%s1433_s27 + $0x88] sm:$0xff] %v794_v35  ;;  %835 = vst [vmem:[%s1433_s27 + $0x80] sm:$0xff] %v793_v36  ;;  %v430_v43 = vadd.f32 %v1343_v14, %v381_v33 }
  0xac   : > { %v668_v41 = vpop.permute.xlu1 %667  ;;  %v665_v42 = vpop.permute.xlu0 %664  ;;  %v380_v34 = vmul.f32 %v1037_v22, %v1334_v9 }
  0xad   : > { %vm754_vm12 = vcmp.eq.s32.totalorder %v668_v41, 1  ;;  %vm753_vm13 = vcmp.eq.s32.totalorder %v665_v42, 1  ;;  %v472_v48 = vmax.f32 %v430_v43, 0.0 }
  0xae   : > { %v796_v52 = vsel %vm754_vm12, %v460_v32, 0.0  ;;  %v795_v53 = vsel %vm753_vm13, %v459_v37, 0.0  ;;  %v470_v37 = vmax.f32 %v428_v27, 0.0  ;;  %v429_v44 = vadd.f32 %v1343_v14, %v380_v34 }
  0xaf   : > { %838 = vst [vmem:[%s1433_s27 + $0x98] sm:$0xff] %v796_v52  ;;  %837 = vst [vmem:[%s1433_s27 + $0x90] sm:$0xff] %v795_v53 }
  0xb0   : > { %v674_v56 = vpop.permute.xlu1 %673  ;;  %v671_v59 = vpop.permute.xlu0 %670  ;;  %v471_v51 = vmax.f32 %v429_v44, 0.0 }
  0xb1   : > { %vm756_vm14 = vcmp.eq.s32.totalorder %v674_v56, 1  ;;  %vm755_vm15 = vcmp.eq.s32.totalorder %v671_v59, 1  ;;  %v473_v56 = vmax.f32 %v1356_v19, 0.0 }
  0xb2   : > { %v798_v3 = vsel %vm756_vm14, %v462_v47, 0.0  ;;  %v797_v2 = vsel %vm755_vm15, %v461_v54, 0.0 }
  0xb3   : > { %840 = vst [vmem:[%s1433_s27 + $0xa8] sm:$0xff] %v798_v3  ;;  %839 = vst [vmem:[%s1433_s27 + $0xa0] sm:$0xff] %v797_v2  ;;  %v478_v2 = vmax.f32 %v1382_v38, 0.0 }
  0xb4   : > { %v680_v7 = vpop.permute.xlu1 %679  ;;  %v677_v8 = vpop.permute.xlu0 %676 }
  0xb5   : > { %vm758_vm0 = vcmp.eq.s32.totalorder %v680_v7, 1  ;;  %vm757_vm1 = vcmp.eq.s32.totalorder %v677_v8, 1  ;;  %v480_v7 = vmax.f32 %v1399_v49, 0.0  ;;  %v479_v8 = vmax.f32 %v1402_v50, 0.0 }
  0xb6   : > { %v800_v17 = vsel %vm758_vm0, %v464_v4, 0.0  ;;  %v799_v20 = vsel %vm757_vm1, %v463_v5, 0.0  ;;  %v477_v4 = vmax.f32 %v1385_v39, 0.0 }
  0xb7   : > { %842 = vst [vmem:[%s1433_s27 + $0xb8] sm:$0xff] %v800_v17  ;;  %841 = vst [vmem:[%s1433_s27 + $0xb0] sm:$0xff] %v799_v20 }
  0xb8   : > { %v686_v23 = vpop.permute.xlu1 %685  ;;  %v683_v24 = vpop.permute.xlu0 %682 }
  0xb9   : > { %vm760_vm2 = vcmp.eq.s32.totalorder %v686_v23, 1  ;;  %vm759_vm3 = vcmp.eq.s32.totalorder %v683_v24, 1 }
  0xba   : > { %v802_v31 = vsel %vm760_vm2, %v466_v10, 0.0  ;;  %v801_v32 = vsel %vm759_vm3, %v465_v15, 0.0 }
  0xbb   : > { %844 = vst [vmem:[%s1433_s27 + $0xc8] sm:$0xff] %v802_v31  ;;  %843 = vst [vmem:[%s1433_s27 + $0xc0] sm:$0xff] %v801_v32 }
  0xbc   : > { %v692_v35 = vpop.permute.xlu1 %691  ;;  %v689_v36 = vpop.permute.xlu0 %688 }
  0xbd   : > { %vm762_vm4 = vcmp.eq.s32.totalorder %v692_v35, 1  ;;  %vm761_vm5 = vcmp.eq.s32.totalorder %v689_v36, 1 }
  0xbe   : > { %v804_v41 = vsel %vm762_vm4, %v468_v25, 0.0  ;;  %v803_v42 = vsel %vm761_vm5, %v467_v26, 0.0 }
  0xbf   : > { %846 = vst [vmem:[%s1433_s27 + $0xd8] sm:$0xff] %v804_v41  ;;  %845 = vst [vmem:[%s1433_s27 + $0xd0] sm:$0xff] %v803_v42 }
  0xc0   : > { %v698_v45 = vpop.permute.xlu1 %697  ;;  %v695_v9 = vpop.permute.xlu0 %694 }
  0xc1   : > { %vm764_vm6 = vcmp.eq.s32.totalorder %v698_v45, 1  ;;  %vm763_vm7 = vcmp.eq.s32.totalorder %v695_v9, 1 }
  0xc2   : > { %v806_v46 = vsel %vm764_vm6, %v470_v37, 0.0  ;;  %v805_v47 = vsel %vm763_vm7, %v469_v40, 0.0 }
  0xc3   : > { %848 = vst [vmem:[%s1433_s27 + $0xe8] sm:$0xff] %v806_v46  ;;  %847 = vst [vmem:[%s1433_s27 + $0xe0] sm:$0xff] %v805_v47 }
  0xc4   : > { %v704_v52 = vpop.permute.xlu1 %703  ;;  %v701_v53 = vpop.permute.xlu0 %700 }
  0xc5   : > { %vm766_vm8 = vcmp.eq.s32.totalorder %v704_v52, 1  ;;  %vm765_vm9 = vcmp.eq.s32.totalorder %v701_v53, 1 }
  0xc6   : > { %v808_v14 = vsel %vm766_vm8, %v472_v48, 0.0  ;;  %v807_v54 = vsel %vm765_vm9, %v471_v51, 0.0 }
  0xc7   : > { %850 = vst [vmem:[%s1433_s27 + $0xf8] sm:$0xff] %v808_v14  ;;  %849 = vst [vmem:[%s1433_s27 + $0xf0] sm:$0xff] %v807_v54 }
  0xc8   : > { %v710_v59 = vpop.permute.xlu1 %709  ;;  %v707_v60 = vpop.permute.xlu0 %706 }
  0xc9   : > { %vm768_vm10 = vcmp.eq.s32.totalorder %v710_v59, 1  ;;  %vm767_vm11 = vcmp.eq.s32.totalorder %v707_v60, 1 }
  0xca   : > { %v810_v61 = vsel %vm768_vm10, %v474_v55, 0.0  ;;  %v809_v62 = vsel %vm767_vm11, %v473_v56, 0.0 }
  0xcb   : > { %852 = vst [vmem:[%s1433_s27 + $0x108] sm:$0xff] %v810_v61  ;;  %851 = vst [vmem:[%s1433_s27 + $0x100] sm:$0xff] %v809_v62 }
  0xcc   : > { %v716_v1 = vpop.permute.xlu1 %715  ;;  %v713_v18 = vpop.permute.xlu0 %712 }
  0xcd   : > { %vm770_vm12 = vcmp.eq.s32.totalorder %v716_v1, 1  ;;  %vm769_vm13 = vcmp.eq.s32.totalorder %v713_v18, 1 }
  0xce   : > { %v812_v19 = vsel %vm770_vm12, %v476_v63, 0.0  ;;  %v811_v3 = vsel %vm769_vm13, %v475_v0, 0.0 }
  0xcf   : > { %854 = vst [vmem:[%s1433_s27 + $0x118] sm:$0xff] %v812_v19  ;;  %853 = vst [vmem:[%s1433_s27 + $0x110] sm:$0xff] %v811_v3 }
  0xd0   : > { %v722_v5 = vpop.permute.xlu1 %721  ;;  %v719_v29 = vpop.permute.xlu0 %718 }
  0xd1   : > { %vm772_vm14 = vcmp.eq.s32.totalorder %v722_v5, 1  ;;  %vm771_vm15 = vcmp.eq.s32.totalorder %v719_v29, 1 }
  0xd2   : > { %v814_v30 = vsel %vm772_vm14, %v478_v2, 0.0  ;;  %v813_v6 = vsel %vm771_vm15, %v477_v4, 0.0 }
  0xd3   : > { %856 = vst [vmem:[%s1433_s27 + $0x128] sm:$0xff] %v814_v30  ;;  %855 = vst [vmem:[%s1433_s27 + $0x120] sm:$0xff] %v813_v6 }
  0xd4   : > { %v728_v10 = vpop.permute.xlu1 %727  ;;  %v725_v38 = vpop.permute.xlu0 %724 }
  0xd5   : > { %vm774_vm0 = vcmp.eq.s32.totalorder %v728_v10, 1  ;;  %vm773_vm1 = vcmp.eq.s32.totalorder %v725_v38, 1 }
  0xd6   : > { %v816_v39 = vsel %vm774_vm0, %v480_v7, 0.0  ;;  %v815_v11 = vsel %vm773_vm1, %v479_v8, 0.0 }
  0xd7   : > { %858 = vst [vmem:[%s1433_s27 + $0x138] sm:$0xff] %v816_v39  ;;  %857 = vst [vmem:[%s1433_s27 + $0x130] sm:$0xff] %v815_v11 }
  0xd8   : > { %v734_v15 = vpop.permute.xlu1 %733  ;;  %v731_v49 = vpop.permute.xlu0 %730 }
  0xd9   : > { %vm776_vm2 = vcmp.eq.s32.totalorder %v734_v15, 1  ;;  %vm775_vm3 = vcmp.eq.s32.totalorder %v731_v49, 1 }
  0xda   : > { %v818_v50 = vsel %vm776_vm2, %v482_v12, 0.0  ;;  %v817_v16 = vsel %vm775_vm3, %v481_v13, 0.0 }
  0xdb   : > { %860 = vst [vmem:[%s1433_s27 + $0x148] sm:$0xff] %v818_v50  ;;  %859 = vst [vmem:[%s1433_s27 + $0x140] sm:$0xff] %v817_v16 }
  0xdc PF: > { %s14_s17 = sadd.s32 1, %s1130_s17   ;;  %s1566_s15 = smov %s1126_s16 }
  0xdd   : > { %p11_p5 = scmp.ge.s32.totalorder %s14_s17, 4   ;;  %s1567_s16 = smov %s1569_s18 }
  0xdf   :  { %13 = sbr.rel (!%p11_p5) target bundleno = 2 (0x2), region = 69 }

// kernel: conv_block_forward.3
= control target key start
LH: loop header
LB: loop body
LE: loop exit
PB: predicated region body
PF: predicated region fallthrough
CT: control target
= control target key end

     0   :  { %s6649_s24 = smov 0   ;;  %s8176_s0 = inlined_call_operand.vmem [shape: f32[336,1], index: 0, kind: input, shape index: {}]   ;;  %s8177_s1 = inlined_call_operand.vmem [shape: f32[1,128], index: 1, kind: input, shape index: {}]   ;;  %s8178_s2 = inlined_call_operand.vmem [shape: f32[1,128], index: 2, kind: input, shape index: {}]   ;;  %s8179_s3 = inlined_call_operand.vmem [shape: bf16[2,336,128], index: 3, kind: input, shape index: {}]   ;;  %s8180_s4 = inlined_call_operand.vmem [shape: bf16[9,128,128], index: 4, kind: input, shape index: {}]   ;;  %s8181_s5 = inlined_call_operand.vmem [shape: bf16[2,336,128], index: 5, kind: output, shape index: {0}]   ;;  %s8182_s6 = inlined_call_operand.vmem [shape: f32[2,1,128], index: 6, kind: output, shape index: {1}]   ;;  %s8183_s7 = inlined_call_operand.vmem [shape: f32[2,1,128], index: 7, kind: output, shape index: {2}]  }
   0x1 LB: > { %s5043_s1 = sadd.s32 4294967295, %s6606_s24   ;;  %p5047_p0 = scmp.ge.s32.totalorder %s6606_s24, 1  ;;  %s6606_s24 = sphi %s6649_s24, %s18_s24  }
   0x2   : > { %p242_p1 = scmp.lt.s32.totalorder %s6606_s24, 3 }
   0x4   : > { %p243_p2 = pnand %p5047_p0, %p242_p1 }
   0x5   : > { %v6404_v0 = vld [vmem:[%s8180_s4 + $0x40] sm:$0xff] (!%p243_p2)   ;;  %p280_p3 = scmp.lt.s32.totalorder (!%p243_p2), %s5043_s1, 1  ;;  %v6406_v2 = vld [vmem:[%s8180_s4 + $0x48] sm:$0xff] (!%p243_p2)   ;;  %v6408_v4 = vld [vmem:[%s8180_s4 + $0x50] sm:$0xff] (!%p243_p2)   ;;  %vm460_vm0 = vsmask.f32 (!%p243_p2), 7424 }
   0x6   : > { %246 = sbr.rel (%p243_p2) target bundleno = 640 (0x280), region = 40  ;;  %v6405_v1 = vld [vmem:[%s8180_s4 + $0x100] sm:$0xff] (!%p243_p2)   ;;  %5620 = vmatprep.subr.bf16.mxu1 (!%p243_p2), %v6404_v0  ;;  %v6407_v3 = vld [vmem:[%s8180_s4 + $0x108] sm:$0xff] (!%p243_p2)   ;;  %v6409_v5 = vld [vmem:[%s8180_s4 + $0x110] sm:$0xff] (!%p243_p2)   ;;  %vm1917_vm1 = vsmask.f32 (!%p243_p2), 6400 }
   0x7   : > { %5828 = vmatprep.subr.bf16.mxu0 (!%p243_p2), %v6405_v1  ;;  %5621 = vmatpush3.bf16.msra.mxu1 (!%p243_p2), %v6404_v0  ;;  %v6410_v6 = vld [vmem:[%s8180_s4 + $0x58] sm:$0xff] (!%p243_p2)   ;;  %v6412_v8 = vld [vmem:[%s8180_s4 + $0x60] sm:$0xff] (!%p243_p2)   ;;  %v6414_v10 = vld [vmem:[%s8180_s4 + $0x68] sm:$0xff] (!%p243_p2)   ;;  %vm2388_vm2 = vcmask (!%p243_p2), 1045504   ;;  %vm1116_vm3 = vcmask (!%p243_p2), 1046528  }
   0x8   : > { %5829 = vmatpush3.bf16.msra.mxu0 (!%p243_p2), %v6405_v1  ;;  %5622 = vmatprep.subr.bf16.mxu1 (!%p243_p2), %v6406_v2  ;;  %v6411_v7 = vld [vmem:[%s8180_s4 + $0x118] sm:$0xff] (!%p243_p2)   ;;  %v6413_v9 = vld [vmem:[%s8180_s4 + $0x120] sm:$0xff] (!%p243_p2)   ;;  %v6415_v11 = vld [vmem:[%s8180_s4 + $0x128] sm:$0xff] (!%p243_p2)   ;;  %vm3189_vm15 = vsmask.f32 (!%p243_p2), 5376 }
   0x9   : > { %5830 = vmatprep.subr.bf16.mxu0 (!%p243_p2), %v6407_v3  ;;  %v6416_v17 = vld [vmem:[%s8180_s4 + $0x70] sm:$0xff] (!%p243_p2)   ;;  %v6418_v32 = vld [vmem:[%s8180_s4 + $0x78] sm:$0xff] (!%p243_p2)   ;;  %v6425_v48 = vld [vmem:[%s8180_s4] sm:$0xff] (!%p243_p2)  }
   0xa   : > { %v6417_v20 = vld [vmem:[%s8180_s4 + $0x130] sm:$0xff] (!%p243_p2)   ;;  %v6419_v36 = vld [vmem:[%s8180_s4 + $0x138] sm:$0xff] (!%p243_p2)   ;;  %v6427_v54 = vld [vmem:[%s8180_s4 + $0x140] sm:$0xff] (!%p243_p2)  }
   0xb   : > { %5623 = vmatpush3.bf16.msra.mxu1 (!%p243_p2), %v6406_v2 }
   0xc   : > { %5831 = vmatpush3.bf16.msra.mxu0 (!%p243_p2), %v6407_v3  ;;  %5624 = vmatprep.subr.bf16.mxu1 (!%p243_p2), %v6408_v4 }
   0xd   : > { %s8189_s1 = smov (!%p280_p3, %s5043_s1), 1  ;;  %5832 = vmatprep.subr.bf16.mxu0 %v6409_v5 }
   0xe   : > { %s6392_s17 = smul.u32 168, %s8189_s1  ;;  %s292_s30 = scalar_lea.vmem %s8182_s6, %s8189_s1 }
   0xf   : > { %5625 = vmatpush3.bf16.msra.mxu1 %v6408_v4  ;;  %s295_s10 = scalar_lea.vmem %s8183_s7, %s8189_s1 }
  0x10   : > { %5833 = vmatpush3.bf16.msra.mxu0 %v6409_v5  ;;  %5626 = vmatprep.subr.bf16.mxu1 %v6410_v6  ;;  %s6695_s2 = scalar_lea.vmem %s8179_s3, %s6392_s17  ;;  %s7716_s28 = scalar_lea.vmem %s8181_s5, %s6392_s17 }
  0x11   : > { %5834 = vmatprep.subr.bf16.mxu0 %v6411_v7  ;;  %v297_v12 = vld [vmem:[%s6695_s2] sm:$0xf]  ;;  %v298_v13 = vld [vmem:[%s6695_s2 + $0x4] sm:$0xf]  ;;  %v6708_v15 = vld [vmem:[%s6695_s2 + $0x8] sm:$0xff]  }
  0x12   : > { %v6705_v14 = vcombine.low %v297_v12, %v298_v13  ;;  %v6711_v16 = vld [vmem:[%s6695_s2 + $0x10] sm:$0xff]   ;;  %v1433_v18 = vld [vmem:[%s6695_s2 + $0x8] sm:$0xe]  ;;  %v6718_v19 = vld [vmem:[%s6695_s2 + $0xc] sm:$0xf]  ;;  %v469_v23 = vshll.u32 %v6708_v15, 16 }
  0x13   : > { %5627 = vmatpush3.bf16.msra.mxu1 %v6410_v6  ;;  %v6727_v24 = vcombine.low %v1433_v18, %v6718_v19  ;;  %v6730_v25 = vld [vmem:[%s6695_s2 + $0x10] sm:$0xff]   ;;  %v1927_v26 = vshrl.u32 %v6711_v16, 16  ;;  %v1930_v27 = vshll.u32 %v6711_v16, 16  ;;  %v473_v40 = vshrl.u32 %v6708_v15, 16  ;;  %v6745_v41 = vld [vmem:[%s6695_s2 + $0x18] sm:$0xff]   ;;  %v6762_v57 = vld [vmem:[%s6695_s2 + $0x20] sm:$0xff]  }
  0x14   : > { %5835 = vmatpush3.bf16.msra.mxu0 %v6411_v7  ;;  %5628 = vmatprep.subr.bf16.mxu1 %v6412_v8  ;;  %v462_v21 = vshrl.u32 %v6705_v14, 16  ;;  %v464_v22 = vshll.u32 %v6705_v14, 16  ;;  %v471_v29 = vrot.slane %v469_v23, 1  ;;  %v477_v35 = vshll.u32 %v6730_v25, 16  ;;  %v6759_v55 = vld [vmem:[%s6695_s2 + $0x18] sm:$0xff]   ;;  %v6766_v60 = vld [vmem:[%s6695_s2 + $0x20] sm:$0xff]  }
  0x15   : > { %5836 = vmatprep.subr.bf16.mxu0 %v6413_v9  ;;  %v1919_v30 = vshrl.u32 %v6727_v24, 16  ;;  %v1922_v31 = vshll.u32 %v6727_v24, 16  ;;  %v1929_v33 = vrot.slane %v1927_v26, 1  ;;  %v1932_v34 = vrot.slane %v1930_v27, 2  ;;  %v6770_v62 = vld [vmem:[%s6695_s2 + $0x28] sm:$0xff]  }
  0x16   : > { %v466_v28 = vrot.slane %v464_v22, 1  ;;  %v1936_v45 = vshrl.u32 %v6745_v41, 16  ;;  %v1939_v46 = vshll.u32 %v6745_v41, 16  ;;  %v479_v47 = vrot.slane %v477_v35, 1  ;;  %v6428_v7 = vld [vmem:[%s8180_s4 + $0x148] sm:$0xff]  }
  0x17   : > { %5629 = vmatpush3.bf16.msra.mxu1 %v6412_v8  ;;  %v1921_v38 = vrot.slane %v1919_v30, 1  ;;  %v1924_v39 = vrot.slane %v1922_v31, 2  ;;  %v1933_v42 = vor.u32 %v1932_v34, %v1929_v33  ;;  %v481_v49 = vshrl.u32 %v6730_v25, 16  ;;  %v6790_v22 = vld [vmem:[%s6695_s2 + $0x28] sm:$0xff]   ;;  %v6799_v31 = vld [vmem:[%s6695_s2 + $0x30] sm:$0xff]   ;;  %v6803_v33 = vld [vmem:[%s6695_s2 + $0x38] sm:$0xff]  }
  0x18   : > { %5837 = vmatpush3.bf16.msra.mxu0 %v6413_v9  ;;  %5630 = vmatprep.subr.bf16.mxu1 %v6414_v10  ;;  %v467_v37 = vor.u32 %v466_v28, %v462_v21  ;;  %v475_v51 = vor.u32 %v473_v40, %v471_v29  ;;  %v1938_v52 = vrot.slane %v1936_v45, 1  ;;  %v1941_v53 = vrot.slane %v1939_v46, 2  ;;  %v6433_v21 = vld [vmem:[%s8180_s4 + $0x150] sm:$0xff]  }
  0x19   : > { %5838 = vmatprep.subr.bf16.mxu0 %v6415_v11  ;;  %v1925_v44 = vor.u32 %v1924_v39, %v1921_v38  ;;  %v483_v58 = vor.u32 %v481_v49, %v479_v47  ;;  %v485_v59 = vshll.u32 %v6759_v55, 16  ;;  %v489_v61 = vshrl.u32 %v6759_v55, 16  ;;  %v6795_v28 = vld [vmem:[%s6695_s2 + $0x30] sm:$0xff]  }
  0x1a   : > { %v472_v43 = vsel %vm460_vm0, %v467_v37, %v471_v29  ;;  %v1942_v56 = vor.u32 %v1941_v53, %v1938_v52  ;;  %v480_v63 = vsel %vm460_vm0, %v475_v51, %v479_v47  ;;  %v1945_v1 = vshrl.u32 %v6762_v57, 16  ;;  %v6441_v46 = vld [vmem:[%s8180_s4 + $0x10] sm:$0xff]   ;;  %v6440_v53 = vld [vmem:[%s8180_s4 + $0x160] sm:$0xff]  }
  0x1b   : > { %5631 = vmatpush3.bf16.msra.mxu1 %v6414_v10  ;;  %5636 = vmatprep.mubr.bf16.mxu1 %v472_v43  ;;  %v1934_v50 = vsel %vm1917_vm1, %v1925_v44, %v1933_v42  ;;  %v1948_v2 = vshll.u32 %v6762_v57, 16  ;;  %v487_v3 = vrot.slane %v485_v59, 1  ;;  %v493_v4 = vshll.u32 %v6766_v60, 16  ;;  %v6434_v10 = vld [vmem:[%s8180_s4 + $0x8] sm:$0xff]   ;;  %v6435_v43 = vld [vmem:[%s8180_s4 + $0x158] sm:$0xff]  }
  0x1c   : > { %5839 = vmatpush3.bf16.msra.mxu0 %v6415_v11  ;;  %5632 = vmatprep.subr.bf16.mxu1 %v6416_v17  ;;  %v1943_v0 = vsel %vm1917_vm1, %v1933_v42, %v1942_v56  ;;  %v1954_v5 = vshrl.u32 %v6770_v62, 16  ;;  %v1957_v6 = vshll.u32 %v6770_v62, 16  ;;  %v1947_v8 = vrot.slane %v1945_v1, 1  ;;  %v6832_v1 = vld [vmem:[%s6695_s2 + $0x40] sm:$0xff]  }
  0x1d   : > { %5840 = vmatprep.subr.bf16.mxu0 %v6417_v20  ;;  %5844 = vmatprep.mubr.bf16.mxu0 %v1934_v50  ;;  %v1950_v9 = vrot.slane %v1948_v2, 2  ;;  %v488_v11 = vsel %vm460_vm0, %v483_v58, %v487_v3  ;;  %v495_v18 = vrot.slane %v493_v4, 1  ;;  %v497_v23 = vshrl.u32 %v6766_v60, 16 }
  0x1e   : > { %v1956_v12 = vrot.slane %v1954_v5, 1  ;;  %v501_v30 = vshll.u32 %v6790_v22, 16  ;;  %v1966_v37 = vshll.u32 %v6795_v28, 16  ;;  %v509_v39 = vshll.u32 %v6799_v31, 16 }
  0x1f   : > { %5633 = vmatpush3.bf16.msra.mxu1 %v6416_v17  ;;  %v1951_v13 = vor.u32 %v1950_v9, %v1947_v8  ;;  %v491_v17 = vor.u32 %v489_v61, %v487_v3  ;;  %v499_v29 = vor.u32 %v497_v23, %v495_v18  ;;  %v1972_v40 = vshrl.u32 %v6803_v33, 16  ;;  %v6828_v61 = vld [vmem:[%s6695_s2 + $0x40] sm:$0xff]   ;;  %v6442_v3 = vld [vmem:[%s8180_s4 + $0x168] sm:$0xff]  }
  0x20   : > { %5841 = vmatpush3.bf16.msra.mxu0 %v6417_v20  ;;  %5634 = vmatprep.subr.bf16.mxu1 %v6418_v32  ;;  %v1959_v20 = vrot.slane %v1957_v6, 2  ;;  %v503_v38 = vrot.slane %v501_v30, 1  ;;  %v1975_v42 = vshll.u32 %v6803_v33, 16  ;;  %v1968_v45 = vrot.slane %v1966_v37, 2  ;;  %v6448_v30 = vld [vmem:[%s8180_s4 + $0x18] sm:$0xff]  }
  0x21   : > { %5842 = vmatprep.subr.bf16.mxu0 %v6419_v36  ;;  %v1952_v26 = vsel %vm1917_vm1, %v1942_v56, %v1951_v13  ;;  %v496_v34 = vsel %vm460_vm0, %v491_v17, %v495_v18  ;;  %v511_v51 = vrot.slane %v509_v39, 1  ;;  %v513_v56 = vshrl.u32 %v6799_v31, 16  ;;  %v2367_v37 = vld [vmem:[%s6695_s2 + $0x8] sm:$0xc] }
  0x22   : > { %v1960_v27 = vor.u32 %v1959_v20, %v1956_v12  ;;  %v504_v47 = vsel %vm460_vm0, %v499_v29, %v503_v38  ;;  %v1977_v52 = vrot.slane %v1975_v42, 2  ;;  %v1981_v4 = vshrl.u32 %v6828_v61, 16  ;;  %v6447_v29 = vld [vmem:[%s8180_s4 + $0x170] sm:$0xff]  }
  0x23   : > { %5635 = vmatpush3.bf16.msra.mxu1 %v6418_v32  ;;  %v505_v32 = vshrl.u32 %v6790_v22, 16  ;;  %v1984_v5 = vshll.u32 %v6828_v61, 16  ;;  %v2390_v39 = vrot.slane %v6711_v16, 2 }
  0x24   : > { %5843 = vmatpush3.bf16.msra.mxu0 %v6419_v36  ;;  %5672 = vmatprep.subr.bf16.mxu1 %v6425_v48  ;;  %v1961_v35 = vsel %vm1917_vm1, %v1951_v13, %v1960_v27  ;;  %v1963_v36 = vshrl.u32 %v6795_v28, 16 }
  0x25   : > { %5880 = vmatprep.subr.bf16.mxu0 %v6427_v54  ;;  %v507_v50 = vor.u32 %v505_v32, %v503_v38  ;;  %v1986_v12 = vrot.slane %v1984_v5, 2  ;;  %v5210_v38 = vcombine.low %v2367_v37, %v6718_v19  ;;  %v2394_v5 = vrot.slane %v6762_v57, 2  ;;  %v6464_v37 = vld [vmem:[%s8180_s4 + $0x190] sm:$0xff]  }
  0x26   : > { %5637 = vmatmul.mubr.bf16.vlgmr.msra.gmra.mrb[0].mxu1 %v480_v63  ;;  %v1965_v44 = vrot.slane %v1963_v36, 1  ;;  %v515_v63 = vor.u32 %v513_v56, %v511_v51  ;;  %v529_v36 = vshrl.u32 %v6832_v1, 16 }
  0x27   : > { %5845 = vmatmul.mubr.bf16.vlgmr.msra.gmra.mrb[0].mxu0 %v1943_v0  ;;  %5673 = vmatpush3.bf16.msra.mxu1 %v6425_v48  ;;  %v1974_v48 = vrot.slane %v1972_v40, 1  ;;  %v512_v2 = vsel %vm460_vm0, %v507_v50, %v511_v51  ;;  %v6866_v40 = vld [vmem:[%s6695_s2 + $0x50] sm:$0xff]   ;;  %v2389_v19 = vrot.slane %v5210_v38, 2 }
  0x28   : > { %5881 = vmatpush3.bf16.msra.mxu0 %v6427_v54  ;;  %5640 = vmatprep.mubr.bf16.mxu1 %v488_v11  ;;  %v1969_v49 = vor.u32 %v1968_v45, %v1965_v44  ;;  %v6823_v54 = vld [vmem:[%s6695_s2 + $0x38] sm:$0xff]   ;;  %v1983_v11 = vrot.slane %v1981_v4, 1  ;;  %v545_v51 = vshrl.u32 %v6866_v40, 16 }
  0x29   : > { %5882 = vmatprep.subr.bf16.mxu0 %v6428_v7  ;;  %5674 = vmatprep.subr.bf16.mxu1 %v6434_v10  ;;  %v1978_v59 = vor.u32 %v1977_v52, %v1974_v48  ;;  %v517_v0 = vshll.u32 %v6823_v54, 16  ;;  %v521_v6 = vshrl.u32 %v6823_v54, 16  ;;  %v541_v48 = vshll.u32 %v6866_v40, 16 }
  0x2a   : > { %5848 = vmatprep.mubr.bf16.mxu0 %v1952_v26  ;;  %v1970_v58 = vsel %vm1917_vm1, %v1960_v27, %v1969_v49 }
  0x2b   : > { %5675 = vmatpush3.bf16.msra.mxu1 %v6434_v10  ;;  %v1979_v8 = vsel %vm1917_vm1, %v1969_v49, %v1978_v59  ;;  %v519_v9 = vrot.slane %v517_v0, 1  ;;  %v525_v10 = vshll.u32 %v6832_v1, 16  ;;  %v6449_v49 = vld [vmem:[%s8180_s4 + $0x178] sm:$0xff]   ;;  %v543_v56 = vrot.slane %v541_v48, 1 }
  0x2c   : > { %5883 = vmatpush3.bf16.msra.mxu0 %v6428_v7  ;;  %5676 = vmatprep.subr.bf16.mxu1 %v6441_v46  ;;  %v6842_v7 = vld [vmem:[%s6695_s2 + $0x48] sm:$0xff]   ;;  %v2392_v0 = vrot.slane %v6745_v41, 2  ;;  %v6470_v48 = vld [vmem:[%s8180_s4 + $0x198] sm:$0xff]  }
  0x2d   : > { %5884 = vmatprep.subr.bf16.mxu0 %v6433_v21  ;;  %v1990_v13 = vshrl.u32 %v6842_v7, 16  ;;  %v1993_v17 = vshll.u32 %v6842_v7, 16  ;;  %v520_v18 = vsel %vm460_vm0, %v515_v63, %v519_v9  ;;  %v527_v20 = vrot.slane %v525_v10, 1 }
  0x2e   : > { %5641 = vmatmul.mubr.bf16.gmra.mrb[4].mxu1 %v496_v34  ;;  %v523_v23 = vor.u32 %v521_v6, %v519_v9  ;;  %v547_v4 = vor.u32 %v545_v51, %v543_v56  ;;  %v6456_v6 = vld [vmem:[%s8180_s4 + $0x180] sm:$0xff]   ;;  %v2393_v57 = vsel %vm2388_vm2, %v2390_v39, %v2392_v0 }
  0x2f   : > { %5849 = vmatmul.mubr.bf16.gmra.mrb[4].mxu0 %v1961_v35  ;;  %5644 = vmatprep.mubr.bf16.mxu1 %v504_v47  ;;  %v1992_v26 = vrot.slane %v1990_v13, 1  ;;  %v1995_v27 = vrot.slane %v1993_v17, 2  ;;  %v6859_v35 = vld [vmem:[%s6695_s2 + $0x48] sm:$0xff]   ;;  %v6875_v47 = vld [vmem:[%s6695_s2 + $0x58] sm:$0xff]   ;;  %v6461_v17 = vld [vmem:[%s8180_s4 + $0x30] sm:$0xff]  }
  0x30   : > { %5885 = vmatpush3.bf16.msra.mxu0 %v6433_v21  ;;  %5677 = vmatpush3.bf16.msra.mxu1 %v6441_v46  ;;  %v1987_v21 = vor.u32 %v1986_v12, %v1983_v11  ;;  %v528_v42 = vsel %vm460_vm0, %v523_v23, %v527_v20  ;;  %v533_v44 = vshll.u32 %v6859_v35, 16  ;;  %v537_v45 = vshrl.u32 %v6859_v35, 16  ;;  %v6453_v46 = vld [vmem:[%s8180_s4 + $0x20] sm:$0xff]   ;;  %v6916_v23 = vld [vmem:[%s6695_s2 + $0x70] sm:$0xff]  }
  0x31   : > { %5886 = vmatprep.subr.bf16.mxu0 %v6435_v43  ;;  %5852 = vmatprep.mubr.bf16.mxu0 %v1970_v58  ;;  %v6856_v34 = vor.u32 %v1995_v27, %v1992_v26  ;;  %v549_v52 = vshll.u32 %v6875_v47, 16  ;;  %v6887_v58 = vld [vmem:[%s6695_s2 + $0x60] sm:$0xff]   ;;  %v553_v10 = vshrl.u32 %v6875_v47, 16  ;;  %v2396_v27 = vrot.slane %v6770_v62, 2 }
  0x32   : > { %v1988_v32 = vsel %vm1917_vm1, %v1978_v59, %v1987_v21  ;;  %5678 = vmatprep.subr.bf16.mxu1 %v6448_v30  ;;  %v535_v50 = vrot.slane %v533_v44, 1  ;;  %v557_v41 = vshll.u32 %v6887_v58, 16  ;;  %v561_v11 = vshrl.u32 %v6887_v58, 16 }
  0x33   : > { %v1997_v16 = vsel %vm1917_vm1, %v1987_v21, %v6856_v34  ;;  %v573_v38 = vshll.u32 %v6916_v23, 16  ;;  %v577_v44 = vshrl.u32 %v6916_v23, 16 }
  0x34   : > { %5887 = vmatpush3.bf16.msra.mxu0 %v6435_v43  ;;  %5679 = vmatpush3.bf16.msra.mxu1 %v6448_v30  ;;  %v531_v43 = vor.u32 %v529_v36, %v527_v20  ;;  %v539_v63 = vor.u32 %v537_v45, %v535_v50  ;;  %v6460_v20 = vld [vmem:[%s8180_s4 + $0x188] sm:$0xff]   ;;  %v559_v21 = vrot.slane %v557_v41, 1  ;;  %v2398_v36 = vrot.slane %v6795_v28, 2  ;;  %v6467_v41 = vld [vmem:[%s6695_s2 + $0x50] sm:$0xff]  }
  0x35   : > { %5888 = vmatprep.subr.bf16.mxu0 %v6440_v53  ;;  %5680 = vmatprep.subr.bf16.mxu1 %v6453_v46 }
  0x36   : > { %5645 = vmatmul.mubr.bf16.gmra.mrb[8].mxu1 %v512_v2  ;;  %v536_v59 = vsel %vm460_vm0, %v531_v43, %v535_v50  ;;  %v551_v2 = vrot.slane %v549_v52, 1  ;;  %v544_v9 = vsel %vm460_vm0, %v539_v63, %v543_v56  ;;  %v2397_v43 = vsel %vm2388_vm2, %v2394_v5, %v2396_v27 }
  0x37   : > { %5853 = vmatmul.mubr.bf16.gmra.mrb[8].mxu0 %v1979_v8  ;;  %5648 = vmatprep.mubr.bf16.mxu1 %v520_v18  ;;  %v6899_v8 = vld [vmem:[%s6695_s2 + $0x68] sm:$0xff]   ;;  %v2395_v18 = vsel %vm2388_vm2, %v2392_v0, %v2394_v5  ;;  %v2400_v50 = vrot.slane %v6803_v33, 2  ;;  %v2402_v56 = vrot.slane %v6828_v61, 2  ;;  %v6474_v61 = vld [vmem:[%s8180_s4 + $0x1a0] sm:$0xff]  }
  0x38   : > { %5889 = vmatpush3.bf16.msra.mxu0 %v6440_v53  ;;  %5856 = vmatprep.mubr.bf16.mxu0 %v1988_v32  ;;  %v2391_v53 = vsel %vm2388_vm2, %v2389_v19, %v2390_v39  ;;  %v552_v12 = vsel %vm460_vm0, %v547_v4, %v551_v2  ;;  %v565_v13 = vshll.u32 %v6899_v8, 16  ;;  %v555_v26 = vor.u32 %v553_v10, %v551_v2  ;;  %v6920_v32 = vld [vmem:[%s6695_s2 + $0x78] sm:$0xff]  }
  0x39   : > { %5890 = vmatprep.subr.bf16.mxu0 %v6442_v3  ;;  %5681 = vmatpush3.bf16.msra.mxu1 %v6453_v46  ;;  %v569_v62 = vshrl.u32 %v6899_v8, 16  ;;  %v581_v45 = vshll.u32 %v6920_v32, 16  ;;  %v2399_v46 = vsel %vm2388_vm2, %v2396_v27, %v2398_v36  ;;  %v575_v19 = vrot.slane %v573_v38, 1  ;;  %v6482_v27 = vld [vmem:[%s8180_s4 + $0x1b0] sm:$0xff]  }
  0x3a   : > { %v567_v30 = vrot.slane %v565_v13, 1  ;;  %v560_v39 = vsel %vm460_vm0, %v555_v26, %v559_v21  ;;  %v585_v0 = vshrl.u32 %v6920_v32, 16  ;;  %v2401_v2 = vsel %vm2388_vm2, %v2398_v36, %v2400_v50  ;;  %v6469_v36 = vld [vmem:[%s6695_s2 + $0x58] sm:$0xff]  }
  0x3b   : > { %v579_v51 = vor.u32 %v577_v44, %v575_v19  ;;  %v583_v52 = vrot.slane %v581_v45, 1  ;;  %v6473_v45 = vld [vmem:[%s6695_s2 + $0x68] sm:$0xff]  }
  0x3c   : > { %5891 = vmatpush3.bf16.msra.mxu0 %v6442_v3  ;;  %v6457_v3 = vld [vmem:[%s8180_s4 + $0x28] sm:$0xff]  }
  0x3d   : > { %5892 = vmatprep.subr.bf16.mxu0 %v6447_v29  ;;  %5682 = vmatprep.subr.bf16.mxu1 %v6457_v3 }
  0x3e   : > { %5649 = vmatmul.mubr.bf16.gmra.mrb[12].mxu1 %v528_v42  ;;  %v6466_v42 = vld [vmem:[%s8180_s4 + $0x38] sm:$0xff]  }
  0x3f   : > { %5857 = vmatmul.mubr.bf16.gmra.mrb[12].mxu0 %v1997_v16  ;;  %5652 = vmatprep.mubr.bf16.mxu1 %v536_v59  ;;  %v6938_v16 = vld [vmem:[%s6695_s2 + $0x80] sm:$0xff]  }
  0x40   : > { %5893 = vmatpush3.bf16.msra.mxu0 %v6447_v29  ;;  %5896 = vmatprep.mubr.bf16.mxu0 %v2391_v53  ;;  %v563_v29 = vor.u32 %v561_v11, %v559_v21  ;;  %v6945_v53 = vld [vmem:[%s6695_s2 + $0x88] sm:$0xff]   ;;  %v6951_v59 = vld [vmem:[%s8180_s4 + $0x80] sm:$0xff]   ;;  %v589_v63 = vshll.u32 %v6938_v16, 16  ;;  %v593_v4 = vshrl.u32 %v6938_v16, 16  ;;  %v587_v11 = vor.u32 %v585_v0, %v583_v52  ;;  %v6481_v0 = vld [vmem:[%s8180_s4 + $0x90] sm:$0xff]  }
  0x41   : > { %5894 = vmatprep.subr.bf16.mxu0 %v6449_v49  ;;  %5683 = vmatpush3.bf16.msra.mxu1 %v6457_v3  ;;  %v584_v3 = vsel %vm460_vm0, %v579_v51, %v583_v52  ;;  %v597_v5 = vshll.u32 %v6945_v53, 16  ;;  %v6476_v51 = vld [vmem:[%s6695_s2 + $0x78] sm:$0xff]  }
  0x42   : > { %5684 = vmatprep.subr.bf16.mxu1 %v6461_v17  ;;  %v568_v28 = vsel %vm460_vm0, %v563_v29, %v567_v30  ;;  %v591_v10 = vrot.slane %v589_v63, 1 }
  0x44   : > { %5895 = vmatpush3.bf16.msra.mxu0 %v6449_v49  ;;  %v571_v49 = vor.u32 %v569_v62, %v567_v30  ;;  %v595_v13 = vor.u32 %v593_v4, %v591_v10  ;;  %v592_v21 = vsel %vm460_vm0, %v587_v11, %v591_v10  ;;  %v6486_v62 = vld [vmem:[%s8180_s4 + $0x1b8] sm:$0xff]  }
  0x45   : > { %5932 = vmatprep.subr.bf16.mxu0 %v6456_v6  ;;  %5685 = vmatpush3.bf16.msra.mxu1 %v6461_v17  ;;  %v599_v17 = vrot.slane %v597_v5, 1  ;;  %v6485_v4 = vld [vmem:[%s8180_s4 + $0x98] sm:$0xff]   ;;  %v2705_v5 = vld [vmem:[%s6695_s2 + $0x10] sm:$0xc] }
  0x46   : > { %5653 = vmatmul.mubr.bf16.gmra.mrb[16].mxu1 %v544_v9  ;;  %5686 = vmatprep.subr.bf16.mxu1 %v6466_v42  ;;  %v576_v33 = vsel %vm460_vm0, %v571_v49, %v575_v19  ;;  %v6468_v9 = vld [vmem:[%s6695_s2 + $0x90] ss:$0 sps:$4 sm:$0x11]   ;;  %v2412_v49 = vrot.slane %v6473_v45, 2 }
  0x47   : > { %5897 = vmatmul.mubr.bf16.vlgmr.msra.gmra.mrb[0].mxu0 %v2393_v57  ;;  %5656 = vmatprep.mubr.bf16.mxu1 %v552_v12  ;;  %v6478_v57 = vld [vmem:[%s8180_s4 + $0x1a8] sm:$0xff]   ;;  %v2404_v12 = vrot.slane %v6842_v7, 2  ;;  %v605_v26 = vshll.u32 %v6468_v9, 16  ;;  %v600_v30 = vsel %vm460_vm0, %v595_v13, %v599_v17  ;;  %v6475_v19 = vld [vmem:[%s6695_s2 + $0x70] sm:$0xff]   ;;  %v6490_v9 = vld [vmem:[%s8180_s4 + $0xa0] sm:$0xff]  }
  0x48   : > { %5900 = vmatprep.mubr.bf16.mxu0 %v2395_v18  ;;  %5933 = vmatpush3.bf16.msra.mxu0 %v6456_v6  ;;  %v2403_v6 = vsel %vm2388_vm2, %v2400_v50, %v2402_v56  ;;  %v2406_v18 = vrot.slane %v6467_v41, 2  ;;  %v2414_v50 = vrot.slane %v6475_v19, 2  ;;  %v6484_v10 = vld [vmem:[%s6695_s2 + $0x98] ss:$0 sps:$4 sm:$0x33]   ;;  %v6510_v19 = vld [vmem:[%s8180_s4 + $0x1e0] sm:$0xff]  }
  0x49   : > { %5934 = vmatprep.subr.bf16.mxu0 %v6460_v20  ;;  %5687 = vmatpush3.bf16.msra.mxu1 %v6466_v42  ;;  %v2405_v29 = vsel %vm2388_vm2, %v2402_v56, %v2404_v12  ;;  %v2408_v42 = vrot.slane %v6469_v36, 2  ;;  %v6477_v56 = vld [vmem:[%s8180_s4 + $0x88] sm:$0xff]   ;;  %v2424_v13 = vrot.slane %v6484_v10, 2  ;;  %v7059_v36 = vld [vmem:[%s8180_s4 + $0xc0] sm:$0xff]   ;;  %v6540_v10 = vld [vmem:[%s6695_s2 + $0x10] sm:$0xff]  }
  0x4a   : > { %5724 = vmatprep.subr.bf16.mxu1 %v6951_v59  ;;  %v2407_v7 = vsel %vm2388_vm2, %v2404_v12, %v2406_v18  ;;  %v2415_v63 = vsel %vm2388_vm2, %v2412_v49, %v2414_v50  ;;  %v6494_v12 = vld [vmem:[%s8180_s4 + $0xa8] sm:$0xff]  }
  0x4b   : > { %v2409_v44 = vsel %vm2388_vm2, %v2406_v18, %v2408_v42 }
  0x4c   : > { %5935 = vmatpush3.bf16.msra.mxu0 %v6460_v20  ;;  %v601_v20 = vshrl.u32 %v6945_v53, 16 }
  0x4d   : > { %5936 = vmatprep.subr.bf16.mxu0 %v6464_v37 }
  0x4e   : > { %5657 = vmatmul.mubr.bf16.gmra.mrb[20].mxu1 %v560_v39  ;;  %v603_v38 = vor.u32 %v601_v20, %v599_v17  ;;  %v607_v39 = vrot.slane %v605_v26, 1  ;;  %v6498_v20 = vld [vmem:[%s8180_s4 + $0xb0] sm:$0xff]   ;;  %v7043_v26 = vld [vmem:[%s6695_s2 + $0x20] sm:$0xff]  }
  0x4f   : > { %5901 = vmatmul.mubr.bf16.gmra.mrb[4].mxu0 %v2397_v43  ;;  %5660 = vmatprep.mubr.bf16.mxu1 %v568_v28 }
  0x50   : > { %5904 = vmatprep.mubr.bf16.mxu0 %v2399_v46  ;;  %5937 = vmatpush3.bf16.msra.mxu0 %v6464_v37  ;;  %v6471_v37 = vld [vmem:[%s6695_s2 + $0x60] sm:$0xff]   ;;  %v608_v28 = vsel %vm460_vm0, %v603_v38, %v607_v39  ;;  %v6497_v38 = vld [vmem:[%s8180_s4 + $0x1c8] sm:$0xff]  }
  0x51   : > { %5938 = vmatprep.subr.bf16.mxu0 %v6470_v48  ;;  %v2410_v43 = vrot.slane %v6471_v37, 2  ;;  %v7063_v37 = vld [vmem:[%s6695_s2 + $0x30] sm:$0xff]  }
  0x52   : > { %v2859_v39 = vrot.slane %v7063_v37, 2 }
  0x53   : > { %v2411_v46 = vsel %vm2388_vm2, %v2408_v42, %v2410_v43  ;;  %v2413_v52 = vsel %vm2388_vm2, %v2410_v43, %v2412_v49  ;;  %v6501_v42 = vld [vmem:[%s8180_s4 + $0x1d0] sm:$0xff]  }
  0x54   : > { %5939 = vmatpush3.bf16.msra.mxu0 %v6470_v48  ;;  %v6992_v48 = vld [vmem:[%s8180_s4 + $0x1c0] sm:$0xff]   ;;  %v7101_v49 = vld [vmem:[%s6695_s2 + $0x50] sm:$0xff]  }
  0x55   : > { %5940 = vmatprep.subr.bf16.mxu0 %v6474_v61 }
  0x56   : > { %5661 = vmatmul.mubr.bf16.gmra.mrb[24].mxu1 %v576_v33  ;;  %v6479_v33 = vld [vmem:[%s6695_s2 + $0x80] sm:$0xff]  }
  0x57   : > { %5905 = vmatmul.mubr.bf16.gmra.mrb[8].mxu0 %v2401_v2  ;;  %5664 = vmatprep.mubr.bf16.mxu1 %v584_v3  ;;  %v6480_v2 = vld [vmem:[%s6695_s2 + $0x88] sm:$0xff]  }
  0x58   : > { %5908 = vmatprep.mubr.bf16.mxu0 %v2403_v6  ;;  %5941 = vmatpush3.bf16.msra.mxu0 %v6474_v61  ;;  %v2418_v61 = vrot.slane %v6479_v33, 2  ;;  %v2706_v6 = vld [vmem:[%s6695_s2 + $0x14] sm:$0xf] }
  0x59   : > { %5942 = vmatprep.subr.bf16.mxu0 %v6478_v57 }
  0x5c   : > { %5943 = vmatpush3.bf16.msra.mxu0 %v6478_v57  ;;  %v7025_v57 = vcombine.low %v2705_v5, %v2706_v6  ;;  %v7143_v6 = vld [vmem:[%s6695_s2 + $0x70] sm:$0xff]  }
  0x5d   : > { %5944 = vmatprep.subr.bf16.mxu0 %v6482_v27 }
  0x5e   : > { %5665 = vmatmul.mubr.bf16.gmra.mrb[28].mxu1 %v592_v21  ;;  %v2852_v17 = vrot.slane %v7025_v57, 2 }
  0x5f   : > { %5909 = vmatmul.mubr.bf16.gmra.mrb[12].mxu0 %v2405_v29  ;;  %5668 = vmatprep.mubr.bf16.mxu1 %v600_v30  ;;  %v2855_v29 = vrot.slane %v7043_v26, 2 }
  0x60   : > { %5912 = vmatprep.mubr.bf16.mxu0 %v2407_v7  ;;  %5945 = vmatpush3.bf16.msra.mxu0 %v6482_v27  ;;  %v6502_v27 = vld [vmem:[%s8180_s4 + $0xb8] sm:$0xff]  }
  0x61   : > { %5946 = vmatprep.subr.bf16.mxu0 %v6486_v62 }
  0x64   : > { %5947 = vmatpush3.bf16.msra.mxu0 %v6486_v62 }
  0x65   : > { %5984 = vmatprep.subr.bf16.mxu0 %v6992_v48 }
  0x66   : > { %5669 = vmatmul.mubr.bf16.gmra.mrb[32].mxu1 %v608_v28  ;;  %v7083_v28 = vld [vmem:[%s6695_s2 + $0x40] sm:$0xff]  }
  0x67   : > { %5913 = vmatmul.mubr.bf16.gmra.mrb[16].mxu0 %v2409_v44  ;;  %5688 = vmatprep.mubr.bf16.mxu1 %v6705_v14  ;;  %v2416_v14 = vrot.slane %v6476_v51, 2  ;;  %v6505_v44 = vld [vmem:[%s8180_s4 + $0x1d8] sm:$0xff]   ;;  %v2863_v45 = vrot.slane %v7083_v28, 2  ;;  %v2867_v51 = vrot.slane %v7101_v49, 2 }
  0x68   : > { %5916 = vmatprep.mubr.bf16.mxu0 %v2411_v46 }
  0x69   : > { %v2417_v3 = vsel %vm2388_vm2, %v2414_v50, %v2416_v14  ;;  %v6514_v50 = vld [vmem:[%s8180_s4 + $0x1e8] sm:$0xff]  }
  0x6e   : > { %5689 = vmatmul.mubr.bf16.vlgmr.msra.gmra.mrb[0].mxu1 %v6708_v15  ;;  %v2419_v15 = vsel %vm2388_vm2, %v2416_v14, %v2418_v61  ;;  %v6538_v14 = vld [vmem:[%s6695_s2 + $0x4] sm:$0xf] }
  0x6f   : > { %5917 = vmatmul.mubr.bf16.gmra.mrb[20].mxu0 %v2413_v52  ;;  %5725 = vmatpush3.bf16.msra.mxu1 %v6951_v59  ;;  %v2420_v59 = vrot.slane %v6480_v2, 2  ;;  %v6522_v2 = vld [vmem:[%s8180_s4 + $0x1f8] sm:$0xff]  }
  0x70   : > { %5692 = vmatprep.mubr.bf16.mxu1 %v6730_v25  ;;  %5920 = vmatprep.mubr.bf16.mxu0 %v2415_v63  ;;  %v6483_v25 = vld [vmem:[%s6695_s2 + $0x90] sm:$0xff]  }
  0x71   : > { %5726 = vmatprep.subr.bf16.mxu1 %v6477_v56  ;;  %v2422_v41 = vrot.slane %v6483_v25, 2  ;;  %v2421_v11 = vsel %vm2388_vm2, %v2418_v61, %v2420_v59  ;;  %v6518_v63 = vld [vmem:[%s8180_s4 + $0x1f0] sm:$0xff]   ;;  %v7125_v61 = vld [vmem:[%s6695_s2 + $0x68] sm:$0xff]  }
  0x73   : > { %5727 = vmatpush3.bf16.msra.mxu1 %v6477_v56  ;;  %v2425_v21 = vsel %vm2388_vm2, %v2422_v41, %v2424_v13  ;;  %v1095_v56 = vld [vmem:[%s6695_s2] sm:$0xe] }
  0x74   : > { %5728 = vmatprep.subr.bf16.mxu1 %v6481_v0 }
  0x76   : > { %5693 = vmatmul.mubr.bf16.gmra.mrb[4].mxu1 %v6759_v55  ;;  %v7028_v55 = vld [vmem:[%s6695_s2 + $0x18] sm:$0xff]  }
  0x77   : > { %5921 = vmatmul.mubr.bf16.gmra.mrb[24].mxu0 %v2417_v3  ;;  %5696 = vmatprep.mubr.bf16.mxu1 %v6766_v60  ;;  %v2423_v60 = vsel %vm2388_vm2, %v2420_v59, %v2422_v41  ;;  %v2853_v18 = vrot.slane %v7028_v55, 2  ;;  %v6539_v59 = vld [vmem:[%s6695_s2 + $0x8] sm:$0xff]  }
  0x78   : > { %5924 = vmatprep.mubr.bf16.mxu0 %v2419_v15  ;;  %5729 = vmatpush3.bf16.msra.mxu1 %v6481_v0  ;;  %v5117_v0 = vcombine.low %v1095_v56, %v6538_v14  ;;  %v1118_v25 = vrot.slane %v6539_v59, 1  ;;  %v4534_v56 = vld [vmem:[%s8176_s0 + $0x33] sm:$0xff]  ;;  %v3191_v59 = vshrl.u32 %v7025_v57, 16 }
  0x79   : > { %5730 = vmatprep.subr.bf16.mxu1 %v6485_v4  ;;  %v2856_v7 = vsel %vm2388_vm2, %v2853_v18, %v2855_v29  ;;  %v6521_v14 = vld [vmem:[%s8180_s4 + $0xd8] sm:$0xff]   ;;  %vm4570_vm8 = vcmp.gt.f32.partialorder %v4534_v56, 0.0 }
  0x7a   : > { %v1117_v15 = vrot.slane %v5117_v0, 1  ;;  %v6544_v0 = vld [vmem:[%s6695_s2 + $0x30] sm:$0xff]  }
  0x7c   : > { %5731 = vmatpush3.bf16.msra.mxu1 %v6485_v4  ;;  %v2873_v4 = vrot.slane %v7125_v61, 2  ;;  %v1119_v5 = vsel %vm1116_vm3, %v1117_v15, %v1118_v25 }
  0x7d   : > { %5732 = vmatprep.subr.bf16.mxu1 %v6490_v9 }
  0x7e   : > { %5697 = vmatmul.mubr.bf16.gmra.mrb[8].mxu1 %v6790_v22  ;;  %v2854_v22 = vsel %vm2388_vm2, %v2852_v17, %v2853_v18  ;;  %v6608_v18 = vmov 0  }
  0x7f   : > { %5925 = vmatmul.mubr.bf16.gmra.mrb[28].mxu0 %v2421_v11  ;;  %5700 = vmatprep.mubr.bf16.mxu1 %v6799_v31  ;;  %v7047_v31 = vld [vmem:[%s6695_s2 + $0x28] sm:$0xff]   ;;  %v1120_v11 = vrot.slane %v6540_v10, 1 }
  0x80   : > { %5928 = vmatprep.mubr.bf16.mxu0 %v2423_v60  ;;  %5733 = vmatpush3.bf16.msra.mxu1 %v6490_v9  ;;  %v2857_v30 = vrot.slane %v7047_v31, 2  ;;  %v7147_v9 = vld [vmem:[%s6695_s2 + $0x78] sm:$0xff]   ;;  %v2875_v60 = vrot.slane %v7143_v6, 2 }
  0x81   : > { %5734 = vmatprep.subr.bf16.mxu1 %v6494_v12  ;;  %v2877_v17 = vrot.slane %v7147_v9, 2  ;;  %6402 = vset.pattern.permute.xlu0 %v6608_v18 }
  0x82   : > { %v2860_v43 = vsel %vm2388_vm2, %v2857_v30, %v2859_v39  ;;  %6403 = vset.pattern.permute.xlu1 %v6608_v18 }
  0x84   : > { %5735 = vmatpush3.bf16.msra.mxu1 %v6494_v12  ;;  %v6541_v12 = vld [vmem:[%s6695_s2 + $0x18] sm:$0xff]  }
  0x85   : > { %5736 = vmatprep.subr.bf16.mxu1 %v6498_v20  ;;  %v1122_v13 = vrot.slane %v6541_v12, 1 }
  0x86   : > { %5701 = vmatmul.mubr.bf16.gmra.mrb[12].mxu1 %v6823_v54  ;;  %v2858_v54 = vsel %vm2388_vm2, %v2855_v29, %v2857_v30  ;;  %v2878_v29 = vsel %vm2388_vm2, %v2875_v60, %v2877_v17  ;;  %v6513_v30 = vld [vmem:[%s8180_s4 + $0xc8] sm:$0xff]  }
  0x87   : > { %5929 = vmatmul.mubr.bf16.gmra.mrb[32].mxu0 %v2425_v21  ;;  %5704 = vmatprep.mubr.bf16.mxu1 %v6832_v1  ;;  %v7067_v1 = vld [vmem:[%s6695_s2 + $0x38] sm:$0xff]   ;;  %v7160_v21 = vld [vmem:[%s6695_s2 + $0x80] sm:$0xff]  }
  0x88   : > { %5948 = vmatprep.mubr.bf16.mxu0 %v2854_v22  ;;  %5737 = vmatpush3.bf16.msra.mxu1 %v6498_v20  ;;  %v2861_v62 = vrot.slane %v7067_v1, 2  ;;  %v2876_v20 = vsel %vm2388_vm2, %v2873_v4, %v2875_v60  ;;  %v4530_v22 = vld [vmem:[%s8176_s0 + $0x13] sm:$0xff]  ;;  %v6523_v60 = vld [vmem:[%s8180_s4 + $0xe0] sm:$0xff]  }
  0x89   : > { %5738 = vmatprep.subr.bf16.mxu1 %v6502_v27  ;;  %vm4566_vm4 = vcmp.gt.f32.partialorder %v4530_v22, 0.0 }
  0x8c   : > { %5739 = vmatpush3.bf16.msra.mxu1 %v6502_v27  ;;  %v1123_v27 = vsel %vm1116_vm3, %v1120_v11, %v1122_v13 }
  0x8d   : > { %5776 = vmatprep.subr.bf16.mxu1 %v7059_v36 }
  0x8e   : > { %5705 = vmatmul.mubr.bf16.gmra.mrb[16].mxu1 %v6859_v35  ;;  %v7086_v35 = vld [vmem:[%s6695_s2 + $0x48] sm:$0xff]  }
  0x8f   : > { %5949 = vmatmul.mubr.bf16.vlgmr.msra.gmra.mrb[0].mxu0 %v2856_v7  ;;  %5708 = vmatprep.mubr.bf16.mxu1 %v6866_v40  ;;  %v2862_v40 = vsel %vm2388_vm2, %v2859_v39, %v2861_v62  ;;  %v2865_v46 = vrot.slane %v7086_v35, 2  ;;  %v7171_v7 = vld [vmem:[%s6695_s2 + $0x88] sm:$0xff]  }
  0x90   : > { %5952 = vmatprep.mubr.bf16.mxu0 %v2858_v54  ;;  %5985 = vmatpush3.bf16.msra.mxu0 %v6992_v48  ;;  %v2864_v48 = vsel %vm2388_vm2, %v2861_v62, %v2863_v45  ;;  %v4602_v54 = vsel %vm4566_vm4, 1, %v6608_v18  ;;  %v4532_v62 = vld [vmem:[%s8176_s0 + $0x23] sm:$0xff] }
  0x91   : > { %5986 = vmatprep.subr.bf16.mxu0 %v6497_v38  ;;  %v2868_v33 = vsel %vm2388_vm2, %v2865_v46, %v2867_v51  ;;  %vm4568_vm5 = vcmp.gt.f32.partialorder %v4532_v62, 0.0  ;;  %4639 = vperm.xlu0 %6402, %v4602_v54   ;;  %v4537_v54 = vld [vmem:[%s8176_s0 + $0x4b] sm:$0xff] }
  0x92   : > { %v6525_v62 = vld [vmem:[%s8180_s4 + $0xe8] sm:$0xff]   ;;  %vm4573_vm11 = vcmp.gt.f32.partialorder %v4537_v54, 0.0 }
  0x94   : > { %5987 = vmatpush3.bf16.msra.mxu0 %v6497_v38  ;;  %v6542_v38 = vld [vmem:[%s6695_s2 + $0x20] sm:$0xff]  }
  0x95   : > { %5988 = vmatprep.subr.bf16.mxu0 %v6501_v42  ;;  %v1124_v39 = vrot.slane %v6542_v38, 1  ;;  %v4538_v38 = vld [vmem:[%s8176_s0 + $0x53] sm:$0xff] }
  0x96   : > { %5709 = vmatmul.mubr.bf16.gmra.mrb[20].mxu1 %v6875_v47  ;;  %v2866_v47 = vsel %vm2388_vm2, %v2863_v45, %v2865_v46  ;;  %v2881_v45 = vrot.slane %v7171_v7, 2  ;;  %v4604_v46 = vsel %vm4568_vm5, 1, %v6608_v18  ;;  %vm4574_vm12 = vcmp.gt.f32.partialorder %v4538_v38, 0.0 }
  0x97   : > { %5953 = vmatmul.mubr.bf16.gmra.mrb[4].mxu0 %v2860_v43  ;;  %5712 = vmatprep.mubr.bf16.mxu1 %v6887_v58  ;;  %v7105_v58 = vld [vmem:[%s6695_s2 + $0x58] sm:$0xff]   ;;  %v2879_v43 = vrot.slane %v7160_v21, 2 }
  0x98   : > { %5956 = vmatprep.mubr.bf16.mxu0 %v2862_v40  ;;  %5989 = vmatpush3.bf16.msra.mxu0 %v6501_v42  ;;  %v2869_v52 = vrot.slane %v7105_v58, 2  ;;  %v4531_v42 = vld [vmem:[%s8176_s0 + $0x1b] sm:$0xff]  ;;  %v6543_v40 = vld [vmem:[%s6695_s2 + $0x28] sm:$0xff]  }
  0x99   : > { %5990 = vmatprep.subr.bf16.mxu0 %v6505_v44  ;;  %vm4567_vm6 = vcmp.gt.f32.partialorder %v4531_v42, 0.0  ;;  %4645 = vperm.xlu1 %6403, %v4604_v46   ;;  %v6546_v42 = vld [vmem:[%s6695_s2 + $0x40] sm:$0xff]   ;;  %v3208_v46 = vshrl.u32 %v7043_v26, 16 }
  0x9c   : > { %5991 = vmatpush3.bf16.msra.mxu0 %v6505_v44  ;;  %v1126_v44 = vrot.slane %v6543_v40, 1  ;;  %v7251_v40 = vld [vmem:[%s6695_s2 + $0x48] sm:$0xff]  }
  0x9d   : > { %5992 = vmatprep.subr.bf16.mxu0 %v6510_v19 }
  0x9e   : > { %5713 = vmatmul.mubr.bf16.gmra.mrb[24].mxu1 %v6899_v8  ;;  %v7120_v8 = vld [vmem:[%s6695_s2 + $0x60] sm:$0xff]  }
  0x9f   : > { %5957 = vmatmul.mubr.bf16.gmra.mrb[8].mxu0 %v2864_v48  ;;  %5716 = vmatprep.mubr.bf16.mxu1 %v6916_v23  ;;  %v2870_v23 = vsel %vm2388_vm2, %v2867_v51, %v2869_v52  ;;  %v2871_v3 = vrot.slane %v7120_v8, 2  ;;  %v1125_v48 = vsel %vm1116_vm3, %v1122_v13, %v1124_v39  ;;  %v7194_v51 = vld [vmem:[%s6695_s2 + $0x90] sm:$0xff]  }
  0xa0   : > { %5960 = vmatprep.mubr.bf16.mxu0 %v2866_v47  ;;  %5993 = vmatpush3.bf16.msra.mxu0 %v6510_v19  ;;  %v4603_v19 = vsel %vm4567_vm6, 1, %v6608_v18  ;;  %v2880_v47 = vsel %vm2388_vm2, %v2877_v17, %v2879_v43  ;;  %v2883_v10 = vrot.slane %v7194_v51, 2  ;;  %v3193_v17 = vrot.slane %v3191_v59, 2 }
  0xa1   : > { %5994 = vmatprep.subr.bf16.mxu0 %v6514_v50  ;;  %v2874_v41 = vsel %vm2388_vm2, %v2871_v3, %v2873_v4  ;;  %4642 = vperm.xlu0 %6402, %v4603_v19   ;;  %v3199_v4 = vshrl.u32 %v7028_v55, 16  ;;  %v3211_v19 = vshll.u32 %v7043_v26, 16  ;;  %v3220_v26 = vshll.u32 %v7047_v31, 16 }
  0xa2   : > { %v2884_v22 = vsel %vm2388_vm2, %v2881_v45, %v2883_v10 }
  0xa3   : > { %v3213_v59 = vrot.slane %v3211_v19, 3  ;;  %v6526_v19 = vld [vmem:[%s8180_s4 + $0x208] sm:$0xff]  }
  0xa4   : > { %5995 = vmatpush3.bf16.msra.mxu0 %v6514_v50  ;;  %v1127_v50 = vsel %vm1116_vm3, %v1124_v39, %v1126_v44 }
  0xa5   : > { %5996 = vmatprep.subr.bf16.mxu0 %v6518_v63 }
  0xa6   : > { %5717 = vmatmul.mubr.bf16.gmra.mrb[28].mxu1 %v6920_v32  ;;  %v7138_v32 = vld [vmem:[%s8180_s4 + $0x200] sm:$0xff]  }
  0xa7   : > { %5961 = vmatmul.mubr.bf16.gmra.mrb[12].mxu0 %v2868_v33  ;;  %5720 = vmatprep.mubr.bf16.mxu1 %v6938_v16  ;;  %v2872_v16 = vsel %vm2388_vm2, %v2869_v52, %v2871_v3  ;;  %v4533_v52 = vld [vmem:[%s8176_s0 + $0x2b] sm:$0xff]  ;;  %v7204_v33 = vld [vmem:[%s6695_s2 + $0x98] sm:$0xff]  }
  0xa8   : > { %5964 = vmatprep.mubr.bf16.mxu0 %v2870_v23  ;;  %5997 = vmatpush3.bf16.msra.mxu0 %v6518_v63  ;;  %v2882_v63 = vsel %vm2388_vm2, %v2879_v43, %v2881_v45  ;;  %vm4569_vm7 = vcmp.gt.f32.partialorder %v4533_v52, 0.0  ;;  %v1128_v23 = vrot.slane %v6544_v0, 1  ;;  %v1132_v43 = vrot.slane %v6546_v42, 1 }
  0xa9   : > { %5998 = vmatprep.subr.bf16.mxu0 %v6522_v2  ;;  %v4605_v15 = vsel %vm4569_vm7, 1, %v6608_v18 }
  0xaa   : > { %4648 = vperm.xlu1 %6403, %v4605_v15   ;;  %v1129_v12 = vsel %vm1116_vm3, %v1126_v44, %v1128_v23  ;;  %v1134_v44 = vrot.slane %v7251_v40, 1  ;;  %v3210_v15 = vrot.slane %v3208_v46, 2  ;;  %v4545_v40 = vld [vmem:[%s8176_s0 + $0x8b] sm:$0xff] }
  0xab   : > { %vm4581_vm6 = vcmp.gt.f32.partialorder %v4545_v40, 0.0  ;;  %v6531_v40 = vld [vmem:[%s8180_s4 + $0x220] sm:$0xff]  }
  0xac   : > { %5999 = vmatpush3.bf16.msra.mxu0 %v6522_v2  ;;  %v7211_v2 = vld [vmem:[%s6695_s2 + $0x38] sm:$0xff]  }
  0xad   : > { %6036 = vmatprep.subr.bf16.mxu0 %v7138_v32  ;;  %v1130_v3 = vrot.slane %v7211_v2, 1  ;;  %v4541_v2 = vld [vmem:[%s8176_s0 + $0x6b] sm:$0xff] }
  0xae   : > { %5721 = vmatmul.mubr.bf16.gmra.mrb[32].mxu1 %v6945_v53  ;;  %v1121_v53 = vsel %vm1116_vm3, %v1118_v25, %v1120_v11  ;;  %v3194_v25 = vshll.u32 %v7025_v57, 16  ;;  %v3202_v11 = vshll.u32 %v7028_v55, 16  ;;  %v2885_v57 = vrot.slane %v7204_v33, 2 }
  0xaf   : > { %5965 = vmatmul.mubr.bf16.gmra.mrb[16].mxu0 %v2872_v16  ;;  %5740 = vmatprep.mubr.bf16.mxu1 %v1119_v5  ;;  %v4606_v16 = vsel %vm4570_vm8, 1, %v6608_v18  ;;  %v4535_v5 = vld [vmem:[%s8176_s0 + $0x3b] sm:$0xff]  ;;  %vm4577_vm0 = vcmp.gt.f32.partialorder %v4541_v2, 0.0 }
  0xb0   : > { %5968 = vmatprep.mubr.bf16.mxu0 %v2874_v41  ;;  %v4536_v41 = vld [vmem:[%s8176_s0 + $0x43] sm:$0xff]  ;;  %vm4571_vm9 = vcmp.gt.f32.partialorder %v4535_v5, 0.0  ;;  %4651 = vperm.xlu0 %6402, %v4606_v16   ;;  %v2886_v39 = vsel %vm2388_vm2, %v2883_v10, %v2885_v57  ;;  %v6529_v10 = vld [vmem:[%s8180_s4 + $0xf8] sm:$0xff]   ;;  %v7357_v2 = vld [vmem:[%s6695_s2 + $0xa0] ss:$0 sps:$4 sm:$0x77]  }
  0xb1   : > { %vm4572_vm10 = vcmp.gt.f32.partialorder %v4536_v41, 0.0  ;;  %v4607_v13 = vsel %vm4571_vm9, 1, %v6608_v18  ;;  %v3222_v41 = vrot.slane %v3220_v26, 3 }
  0xb2   : > { %v4608_v55 = vsel %vm4572_vm10, 1, %v6608_v18  ;;  %4654 = vperm.xlu1 %6403, %v4607_v13   ;;  %v4613_v13 = vsel %vm4577_vm0, 1, %v6608_v18  ;;  %vm3660_vm10 = vcmask 1044480  }
  0xb4   : > { %4657 = vperm.xlu0 %6402, %v4608_v55  }
  0xb6   : > { %5741 = vmatmul.mubr.bf16.vlgmr.msra.gmra.mrb[0].mxu1 %v1121_v53  ;;  %v3196_v53 = vrot.slane %v3194_v25, 3 }
  0xb7   : > { %5969 = vmatmul.mubr.bf16.gmra.mrb[20].mxu0 %v2876_v20  ;;  %5777 = vmatpush3.bf16.msra.mxu1 %v7059_v36  ;;  %v6517_v36 = vld [vmem:[%s8180_s4 + $0xd0] sm:$0xff]   ;;  %v3201_v20 = vrot.slane %v3199_v4, 2  ;;  %v1135_v4 = vsel %vm1116_vm3, %v1132_v43, %v1134_v44 }
  0xb8   : > { %5744 = vmatprep.mubr.bf16.mxu1 %v1123_v27  ;;  %5972 = vmatprep.mubr.bf16.mxu0 %v2878_v29  ;;  %v1131_v27 = vsel %vm1116_vm3, %v1128_v23, %v1130_v3  ;;  %v6520_v29 = vld [vmem:[%s6695_s2 + $0xa0] ss:$0 sps:$4 sm:$0x33]   ;;  %v3197_v45 = vor.u32 %v3196_v53, %v3193_v17  ;;  %v1133_v23 = vsel %vm1116_vm3, %v1130_v3, %v1132_v43  ;;  %v4542_v3 = vld [vmem:[%s8176_s0 + $0x73] sm:$0xff]  ;;  %v3226_v53 = vshrl.u32 %v7063_v37, 16 }
  0xb9   : > { %5778 = vmatprep.subr.bf16.mxu1 %v6513_v30  ;;  %v2887_v52 = vrot.slane %v6520_v29, 2  ;;  %v3214_v17 = vor.u32 %v3213_v59, %v3210_v15  ;;  %v3235_v29 = vshrl.u32 %v7067_v1, 16  ;;  %v4547_v15 = vld [vmem:[%s8176_s0 + $0x9b] sm:$0xff]  ;;  %v4548_v59 = vld [vmem:[%s8176_s0 + $0xa3] sm:$0xff] }
  0xba   : > { %vm4583_vm8 = vcmp.gt.f32.partialorder %v4547_v15, 0.0  ;;  %vm4584_vm9 = vcmp.gt.f32.partialorder %v4548_v59, 0.0  ;;  %v4555_v15 = vld [vmem:[%s8176_s0 + $0xdb] sm:$0xff]  ;;  %v4556_v59 = vld [vmem:[%s8176_s0 + $0xe3] sm:$0xff] }
  0xbb   : > { %5779 = vmatpush3.bf16.msra.mxu1 %v6513_v30  ;;  %v3204_v30 = vrot.slane %v3202_v11, 3  ;;  %v6548_v11 = vld [vmem:[%s6695_s2 + $0x50] sm:$0xff]  }
  0xbc   : > { %5780 = vmatprep.subr.bf16.mxu1 %v6517_v36 }
  0xbd   : > { %v3205_v56 = vor.u32 %v3204_v30, %v3201_v20  ;;  %v3229_v20 = vshll.u32 %v7063_v37, 16  ;;  %v3238_v30 = vshll.u32 %v7067_v1, 16 }
  0xbe   : > { %5745 = vmatmul.mubr.bf16.gmra.mrb[4].mxu1 %v1125_v48  ;;  %v4610_v48 = vsel %vm4574_vm12, 1, %v6608_v18 }
  0xbf   : > { %5973 = vmatmul.mubr.bf16.gmra.mrb[24].mxu0 %v2880_v47  ;;  %5748 = vmatprep.mubr.bf16.mxu1 %v1127_v50  ;;  %v4539_v47 = vld [vmem:[%s8176_s0 + $0x5b] sm:$0xff]  ;;  %v4540_v50 = vld [vmem:[%s8176_s0 + $0x63] sm:$0xff]  ;;  %v3206_v16 = vsel %vm3189_vm15, %v3197_v45, %v3205_v56  ;;  %v3215_v1 = vsel %vm3189_vm15, %v3205_v56, %v3214_v17  ;;  %v3240_v45 = vrot.slane %v3238_v30, 3 }
  0xc0   : > { %5976 = vmatprep.mubr.bf16.mxu0 %v2882_v63  ;;  %5781 = vmatpush3.bf16.msra.mxu1 %v6517_v36  ;;  %v4609_v36 = vsel %vm4573_vm11, 1, %v6608_v18  ;;  %vm4575_vm13 = vcmp.gt.f32.partialorder %v4539_v47, 0.0  ;;  %vm4576_vm14 = vcmp.gt.f32.partialorder %v4540_v50, 0.0  ;;  %v3217_v63 = vshrl.u32 %v7047_v31, 16  ;;  %v6551_v47 = vld [vmem:[%s6695_s2 + $0x60] sm:$0xff]  }
  0xc1   : > { %5782 = vmatprep.subr.bf16.mxu1 %v6521_v14  ;;  %4660 = vperm.xlu1 %6403, %v4609_v36   ;;  %v4611_v0 = vsel %vm4575_vm13, 1, %v6608_v18  ;;  %v4612_v25 = vsel %vm4576_vm14, 1, %v6608_v18  ;;  %v2888_v31 = vsel %vm2388_vm2, %v2885_v57, %v2887_v52  ;;  %vm4578_vm2 = vcmp.gt.f32.partialorder %v4542_v3, 0.0  ;;  %v7332_v52 = vld [vmem:[%s6695_s2 + $0x68] sm:$0xff]  }
  0xc2   : > { %4663 = vperm.xlu0 %6402, %v4610_v48   ;;  %v3219_v5 = vrot.slane %v3217_v63, 2  ;;  %v1136_v57 = vrot.slane %v6548_v11, 1  ;;  %v4614_v55 = vsel %vm4578_vm2, 1, %v6608_v18  ;;  %v3237_v36 = vrot.slane %v3235_v29, 2  ;;  %v7327_v48 = vld [vmem:[%s8180_s4 + $0x100] sm:$0xff]  }
  0xc3   : > { %v1140_v50 = vrot.slane %v6551_v47, 1  ;;  %v1142_v56 = vrot.slane %v7332_v52, 1  ;;  %v4617_v63 = vsel %vm4581_vm6, 1, %v6608_v18  ;;  %v3694_v3 = vrot.slane %v7204_v33, 3  ;;  %v4554_v52 = vld [vmem:[%s8176_s0 + $0xd3] sm:$0xff] }
  0xc4   : > { %5783 = vmatpush3.bf16.msra.mxu1 %v6521_v14  ;;  %v6527_v14 = vld [vmem:[%s8180_s4 + $0xf0] sm:$0xff]   ;;  %v3223_v54 = vor.u32 %v3222_v41, %v3219_v5  ;;  %v1137_v38 = vsel %vm1116_vm3, %v1134_v44, %v1136_v57  ;;  %vm4590_vm2 = vcmp.gt.f32.partialorder %v4554_v52, 0.0 }
  0xc5   : > { %5784 = vmatprep.subr.bf16.mxu1 %v6523_v60  ;;  %4666 = vperm.xlu1 %6403, %v4611_v0   ;;  %v4546_v44 = vld [vmem:[%s8176_s0 + $0x93] sm:$0xff]  ;;  %v3247_v0 = vshll.u32 %v7083_v28, 16 }
  0xc6   : > { %5749 = vmatmul.mubr.bf16.gmra.mrb[8].mxu1 %v1129_v12  ;;  %4669 = vperm.xlu0 %6402, %v4612_v25   ;;  %v3224_v46 = vsel %vm3189_vm15, %v3214_v17, %v3223_v54  ;;  %vm4582_vm7 = vcmp.gt.f32.partialorder %v4546_v44, 0.0  ;;  %v7346_v25 = vor.u32 %v3240_v45, %v3237_v36  ;;  %v4550_v17 = vld [vmem:[%s8176_s0 + $0xb3] sm:$0xff]  ;;  %v3274_v45 = vshll.u32 %v7105_v58, 16 }
  0xc7   : > { %5977 = vmatmul.mubr.bf16.gmra.mrb[28].mxu0 %v2884_v22  ;;  %5752 = vmatprep.mubr.bf16.mxu1 %v1131_v27  ;;  %v4543_v22 = vld [vmem:[%s8176_s0 + $0x7b] sm:$0xff]  ;;  %v4544_v27 = vld [vmem:[%s8176_s0 + $0x83] sm:$0xff]  ;;  %v3249_v41 = vrot.slane %v3247_v0, 3  ;;  %vm4586_vm12 = vcmp.gt.f32.partialorder %v4550_v17, 0.0 }
  0xc8   : > { %5980 = vmatprep.mubr.bf16.mxu0 %v2886_v39  ;;  %5785 = vmatpush3.bf16.msra.mxu1 %v6523_v60  ;;  %v7290_v60 = vld [vmem:[%s6695_s2 + $0x58] sm:$0xff]   ;;  %vm4579_vm4 = vcmp.gt.f32.partialorder %v4543_v22, 0.0  ;;  %vm4580_vm5 = vcmp.gt.f32.partialorder %v4544_v27, 0.0  ;;  %v3228_v39 = vrot.slane %v3226_v53, 2  ;;  %v6532_v0 = vld [vmem:[%s8180_s4 + $0x228] sm:$0xff]  }
  0xc9   : > { %5786 = vmatprep.subr.bf16.mxu1 %v6525_v62  ;;  %v1138_v12 = vrot.slane %v7290_v60, 1  ;;  %4672 = vperm.xlu1 %6403, %v4613_v13   ;;  %v4615_v37 = vsel %vm4579_vm4, 1, %v6608_v18  ;;  %v4616_v42 = vsel %vm4580_vm5, 1, %v6608_v18  ;;  %v4549_v13 = vld [vmem:[%s8176_s0 + $0xab] sm:$0xff]  ;;  %vm4591_vm4 = vcmp.gt.f32.partialorder %v4555_v15, 0.0 }
  0xca   : > { %4675 = vperm.xlu0 %6402, %v4614_v55   ;;  %vm4585_vm11 = vcmp.gt.f32.partialorder %v4549_v13, 0.0  ;;  %v6553_v55 = vld [vmem:[%s6695_s2 + $0x70] sm:$0xff]   ;;  %vm4592_vm5 = vcmp.gt.f32.partialorder %v4556_v59, 0.0  ;;  %v4564_v59 = vld [vmem:[%s8176_s0 + $0x123] sm:$0xff] }
  0xcb   : > { %v1139_v43 = vsel %vm1116_vm3, %v1136_v57, %v1138_v12  ;;  %v1144_v22 = vrot.slane %v6553_v55, 1  ;;  %v4621_v29 = vsel %vm4585_vm11, 1, %v6608_v18  ;;  %v4628_v17 = vsel %vm4592_vm5, 1, %v6608_v18 }
  0xcc   : > { %5787 = vmatpush3.bf16.msra.mxu1 %v6525_v62  ;;  %v3231_v62 = vrot.slane %v3229_v20, 3  ;;  %v6530_v20 = vld [vmem:[%s8180_s4 + $0x218] sm:$0xff]   ;;  %vm4085_vm5 = vsmask.f32 1280 }
  0xcd   : > { %5788 = vmatprep.subr.bf16.mxu1 %v6527_v14  ;;  %4678 = vperm.xlu1 %6403, %v4615_v37  }
  0xce   : > { %5753 = vmatmul.mubr.bf16.gmra.mrb[12].mxu1 %v1133_v23  ;;  %4681 = vperm.xlu0 %6402, %v4616_v42   ;;  %v3232_v26 = vor.u32 %v3231_v62, %v3228_v39  ;;  %v4618_v23 = vsel %vm4582_vm7, 1, %v6608_v18  ;;  %v4622_v39 = vsel %vm4586_vm12, 1, %v6608_v18  ;;  %v4551_v62 = vld [vmem:[%s8176_s0 + $0xbb] sm:$0xff]  ;;  %v4552_v42 = vld [vmem:[%s8176_s0 + $0xc3] sm:$0xff] }
  0xcf   : > { %5981 = vmatmul.mubr.bf16.gmra.mrb[32].mxu0 %v2888_v31  ;;  %5756 = vmatprep.mubr.bf16.mxu1 %v1135_v4  ;;  %v3253_v31 = vshrl.u32 %v7086_v35, 16  ;;  %v6528_v4 = vld [vmem:[%s8180_s4 + $0x210] sm:$0xff]   ;;  %vm4587_vm13 = vcmp.gt.f32.partialorder %v4551_v62, 0.0  ;;  %vm4588_vm14 = vcmp.gt.f32.partialorder %v4552_v42, 0.0 }
  0xd0   : > { %6000 = vmatprep.mubr.bf16.mxu0 %v3206_v16  ;;  %5789 = vmatpush3.bf16.msra.mxu1 %v6527_v14  ;;  %v3244_v14 = vshrl.u32 %v7083_v28, 16  ;;  %v3256_v28 = vshll.u32 %v7086_v35, 16  ;;  %v1141_v16 = vsel %vm1116_vm3, %v1138_v12, %v1140_v50  ;;  %v1143_v35 = vsel %vm1116_vm3, %v1140_v50, %v1142_v56 }
  0xd1   : > { %5790 = vmatprep.subr.bf16.mxu1 %v6529_v10  ;;  %4684 = vperm.xlu1 %6403, %v4617_v63   ;;  %v3233_v11 = vsel %vm3189_vm15, %v3223_v54, %v3232_v26  ;;  %v3242_v57 = vsel %vm3189_vm15, %v3232_v26, %v7346_v25  ;;  %v3255_v60 = vrot.slane %v3253_v31, 2  ;;  %v3696_v12 = vrot.slane %v7357_v2, 3  ;;  %v7386_v54 = vld [vmem:[%s6695_s2 + $0x78] sm:$0xff]   ;;  %v4553_v26 = vld [vmem:[%s8176_s0 + $0xcb] sm:$0xff] }
  0xd2   : > { %4687 = vperm.xlu0 %6402, %v4618_v23   ;;  %v3246_v5 = vrot.slane %v3244_v14, 2  ;;  %v3258_v53 = vrot.slane %v3256_v28, 3  ;;  %v1146_v37 = vrot.slane %v7386_v54, 1  ;;  %v4623_v44 = vsel %vm4587_vm13, 1, %v6608_v18  ;;  %v7432_v28 = vld [vmem:[%s6695_s2 + $0x88] sm:$0xff]  }
  0xd3   : > { %v7382_v27 = vsel %vm3660_vm10, %v3694_v3, %v3696_v12  ;;  %v3276_v14 = vrot.slane %v3274_v45, 3  ;;  %vm4589_vm0 = vcmp.gt.f32.partialorder %v4553_v26, 0.0  ;;  %v4627_v12 = vsel %vm4591_vm4, 1, %v6608_v18 }
  0xd4   : > { %5791 = vmatpush3.bf16.msra.mxu1 %v6529_v10  ;;  %v4620_v10 = vsel %vm4584_vm9, 1, %v6608_v18  ;;  %v3250_v30 = vor.u32 %v3249_v41, %v3246_v5  ;;  %v3259_v36 = vor.u32 %v3258_v53, %v3255_v60  ;;  %v4625_v23 = vsel %vm4589_vm0, 1, %v6608_v18  ;;  %v4557_v41 = vld [vmem:[%s8176_s0 + $0xeb] sm:$0xff] }
  0xd5   : > { %6088 = vmatprep.subr.bf16.mxu1 %v7327_v48  ;;  %v3283_v5 = vshll.u32 %v7120_v8, 16  ;;  %v6533_v60 = vld [vmem:[%s8180_s4 + $0x230] sm:$0xff]   ;;  %vm4593_vm6 = vcmp.gt.f32.partialorder %v4557_v41, 0.0  ;;  %v6560_v41 = vld [vmem:[%s6695_s2 + $0x20] sm:$0xff]   ;;  %vm4485_vm4 = vsmask.f32 7942 }
  0xd6   : > { %5757 = vmatmul.mubr.bf16.gmra.mrb[16].mxu1 %v1137_v38  ;;  %4693 = vperm.xlu0 %6402, %v4620_v10   ;;  %v3262_v38 = vshrl.u32 %v7101_v49, 16  ;;  %v4629_v42 = vsel %vm4593_vm6, 1, %v6608_v18 }
  0xd7   : > { %6001 = vmatmul.mubr.bf16.vlgmr.msra.gmra.mrb[0].mxu0 %v3215_v1  ;;  %5760 = vmatprep.mubr.bf16.mxu1 %v1139_v43  ;;  %v3265_v1 = vshll.u32 %v7101_v49, 16  ;;  %v3271_v43 = vshrl.u32 %v7105_v58, 16  ;;  %v1145_v49 = vsel %vm1116_vm3, %v1142_v56, %v1144_v22  ;;  %v3251_v58 = vsel %vm3189_vm15, %v7346_v25, %v3250_v30  ;;  %v6555_v25 = vld [vmem:[%s6695_s2 + $0x80] sm:$0xff]  }
  0xd8   : > { %6004 = vmatprep.mubr.bf16.mxu0 %v3224_v46  ;;  %6037 = vmatpush3.bf16.msra.mxu0 %v7138_v32  ;;  %v4619_v32 = vsel %vm4583_vm8, 1, %v6608_v18  ;;  %v1147_v46 = vsel %vm1116_vm3, %v1144_v22, %v1146_v37  ;;  %v3264_v47 = vrot.slane %v3262_v38, 2  ;;  %v3260_v56 = vsel %vm3189_vm15, %v3250_v30, %v3259_v36  ;;  %v4559_v22 = vld [vmem:[%s8176_s0 + $0xfb] sm:$0xff]  ;;  %v4560_v38 = vld [vmem:[%s8176_s0 + $0x103] sm:$0xff] }
  0xd9   : > { %6038 = vmatprep.subr.bf16.mxu0 %v6526_v19  ;;  %4690 = vperm.xlu1 %6403, %v4619_v32   ;;  %v3267_v50 = vrot.slane %v3265_v1, 3  ;;  %v3273_v63 = vrot.slane %v3271_v43, 2  ;;  %v1148_v31 = vrot.slane %v6555_v25, 1  ;;  %v3285_v55 = vrot.slane %v3283_v5, 3  ;;  %v6558_v43 = vld [vmem:[%s6695_s2 + $0x10] sm:$0xff]  }
  0xda   : > { %4699 = vperm.xlu0 %6402, %v4622_v39   ;;  %v6557_v39 = vld [vmem:[%s6695_s2 + $0x90] ss:$0 sps:$4 sm:$0x11]   ;;  %v1580_v1 = vrot.slane %v6727_v24, 1  ;;  %vm4595_vm8 = vcmp.gt.f32.partialorder %v4559_v22, 0.0  ;;  %vm4596_vm9 = vcmp.gt.f32.partialorder %v4560_v38, 0.0 }
  0xdb   : > { %v3268_v32 = vor.u32 %v3267_v50, %v3264_v47  ;;  %v3277_v10 = vor.u32 %v3276_v14, %v3273_v63  ;;  %v1149_v13 = vsel %vm1116_vm3, %v1146_v37, %v1148_v31  ;;  %v6535_v37 = vld [vmem:[%s8180_s4 + $0x238] sm:$0xff]   ;;  %v1152_v62 = vrot.slane %v6557_v39, 1  ;;  %v4565_v5 = vld [vmem:[%s8176_s0 + $0x12b] sm:$0xff] }
  0xdc   : > { %6039 = vmatpush3.bf16.msra.mxu0 %v6526_v19  ;;  %v4624_v19 = vsel %vm4588_vm14, 1, %v6608_v18  ;;  %v3307_v24 = vshrl.u32 %v7147_v9, 16  ;;  %v4562_v47 = vld [vmem:[%s8176_s0 + $0x113] sm:$0xff]  ;;  %v4632_v26 = vsel %vm4596_vm9, 1, %v6608_v18  ;;  %v4563_v14 = vld [vmem:[%s8176_s0 + $0x11b] sm:$0xff]  ;;  %vm4600_vm14 = vcmp.gt.f32.partialorder %v4564_v59, 0.0 }
  0xdd   : > { %6040 = vmatprep.subr.bf16.mxu0 %v6528_v4  ;;  %4696 = vperm.xlu1 %6403, %v4621_v29   ;;  %v3269_v53 = vsel %vm3189_vm15, %v3259_v36, %v3268_v32  ;;  %v3278_v29 = vsel %vm3189_vm15, %v3268_v32, %v3277_v10  ;;  %v1581_v36 = vrot.slane %v6558_v43, 1  ;;  %vm4598_vm12 = vcmp.gt.f32.partialorder %v4562_v47, 0.0 }
  0xde   : > { %5761 = vmatmul.mubr.bf16.gmra.mrb[20].mxu1 %v1141_v16  ;;  %4705 = vperm.xlu0 %6402, %v4624_v19   ;;  %v4626_v16 = vsel %vm4590_vm2, 1, %v6608_v18  ;;  %vm4599_vm13 = vcmp.gt.f32.partialorder %v4563_v14, 0.0  ;;  %v3316_v32 = vshrl.u32 %v7160_v21, 16  ;;  %vm4601_vm0 = vcmp.gt.f32.partialorder %v4565_v5, 0.0 }
  0xdf   : > { %6005 = vmatmul.mubr.bf16.gmra.mrb[4].mxu0 %v3233_v11  ;;  %5764 = vmatprep.mubr.bf16.mxu1 %v1143_v35  ;;  %v3280_v35 = vshrl.u32 %v7120_v8, 16  ;;  %v3289_v11 = vshrl.u32 %v7125_v61, 16  ;;  %v4558_v8 = vld [vmem:[%s8176_s0 + $0xf3] sm:$0xff]  ;;  %v1582_v63 = vsel %vm1116_vm3, %v1580_v1, %v1581_v36  ;;  %v4637_v22 = vsel %vm4601_vm0, 1, %v6608_v18 }
  0xe0   : > { %6008 = vmatprep.mubr.bf16.mxu0 %v3242_v57  ;;  %6041 = vmatpush3.bf16.msra.mxu0 %v6528_v4  ;;  %v1150_v4 = vrot.slane %v7432_v28, 1  ;;  %v3292_v57 = vshll.u32 %v7125_v61, 16  ;;  %vm4594_vm7 = vcmp.gt.f32.partialorder %v4558_v8, 0.0  ;;  %v4635_v8 = vsel %vm4599_vm13, 1, %v6608_v18 }
  0xe1   : > { %6042 = vmatprep.subr.bf16.mxu0 %v6530_v20  ;;  %4702 = vperm.xlu1 %6403, %v4623_v44   ;;  %v3291_v30 = vrot.slane %v3289_v11, 2  ;;  %v4630_v45 = vsel %vm4594_vm7, 1, %v6608_v18  ;;  %v3298_v44 = vshrl.u32 %v7143_v6, 16  ;;  %v3334_v39 = vshrl.u32 %v7194_v51, 16 }
  0xe2   : > { %4711 = vperm.xlu0 %6402, %v4626_v16   ;;  %v1151_v61 = vsel %vm1116_vm3, %v1148_v31, %v1150_v4  ;;  %v3294_v54 = vrot.slane %v3292_v57, 3  ;;  %v1153_v50 = vsel %vm1116_vm3, %v1150_v4, %v1152_v62  ;;  %v6559_v31 = vld [vmem:[%s6695_s2 + $0x18] sm:$0xff]   ;;  %v4634_v4 = vsel %vm4598_vm12, 1, %v6608_v18 }
  0xe3   : > { %v3300_v52 = vrot.slane %v3298_v44, 2  ;;  %v1583_v28 = vrot.slane %v6559_v31, 1  ;;  %v3325_v57 = vshrl.u32 %v7171_v7, 16  ;;  %v3337_v62 = vshll.u32 %v7194_v51, 16  ;;  %v6564_v44 = vld [vmem:[%s8180_s4 + $0x110] sm:$0xff]  }
  0xe4   : > { %6043 = vmatpush3.bf16.msra.mxu0 %v6530_v20  ;;  %v3282_v20 = vrot.slane %v3280_v35, 2  ;;  %v3295_v19 = vor.u32 %v3294_v54, %v3291_v30  ;;  %v3319_v35 = vshll.u32 %v7160_v21, 16  ;;  %v4636_v21 = vsel %vm4600_vm14, 1, %v6608_v18 }
  0xe5   : > { %6044 = vmatprep.subr.bf16.mxu0 %v6531_v40  ;;  %4708 = vperm.xlu1 %6403, %v4625_v23   ;;  %v3309_v23 = vrot.slane %v3307_v24, 2  ;;  %v3343_v1 = vshrl.u32 %v7204_v33, 16  ;;  %v3336_v51 = vrot.slane %v3334_v39, 2  ;;  %v6565_v24 = vld [vmem:[%s6695_s2 + $0x38] sm:$0xff]   ;;  %vm4484_vm2 = vcmask 1043457  }
  0xe6   : > { %5765 = vmatmul.mubr.bf16.gmra.mrb[24].mxu1 %v1145_v49  ;;  %4717 = vperm.xlu0 %6402, %v4628_v17   ;;  %v3301_v49 = vshll.u32 %v7143_v6, 16  ;;  %v4631_v6 = vsel %vm4595_vm8, 1, %v6608_v18  ;;  %v3321_v17 = vrot.slane %v3319_v35, 3  ;;  %v7553_v35 = vld [vmem:[%s6695_s2 + $0x50] sm:$0xff]   ;;  %vm4086_vm7 = vsmask.f32 5392 }
  0xe7   : > { %6009 = vmatmul.mubr.bf16.gmra.mrb[8].mxu0 %v3251_v58  ;;  %5768 = vmatprep.mubr.bf16.mxu1 %v1147_v46  ;;  %v4561_v46 = vld [vmem:[%s8176_s0 + $0x10b] sm:$0xff]  ;;  %v3310_v58 = vshll.u32 %v7147_v9, 16  ;;  %v1597_v5 = vrot.slane %v7553_v35, 1  ;;  %vm7734_vm12 = vmor %vm4085_vm5, %vm4086_vm7 }
  0xe8   : > { %6012 = vmatprep.mubr.bf16.mxu0 %v3260_v56  ;;  %6045 = vmatpush3.bf16.msra.mxu0 %v6531_v40  ;;  %v3286_v40 = vor.u32 %v3285_v55, %v3282_v20  ;;  %vm4597_vm11 = vcmp.gt.f32.partialorder %v4561_v46, 0.0  ;;  %v3303_v56 = vrot.slane %v3301_v49, 3  ;;  %v3345_v46 = vrot.slane %v3343_v1, 2 }
  0xe9   : > { %6046 = vmatprep.subr.bf16.mxu0 %v6532_v0  ;;  %4714 = vperm.xlu1 %6403, %v4627_v12   ;;  %v3312_v15 = vrot.slane %v3310_v58, 3  ;;  %v4633_v25 = vsel %vm4597_vm11, 1, %v6608_v18  ;;  %v1584_v12 = vsel %vm1116_vm3, %v1581_v36, %v1583_v28  ;;  %v1591_v58 = vrot.slane %v6565_v24, 1  ;;  %v6585_v24 = vld [vmem:[%s6695_s2 + $0x40] sm:$0xff]   ;;  %vm7727_vm11 = vmand %vm4484_vm2, %vm4485_vm4 }
  0xea   : > { %4723 = vperm.xlu0 %6402, %v4630_v45   ;;  %v3287_v9 = vsel %vm3189_vm15, %v3277_v10, %v3286_v40  ;;  %v3304_v16 = vor.u32 %v3303_v56, %v3300_v52  ;;  %v1585_v10 = vrot.slane %v6560_v41, 1  ;;  %v6567_v52 = vld [vmem:[%s8180_s4 + $0x118] sm:$0xff]   ;;  %v3639_v56 = vld [vmem:[%s6695_s2 + $0x10] sm:$0x8] }
  0xeb   : > { %v3313_v11 = vor.u32 %v3312_v15, %v3309_v23 }
  0xec   : > { %6047 = vmatpush3.bf16.msra.mxu0 %v6532_v0  ;;  %v3296_v0 = vsel %vm3189_vm15, %v3286_v40, %v3295_v19  ;;  %v3339_v40 = vrot.slane %v3337_v62, 3  ;;  %v7585_v62 = vld [vmem:[%s6695_s2 + $0x68] sm:$0xff]  }
  0xed   : > { %6048 = vmatprep.subr.bf16.mxu0 %v6533_v60  ;;  %4720 = vperm.xlu1 %6403, %v4629_v42   ;;  %v3314_v20 = vsel %vm3189_vm15, %v3304_v16, %v3313_v11  ;;  %v6563_v42 = vld [vmem:[%s8180_s4 + $0x108] sm:$0xff]  }
  0xee   : > { %5769 = vmatmul.mubr.bf16.gmra.mrb[28].mxu1 %v1149_v13  ;;  %4729 = vperm.xlu0 %6402, %v4632_v26   ;;  %v3305_v13 = vsel %vm3189_vm15, %v3295_v19, %v3304_v16  ;;  %v3340_v47 = vor.u32 %v3339_v40, %v3336_v51  ;;  %v3355_v26 = vshll.u32 %v7357_v2, 16 }
  0xef   : > { %6013 = vmatmul.mubr.bf16.gmra.mrb[12].mxu0 %v3269_v53  ;;  %5772 = vmatprep.mubr.bf16.mxu1 %v1151_v61  ;;  %v3318_v61 = vrot.slane %v3316_v32, 2  ;;  %v1586_v53 = vsel %vm1116_vm3, %v1583_v28, %v1585_v10  ;;  %v6569_v28 = vld [vmem:[%s8180_s4 + $0x120] sm:$0xff]  }
  0xf0   : > { %6016 = vmatprep.mubr.bf16.mxu0 %v3278_v29  ;;  %6049 = vmatpush3.bf16.msra.mxu0 %v6533_v60  ;;  %v3328_v60 = vshll.u32 %v7171_v7, 16  ;;  %v3327_v7 = vrot.slane %v3325_v57, 2  ;;  %v6561_v29 = vld [vmem:[%s6695_s2 + $0x28] sm:$0xff]   ;;  %v3357_v59 = vrot.slane %v3355_v26, 3 }
  0xf1   : > { %6050 = vmatprep.subr.bf16.mxu0 %v6535_v37  ;;  %4726 = vperm.xlu1 %6403, %v4631_v6   ;;  %v1587_v30 = vrot.slane %v6561_v29, 1  ;;  %v3322_v54 = vor.u32 %v3321_v17, %v3318_v61  ;;  %v6566_v6 = vld [vmem:[%s6695_s2 + $0x40] sm:$0xff]   ;;  %v6573_v57 = vld [vmem:[%s8180_s4 + $0x128] sm:$0xff]   ;;  %v7568_v61 = vld [vmem:[%s6695_s2 + $0x58] sm:$0xff]  }
  0xf2   : > { %4735 = vperm.xlu0 %6402, %v4634_v4   ;;  %v3330_v55 = vrot.slane %v3328_v60, 3  ;;  %v6570_v4 = vld [vmem:[%s6695_s2 + $0x48] sm:$0xff]   ;;  %v1599_v17 = vrot.slane %v7568_v61, 1 }
  0xf3   : > { %v1588_v43 = vsel %vm1116_vm3, %v1585_v10, %v1587_v30  ;;  %v3323_v36 = vsel %vm3189_vm15, %v3313_v11, %v3322_v54  ;;  %v1595_v16 = vrot.slane %v6570_v4, 1  ;;  %v6572_v10 = vld [vmem:[%s6695_s2 + $0x18] sm:$0xff]  }
  0xf4   : > { %6051 = vmatpush3.bf16.msra.mxu0 %v6535_v37  ;;  %v6562_v37 = vld [vmem:[%s6695_s2 + $0x30] sm:$0xff]   ;;  %v3331_v18 = vor.u32 %v3330_v55, %v3327_v7  ;;  %v3662_v11 = vrot.slane %v6572_v10, 3  ;;  %v7573_v7 = vld [vmem:[%s6695_s2 + $0x60] sm:$0xff]  }
  0xf5   : > { %4732 = vperm.xlu1 %6403, %v4633_v25   ;;  %v1589_v38 = vrot.slane %v6562_v37, 1  ;;  %v6568_v25 = vld [vmem:[%s6695_s2 + $0x14] sm:$0xf]  ;;  %v1601_v55 = vrot.slane %v7573_v7, 1 }
  0xf6   : > { %5773 = vmatmul.mubr.bf16.gmra.mrb[32].mxu1 %v1153_v50  ;;  %4741 = vperm.xlu0 %6402, %v4636_v21   ;;  %v3332_v49 = vsel %vm3189_vm15, %v3322_v54, %v3331_v18  ;;  %v1593_v50 = vrot.slane %v6566_v6, 1  ;;  %v5303_v31 = vcombine.low %v3639_v56, %v6568_v25  ;;  %v1600_v54 = vsel %vm1116_vm3, %v1597_v5, %v1599_v17 }
  0xf7   : > { %6017 = vmatmul.mubr.bf16.gmra.mrb[16].mxu0 %v3287_v9  ;;  %5792 = vmatprep.mubr.bf16.mxu1 %v1582_v63  ;;  %v1590_v45 = vsel %vm1116_vm3, %v1587_v30, %v1589_v38  ;;  %v3352_v63 = vshrl.u32 %v7357_v2, 16  ;;  %v1592_v14 = vsel %vm1116_vm3, %v1589_v38, %v1591_v58  ;;  %v6579_v30 = vld [vmem:[%s8180_s4 + $0x138] sm:$0xff]   ;;  %v1602_v38 = vsel %vm1116_vm3, %v1599_v17, %v1601_v55 }
  0xf8   : > { %6020 = vmatprep.mubr.bf16.mxu0 %v3296_v0  ;;  %v3341_v0 = vsel %vm3189_vm15, %v3331_v18, %v3340_v47  ;;  %v1594_v23 = vsel %vm1116_vm3, %v1591_v58, %v1593_v50  ;;  %v3661_v41 = vrot.slane %v5303_v31, 3  ;;  %v1596_v60 = vsel %vm1116_vm3, %v1593_v50, %v1595_v16  ;;  %v6581_v18 = vld [vmem:[%s6695_s2 + $0x30] sm:$0xff]   ;;  %v6587_v50 = vld [vmem:[%s6695_s2 + $0x48] sm:$0xff]  }
  0xf9   : > { %4738 = vperm.xlu1 %6403, %v4635_v8   ;;  %v3354_v15 = vrot.slane %v3352_v63, 2  ;;  %v3668_v1 = vrot.slane %v6581_v18, 3  ;;  %v3672_v58 = vrot.slane %v6585_v24, 3  ;;  %v3674_v63 = vrot.slane %v6587_v50, 3 }
  0xfa   : > { %v3663_v21 = vsel %vm3660_vm10, %v3661_v41, %v3662_v11  ;;  %v1999_v25 = vshrl.u32 %v7553_v35, 16  ;;  %v2002_v31 = vshll.u32 %v7553_v35, 16  ;;  %v2008_v35 = vshrl.u32 %v7568_v61, 16 }
  0xfb   : > { %v3358_v32 = vor.u32 %v3357_v59, %v3354_v15  ;;  %v3675_v56 = vsel %vm3660_vm10, %v3672_v58, %v3674_v63  ;;  %v7618_v59 = vld [vmem:[%s6695_s2 + $0x90] sm:$0xff]   ;;  %v2017_v17 = vshrl.u32 %v7573_v7, 16  ;;  %v2029_v18 = vshll.u32 %v7585_v62, 16 }
  0xfc   : > { %v2001_v10 = vrot.slane %v1999_v25, 1 }
  0xfd   : > { %4744 = vperm.xlu1 %6403, %v4637_v22   ;;  %v6578_v22 = vld [vmem:[%s6695_s2 + $0x28] sm:$0xff]  }
  0xfe   : > { %5793 = vmatmul.mubr.bf16.vlgmr.msra.gmra.mrb[0].mxu1 %v1584_v12  ;;  %v1598_v12 = vsel %vm1116_vm3, %v1595_v16, %v1597_v5  ;;  %v3666_v29 = vrot.slane %v6578_v22, 3 }
  0xff   : > { %6021 = vmatmul.mubr.bf16.gmra.mrb[20].mxu0 %v3305_v13  ;;  %6096 = vmatpush3.bf16.msra.mxu1 %v7327_v48  ;;  %v3346_v48 = vshll.u32 %v7204_v33, 16  ;;  %v6574_v13 = vld [vmem:[%s8180_s4 + $0x130] sm:$0xff]  }
 0x100   : > { %5796 = vmatprep.mubr.bf16.mxu1 %v1586_v53  ;;  %6024 = vmatprep.mubr.bf16.mxu0 %v3314_v20  ;;  %v6576_v53 = vld [vmem:[%s6695_s2 + $0x20] sm:$0xff]   ;;  %v3669_v40 = vsel %vm3660_vm10, %v3666_v29, %v3668_v1 }
 0x101   : > { %6089 = vmatprep.subr.bf16.mxu1 %v6563_v42  ;;  %v3348_v19 = vrot.slane %v3346_v48, 3  ;;  %v3664_v20 = vrot.slane %v6576_v53, 3  ;;  %v7590_v48 = vld [vmem:[%s6695_s2 + $0x70] sm:$0xff]   ;;  %v2020_v53 = vshll.u32 %v7573_v7, 16 }
 0x103   : > { %6097 = vmatpush3.bf16.msra.mxu1 %v6563_v42  ;;  %v3349_v9 = vor.u32 %v3348_v19, %v3345_v46  ;;  %v3665_v37 = vsel %vm3660_vm10, %v3662_v11, %v3664_v20  ;;  %v3667_v39 = vsel %vm3660_vm10, %v3664_v20, %v3666_v29  ;;  %v1603_v42 = vrot.slane %v7585_v62, 1  ;;  %v7599_v46 = vld [vmem:[%s6695_s2 + $0x78] sm:$0xff]   ;;  %v6593_v20 = vld [vmem:[%s6695_s2 + $0x68] sm:$0xff]  }
 0x104   : > { %6090 = vmatprep.subr.bf16.mxu1 %v6564_v44  ;;  %v1607_v19 = vrot.slane %v7599_v46, 1  ;;  %v2004_v11 = vrot.slane %v2002_v31, 2  ;;  %v2010_v29 = vrot.slane %v2008_v35, 1  ;;  %v2071_v35 = vshrl.u32 %v7618_v59, 16 }
 0x105   : > { %v3350_v2 = vsel %vm3189_vm15, %v3340_v47, %v3349_v9  ;;  %v3359_v8 = vsel %vm3189_vm15, %v3349_v9, %v3358_v32  ;;  %v1604_v51 = vsel %vm1116_vm3, %v1601_v55, %v1603_v42  ;;  %v7604_v47 = vld [vmem:[%s6695_s2 + $0x80] sm:$0xff]   ;;  %v6537_v32 = vld [vmem:[%s6695_s2 + $0x98] ss:$0 sps:$4 sm:$0x11]   ;;  %v3682_v55 = vrot.slane %v6593_v20, 3 }
 0x106   : > { %5797 = vmatmul.mubr.bf16.gmra.mrb[4].mxu1 %v1588_v43  ;;  %v1605_v43 = vrot.slane %v7590_v48, 1  ;;  %v1609_v6 = vrot.slane %v7604_v47, 1  ;;  %v2073_v20 = vrot.slane %v2071_v35, 1 }
 0x107   : > { %6025 = vmatmul.mubr.bf16.gmra.mrb[24].mxu0 %v3323_v36  ;;  %5800 = vmatprep.mubr.bf16.mxu1 %v1590_v45  ;;  %v6583_v36 = vld [vmem:[%s6695_s2 + $0x38] sm:$0xff]  }
 0x108   : > { %6028 = vmatprep.mubr.bf16.mxu0 %v3332_v49  ;;  %6098 = vmatpush3.bf16.msra.mxu1 %v6564_v44  ;;  %v3670_v45 = vrot.slane %v6583_v36, 3  ;;  %v1606_v44 = vsel %vm1116_vm3, %v1603_v42, %v1605_v43  ;;  %v1608_v26 = vsel %vm1116_vm3, %v1605_v43, %v1607_v19  ;;  %v2026_v42 = vshrl.u32 %v7585_v62, 16 }
 0x109   : > { %6091 = vmatprep.subr.bf16.mxu1 %v6567_v52 }
 0x10a   : > { %v3671_v49 = vsel %vm3660_vm10, %v3668_v1, %v3670_v45  ;;  %v3673_v9 = vsel %vm3660_vm10, %v3670_v45, %v3672_v58  ;;  %v6594_v1 = vld [vmem:[%s6695_s2 + $0x70] sm:$0xff]   ;;  %v2035_v45 = vshrl.u32 %v7590_v48, 16 }
 0x10b   : > { %v3684_v43 = vrot.slane %v6594_v1, 3 }
 0x10c   : > { %6099 = vmatpush3.bf16.msra.mxu1 %v6567_v52  ;;  %v1610_v52 = vsel %vm1116_vm3, %v1607_v19, %v1609_v6  ;;  %v2031_v19 = vrot.slane %v2029_v18, 2  ;;  %v2037_v62 = vrot.slane %v2035_v45, 1 }
 0x10d   : > { %6092 = vmatprep.subr.bf16.mxu1 %v6569_v28  ;;  %v3685_v24 = vsel %vm3660_vm10, %v3682_v55, %v3684_v43 }
 0x10e   : > { %5801 = vmatmul.mubr.bf16.gmra.mrb[8].mxu1 %v1592_v14  ;;  %v7613_v14 = vld [vmem:[%s6695_s2 + $0x88] sm:$0xff]  }
 0x10f   : > { %6029 = vmatmul.mubr.bf16.gmra.mrb[28].mxu0 %v3341_v0  ;;  %5804 = vmatprep.mubr.bf16.mxu1 %v1594_v23  ;;  %v1611_v0 = vrot.slane %v7613_v14, 1  ;;  %v6589_v23 = vld [vmem:[%s6695_s2 + $0x50] sm:$0xff]  }
 0x110   : > { %6032 = vmatprep.mubr.bf16.mxu0 %v3350_v2  ;;  %6100 = vmatpush3.bf16.msra.mxu1 %v6569_v28  ;;  %v3676_v15 = vrot.slane %v6589_v23, 3  ;;  %v1613_v2 = vrot.slane %v7618_v59, 1  ;;  %v6591_v28 = vld [vmem:[%s6695_s2 + $0x58] sm:$0xff]   ;;  %v2056_v23 = vshll.u32 %v7604_v47, 16 }
 0x111   : > { %6093 = vmatprep.subr.bf16.mxu1 %v6573_v57  ;;  %v3678_v4 = vrot.slane %v6591_v28, 3  ;;  %v1612_v16 = vsel %vm1116_vm3, %v1609_v6, %v1611_v0 }
 0x112   : > { %v3677_v5 = vsel %vm3660_vm10, %v3674_v63, %v3676_v15  ;;  %v1614_v41 = vsel %vm1116_vm3, %v1611_v0, %v1613_v2  ;;  %v2044_v63 = vshrl.u32 %v7599_v46, 16  ;;  %v2053_v0 = vshrl.u32 %v7604_v47, 16 }
 0x113   : > { %v2062_v47 = vshrl.u32 %v7613_v14, 16 }
 0x114   : > { %6101 = vmatpush3.bf16.msra.mxu1 %v6573_v57  ;;  %v3679_v57 = vsel %vm3660_vm10, %v3676_v15, %v3678_v4  ;;  %v6597_v15 = vld [vmem:[%s6695_s2 + $0x88] sm:$0xff]   ;;  %v2046_v31 = vrot.slane %v2044_v63, 1 }
 0x115   : > { %6094 = vmatprep.subr.bf16.mxu1 %v6574_v13 }
 0x116   : > { %5805 = vmatmul.mubr.bf16.gmra.mrb[12].mxu1 %v1596_v60  ;;  %v1615_v60 = vrot.slane %v6537_v32, 1  ;;  %v2058_v32 = vrot.slane %v2056_v23, 2 }
 0x117   : > { %6033 = vmatmul.mubr.bf16.gmra.mrb[32].mxu0 %v3359_v8  ;;  %5808 = vmatprep.mubr.bf16.mxu1 %v1598_v12  ;;  %v2011_v8 = vshll.u32 %v7568_v61, 16  ;;  %v6592_v12 = vld [vmem:[%s6695_s2 + $0x60] sm:$0xff]  }
 0x118   : > { %6052 = vmatprep.mubr.bf16.mxu0 %v3663_v21  ;;  %6102 = vmatpush3.bf16.msra.mxu1 %v6574_v13  ;;  %v3680_v21 = vrot.slane %v6592_v12, 3  ;;  %v2005_v13 = vor.u32 %v2004_v11, %v2001_v10  ;;  %v1616_v22 = vsel %vm1116_vm3, %v1613_v2, %v1615_v60  ;;  %v3690_v2 = vrot.slane %v6597_v15, 3  ;;  %v6598_v11 = vld [vmem:[%s6695_s2 + $0x90] sm:$0xff]  }
 0x119   : > { %6095 = vmatprep.subr.bf16.mxu1 %v6579_v30  ;;  %v2065_v10 = vshll.u32 %v7613_v14, 16 }
 0x11a   : > { %v2006_v61 = vsel %vm1917_vm1, %v6856_v34, %v2005_v13  ;;  %v2038_v34 = vshll.u32 %v7590_v48, 16 }
 0x11c   : > { %6103 = vmatpush3.bf16.msra.mxu1 %v6579_v30  ;;  %v2013_v30 = vrot.slane %v2011_v8, 2  ;;  %v2040_v6 = vrot.slane %v2038_v34, 2  ;;  %v2074_v8 = vshll.u32 %v7618_v59, 16 }
 0x11e   : > { %5809 = vmatmul.mubr.bf16.gmra.mrb[16].mxu1 %v1600_v54  ;;  %v3681_v54 = vsel %vm3660_vm10, %v3678_v4, %v3680_v21  ;;  %v2014_v7 = vor.u32 %v2013_v30, %v2010_v29  ;;  %v6599_v29 = vld [vmem:[%s6695_s2 + $0x98] ss:$0 sps:$4 sm:$0x33]  }
 0x11f   : > { %6053 = vmatmul.mubr.bf16.vlgmr.msra.gmra.mrb[0].mxu0 %v3665_v37  ;;  %5812 = vmatprep.mubr.bf16.mxu1 %v1602_v38  ;;  %v2019_v37 = vrot.slane %v2017_v17, 1  ;;  %v2022_v38 = vrot.slane %v2020_v53, 2  ;;  %v2080_v59 = vshrl.u32 %v6599_v29, 16  ;;  %v2083_v30 = vshll.u32 %v6599_v29, 16 }
 0x120   : > { %6056 = vmatprep.mubr.bf16.mxu0 %v3667_v39  ;;  %v3683_v39 = vsel %vm3660_vm10, %v3680_v21, %v3682_v55  ;;  %v2064_v21 = vrot.slane %v2062_v47, 1  ;;  %v2076_v55 = vrot.slane %v2074_v8, 2 }
 0x121   : > { %v2023_v36 = vor.u32 %v2022_v38, %v2019_v37  ;;  %v2082_v37 = vrot.slane %v2080_v59, 1  ;;  %v2085_v38 = vrot.slane %v2083_v30, 2  ;;  %v4487_v30 = vld [vmem:[%s7716_s28 + $0x8] sm:$0xe] }
 0x123   : > { %v2024_v58 = vsel %vm1917_vm1, %v2014_v7, %v2023_v36  ;;  %v2086_v33 = vor.u32 %v2085_v38, %v2082_v37 }
 0x126   : > { %5813 = vmatmul.mubr.bf16.gmra.mrb[20].mxu1 %v1604_v51  ;;  %v6595_v51 = vld [vmem:[%s6695_s2 + $0x78] sm:$0xff]  }
 0x127   : > { %6057 = vmatmul.mubr.bf16.gmra.mrb[4].mxu0 %v3669_v40  ;;  %5816 = vmatprep.mubr.bf16.mxu1 %v1606_v44  ;;  %v3686_v40 = vrot.slane %v6595_v51, 3  ;;  %v2015_v44 = vsel %vm1917_vm1, %v2005_v13, %v2014_v7  ;;  %v2067_v13 = vrot.slane %v2065_v10, 2 }
 0x128   : > { %6060 = vmatprep.mubr.bf16.mxu0 %v3671_v49  ;;  %v2028_v49 = vrot.slane %v2026_v42, 1 }
 0x129   : > { %v3687_v50 = vsel %vm3660_vm10, %v3684_v43, %v3686_v40 }
 0x12a   : > { %v2032_v48 = vor.u32 %v2031_v19, %v2028_v49  ;;  %v4646_v19 = vpop.permute.xlu1 %4645 }
 0x12c   : > { %v2033_v25 = vsel %vm1917_vm1, %v2023_v36, %v2032_v48 }
 0x12e   : > { %5817 = vmatmul.mubr.bf16.gmra.mrb[24].mxu1 %v1608_v26  ;;  %v2047_v26 = vshll.u32 %v7599_v46, 16  ;;  %v2055_v46 = vrot.slane %v2053_v0, 1 }
 0x12f   : > { %6061 = vmatmul.mubr.bf16.gmra.mrb[8].mxu0 %v3673_v9  ;;  %5820 = vmatprep.mubr.bf16.mxu1 %v1610_v52  ;;  %v6596_v9 = vld [vmem:[%s6695_s2 + $0x80] sm:$0xff]  }
 0x130   : > { %6064 = vmatprep.mubr.bf16.mxu0 %v3675_v56  ;;  %v3688_v52 = vrot.slane %v6596_v9, 3  ;;  %v2041_v56 = vor.u32 %v2040_v6, %v2037_v62  ;;  %v2049_v28 = vrot.slane %v2047_v26, 2  ;;  %v2059_v60 = vor.u32 %v2058_v32, %v2055_v46 }
 0x132   : > { %v3689_v4 = vsel %vm3660_vm10, %v3686_v40, %v3688_v52  ;;  %v4640_v40 = vpop.permute.xlu0 %4639 }
 0x133   : > { %vm4746_vm3 = vcmp.eq.s32.totalorder %v4640_v40, 1 }
 0x136   : > { %5821 = vmatmul.mubr.bf16.gmra.mrb[28].mxu1 %v1612_v16  ;;  %v2042_v16 = vsel %vm1917_vm1, %v2032_v48, %v2041_v56  ;;  %v4649_v48 = vpop.permute.xlu1 %4648 }
 0x137   : > { %6065 = vmatmul.mubr.bf16.gmra.mrb[12].mxu0 %v3677_v5  ;;  %5824 = vmatprep.mubr.bf16.mxu1 %v1614_v41  ;;  %v3691_v5 = vsel %vm3660_vm10, %v3688_v52, %v3690_v2  ;;  %v2050_v41 = vor.u32 %v2049_v28, %v2046_v31 }
 0x138   : > { %6068 = vmatprep.mubr.bf16.mxu0 %v3679_v57  ;;  %v3692_v57 = vrot.slane %v6598_v11, 3 }
 0x139   : > { %v2051_v12 = vsel %vm1917_vm1, %v2041_v56, %v2050_v41  ;;  %v2060_v53 = vsel %vm1917_vm1, %v2050_v41, %v2059_v60 }
 0x13a   : > { %v3693_v17 = vsel %vm3660_vm10, %v3690_v2, %v3692_v57  ;;  %v3695_v14 = vsel %vm3660_vm10, %v3692_v57, %v3694_v3  ;;  %vm4749_vm10 = vcmp.eq.s32.totalorder %v4649_v48, 1  ;;  %v7705_v56 = vpop.permute.xlu1 %4654 }
 0x13b   : > { %vm4751_vm13 = vcmp.eq.s32.totalorder %v7705_v56, 1 }
 0x13e   : > { %5825 = vmatmul.mubr.bf16.gmra.mrb[32].mxu1 %v1616_v22  ;;  %v2068_v22 = vor.u32 %v2067_v13, %v2064_v21 }
 0x13f   : > { %6069 = vmatmul.mubr.bf16.gmra.mrb[16].mxu0 %v3681_v54  ;;  %5860 = vmatprep.mubr.bf16.mxu1 %v2006_v61  ;;  %v2077_v54 = vor.u32 %v2076_v55, %v2073_v20 }
 0x140   : > { %6072 = vmatprep.mubr.bf16.mxu0 %v3683_v39  ;;  %v2069_v61 = vsel %vm1917_vm1, %v2059_v60, %v2068_v22  ;;  %v7719_v13 = vpop.permute.xlu1 %4660 }
 0x141   : > { %v2078_v39 = vsel %vm1917_vm1, %v2068_v22, %v2077_v54  ;;  %v2087_v3 = vsel %vm1917_vm1, %v2077_v54, %v2086_v33  ;;  %vm4748_vm1 = vcmp.eq.s32.totalorder %v4646_v19, 1  ;;  %vm4753_vm9 = vcmp.eq.s32.totalorder %v7719_v13, 1 }
 0x146   : > { %5861 = vmatmul.mubr.bf16.vlgmr.msra.gmra.mrb[16].mxu1 %v2015_v44 }
 0x147   : > { %6073 = vmatmul.mubr.bf16.gmra.mrb[20].mxu0 %v3685_v24  ;;  %5864 = vmatprep.mubr.bf16.mxu1 %v2024_v58  ;;  %v7692_v24 = vpop.permute.xlu0 %4642 }
 0x148   : > { %6076 = vmatprep.mubr.bf16.mxu0 %v3687_v50  ;;  %vm4747_vm15 = vcmp.eq.s32.totalorder %v7692_v24, 1 }
 0x14b   : > { %v7702_v63 = vpop.permute.xlu0 %4651 }
 0x14c   : > { %vm4750_vm8 = vcmp.eq.s32.totalorder %v7702_v63, 1 }
 0x14e   : > { %5865 = vmatmul.mubr.bf16.gmra.mrb[20].mxu1 %v2033_v25 }
 0x14f   : > { %6077 = vmatmul.mubr.bf16.gmra.mrb[24].mxu0 %v3689_v4  ;;  %5868 = vmatprep.mubr.bf16.mxu1 %v2042_v16  ;;  %v7707_v15 = vpop.permute.xlu0 %4657 }
 0x150   : > { %6080 = vmatprep.mubr.bf16.mxu0 %v3691_v5  ;;  %vm4752_vm6 = vcmp.eq.s32.totalorder %v7707_v15, 1 }
 0x153   : > { %v7723_v22 = vpop.permute.xlu0 %4663 }
 0x154   : > { %vm4754_vm0 = vcmp.eq.s32.totalorder %v7723_v22, 1 }
 0x156   : > { %5869 = vmatmul.mubr.bf16.gmra.mrb[24].mxu1 %v2051_v12 }
 0x157   : > { %6081 = vmatmul.mubr.bf16.gmra.mrb[28].mxu0 %v3693_v17  ;;  %5872 = vmatprep.mubr.bf16.mxu1 %v2060_v53 }
 0x158   : > { %6084 = vmatprep.mubr.bf16.mxu0 %v3695_v14 }
 0x15e   : > { %5873 = vmatmul.mubr.bf16.gmra.mrb[28].mxu1 %v2069_v61 }
 0x15f   : > { %6085 = vmatmul.mubr.bf16.gmra.mrb[32].mxu0 %v7382_v27  ;;  %5876 = vmatprep.mubr.bf16.mxu1 %v2078_v39 }
 0x166   : > { %5877 = vmatmul.mubr.bf16.gmra.mrb[32].mxu1 %v2087_v3 }
 0x1d1   : > { %v5794_v7 = vpop.f32.mrb[0].mxu1 }
 0x1d2   : > { %v1717_v42 = vpop.f32.mrb[1].mxu1 }
 0x1d3   : > { %v5795_v18 = vpop.f32.mrb[2].mxu1 }
 0x1d4   : > { %v1720_v1 = vpop.f32.mrb[3].mxu1 }
 0x1d9   : > { %v7676_v43 = vpop.f32.mrb[4].mxu1 }
 0x1da   : > { %v7678_v36 = vpop.f32.mrb[5].mxu1 }
 0x1db   : > { %v7680_v45 = vpop.f32.mrb[6].mxu1 }
 0x1dc   : > { %v7682_v34 = vpop.f32.mrb[7].mxu1 }
 0x1e1   : > { %v7684_v51 = vpop.f32.mrb[8].mxu1 }
 0x1e2   : > { %v7686_v27 = vpop.f32.mrb[9].mxu1 }
 0x1e3   : > { %v7688_v44 = vpop.f32.mrb[10].mxu1 }
 0x1e4   : > { %v7690_v49 = vpop.f32.mrb[11].mxu1 }
 0x1e9   : > { %v7694_v58 = vpop.f32.mrb[12].mxu1 }
 0x1ea   : > { %v7696_v62 = vpop.f32.mrb[13].mxu1 }
 0x1eb   : > { %v7698_v6 = vpop.f32.mrb[14].mxu1 }
 0x1ec   : > { %v7700_v50 = vpop.f32.mrb[15].mxu1 }
 0x1f2   : > { %v6054_v26 = vpop.f32.mrb[0].mxu0 }
 0x1f3   : > { %v6104_v9 = vadd.f32 %v6054_v26, %v5794_v7  ;;  %v3798_v52 = vpop.f32.mrb[1].mxu0 }
 0x1f4   : > { %v6105_v0 = vadd.f32 %v3798_v52, %v1717_v42  ;;  %v6055_v23 = vpop.f32.mrb[2].mxu0 }
 0x1f5   : > { %v5352_v2 = vpack.c.bf16 %v6104_v9, %v6104_v9  ;;  %v4784_v25 = vsel %vm4748_vm1, %v6104_v9, 0.0  ;;  %v6106_v31 = vadd.f32 %v6055_v23, %v5795_v18  ;;  %v3801_v28 = vpop.f32.mrb[3].mxu0 }
 0x1f6   : > { %v5350_v4 = vpack.c.bf16 %v6105_v0, %v6105_v0  ;;  %v4782_v16 = vsel %vm4746_vm3, %v6105_v0, 0.0  ;;  %v6107_v46 = vadd.f32 %v3801_v28, %v1720_v1  ;;  %v4862_v41 = vmul.f32 %v4784_v25, %v4784_v25  ;;  %v7750_v28 = vpop.permute.xlu1 %4666 }
 0x1f7   : > { %v4108_v32 = vshrl.u32 %v5352_v2, 16  ;;  %v4111_v5 = vshll.u32 %v5352_v2, 16  ;;  %v5353_v47 = vpack.c.bf16 %v6106_v31, %v6106_v31  ;;  %v4860_v57 = vmul.f32 %v4782_v16, %v4782_v16 }
 0x1f8   : > { %v4089_v10 = vshrl.u32 %v5350_v4, 16  ;;  %v4092_v11 = vshll.u32 %v5350_v4, 16  ;;  %v5351_v60 = vpack.c.bf16 %v6107_v46, %v6107_v46  ;;  %v4785_v20 = vsel %vm4749_vm10, %v6106_v31, 0.0 }
 0x1f9   : > { %v4110_v35 = vrot.slane %v4108_v32, 6  ;;  %v4113_v8 = vrot.slane %v4111_v5, 7  ;;  %v4118_v12 = vshrl.u32 %v5353_v47, 16  ;;  %v4121_v21 = vshll.u32 %v5353_v47, 16  ;;  %v7754_v5 = vpop.permute.xlu0 %4669 }
 0x1fa   : > { %v4091_v17 = vrot.slane %v4089_v10, 6  ;;  %v4094_v53 = vrot.slane %v4092_v11, 7  ;;  %v4098_v55 = vshrl.u32 %v5351_v60, 16  ;;  %v6058_v14 = vpop.f32.mrb[4].mxu0  ;;  %v4101_v37 = vshll.u32 %v5351_v60, 16 }
 0x1fb   : > { %v4114_v29 = vor.u32 %v4113_v8, %v4110_v35  ;;  %v4120_v54 = vrot.slane %v4118_v12, 6  ;;  %v4123_v61 = vrot.slane %v4121_v21, 7  ;;  %v3814_v38 = vpop.f32.mrb[5].mxu0  ;;  %v4783_v7 = vsel %vm4747_vm15, %v6107_v46, 0.0 }
 0x1fc   : > { %v4095_v39 = vor.u32 %v4094_v53, %v4091_v17  ;;  %v4100_v3 = vrot.slane %v4098_v55, 6  ;;  %v6108_v42 = vadd.f32 %v6058_v14, %v7676_v43  ;;  %v6059_v18 = vpop.f32.mrb[6].mxu0  ;;  %v4103_v19 = vrot.slane %v4101_v37, 7 }
 0x1fd   : > { %v4116_v1 = vrot.slane %v4114_v29, 4  ;;  %v7742_v40 = vor.u32 %v4123_v61, %v4120_v54  ;;  %v4818_v48 = vadd.f32 %v4783_v7, %v4782_v16  ;;  %v3817_v26 = vpop.f32.mrb[7].mxu0  ;;  %v4861_v0 = vmul.f32 %v4783_v7, %v4783_v7  ;;  %v7782_v7 = vpop.permute.xlu0 %4675 }
 0x1fe   : > { %v4096_v9 = vrot.slane %v4095_v39, 4  ;;  %v4488_v52 = vsel %vm7727_vm11, %v4095_v39, %v4487_v30  ;;  %v5356_v23 = vpack.c.bf16 %v6108_v42, %v6108_v42  ;;  %v4863_v24 = vmul.f32 %v4785_v20, %v4785_v20 }
 0x1ff   : > { %4489 = vst [vmem:[%s7716_s28 + $0x8] sm:$0xe] %v4488_v52  ;;  %v4125_v43 = vsel %vm7734_vm12, %v4116_v1, %v7742_v40  ;;  %v4104_v2 = vor.u32 %v4103_v19, %v4100_v3  ;;  %v4819_v31 = vadd.f32 %v4818_v48, %v4784_v25  ;;  %v4126_v4 = vrot.slane %v7742_v40, 4 }
 0x200   : > { %4492 = vst [vmem:[%s7716_s28 + $0x14] sm:$0xf] %v4125_v43  ;;  %v4896_v16 = vadd.f32 %v4861_v0, %v4860_v57  ;;  %v4148_v46 = vshrl.u32 %v5356_v23, 16  ;;  %v4151_v32 = vshll.u32 %v5356_v23, 16  ;;  %v4788_v11 = vsel %vm4752_vm6, %v6108_v42, 0.0 }
 0x201   : > { %v4105_v47 = vsel %vm7734_vm12, %v4096_v9, %v4104_v2  ;;  %v4106_v10 = vrot.slane %v4104_v2, 4  ;;  %v6109_v25 = vadd.f32 %v3814_v38, %v7678_v36  ;;  %v4820_v12 = vadd.f32 %v4819_v31, %v4785_v20 }
 0x202   : > { %4490 = vst [vmem:[%s7716_s28 + $0xc] sm:$0xf] %v4105_v47  ;;  %v4897_v60 = vadd.f32 %v4896_v16, %v4862_v41  ;;  %v4150_v35 = vrot.slane %v4148_v46, 6  ;;  %v4153_v8 = vrot.slane %v4151_v32, 7  ;;  %v6062_v57 = vpop.f32.mrb[8].mxu0  ;;  %v6110_v55 = vadd.f32 %v6059_v18, %v7680_v45  ;;  %v7776_v45 = vpop.permute.xlu1 %4672 }
 0x203   : > { %v4115_v21 = vsel %vm7734_vm12, %v4106_v10, %v4114_v29  ;;  %v5354_v17 = vpack.c.bf16 %v6109_v25, %v6109_v25  ;;  %v4786_v53 = vsel %vm4750_vm8, %v6109_v25, 0.0  ;;  %v3830_v14 = vpop.f32.mrb[9].mxu0  ;;  %vm4756_vm14 = vcmp.eq.s32.totalorder %v7754_v5, 1 }
 0x204   : > { %4491 = vst [vmem:[%s7716_s28 + $0x10] sm:$0xf] %v4115_v21  ;;  %v7768_v15 = vor.u32 %v4153_v8, %v4150_v35  ;;  %v4821_v36 = vadd.f32 %v4820_v12, %v4786_v53  ;;  %v4864_v59 = vmul.f32 %v4786_v53, %v4786_v53  ;;  %v4898_v41 = vadd.f32 %v4897_v60, %v4863_v24  ;;  %v7770_v30 = vpop.f32.mrb[10].mxu0  ;;  %v7801_v8 = vpop.permute.xlu0 %4681 }
 0x205   : > { %v4866_v20 = vmul.f32 %v4788_v11, %v4788_v11  ;;  %v4128_v54 = vshrl.u32 %v5354_v17, 16  ;;  %v4131_v29 = vshll.u32 %v5354_v17, 16  ;;  %v5357_v61 = vpack.c.bf16 %v6110_v55, %v6110_v55  ;;  %v7773_v37 = vpop.f32.mrb[11].mxu0 }
 0x206   : > { %v4156_v63 = vrot.slane %v7768_v15, 4  ;;  %v4899_v38 = vadd.f32 %v4898_v41, %v4864_v59  ;;  %v4789_v39 = vsel %vm4753_vm9, %v6110_v55, 0.0  ;;  %v6111_v3 = vadd.f32 %v3817_v26, %v7682_v34  ;;  %v7796_v32 = vpop.permute.xlu1 %4678 }
 0x207   : > { %v4130_v42 = vrot.slane %v4128_v54, 6  ;;  %v4133_v18 = vrot.slane %v4131_v29, 7  ;;  %v4158_v1 = vshrl.u32 %v5357_v61, 16  ;;  %v4161_v40 = vshll.u32 %v5357_v61, 16 }
 0x208   : > { %v5355_v19 = vpack.c.bf16 %v6111_v3, %v6111_v3  ;;  %v4787_v48 = vsel %vm4751_vm13, %v6111_v3, 0.0  ;;  %v6112_v9 = vadd.f32 %v6062_v57, %v7684_v51  ;;  %v6113_v52 = vadd.f32 %v3830_v14, %v7686_v27 }
 0x209   : > { %v4134_v0 = vor.u32 %v4133_v18, %v4130_v42  ;;  %v4160_v23 = vrot.slane %v4158_v1, 6  ;;  %v4163_v13 = vrot.slane %v4161_v40, 7  ;;  %v4822_v43 = vadd.f32 %v4821_v36, %v4787_v48 }
 0x20a   : > { %v4138_v34 = vshrl.u32 %v5355_v19, 16  ;;  %v4141_v26 = vshll.u32 %v5355_v19, 16  ;;  %v4865_v24 = vmul.f32 %v4787_v48, %v4787_v48  ;;  %v5360_v2 = vpack.c.bf16 %v6112_v9, %v6112_v9  ;;  %v6066_v31 = vpop.f32.mrb[12].mxu0  ;;  %v7821_v22 = vpop.permute.xlu1 %4684 }
 0x20b   : > { %vm4755_vm1 = vcmp.eq.s32.totalorder %v7750_v28, 1  ;;  %v4135_v56 = vsel %vm7734_vm12, %v4126_v4, %v4134_v0  ;;  %v4136_v16 = vrot.slane %v4134_v0, 4  ;;  %v7791_v46 = vor.u32 %v4163_v13, %v4160_v23  ;;  %v7793_v27 = vpop.f32.mrb[13].mxu0  ;;  %v7832_v48 = vpop.permute.xlu0 %4687 }
 0x20c   : > { %v4823_v51 = vadd.f32 %v4822_v43, %v4788_v11  ;;  %vm4757_vm3 = vcmp.eq.s32.totalorder %v7776_v45, 1  ;;  %4493 = vst [vmem:[%s7716_s28 + $0x18] sm:$0xf] %v4135_v56  ;;  %v4140_v47 = vrot.slane %v4138_v34, 6  ;;  %v4143_v10 = vrot.slane %v4141_v26, 7  ;;  %v7799_v35 = vpop.f32.mrb[14].mxu0 }
 0x20d   : > { %v4900_v25 = vadd.f32 %v4899_v38, %v4865_v24  ;;  %v4188_v60 = vshrl.u32 %v5360_v2, 16  ;;  %v4165_v4 = vsel %vm7734_vm12, %v4156_v63, %v7791_v46  ;;  %v4166_v11 = vrot.slane %v7791_v46, 4  ;;  %v7807_v21 = vpop.f32.mrb[15].mxu0 }
 0x20e   : > { %v4867_v12 = vmul.f32 %v4789_v39, %v4789_v39  ;;  %v4191_v57 = vshll.u32 %v5360_v2, 16  ;;  %4496 = vst [vmem:[%s7716_s28 + $0x24] sm:$0xf] %v4165_v4  ;;  %v4144_v17 = vor.u32 %v4143_v10, %v4140_v47  ;;  %v4792_v14 = vsel %vm4756_vm14, %v6112_v9, 0.0  ;;  %v7849_v10 = vpop.permute.xlu1 %4690 }
 0x20f   : > { %v4901_v53 = vadd.f32 %v4900_v25, %v4866_v20  ;;  %v4190_v55 = vrot.slane %v4188_v60, 6  ;;  %v5358_v59 = vpack.c.bf16 %v6113_v52, %v6113_v52  ;;  %v4790_v41 = vsel %vm4754_vm0, %v6113_v52, 0.0 }
 0x210   : > { %v4193_v36 = vrot.slane %v4191_v57, 7  ;;  %v4824_v54 = vadd.f32 %v4823_v51, %v4789_v39  ;;  %vm4760_vm15 = vcmp.eq.s32.totalorder %v7801_v8, 1  ;;  %v4145_v29 = vsel %vm7734_vm12, %v4136_v16, %v4144_v17 }
 0x211   : > { %v4146_v61 = vrot.slane %v4144_v17, 4  ;;  %v4868_v63 = vmul.f32 %v4790_v41, %v4790_v41  ;;  %v4902_v38 = vadd.f32 %v4901_v53, %v4867_v12  ;;  %4494 = vst [vmem:[%s7716_s28 + $0x1c] sm:$0xf] %v4145_v29  ;;  %v4168_v5 = vshrl.u32 %v5358_v59, 16  ;;  %v7854_v12 = vpop.permute.xlu0 %4693 }
 0x212   : > { %v7818_v20 = vor.u32 %v4193_v36, %v4190_v55  ;;  %v4171_v3 = vshll.u32 %v5358_v59, 16  ;;  %v4825_v42 = vadd.f32 %v4824_v54, %v4790_v41  ;;  %vm4758_vm10 = vcmp.eq.s32.totalorder %v7782_v7, 1  ;;  %v7830_v19 = vpop.f32.mrb[16].mxu0 }
 0x213   : > { %v4155_v39 = vsel %vm7734_vm12, %v4146_v61, %v7768_v15  ;;  %v4903_v18 = vadd.f32 %v4902_v38, %v4868_v63  ;;  %v6114_v1 = vadd.f32 %v7770_v30, %v7688_v44  ;;  %v6115_v40 = vadd.f32 %v7773_v37, %v7690_v49  ;;  %v7836_v13 = vpop.f32.mrb[17].mxu0 }
 0x214   : > { %4495 = vst [vmem:[%s7716_s28 + $0x20] sm:$0xf] %v4155_v39  ;;  %v4870_v9 = vmul.f32 %v4792_v14, %v4792_v14  ;;  %v4170_v52 = vrot.slane %v4168_v5, 6  ;;  %v4173_v0 = vrot.slane %v4171_v3, 7  ;;  %v6116_v23 = vadd.f32 %v6066_v31, %v7694_v58  ;;  %v7841_v49 = vpop.f32.mrb[18].mxu0 }
 0x215   : > { %v4196_v15 = vrot.slane %v7818_v20, 4  ;;  %v5361_v43 = vpack.c.bf16 %v6114_v1, %v6114_v1  ;;  %v5359_v34 = vpack.c.bf16 %v6115_v40, %v6115_v40  ;;  %v4791_v44 = vsel %vm4755_vm1, %v6115_v40, 0.0  ;;  %v7845_v2 = vpop.f32.mrb[19].mxu0 }
 0x216   : > { %v4174_v30 = vor.u32 %v4173_v0, %v4170_v52  ;;  %v4793_v37 = vsel %vm4757_vm3, %v6114_v1, 0.0  ;;  %v4826_v26 = vadd.f32 %v4825_v42, %v4791_v44  ;;  %v4869_v24 = vmul.f32 %v4791_v44, %v4791_v44 }
 0x217   : > { %v4198_v58 = vshrl.u32 %v5361_v43, 16  ;;  %v4201_v31 = vshll.u32 %v5361_v43, 16  ;;  %v4178_v56 = vshrl.u32 %v5359_v34, 16  ;;  %v4181_v16 = vshll.u32 %v5359_v34, 16 }
 0x218   : > { %v4175_v46 = vsel %vm7734_vm12, %v4166_v11, %v4174_v30  ;;  %v4176_v28 = vrot.slane %v4174_v30, 4  ;;  %v4827_v51 = vadd.f32 %v4826_v26, %v4792_v14  ;;  %v4904_v47 = vadd.f32 %v4903_v18, %v4869_v24  ;;  %v7896_v24 = vpop.permute.xlu1 %4696 }
 0x219   : > { %4497 = vst [vmem:[%s7716_s28 + $0x28] sm:$0xf] %v4175_v46  ;;  %v4200_v25 = vrot.slane %v4198_v58, 6  ;;  %v4203_v45 = vrot.slane %v4201_v31, 7  ;;  %v4180_v60 = vrot.slane %v4178_v56, 6  ;;  %v4183_v4 = vrot.slane %v4181_v16, 7  ;;  %v7902_v16 = vpop.permute.xlu0 %4699 }
 0x21a   : > { %vm4759_vm2 = vcmp.eq.s32.totalorder %v7796_v32, 1  ;;  %vm4761_vm4 = vcmp.eq.s32.totalorder %v7821_v22, 1  ;;  %v4905_v57 = vadd.f32 %v4904_v47, %v4870_v9  ;;  %v5364_v17 = vpack.c.bf16 %v6116_v23, %v6116_v23  ;;  %v5862_v55 = vpop.f32.mrb[16].mxu1  ;;  %v7862_v54 = vpop.f32.mrb[20].mxu0 }
 0x21b   : > { %v7858_v11 = vsel %vm4760_vm15, %v6116_v23, 0.0  ;;  %v6117_v53 = vadd.f32 %v7793_v27, %v7696_v62  ;;  %v4204_v14 = vor.u32 %v4203_v45, %v4200_v25  ;;  %v4871_v36 = vmul.f32 %v4793_v37, %v4793_v37  ;;  %v2252_v29 = vpop.f32.mrb[17].mxu1  ;;  %v7866_v5 = vpop.f32.mrb[21].mxu0 }
 0x21c   : > { %v4184_v59 = vor.u32 %v4183_v4, %v4180_v60  ;;  %v4828_v41 = vadd.f32 %v4827_v51, %v4793_v37  ;;  %v4228_v61 = vshrl.u32 %v5364_v17, 16  ;;  %v4231_v63 = vshll.u32 %v5364_v17, 16  ;;  %v7868_v3 = vpop.f32.mrb[18].mxu1  ;;  %v7878_v18 = vpop.f32.mrb[22].mxu0 }
 0x21d   : > { %v5362_v38 = vpack.c.bf16 %v6117_v53, %v6117_v53  ;;  %v4794_v8 = vsel %vm4758_vm10, %v6117_v53, 0.0  ;;  %v4205_v62 = vsel %vm7734_vm12, %v4196_v15, %v4204_v14  ;;  %v7876_v39 = vmul.f32 %v7858_v11, %v7858_v11  ;;  %v7880_v7 = vpop.f32.mrb[19].mxu1  ;;  %v7884_v0 = vpop.f32.mrb[23].mxu0 }
 0x21e   : > { %v4185_v27 = vsel %vm7734_vm12, %v4176_v28, %v4184_v59  ;;  %v4186_v42 = vrot.slane %v4184_v59, 4  ;;  %4500 = vst [vmem:[%s7716_s28 + $0x34] sm:$0xf] %v4205_v62  ;;  %v4230_v1 = vrot.slane %v4228_v61, 6  ;;  %v4233_v40 = vrot.slane %v4231_v63, 7 }
 0x21f   : > { %4498 = vst [vmem:[%s7716_s28 + $0x2c] sm:$0xf] %v4185_v27  ;;  %v4208_v9 = vshrl.u32 %v5362_v38, 16  ;;  %v4211_v52 = vshll.u32 %v5362_v38, 16  ;;  %vm4764_vm6 = vcmp.eq.s32.totalorder %v7854_v12, 1  ;;  %v4829_v15 = vadd.f32 %v4828_v41, %v4794_v8 }
 0x220   : > { %v4195_v23 = vsel %vm7734_vm12, %v4186_v42, %v7818_v20  ;;  %v4872_v43 = vmul.f32 %v4794_v8, %v4794_v8  ;;  %v4906_v34 = vadd.f32 %v4905_v57, %v4871_v36  ;;  %v7891_v44 = vor.u32 %v4233_v40, %v4230_v1 }
 0x221   : > { %4499 = vst [vmem:[%s7716_s28 + $0x30] sm:$0xf] %v4195_v23  ;;  %v4210_v30 = vrot.slane %v4208_v9, 6  ;;  %v4213_v37 = vrot.slane %v4211_v52, 7  ;;  %v6118_v26 = vadd.f32 %v7799_v35, %v7698_v6  ;;  %vm4762_vm7 = vcmp.eq.s32.totalorder %v7832_v48, 1  ;;  %v7905_v35 = vpop.f32.mrb[20].mxu1  ;;  %v7935_v23 = vpop.permute.xlu1 %4702 }
 0x222   : > { %v4907_v58 = vadd.f32 %v4906_v34, %v4872_v43  ;;  %v6119_v31 = vadd.f32 %v7807_v21, %v7700_v50  ;;  %v6120_v20 = vadd.f32 %v7830_v19, %v5862_v55  ;;  %v6121_v56 = vadd.f32 %v7836_v13, %v2252_v29  ;;  %v7911_v19 = vpop.f32.mrb[24].mxu0  ;;  %v7913_v13 = vpop.f32.mrb[21].mxu1 }
 0x223   : > { %v4206_v46 = vrot.slane %v4204_v14, 4  ;;  %v4236_v28 = vrot.slane %v7891_v44, 4  ;;  %v4214_v51 = vor.u32 %v4213_v37, %v4210_v30  ;;  %v5365_v6 = vpack.c.bf16 %v6118_v26, %v6118_v26  ;;  %v7917_v17 = vpop.f32.mrb[25].mxu0  ;;  %v7919_v53 = vpop.f32.mrb[22].mxu1 }
 0x224   : > { %v4797_v47 = vsel %vm4761_vm4, %v6118_v26, 0.0  ;;  %v5363_v25 = vpack.c.bf16 %v6119_v31, %v6119_v31  ;;  %v4795_v50 = vsel %vm4759_vm2, %v6119_v31, 0.0  ;;  %v5368_v21 = vpack.c.bf16 %v6120_v20, %v6120_v20  ;;  %v7922_v36 = vpop.f32.mrb[26].mxu0  ;;  %v7924_v59 = vpop.f32.mrb[23].mxu1 }
 0x225   : > { %v4215_v45 = vsel %vm7734_vm12, %v4206_v46, %v4214_v51  ;;  %v4216_v60 = vrot.slane %v4214_v51, 4  ;;  %v4238_v4 = vshrl.u32 %v5365_v6, 16  ;;  %v4241_v57 = vshll.u32 %v5365_v6, 16  ;;  %v7926_v38 = vpop.f32.mrb[27].mxu0  ;;  %v7938_v37 = vpop.permute.xlu0 %4705 }
 0x226   : > { %4501 = vst [vmem:[%s7716_s28 + $0x38] sm:$0xf] %v4215_v45  ;;  %v4218_v22 = vshrl.u32 %v5363_v25, 16  ;;  %v4221_v55 = vshll.u32 %v5363_v25, 16  ;;  %v4830_v32 = vadd.f32 %v4829_v15, %v4795_v50  ;;  %v4873_v14 = vmul.f32 %v4795_v50, %v4795_v50 }
 0x227   : > { %v4240_v41 = vrot.slane %v4238_v4, 6  ;;  %v4243_v29 = vrot.slane %v4241_v57, 7  ;;  %v4268_v61 = vshrl.u32 %v5368_v21, 16  ;;  %v4271_v63 = vshll.u32 %v5368_v21, 16 }
 0x228   : > { %vm4763_vm8 = vcmp.eq.s32.totalorder %v7849_v10, 1  ;;  %vm4765_vm9 = vcmp.eq.s32.totalorder %v7896_v24, 1  ;;  %v4220_v8 = vrot.slane %v4218_v22, 6  ;;  %v4223_v62 = vrot.slane %v4221_v55, 7 }
 0x229   : > { %v4831_v27 = vadd.f32 %v4830_v32, %v7858_v11  ;;  %v4908_v42 = vadd.f32 %v4907_v58, %v4873_v14  ;;  %v4244_v1 = vor.u32 %v4243_v29, %v4240_v41  ;;  %v4270_v40 = vrot.slane %v4268_v61, 6  ;;  %v7950_v31 = vpop.f32.mrb[24].mxu1 }
 0x22a   : > { %v4273_v9 = vrot.slane %v4271_v63, 7  ;;  %v7933_v52 = vsel %vm4764_vm6, %v6120_v20, 0.0  ;;  %v4875_v15 = vmul.f32 %v4797_v47, %v4797_v47  ;;  %v4224_v43 = vor.u32 %v4223_v62, %v4220_v8  ;;  %v7955_v6 = vpop.f32.mrb[28].mxu0 }
 0x22b   : > { %v4909_v34 = vadd.f32 %v4908_v42, %v7876_v39  ;;  %v5366_v30 = vpack.c.bf16 %v6121_v56, %v6121_v56  ;;  %v4245_v11 = vsel %vm7734_vm12, %v4236_v28, %v4244_v1  ;;  %v7946_v12 = vmul.f32 %v7933_v52, %v7933_v52  ;;  %v7957_v28 = vpop.f32.mrb[25].mxu1  ;;  %v7961_v21 = vpop.f32.mrb[29].mxu0 }
 0x22c   : > { %v7942_v26 = vor.u32 %v4273_v9, %v4270_v40  ;;  %v4798_v58 = vsel %vm4762_vm7, %v6121_v56, 0.0  ;;  %4504 = vst [vmem:[%s7716_s28 + $0x44] sm:$0xf] %v4245_v11  ;;  %v4225_v39 = vsel %vm7734_vm12, %v4216_v60, %v4224_v43  ;;  %v4226_v20 = vrot.slane %v4224_v43, 4  ;;  %v7963_v45 = vpop.f32.mrb[26].mxu1  ;;  %v7970_v55 = vpop.f32.mrb[30].mxu0 }
 0x22d   : > { %v4248_v46 = vshrl.u32 %v5366_v30, 16  ;;  %v4251_v51 = vshll.u32 %v5366_v30, 16  ;;  %vm4768_vm11 = vcmp.eq.s32.totalorder %v7938_v37, 1  ;;  %v4246_v25 = vrot.slane %v4244_v1, 4  ;;  %4502 = vst [vmem:[%s7716_s28 + $0x3c] sm:$0xf] %v4225_v39  ;;  %v7993_v40 = vpop.permute.xlu0 %4711 }
 0x22e   : > { %v4832_v48 = vadd.f32 %v4831_v27, %v4797_v47  ;;  %v4876_v56 = vmul.f32 %v4798_v58, %v4798_v58  ;;  %v4910_v50 = vadd.f32 %v4909_v34, %v4875_v15  ;;  %v4235_v60 = vsel %vm7734_vm12, %v4226_v20, %v7891_v44  ;;  %v7972_v32 = vpop.f32.mrb[27].mxu1  ;;  %v7980_v29 = vpop.f32.mrb[31].mxu0 }
 0x22f   : > { %v4250_v4 = vrot.slane %v4248_v46, 6  ;;  %v4253_v57 = vrot.slane %v4251_v51, 7  ;;  %v6122_v22 = vadd.f32 %v7841_v49, %v7868_v3  ;;  %vm4766_vm13 = vcmp.eq.s32.totalorder %v7902_v16, 1  ;;  %4503 = vst [vmem:[%s7716_s28 + $0x40] sm:$0xf] %v4235_v60  ;;  %v7989_v27 = vpop.permute.xlu1 %4708 }
 0x230   : > { %v4833_v47 = vadd.f32 %v4832_v48, %v4798_v58  ;;  %v4911_v14 = vadd.f32 %v4910_v50, %v4876_v56  ;;  %v6123_v41 = vadd.f32 %v7845_v2, %v7880_v7  ;;  %v6124_v44 = vadd.f32 %v7862_v54, %v7905_v35 }
 0x231   : > { %v4276_v49 = vrot.slane %v7942_v26, 4  ;;  %v4254_v3 = vor.u32 %v4253_v57, %v4250_v4  ;;  %v5369_v61 = vpack.c.bf16 %v6122_v22, %v6122_v22  ;;  %v6125_v63 = vadd.f32 %v7866_v5, %v7913_v13  ;;  %v7996_v15 = vpop.f32.mrb[28].mxu1 }
 0x232   : > { %v4801_v8 = vsel %vm4765_vm9, %v6122_v22, 0.0  ;;  %v5367_v62 = vpack.c.bf16 %v6123_v41, %v6123_v41  ;;  %v4799_v2 = vsel %vm4763_vm8, %v6123_v41, 0.0  ;;  %v5372_v7 = vpack.c.bf16 %v6124_v44, %v6124_v44  ;;  %v7998_v11 = vpop.f32.mrb[32].mxu0  ;;  %v8000_v58 = vpop.f32.mrb[29].mxu1 }
 0x233   : > { %v4255_v54 = vsel %vm7734_vm12, %v4246_v25, %v4254_v3  ;;  %v4256_v35 = vrot.slane %v4254_v3, 4  ;;  %v4278_v42 = vshrl.u32 %v5369_v61, 16  ;;  %v4281_v1 = vshll.u32 %v5369_v61, 16  ;;  %v8005_v25 = vpop.f32.mrb[33].mxu0  ;;  %v8007_v48 = vpop.f32.mrb[30].mxu1 }
 0x234   : > { %4505 = vst [vmem:[%s7716_s28 + $0x48] sm:$0xf] %v4255_v54  ;;  %v4258_v5 = vshrl.u32 %v5367_v62, 16  ;;  %v4261_v13 = vshll.u32 %v5367_v62, 16  ;;  %v4834_v24 = vadd.f32 %v4833_v47, %v4799_v2  ;;  %v4877_v9 = vmul.f32 %v4799_v2, %v4799_v2  ;;  %v8013_v57 = vpop.f32.mrb[34].mxu0  ;;  %v8015_v22 = vpop.f32.mrb[31].mxu1 }
 0x235   : > { %v4280_v10 = vrot.slane %v4278_v42, 6  ;;  %v4283_v43 = vrot.slane %v4281_v1, 7  ;;  %v4308_v34 = vshrl.u32 %v5372_v7, 16  ;;  %v4311_v30 = vshll.u32 %v5372_v7, 16  ;;  %v8018_v3 = vpop.f32.mrb[35].mxu0  ;;  %v4718_v2 = vpop.permute.xlu0 %4717 }
 0x236   : > { %vm4767_vm14 = vcmp.eq.s32.totalorder %v7935_v23, 1  ;;  %vm4769_vm0 = vcmp.eq.s32.totalorder %v7989_v27, 1  ;;  %v4260_v39 = vrot.slane %v4258_v5, 6  ;;  %v4263_v20 = vrot.slane %v4261_v13, 7 }
 0x237   : > { %v4835_v46 = vadd.f32 %v4834_v24, %v7933_v52  ;;  %v4912_v51 = vadd.f32 %v4911_v14, %v4877_v9  ;;  %v4284_v56 = vor.u32 %v4283_v43, %v4280_v10  ;;  %v4310_v50 = vrot.slane %v4308_v34, 6  ;;  %v8034_v24 = vpop.permute.xlu1 %4714 }
 0x238   : > { %v4313_v60 = vrot.slane %v4311_v30, 7  ;;  %v8011_v4 = vsel %vm4768_vm11, %v6124_v44, 0.0  ;;  %v4879_v47 = vmul.f32 %v4801_v8, %v4801_v8  ;;  %v4264_v41 = vor.u32 %v4263_v20, %v4260_v39 }
 0x239   : > { %v4913_v52 = vadd.f32 %v4912_v51, %v7946_v12  ;;  %v5370_v14 = vpack.c.bf16 %v6125_v63, %v6125_v63  ;;  %v4285_v61 = vsel %vm7734_vm12, %v4276_v49, %v4284_v56  ;;  %v8026_v37 = vmul.f32 %v8011_v4, %v8011_v4  ;;  %v8041_v10 = vpop.f32.mrb[32].mxu1 }
 0x23a   : > { %v8022_v62 = vor.u32 %v4313_v60, %v4310_v50  ;;  %v4802_v44 = vsel %vm4766_vm13, %v6125_v63, 0.0  ;;  %4508 = vst [vmem:[%s7716_s28 + $0x54] sm:$0xf] %v4285_v61  ;;  %v4265_v12 = vsel %vm7734_vm12, %v4256_v35, %v4264_v41  ;;  %v4266_v7 = vrot.slane %v4264_v41, 4  ;;  %v8049_v39 = vpop.f32.mrb[33].mxu1  ;;  %v8064_v41 = vpop.permute.xlu0 %4723 }
 0x23b   : > { %v4288_v54 = vshrl.u32 %v5370_v14, 16  ;;  %v4291_v42 = vshll.u32 %v5370_v14, 16  ;;  %vm4772_vm1 = vcmp.eq.s32.totalorder %v4718_v2, 1  ;;  %v4286_v49 = vrot.slane %v4284_v56, 4  ;;  %4506 = vst [vmem:[%s7716_s28 + $0x4c] sm:$0xf] %v4265_v12  ;;  %v4721_v14 = vpop.permute.xlu1 %4720 }
 0x23c   : > { %v4836_v1 = vadd.f32 %v4835_v46, %v4801_v8  ;;  %v4880_v5 = vmul.f32 %v4802_v44, %v4802_v44  ;;  %v4914_v13 = vadd.f32 %v4913_v52, %v4879_v47  ;;  %v4275_v16 = vsel %vm7734_vm12, %v4266_v7, %v7942_v26  ;;  %v8054_v46 = vpop.f32.mrb[34].mxu1 }
 0x23d   : > { %v4290_v63 = vrot.slane %v4288_v54, 6  ;;  %v4293_v9 = vrot.slane %v4291_v42, 7  ;;  %v6126_v35 = vadd.f32 %v7878_v18, %v7919_v53  ;;  %vm4770_vm3 = vcmp.eq.s32.totalorder %v7993_v40, 1  ;;  %4507 = vst [vmem:[%s7716_s28 + $0x50] sm:$0xf] %v4275_v16 }
 0x23e   : > { %v4837_v43 = vadd.f32 %v4836_v1, %v4802_v44  ;;  %v4915_v8 = vadd.f32 %v4914_v13, %v4880_v5  ;;  %v6127_v34 = vadd.f32 %v7884_v0, %v7924_v59  ;;  %v6128_v30 = vadd.f32 %v7911_v19, %v7950_v31  ;;  %v8060_v59 = vpop.f32.mrb[35].mxu1 }
 0x23f   : > { %v4316_v26 = vrot.slane %v8022_v62, 4  ;;  %v4294_v20 = vor.u32 %v4293_v9, %v4290_v63  ;;  %v5373_v18 = vpack.c.bf16 %v6126_v35, %v6126_v35  ;;  %v6129_v53 = vadd.f32 %v7917_v17, %v7957_v28 }
 0x240   : > { %v4805_v51 = vsel %vm4769_vm0, %v6126_v35, 0.0  ;;  %v5371_v56 = vpack.c.bf16 %v6127_v34, %v6127_v34  ;;  %v4803_v0 = vsel %vm4767_vm14, %v6127_v34, 0.0  ;;  %v5376_v19 = vpack.c.bf16 %v6128_v30, %v6128_v30 }
 0x241   : > { %v4295_v31 = vsel %vm7734_vm12, %v4286_v49, %v4294_v20  ;;  %v4296_v50 = vrot.slane %v4294_v20, 4  ;;  %v4318_v60 = vshrl.u32 %v5373_v18, 16  ;;  %v4321_v47 = vshll.u32 %v5373_v18, 16 }
 0x242   : > { %4509 = vst [vmem:[%s7716_s28 + $0x58] sm:$0xf] %v4295_v31  ;;  %v4298_v17 = vshrl.u32 %v5371_v56, 16  ;;  %v4301_v28 = vshll.u32 %v5371_v56, 16  ;;  %v4838_v27 = vadd.f32 %v4837_v43, %v4803_v0  ;;  %v4881_v52 = vmul.f32 %v4803_v0, %v4803_v0 }
 0x243   : > { %v4320_v61 = vrot.slane %v4318_v60, 6  ;;  %v4323_v23 = vrot.slane %v4321_v47, 7  ;;  %v4348_v44 = vshrl.u32 %v5376_v19, 16  ;;  %v4351_v12 = vshll.u32 %v5376_v19, 16  ;;  %v8081_v60 = vpop.permute.xlu1 %4726 }
 0x244   : > { %vm4771_vm15 = vcmp.eq.s32.totalorder %v8034_v24, 1  ;;  %vm4773_vm10 = vcmp.eq.s32.totalorder %v4721_v14, 1  ;;  %v4300_v7 = vrot.slane %v4298_v17, 6  ;;  %v4303_v54 = vrot.slane %v4301_v28, 7 }
 0x245   : > { %v4839_v42 = vadd.f32 %v4838_v27, %v8011_v4  ;;  %v4916_v49 = vadd.f32 %v4915_v8, %v4881_v52  ;;  %v4324_v1 = vor.u32 %v4323_v23, %v4320_v61  ;;  %v4350_v5 = vrot.slane %v4348_v44, 6  ;;  %v4730_v8 = vpop.permute.xlu0 %4729 }
 0x246   : > { %v4353_v13 = vrot.slane %v4351_v12, 7  ;;  %v4808_v16 = vsel %vm4772_vm1, %v6128_v30, 0.0  ;;  %v4883_v63 = vmul.f32 %v4805_v51, %v4805_v51  ;;  %v4304_v9 = vor.u32 %v4303_v54, %v4300_v7 }
 0x247   : > { %v4917_v35 = vadd.f32 %v4916_v49, %v8026_v37  ;;  %v5374_v43 = vpack.c.bf16 %v6129_v53, %v6129_v53  ;;  %v4325_v34 = vsel %vm7734_vm12, %v4316_v26, %v4324_v1  ;;  %v4886_v18 = vmul.f32 %v4808_v16, %v4808_v16 }
 0x248   : > { %v8073_v20 = vor.u32 %v4353_v13, %v4350_v5  ;;  %v4806_v4 = vsel %vm4770_vm3, %v6129_v53, 0.0  ;;  %4512 = vst [vmem:[%s7716_s28 + $0x64] sm:$0xf] %v4325_v34  ;;  %v4305_v2 = vsel %vm7734_vm12, %v4296_v50, %v4304_v9  ;;  %v4306_v30 = vrot.slane %v4304_v9, 4 }
 0x249   : > { %v4328_v56 = vshrl.u32 %v5374_v43, 16  ;;  %v4331_v0 = vshll.u32 %v5374_v43, 16  ;;  %vm4776_vm2 = vcmp.eq.s32.totalorder %v4730_v8, 1  ;;  %v4326_v37 = vrot.slane %v4324_v1, 4  ;;  %4510 = vst [vmem:[%s7716_s28 + $0x5c] sm:$0xf] %v4305_v2  ;;  %v4733_v1 = vpop.permute.xlu1 %4732 }
 0x24a   : > { %v4840_v19 = vadd.f32 %v4839_v42, %v4805_v51  ;;  %v4884_v26 = vmul.f32 %v4806_v4, %v4806_v4  ;;  %v4918_v31 = vadd.f32 %v4917_v35, %v4883_v63  ;;  %v4315_v40 = vsel %vm7734_vm12, %v4306_v30, %v8022_v62 }
 0x24b   : > { %v4330_v53 = vrot.slane %v4328_v56, 6  ;;  %v4333_v47 = vrot.slane %v4331_v0, 7  ;;  %v6130_v50 = vadd.f32 %v7922_v36, %v7963_v45  ;;  %vm4774_vm4 = vcmp.eq.s32.totalorder %v8064_v41, 1  ;;  %4511 = vst [vmem:[%s7716_s28 + $0x60] sm:$0xf] %v4315_v40 }
 0x24c   : > { %v4841_v17 = vadd.f32 %v4840_v19, %v4806_v4  ;;  %v4919_v28 = vadd.f32 %v4918_v31, %v4884_v26  ;;  %v6131_v51 = vadd.f32 %v7926_v38, %v7972_v32  ;;  %v6132_v27 = vadd.f32 %v7955_v6, %v7996_v15 }
 0x24d   : > { %v4356_v52 = vrot.slane %v8073_v20, 4  ;;  %v4334_v62 = vor.u32 %v4333_v47, %v4330_v53  ;;  %v5377_v61 = vpack.c.bf16 %v6130_v50, %v6130_v50  ;;  %v6133_v23 = vadd.f32 %v7961_v21, %v8000_v58 }
 0x24e   : > { %v4809_v36 = vsel %vm4773_vm10, %v6130_v50, 0.0  ;;  %v5375_v45 = vpack.c.bf16 %v6131_v51, %v6131_v51  ;;  %v4807_v44 = vsel %vm4771_vm15, %v6131_v51, 0.0  ;;  %v5380_v12 = vpack.c.bf16 %v6132_v27, %v6132_v27 }
 0x24f   : > { %v4335_v38 = vsel %vm7734_vm12, %v4326_v37, %v4334_v62  ;;  %v4336_v32 = vrot.slane %v4334_v62, 4  ;;  %v4358_v7 = vshrl.u32 %v5377_v61, 16  ;;  %v4361_v6 = vshll.u32 %v5377_v61, 16 }
 0x250   : > { %4513 = vst [vmem:[%s7716_s28 + $0x68] sm:$0xf] %v4335_v38  ;;  %v4338_v15 = vshrl.u32 %v5375_v45, 16  ;;  %v4341_v54 = vshll.u32 %v5375_v45, 16  ;;  %v4842_v42 = vadd.f32 %v4841_v17, %v4807_v44  ;;  %v4885_v49 = vmul.f32 %v4807_v44, %v4807_v44 }
 0x251   : > { %v4360_v21 = vrot.slane %v4358_v7, 6  ;;  %v4363_v58 = vrot.slane %v4361_v6, 7  ;;  %v4388_v14 = vshrl.u32 %v5380_v12, 16  ;;  %v4391_v5 = vshll.u32 %v5380_v12, 16 }
 0x252   : > { %vm4775_vm6 = vcmp.eq.s32.totalorder %v8081_v60, 1  ;;  %vm4777_vm7 = vcmp.eq.s32.totalorder %v4733_v1, 1  ;;  %v4340_v24 = vrot.slane %v4338_v15, 6  ;;  %v4343_v13 = vrot.slane %v4341_v54, 7 }
 0x253   : > { %v4843_v63 = vadd.f32 %v4842_v42, %v4808_v16  ;;  %v4920_v9 = vadd.f32 %v4919_v28, %v4885_v49  ;;  %v4364_v35 = vor.u32 %v4363_v58, %v4360_v21  ;;  %v4390_v43 = vrot.slane %v4388_v14, 6  ;;  %v4736_v28 = vpop.permute.xlu0 %4735  ;;  %v4739_v42 = vpop.permute.xlu1 %4738 }
 0x254   : > { %v4393_v34 = vrot.slane %v4391_v5, 7  ;;  %v4812_v4 = vsel %vm4776_vm2, %v6132_v27, 0.0  ;;  %v4887_v2 = vmul.f32 %v4809_v36, %v4809_v36  ;;  %v4344_v30 = vor.u32 %v4343_v13, %v4340_v24 }
 0x255   : > { %v4921_v56 = vadd.f32 %v4920_v9, %v4886_v18  ;;  %v5378_v0 = vpack.c.bf16 %v6133_v23, %v6133_v23  ;;  %v4365_v37 = vsel %vm7734_vm12, %v4356_v52, %v4364_v35  ;;  %v4890_v26 = vmul.f32 %v4812_v4, %v4812_v4 }
 0x256   : > { %v8107_v19 = vor.u32 %v4393_v34, %v4390_v43  ;;  %v4810_v16 = vsel %vm4774_vm4, %v6133_v23, 0.0  ;;  %4516 = vst [vmem:[%s7716_s28 + $0x74] sm:$0xf] %v4365_v37  ;;  %v4345_v8 = vsel %vm7734_vm12, %v4336_v32, %v4344_v30  ;;  %v4346_v31 = vrot.slane %v4344_v30, 4 }
 0x257   : > { %v4368_v40 = vshrl.u32 %v5378_v0, 16  ;;  %v4371_v53 = vshll.u32 %v5378_v0, 16  ;;  %v4366_v47 = vrot.slane %v4364_v35, 4  ;;  %4514 = vst [vmem:[%s7716_s28 + $0x6c] sm:$0xf] %v4345_v8  ;;  %v4844_v18 = vadd.f32 %v4843_v63, %v4809_v36  ;;  %v4745_v8 = vpop.permute.xlu1 %4744 }
 0x258   : > { %v4888_v50 = vmul.f32 %v4810_v16, %v4810_v16  ;;  %v4922_v17 = vadd.f32 %v4921_v56, %v4887_v2  ;;  %v4355_v51 = vsel %vm7734_vm12, %v4346_v31, %v8073_v20  ;;  %v6134_v52 = vadd.f32 %v7970_v55, %v8007_v48 }
 0x259   : > { %v4370_v41 = vrot.slane %v4368_v40, 6  ;;  %v4373_v27 = vrot.slane %v4371_v53, 7  ;;  %4515 = vst [vmem:[%s7716_s28 + $0x70] sm:$0xf] %v4355_v51  ;;  %v4845_v62 = vadd.f32 %v4844_v18, %v4810_v16  ;;  %v6135_v23 = vadd.f32 %v7980_v29, %v8015_v22 }
 0x25a   : > { %v4923_v61 = vadd.f32 %v4922_v17, %v4888_v50  ;;  %v6136_v36 = vadd.f32 %v7998_v11, %v8041_v10  ;;  %v4396_v45 = vrot.slane %v8107_v19, 4  ;;  %v5381_v12 = vpack.c.bf16 %v6134_v52, %v6134_v52 }
 0x25b   : > { %v4374_v44 = vor.u32 %v4373_v27, %v4370_v41  ;;  %v6137_v20 = vadd.f32 %v8005_v25, %v8049_v39  ;;  %v4813_v38 = vsel %vm4777_vm7, %v6134_v52, 0.0  ;;  %v5379_v55 = vpack.c.bf16 %v6135_v23, %v6135_v23  ;;  %v4742_v25 = vpop.permute.xlu0 %4741 }
 0x25c   : > { %v4811_v48 = vsel %vm4775_vm6, %v6135_v23, 0.0  ;;  %v5384_v32 = vpack.c.bf16 %v6136_v36, %v6136_v36  ;;  %v4398_v7 = vshrl.u32 %v5381_v12, 16  ;;  %v4401_v11 = vshll.u32 %v5381_v12, 16 }
 0x25d   : > { %v4375_v29 = vsel %vm7734_vm12, %v4366_v47, %v4374_v44  ;;  %v4376_v22 = vrot.slane %v4374_v44, 4  ;;  %v4378_v10 = vshrl.u32 %v5379_v55, 16  ;;  %v4381_v6 = vshll.u32 %v5379_v55, 16 }
 0x25e   : > { %4517 = vst [vmem:[%s7716_s28 + $0x78] sm:$0xf] %v4375_v29  ;;  %v4846_v15 = vadd.f32 %v4845_v62, %v4811_v48  ;;  %v4889_v54 = vmul.f32 %v4811_v48, %v4811_v48  ;;  %v4400_v39 = vrot.slane %v4398_v7, 6  ;;  %v4403_v49 = vrot.slane %v4401_v11, 7 }
 0x25f   : > { %v4428_v1 = vshrl.u32 %v5384_v32, 16  ;;  %v4431_v21 = vshll.u32 %v5384_v32, 16  ;;  %v4380_v60 = vrot.slane %v4378_v10, 6  ;;  %v4383_v58 = vrot.slane %v4381_v6, 7  ;;  %v4527_v10 = vld [vmem:[%s7716_s28 + $0x98] sm:$0x3] }
 0x260   : > { %v4847_v14 = vadd.f32 %v4846_v15, %v4812_v4  ;;  %v4924_v5 = vadd.f32 %v4923_v61, %v4889_v54  ;;  %vm4778_vm8 = vcmp.eq.s32.totalorder %v4736_v28, 1  ;;  %v4404_v24 = vor.u32 %v4403_v49, %v4400_v39 }
 0x261   : > { %v4430_v13 = vrot.slane %v4428_v1, 6  ;;  %v4433_v63 = vrot.slane %v4431_v21, 7  ;;  %vm4780_vm9 = vcmp.eq.s32.totalorder %v4742_v25, 1  ;;  %v4384_v9 = vor.u32 %v4383_v58, %v4380_v60 }
 0x262   : > { %v4925_v35 = vadd.f32 %v4924_v5, %v4890_v26  ;;  %v5382_v43 = vpack.c.bf16 %v6137_v20, %v6137_v20  ;;  %v4405_v34 = vsel %vm7734_vm12, %v4396_v45, %v4404_v24  ;;  %v4891_v2 = vmul.f32 %v4813_v38, %v4813_v38 }
 0x263   : > { %v4816_v30 = vsel %vm4780_vm9, %v6136_v36, 0.0  ;;  %v4814_v56 = vsel %vm4778_vm8, %v6137_v20, 0.0  ;;  %4520 = vst [vmem:[%s7716_s28 + $0x84] sm:$0xf] %v4405_v34  ;;  %v4385_v4 = vsel %vm7734_vm12, %v4376_v22, %v4384_v9  ;;  %v4386_v0 = vrot.slane %v4384_v9, 4 }
 0x264   : > { %v4408_v37 = vshrl.u32 %v5382_v43, 16  ;;  %v4411_v16 = vshll.u32 %v5382_v43, 16  ;;  %4518 = vst [vmem:[%s7716_s28 + $0x7c] sm:$0xf] %v4385_v4  ;;  %v4434_v31 = vor.u32 %v4433_v63, %v4430_v13  ;;  %v4848_v40 = vadd.f32 %v4847_v14, %v4813_v38 }
 0x265   : > { %v4892_v26 = vmul.f32 %v4814_v56, %v4814_v56  ;;  %v4926_v53 = vadd.f32 %v4925_v35, %v4891_v2  ;;  %v4395_v47 = vsel %vm7734_vm12, %v4386_v0, %v8107_v19  ;;  %v6138_v17 = vadd.f32 %v8013_v57, %v8054_v46 }
 0x266   : > { %v4410_v18 = vrot.slane %v4408_v37, 6  ;;  %v4413_v50 = vrot.slane %v4411_v16, 7  ;;  %vm4779_vm11 = vcmp.eq.s32.totalorder %v4739_v42, 1  ;;  %4519 = vst [vmem:[%s7716_s28 + $0x80] sm:$0xf] %v4395_v47  ;;  %v4849_v28 = vadd.f32 %v4848_v40, %v4814_v56 }
 0x267   : > { %v4927_v51 = vadd.f32 %v4926_v53, %v4892_v26  ;;  %v6139_v41 = vadd.f32 %v8018_v3, %v8060_v59  ;;  %vm4781_vm13 = vcmp.eq.s32.totalorder %v4745_v8, 1  ;;  %v4406_v27 = vrot.slane %v4404_v24, 4 }
 0x268   : > { %v4414_v52 = vor.u32 %v4413_v50, %v4410_v18  ;;  %v5385_v62 = vpack.c.bf16 %v6138_v17, %v6138_v17  ;;  %v4894_v61 = vmul.f32 %v4816_v30, %v4816_v30  ;;  %vm4525_vm14 = vcmask 1041408  }
 0x269   : > { %v5383_v19 = vpack.c.bf16 %v6139_v41, %v6139_v41  ;;  %v4815_v23 = vsel %vm4779_vm11, %v6139_v41, 0.0  ;;  %v4436_v36 = vrot.slane %v4434_v31, 4  ;;  %v4817_v48 = vsel %vm4781_vm13, %v6138_v17, 0.0  ;;  %vm4526_vm0 = vmand %vm4525_vm14, %vm4085_vm5 }
 0x26a   : > { %v4415_v57 = vsel %vm7734_vm12, %v4406_v27, %v4414_v52  ;;  %v4438_v46 = vshrl.u32 %v5385_v62, 16  ;;  %v4441_v45 = vshll.u32 %v5385_v62, 16  ;;  %v4850_v20 = vadd.f32 %v4849_v28, %v4815_v23 }
 0x26b   : > { %4521 = vst [vmem:[%s7716_s28 + $0x88] sm:$0xf] %v4415_v57  ;;  %v4418_v44 = vshrl.u32 %v5383_v19, 16  ;;  %v4421_v12 = vshll.u32 %v5383_v19, 16  ;;  %v4893_v3 = vmul.f32 %v4815_v23, %v4815_v23  ;;  %v4416_v59 = vrot.slane %v4414_v52, 4 }
 0x26c   : > { %v4440_v38 = vrot.slane %v4438_v46, 6  ;;  %v4443_v55 = vrot.slane %v4441_v45, 7  ;;  %v4851_v22 = vadd.f32 %v4850_v20, %v4816_v30  ;;  %v4895_v6 = vmul.f32 %v4817_v48, %v4817_v48 }
 0x26d   : > { %v4420_v32 = vrot.slane %v4418_v44, 6  ;;  %v4423_v29 = vrot.slane %v4421_v12, 7  ;;  %v4928_v7 = vadd.f32 %v4927_v51, %v4893_v3 }
 0x26e   : > { %v4444_v11 = vor.u32 %v4443_v55, %v4440_v38  ;;  %v4852_v54 = vadd.f32 %v4851_v22, %v4817_v48 }
 0x26f   : > { %v4424_v15 = vor.u32 %v4423_v29, %v4420_v32  ;;  %v4929_v42 = vadd.f32 %v4928_v7, %v4894_v61 }
 0x270   : > { %v4445_v25 = vsel %vm7734_vm12, %v4436_v36, %v4444_v11  ;;  %v4446_v39 = vrot.slane %v4444_v11, 4  ;;  %v4853_v21 = vrot.slane %v4852_v54, 4 }
 0x271   : > { %4524 = vst [vmem:[%s7716_s28 + $0x94] sm:$0xf] %v4445_v25  ;;  %v4425_v49 = vsel %vm7734_vm12, %v4416_v59, %v4424_v15  ;;  %v4426_v1 = vrot.slane %v4424_v15, 4  ;;  %v4930_v60 = vadd.f32 %v4929_v42, %v4895_v6 }
 0x272   : > { %v4528_v58 = vsel %vm4526_vm0, %v4446_v39, %v4527_v10  ;;  %4522 = vst [vmem:[%s7716_s28 + $0x8c] sm:$0xf] %v4425_v49  ;;  %v4854_v5 = vadd.f32 %v4853_v21, %v4852_v54 }
 0x273   : > { %4529 = vst [vmem:[%s7716_s28 + $0x98] sm:$0x3] %v4528_v58  ;;  %v4435_v14 = vsel %vm7734_vm12, %v4426_v1, %v4434_v31  ;;  %v4931_v24 = vrot.slane %v4930_v60, 4 }
 0x274   : > { %4523 = vst [vmem:[%s7716_s28 + $0x90] sm:$0xf] %v4435_v14  ;;  %v4855_v13 = vrot.slane %v4854_v5, 2 }
 0x275   : > { %v4932_v63 = vadd.f32 %v4931_v24, %v4930_v60 }
 0x276   : > { %v4856_v9 = vadd.f32 %v4855_v13, %v4854_v5 }
 0x277   : > { %v4933_v35 = vrot.slane %v4932_v63, 2 }
 0x278   : > { %v4857_v43 = vrot.slane %v4856_v9, 1 }
 0x279   : > { %v4934_v34 = vadd.f32 %v4933_v35, %v4932_v63 }
 0x27a   : > { %v4858_v2 = vadd.f32 %v4857_v43, %v4856_v9 }
 0x27b   : > { %v4935_v30 = vrot.slane %v4934_v34, 1 }
 0x27c   : > { %4859 = vst [vmem:[%s292_s30] sm:$0x1] %v4858_v2 }
 0x27d   : > { %v4936_v33 = vadd.f32 %v4935_v30, %v4934_v34 }
 0x27f   : > { %4937 = vst [vmem:[%s295_s10] sm:$0x1] %v4936_v33 }
 0x280 PF: > { %s18_s24 = sadd.s32 1, %s6606_s24  }
 0x281   : > { %p15_p4 = scmp.ge.s32.totalorder %s18_s24, 4  }
 0x283   :  { %17 = sbr.rel (!%p15_p4) target bundleno = 1 (0x1), region = 102 }

// kernel: conv_block_forward.4
= control target key start
LH: loop header
LB: loop body
LE: loop exit
PB: predicated region body
PF: predicated region fallthrough
CT: control target
= control target key end

     0   :  { %s6948_s24 = smov 0   ;;  %s9490_s0 = inlined_call_operand.vmem [shape: f32[336,1], index: 0, kind: input, shape index: {}]   ;;  %s9491_s1 = inlined_call_operand.vmem [shape: f32[1,128], index: 1, kind: input, shape index: {}]   ;;  %s9492_s2 = inlined_call_operand.vmem [shape: f32[1,128], index: 2, kind: input, shape index: {}]   ;;  %s9493_s3 = inlined_call_operand.vmem [shape: bf16[2,336,128], index: 3, kind: input, shape index: {}]   ;;  %s9494_s4 = inlined_call_operand.vmem [shape: bf16[9,128,128], index: 4, kind: input, shape index: {}]   ;;  %s9495_s5 = inlined_call_operand.vmem [shape: bf16[2,336,128], index: 5, kind: output, shape index: {0}]   ;;  %s9496_s6 = inlined_call_operand.vmem [shape: f32[2,1,128], index: 6, kind: output, shape index: {1}]   ;;  %s9497_s7 = inlined_call_operand.vmem [shape: f32[2,1,128], index: 7, kind: output, shape index: {2}]  }
   0x1 LB: > { %s5340_s25 = sadd.s32 4294967295, %s6905_s24   ;;  %p5344_p0 = scmp.ge.s32.totalorder %s6905_s24, 1  ;;  %s6905_s24 = sphi %s6948_s24, %s18_s24  }
   0x2   : > { %p242_p1 = scmp.lt.s32.totalorder %s6905_s24, 3 }
   0x4   : > { %p243_p2 = pnand %p5344_p0, %p242_p1 }
   0x6   : > { %246 = sbr.rel (%p243_p2) target bundleno = 777 (0x309), region = 40 }
   0xd   : > { %v523_v0 = vld [vmem:[%s9490_s0 + $0x10] sm:$0xff]  ;;  %v521_v1 = vld [vmem:[%s9490_s0] sm:$0xff]  ;;  %v524_v2 = vld [vmem:[%s9490_s0 + $0x18] sm:$0xff]  ;;  %v6907_v3 = vmov 0   ;;  %p7090_p3 = scmp.lt.s32.totalorder %s5340_s25, 1 }
   0xe   : > { %6744 = vset.pattern.permute.xlu1 %v6907_v3  ;;  %6743 = vset.pattern.permute.xlu0 %v6907_v3  ;;  %vm565_vm0 = vcmp.gt.f32.partialorder %v523_v0, 0.0  ;;  %vm563_vm1 = vcmp.gt.f32.partialorder %v521_v1, 0.0  ;;  %vm566_vm2 = vcmp.gt.f32.partialorder %v524_v2, 0.0  ;;  %v522_v4 = vld [vmem:[%s9490_s0 + $0x8] sm:$0xff]  ;;  %v525_v8 = vld [vmem:[%s9490_s0 + $0x20] sm:$0xff]  ;;  %v528_v11 = vld [vmem:[%s9490_s0 + $0x38] sm:$0xff] }
   0xf   : > { %v607_v5 = vsel %vm565_vm0, 1, %v6907_v3  ;;  %v605_v6 = vsel %vm563_vm1, 1, %v6907_v3  ;;  %vm564_vm3 = vcmp.gt.f32.partialorder %v522_v4, 0.0  ;;  %v526_v7 = vld [vmem:[%s9490_s0 + $0x28] sm:$0xff]  ;;  %v608_v9 = vsel %vm566_vm2, 1, %v6907_v3  ;;  %v527_v12 = vld [vmem:[%s9490_s0 + $0x30] sm:$0xff] }
  0x10   : > { %654 = vperm.xlu1 %6744, %v607_v5   ;;  %648 = vperm.xlu0 %6743, %v605_v6   ;;  %v606_v10 = vsel %vm564_vm3, 1, %v6907_v3  ;;  %vm568_vm4 = vcmp.gt.f32.partialorder %v526_v7, 0.0  ;;  %vm567_vm5 = vcmp.gt.f32.partialorder %v525_v8, 0.0  ;;  %vm570_vm6 = vcmp.gt.f32.partialorder %v528_v11, 0.0  ;;  %v530_v15 = vld [vmem:[%s9490_s0 + $0x48] sm:$0xff]  ;;  %v529_v16 = vld [vmem:[%s9490_s0 + $0x40] sm:$0xff] }
  0x11   : > { %v610_v13 = vsel %vm568_vm4, 1, %v6907_v3  ;;  %v609_v14 = vsel %vm567_vm5, 1, %v6907_v3  ;;  %vm569_vm7 = vcmp.gt.f32.partialorder %v527_v12, 0.0  ;;  %v612_v17 = vsel %vm570_vm6, 1, %v6907_v3  ;;  %v532_v19 = vld [vmem:[%s9490_s0 + $0x58] sm:$0xff]  ;;  %v531_v20 = vld [vmem:[%s9490_s0 + $0x50] sm:$0xff] }
  0x12   : > { %v611_v18 = vsel %vm569_vm7, 1, %v6907_v3  ;;  %vm572_vm8 = vcmp.gt.f32.partialorder %v530_v15, 0.0  ;;  %vm571_vm9 = vcmp.gt.f32.partialorder %v529_v16, 0.0  ;;  %vm574_vm10 = vcmp.gt.f32.partialorder %v532_v19, 0.0  ;;  %v534_v23 = vld [vmem:[%s9490_s0 + $0x68] sm:$0xff]  ;;  %v533_v24 = vld [vmem:[%s9490_s0 + $0x60] sm:$0xff] }
  0x13   : > { %v614_v21 = vsel %vm572_vm8, 1, %v6907_v3  ;;  %v613_v22 = vsel %vm571_vm9, 1, %v6907_v3  ;;  %vm573_vm11 = vcmp.gt.f32.partialorder %v531_v20, 0.0  ;;  %v616_v25 = vsel %vm574_vm10, 1, %v6907_v3  ;;  %v536_v27 = vld [vmem:[%s9490_s0 + $0x78] sm:$0xff]  ;;  %v535_v28 = vld [vmem:[%s9490_s0 + $0x70] sm:$0xff] }
  0x14   : > { %657 = vperm.xlu1 %6744, %v608_v9   ;;  %651 = vperm.xlu0 %6743, %v606_v10   ;;  %v615_v26 = vsel %vm573_vm11, 1, %v6907_v3  ;;  %vm576_vm12 = vcmp.gt.f32.partialorder %v534_v23, 0.0  ;;  %vm575_vm13 = vcmp.gt.f32.partialorder %v533_v24, 0.0  ;;  %vm578_vm14 = vcmp.gt.f32.partialorder %v536_v27, 0.0  ;;  %v538_v31 = vld [vmem:[%s9490_s0 + $0x88] sm:$0xff]  ;;  %v537_v32 = vld [vmem:[%s9490_s0 + $0x80] sm:$0xff] }
  0x15   : > { %v618_v29 = vsel %vm576_vm12, 1, %v6907_v3  ;;  %v617_v30 = vsel %vm575_vm13, 1, %v6907_v3  ;;  %vm577_vm15 = vcmp.gt.f32.partialorder %v535_v28, 0.0  ;;  %v620_v33 = vsel %vm578_vm14, 1, %v6907_v3  ;;  %v540_v35 = vld [vmem:[%s9490_s0 + $0x98] sm:$0xff]  ;;  %v539_v36 = vld [vmem:[%s9490_s0 + $0x90] sm:$0xff] }
  0x16   : > { %v619_v34 = vsel %vm577_vm15, 1, %v6907_v3  ;;  %vm580_vm0 = vcmp.gt.f32.partialorder %v538_v31, 0.0  ;;  %vm579_vm1 = vcmp.gt.f32.partialorder %v537_v32, 0.0  ;;  %v6745_v37 = vld [vmem:[%s9494_s4 + $0x40] sm:$0xff]   ;;  %vm582_vm2 = vcmp.gt.f32.partialorder %v540_v35, 0.0  ;;  %v542_v40 = vld [vmem:[%s9490_s0 + $0xa8] sm:$0xff] }
  0x17   : > { %v622_v38 = vsel %vm580_vm0, 1, %v6907_v3  ;;  %v621_v39 = vsel %vm579_vm1, 1, %v6907_v3  ;;  %vm581_vm3 = vcmp.gt.f32.partialorder %v539_v36, 0.0  ;;  %5961 = vmatprep.subr.bf16.mxu1 %v6745_v37  ;;  %v6746_v41 = vld [vmem:[%s9494_s4 + $0x48] sm:$0xff]   ;;  %v541_v42 = vld [vmem:[%s9490_s0 + $0xa0] sm:$0xff]  ;;  %v624_v44 = vsel %vm582_vm2, 1, %v6907_v3 }
  0x18   : > { %663 = vperm.xlu1 %6744, %v610_v13   ;;  %660 = vperm.xlu0 %6743, %v609_v14   ;;  %v6747_v43 = vld [vmem:[%s9494_s4 + $0x100] sm:$0xff]   ;;  %v623_v45 = vsel %vm581_vm3, 1, %v6907_v3  ;;  %vm584_vm4 = vcmp.gt.f32.partialorder %v542_v40, 0.0  ;;  %v544_v46 = vld [vmem:[%s9490_s0 + $0xb8] sm:$0xff]  ;;  %v543_v47 = vld [vmem:[%s9490_s0 + $0xb0] sm:$0xff]  ;;  %vm583_vm5 = vcmp.gt.f32.partialorder %v541_v42, 0.0 }
  0x19   : > { %5962 = vmatpush3.bf16.msra.mxu1 %v6745_v37  ;;  %v6748_v48 = vld [vmem:[%s9494_s4 + $0x50] sm:$0xff]   ;;  %v546_v49 = vld [vmem:[%s9490_s0 + $0xc8] sm:$0xff]  ;;  %6169 = vmatprep.subr.bf16.mxu0 %v6747_v43  ;;  %v545_v50 = vld [vmem:[%s9490_s0 + $0xc0] sm:$0xff]  ;;  %v626_v51 = vsel %vm584_vm4, 1, %v6907_v3  ;;  %vm586_vm6 = vcmp.gt.f32.partialorder %v544_v46, 0.0  ;;  %v625_v54 = vsel %vm583_vm5, 1, %v6907_v3 }
  0x1a   : > { %5963 = vmatprep.subr.bf16.mxu1 %v6746_v41  ;;  %6170 = vmatpush3.bf16.msra.mxu0 %v6747_v43  ;;  %v548_v52 = vld [vmem:[%s9490_s0 + $0xd8] sm:$0xff]  ;;  %v6749_v53 = vld [vmem:[%s9494_s4 + $0x108] sm:$0xff]   ;;  %vm585_vm7 = vcmp.gt.f32.partialorder %v543_v47, 0.0  ;;  %v547_v55 = vld [vmem:[%s9490_s0 + $0xd0] sm:$0xff]  ;;  %vm588_vm8 = vcmp.gt.f32.partialorder %v546_v49, 0.0  ;;  %v628_v60 = vsel %vm586_vm6, 1, %v6907_v3 }
  0x1b   : > { %v6750_v56 = vld [vmem:[%s9494_s4 + $0x58] sm:$0xff]   ;;  %v550_v57 = vld [vmem:[%s9490_s0 + $0xe8] sm:$0xff]  ;;  %6171 = vmatprep.subr.bf16.mxu0 %v6749_v53  ;;  %v549_v58 = vld [vmem:[%s9490_s0 + $0xe0] sm:$0xff]  ;;  %v627_v61 = vsel %vm585_vm7, 1, %v6907_v3  ;;  %vm587_vm9 = vcmp.gt.f32.partialorder %v545_v50, 0.0  ;;  %v630_v63 = vsel %vm588_vm8, 1, %v6907_v3 }
  0x1c   : > { %669 = vperm.xlu1 %6744, %v612_v17   ;;  %666 = vperm.xlu0 %6743, %v611_v18   ;;  %v6751_v59 = vld [vmem:[%s9494_s4 + $0x110] sm:$0xff]   ;;  %v552_v62 = vld [vmem:[%s9490_s0 + $0xf8] sm:$0xff]  ;;  %vm590_vm10 = vcmp.gt.f32.partialorder %v548_v52, 0.0  ;;  %vm589_vm11 = vcmp.gt.f32.partialorder %v547_v55, 0.0  ;;  %v6752_v0 = vld [vmem:[%s9494_s4 + $0x60] sm:$0xff]   ;;  %vm592_vm12 = vcmp.gt.f32.partialorder %v550_v57, 0.0 }
  0x1d   : > { %5964 = vmatpush3.bf16.msra.mxu1 %v6746_v41  ;;  %vm591_vm13 = vcmp.gt.f32.partialorder %v549_v58, 0.0  ;;  %v551_v1 = vld [vmem:[%s9490_s0 + $0xf0] sm:$0xff]  ;;  %v554_v2 = vld [vmem:[%s9490_s0 + $0x108] sm:$0xff]  ;;  %v6753_v4 = vld [vmem:[%s9494_s4 + $0x118] sm:$0xff]   ;;  %vm594_vm14 = vcmp.gt.f32.partialorder %v552_v62, 0.0  ;;  %v629_v6 = vsel %vm587_vm9, 1, %v6907_v3 }
  0x1e   : > { %5965 = vmatprep.subr.bf16.mxu1 %v6748_v48  ;;  %6172 = vmatpush3.bf16.msra.mxu0 %v6749_v53  ;;  %v553_v5 = vld [vmem:[%s9490_s0 + $0x100] sm:$0xff]  ;;  %v632_v7 = vsel %vm590_vm10, 1, %v6907_v3  ;;  %v556_v8 = vld [vmem:[%s9490_s0 + $0x118] sm:$0xff]  ;;  %v555_v9 = vld [vmem:[%s9490_s0 + $0x110] sm:$0xff]  ;;  %v631_v10 = vsel %vm589_vm11, 1, %v6907_v3  ;;  %v634_v11 = vsel %vm592_vm12, 1, %v6907_v3 }
  0x1f   : > { %6173 = vmatprep.subr.bf16.mxu0 %v6751_v59  ;;  %v6754_v12 = vld [vmem:[%s9494_s4 + $0x68] sm:$0xff]   ;;  %v6755_v13 = vld [vmem:[%s9494_s4 + $0x120] sm:$0xff]   ;;  %v633_v14 = vsel %vm591_vm13, 1, %v6907_v3  ;;  %v7143_v15 = vsel %vm594_vm14, 1, %v6907_v3  ;;  %vm593_vm15 = vcmp.gt.f32.partialorder %v551_v1, 0.0  ;;  %vm596_vm0 = vcmp.gt.f32.partialorder %v554_v2, 0.0 }
  0x20   : > { %675 = vperm.xlu1 %6744, %v614_v21   ;;  %672 = vperm.xlu0 %6743, %v613_v22   ;;  %v558_v16 = vld [vmem:[%s9490_s0 + $0x128] sm:$0xff]  ;;  %v557_v17 = vld [vmem:[%s9490_s0 + $0x120] sm:$0xff]  ;;  %vm595_vm1 = vcmp.gt.f32.partialorder %v553_v5, 0.0  ;;  %vm598_vm2 = vcmp.gt.f32.partialorder %v556_v8, 0.0  ;;  %vm597_vm3 = vcmp.gt.f32.partialorder %v555_v9, 0.0  ;;  %v560_v18 = vld [vmem:[%s9490_s0 + $0x138] sm:$0xff] }
  0x21   : > { %5966 = vmatpush3.bf16.msra.mxu1 %v6748_v48  ;;  %vm600_vm4 = vcmp.gt.f32.partialorder %v558_v16, 0.0  ;;  %vm599_vm5 = vcmp.gt.f32.partialorder %v557_v17, 0.0  ;;  %v6756_v19 = vld [vmem:[%s9494_s4 + $0x70] sm:$0xff]   ;;  %v6757_v20 = vld [vmem:[%s9494_s4 + $0x128] sm:$0xff]   ;;  %v635_v21 = vsel %vm593_vm15, 1, %v6907_v3  ;;  %v7164_v22 = vsel %vm596_vm0, 1, %v6907_v3 }
  0x22   : > { %5967 = vmatprep.subr.bf16.mxu1 %v6750_v56  ;;  %6174 = vmatpush3.bf16.msra.mxu0 %v6751_v59  ;;  %v559_v23 = vld [vmem:[%s9490_s0 + $0x130] sm:$0xff]  ;;  %v562_v24 = vld [vmem:[%s9490_s0 + $0x148] sm:$0xff]  ;;  %v7179_v27 = vsel %vm597_vm3, 1, %v6907_v3  ;;  %v561_v28 = vld [vmem:[%s9490_s0 + $0x140] sm:$0xff]  ;;  %vm602_vm6 = vcmp.gt.f32.partialorder %v560_v18, 0.0  ;;  %s9835_s25 = smov (!%p7090_p3, %s5340_s25), 1 }
  0x23   : > { %6175 = vmatprep.subr.bf16.mxu0 %v6753_v4  ;;  %v4828_v31 = vld [vmem:[%s9490_s0 + $0x1b] sm:$0xff]  ;;  %vm601_vm7 = vcmp.gt.f32.partialorder %v559_v23, 0.0  ;;  %vm604_vm8 = vcmp.gt.f32.partialorder %v562_v24, 0.0  ;;  %vm603_vm9 = vcmp.gt.f32.partialorder %v561_v28, 0.0  ;;  %v7205_v35 = vsel %vm602_vm6, 1, %v6907_v3  ;;  %v4830_v36 = vld [vmem:[%s9490_s0 + $0x2b] sm:$0xff]  ;;  %s292_s16 = scalar_lea.vmem %s9496_s6, %s9835_s25  ;;  %s295_s20 = scalar_lea.vmem %s9497_s7, %s9835_s25 }
  0x24   : > { %681 = vperm.xlu1 %6744, %v616_v25   ;;  %678 = vperm.xlu0 %6743, %v615_v26   ;;  %v637_v25 = vsel %vm595_vm1, 1, %v6907_v3  ;;  %v7176_v26 = vsel %vm598_vm2, 1, %v6907_v3  ;;  %v6758_v32 = vld [vmem:[%s9494_s4 + $0x78] sm:$0xff]   ;;  %vm4864_vm10 = vcmp.gt.f32.partialorder %v4828_v31, 0.0  ;;  %v4829_v37 = vld [vmem:[%s9490_s0 + $0x23] sm:$0xff]  ;;  %v7230_v42 = vsel %vm603_vm9, 1, %v6907_v3 }
  0x25   : > { %5968 = vmatpush3.bf16.msra.mxu1 %v6750_v56  ;;  %v4832_v40 = vld [vmem:[%s9490_s0 + $0x3b] sm:$0xff]  ;;  %vm4866_vm12 = vcmp.gt.f32.partialorder %v4830_v36, 0.0  ;;  %vm4865_vm13 = vcmp.gt.f32.partialorder %v4829_v37, 0.0  ;;  %v4834_v46 = vld [vmem:[%s9490_s0 + $0x4b] sm:$0xff]  ;;  %v4833_v47 = vld [vmem:[%s9490_s0 + $0x43] sm:$0xff]  ;;  %s6733_s30 = smul.u32 168, %s9835_s25 }
  0x26   : > { %5969 = vmatprep.subr.bf16.mxu1 %v6752_v0  ;;  %6176 = vmatpush3.bf16.msra.mxu0 %v6753_v4  ;;  %v7227_v41 = vld [vmem:[%s9494_s4] sm:$0xff]   ;;  %v6761_v43 = vld [vmem:[%s9494_s4 + $0x138] sm:$0xff]   ;;  %vm4868_vm14 = vcmp.gt.f32.partialorder %v4832_v40, 0.0  ;;  %v7256_v50 = vsel %vm4866_vm12, 1, %v6907_v3  ;;  %vm4870_vm0 = vcmp.gt.f32.partialorder %v4834_v46, 0.0  ;;  %vm4869_vm1 = vcmp.gt.f32.partialorder %v4833_v47, 0.0 }
  0x27   : > { %6177 = vmatprep.subr.bf16.mxu0 %v6755_v13  ;;  %v6762_v49 = vld [vmem:[%s9494_s4 + $0x140] sm:$0xff]   ;;  %v7265_v53 = vsel %vm4868_vm14, 1, %v6907_v3  ;;  %v4838_v55 = vld [vmem:[%s9490_s0 + $0x6b] sm:$0xff]  ;;  %v7290_v59 = vsel %vm4870_vm0, 1, %v6907_v3  ;;  %s7328_s17 = scalar_lea.vmem %s9493_s3, %s6733_s30  ;;  %v4843_v8 = vld [vmem:[%s9490_s0 + $0x93] sm:$0xff]  ;;  %s9021_s14 = scalar_lea.vmem %s9495_s5, %s6733_s30 }
  0x28   : > { %687 = vperm.xlu1 %6744, %v618_v29   ;;  %684 = vperm.xlu0 %6743, %v617_v30   ;;  %v7186_v29 = vsel %vm600_vm4, 1, %v6907_v3  ;;  %v7190_v30 = vsel %vm599_vm5, 1, %v6907_v3  ;;  %v4836_v52 = vld [vmem:[%s9490_s0 + $0x5b] sm:$0xff]  ;;  %v4837_v57 = vld [vmem:[%s9490_s0 + $0x63] sm:$0xff]  ;;  %vm4874_vm4 = vcmp.gt.f32.partialorder %v4838_v55, 0.0  ;;  %v4842_v62 = vld [vmem:[%s9490_s0 + $0x8b] sm:$0xff] }
  0x29   : > { %5970 = vmatpush3.bf16.msra.mxu1 %v6752_v0  ;;  %vm4872_vm2 = vcmp.gt.f32.partialorder %v4836_v52, 0.0  ;;  %v4840_v58 = vld [vmem:[%s9490_s0 + $0x7b] sm:$0xff]  ;;  %vm4873_vm5 = vcmp.gt.f32.partialorder %v4837_v57, 0.0  ;;  %v4841_v0 = vld [vmem:[%s9490_s0 + $0x83] sm:$0xff]  ;;  %v7315_v2 = vsel %vm4874_vm4, 1, %v6907_v3  ;;  %v4846_v16 = vld [vmem:[%s9490_s0 + $0xab] sm:$0xff] }
  0x2a   : > { %5971 = vmatprep.subr.bf16.mxu1 %v6754_v12  ;;  %6178 = vmatpush3.bf16.msra.mxu0 %v6755_v13  ;;  %vm4876_vm6 = vcmp.gt.f32.partialorder %v4840_v58, 0.0  ;;  %v7318_v4 = vsel %vm4873_vm5, 1, %v6907_v3  ;;  %v4844_v5 = vld [vmem:[%s9490_s0 + $0x9b] sm:$0xff]  ;;  %v5723_v9 = vld [vmem:[%s7328_s17 + $0x88] sm:$0xff]   ;;  %vm4877_vm9 = vcmp.gt.f32.partialorder %v4841_v0, 0.0  ;;  %v4847_v28 = vld [vmem:[%s9490_s0 + $0xb3] sm:$0xff] }
  0x2b   : > { %6179 = vmatprep.subr.bf16.mxu0 %v6757_v20  ;;  %v7353_v13 = vld [vmem:[%s9492_s2] ss:$0 sm:$0xff]  ;;  %vm4882_vm12 = vcmp.gt.f32.partialorder %v4846_v16, 0.0  ;;  %v4849_v58 = vld [vmem:[%s9490_s0 + $0xc3] sm:$0xff] }
  0x2c   : > { %693 = vperm.xlu1 %6744, %v620_v33   ;;  %690 = vperm.xlu0 %6743, %v619_v34   ;;  %v6759_v33 = vld [vmem:[%s9494_s4 + $0x130] sm:$0xff]   ;;  %v4848_v23 = vld [vmem:[%s9490_s0 + $0xbb] sm:$0xff] }
  0x2d   : > { %5972 = vmatpush3.bf16.msra.mxu1 %v6754_v12  ;;  %v4827_v34 = vld [vmem:[%s9490_s0 + $0x13] sm:$0xff]  ;;  %v5694_v12 = vunpack.c.h.bf16 %v5723_v9  ;;  %v5726_v31 = vld [vmem:[%s7328_s17 + $0xa0] sm:$0xff]   ;;  %vm4884_vm14 = vcmp.gt.f32.partialorder %v4848_v23, 0.0 }
  0x2e   : > { %5973 = vmatprep.subr.bf16.mxu1 %v6756_v19  ;;  %6180 = vmatpush3.bf16.msra.mxu0 %v6757_v20  ;;  %vm4863_vm11 = vcmp.gt.f32.partialorder %v4827_v34, 0.0 }
  0x2f   : > { %6181 = vmatprep.subr.bf16.mxu0 %v6759_v33  ;;  %v7249_v48 = vsel %vm4863_vm11, 1, %v6907_v3  ;;  %vm4879_vm11 = vcmp.gt.f32.partialorder %v4843_v8, 0.0  ;;  %v5708_v8 = vld [vmem:[%s7328_s17 + $0x10] sm:$0xff]  }
  0x30   : > { %699 = vperm.xlu1 %6744, %v622_v38   ;;  %696 = vperm.xlu0 %6743, %v621_v39   ;;  %v7215_v38 = vsel %vm601_vm7, 1, %v6907_v3  ;;  %v7219_v39 = vsel %vm604_vm8, 1, %v6907_v3  ;;  %vm4878_vm8 = vcmp.gt.f32.partialorder %v4842_v62, 0.0 }
  0x31   : > { %5974 = vmatpush3.bf16.msra.mxu1 %v6756_v19  ;;  %v4845_v19 = vld [vmem:[%s9490_s0 + $0xa3] sm:$0xff] }
  0x32   : > { %5975 = vmatprep.subr.bf16.mxu1 %v6758_v32  ;;  %6182 = vmatpush3.bf16.msra.mxu0 %v6759_v33  ;;  %v4850_v33 = vld [vmem:[%s9490_s0 + $0xcb] sm:$0xff] }
  0x33   : > { %6183 = vmatprep.subr.bf16.mxu0 %v6761_v43  ;;  %vm4886_vm0 = vcmp.gt.f32.partialorder %v4850_v33, 0.0  ;;  %v4856_v33 = vld [vmem:[%s9490_s0 + $0xfb] sm:$0xff] }
  0x34   : > { %705 = vperm.xlu1 %6744, %v624_v44   ;;  %702 = vperm.xlu0 %6743, %v623_v45   ;;  %v7236_v44 = vsel %vm4864_vm10, 1, %v6907_v3  ;;  %v4831_v45 = vld [vmem:[%s9490_s0 + $0x33] sm:$0xff]  ;;  %vm4880_vm10 = vcmp.gt.f32.partialorder %v4844_v5, 0.0  ;;  %v7441_v57 = vsel %vm4886_vm0, 1, %v6907_v3  ;;  %vm951_vm0 = vsmask.f32 7424 }
  0x35   : > { %5976 = vmatpush3.bf16.msra.mxu1 %v6758_v32  ;;  %vm4867_vm15 = vcmp.gt.f32.partialorder %v4831_v45, 0.0  ;;  %v7395_v32 = vsel %vm4879_vm11, 1, %v6907_v3  ;;  %v4851_v5 = vld [vmem:[%s9490_s0 + $0xd3] sm:$0xff] }
  0x36   : > { %6013 = vmatprep.subr.bf16.mxu1 %v7227_v41  ;;  %6184 = vmatpush3.bf16.msra.mxu0 %v6761_v43  ;;  %v7281_v56 = vsel %vm4867_vm15, 1, %v6907_v3  ;;  %vm4883_vm15 = vcmp.gt.f32.partialorder %v4847_v28, 0.0  ;;  %v4853_v28 = vld [vmem:[%s9490_s0 + $0xe3] sm:$0xff] }
  0x37   : > { %6221 = vmatprep.subr.bf16.mxu0 %v6762_v49  ;;  %v7438_v55 = vsel %vm4883_vm15, 1, %v6907_v3  ;;  %vm4889_vm5 = vcmp.gt.f32.partialorder %v4853_v28, 0.0 }
  0x38   : > { %711 = vperm.xlu1 %6744, %v626_v51   ;;  %708 = vperm.xlu0 %6743, %v625_v54   ;;  %v7259_v51 = vsel %vm4865_vm13, 1, %v6907_v3  ;;  %v4835_v54 = vld [vmem:[%s9490_s0 + $0x53] sm:$0xff]  ;;  %vm4881_vm13 = vcmp.gt.f32.partialorder %v4845_v19, 0.0  ;;  %v5710_v19 = vld [vmem:[%s7328_s17 + $0x20] sm:$0xff]  }
  0x39   : > { %vm4871_vm3 = vcmp.gt.f32.partialorder %v4835_v54, 0.0  ;;  %v7429_v52 = vsel %vm4881_vm13, 1, %v6907_v3  ;;  %v7435_v54 = vsel %vm4884_vm14, 1, %v6907_v3 }
  0x3a   : > { %v7312_v1 = vsel %vm4871_vm3, 1, %v6907_v3  ;;  %vm4887_vm3 = vcmp.gt.f32.partialorder %v4851_v5, 0.0 }
  0x3c   : > { %717 = vperm.xlu1 %6744, %v628_v60   ;;  %714 = vperm.xlu0 %6743, %v627_v61   ;;  %v4839_v60 = vld [vmem:[%s9490_s0 + $0x73] sm:$0xff]  ;;  %v7296_v61 = vsel %vm4869_vm1, 1, %v6907_v3  ;;  %vm4885_vm1 = vcmp.gt.f32.partialorder %v4849_v58, 0.0  ;;  %v4858_v58 = vld [vmem:[%s9490_s0 + $0x10b] sm:$0xff] }
  0x3d   : > { %vm4875_vm7 = vcmp.gt.f32.partialorder %v4839_v60, 0.0  ;;  %v5707_v60 = vld [vmem:[%s7328_s17 + $0x8] sm:$0xff]  }
  0x3e   : > { %v5629_v62 = vunpack.c.l.bf16 %v5707_v60 }
  0x40   : > { %723 = vperm.xlu1 %6744, %v630_v63   ;;  %720 = vperm.xlu0 %6743, %v629_v6   ;;  %v7306_v63 = vsel %vm4872_vm2, 1, %v6907_v3  ;;  %v7333_v6 = vsel %vm4876_vm6, 1, %v6907_v3  ;;  %vm4892_vm6 = vcmp.gt.f32.partialorder %v4856_v33, 0.0  ;;  %v4859_v33 = vld [vmem:[%s9490_s0 + $0x113] sm:$0xff] }
  0x41   : > { %vm4895_vm11 = vcmp.gt.f32.partialorder %v4859_v33, 0.0 }
  0x44   : > { %729 = vperm.xlu1 %6744, %v632_v7   ;;  %726 = vperm.xlu0 %6743, %v631_v10   ;;  %v7336_v7 = vsel %vm4875_vm7, 1, %v6907_v3  ;;  %v5724_v10 = vld [vmem:[%s7328_s17 + $0x90] sm:$0xff]  }
  0x45   : > { %v5698_v18 = vunpack.c.h.bf16 %v5724_v10 }
  0x48   : > { %735 = vperm.xlu1 %6744, %v634_v11   ;;  %732 = vperm.xlu0 %6743, %v633_v14   ;;  %v7346_v11 = vld [vmem:[%s9491_s1] ss:$0 sm:$0xff]  ;;  %v5693_v14 = vunpack.c.l.bf16 %v5723_v9  ;;  %v7460_v9 = vsel %vm4885_vm1, 1, %v6907_v3 }
  0x49   : > { %v423_v17 = vmul.f32 %v5694_v12, %v7346_v11  ;;  %v390_v12 = vmul.f32 %v5629_v62, %v7346_v11 }
  0x4a   : > { %v422_v20 = vmul.f32 %v5693_v14, %v7346_v11 }
  0x4b   : > { %v7372_v24 = vadd.f32 %v7353_v13, %v423_v17 }
  0x4c   : > { %741 = vperm.xlu1 %6744, %v7143_v15   ;;  %738 = vperm.xlu0 %6743, %v635_v21   ;;  %v5725_v15 = vld [vmem:[%s7328_s17 + $0x98] sm:$0xff]   ;;  %v5697_v21 = vunpack.c.l.bf16 %v5724_v10 }
  0x4d   : > { %9586 = vst [vmem:[#allocation3_spill] sm:$0xff] %v7372_v24  ;;  %v5701_v36 = vunpack.c.l.bf16 %v5725_v15  ;;  %v5709_v10 = vld [vmem:[%s7328_s17 + $0x18] sm:$0xff]  }
  0x50   : > { %747 = vperm.xlu1 %6744, %v7164_v22   ;;  %744 = vperm.xlu0 %6743, %v637_v25   ;;  %v7366_v22 = vsel %vm4878_vm8, 1, %v6907_v3  ;;  %v425_v25 = vmul.f32 %v5698_v18, %v7346_v11  ;;  %v5638_v18 = vunpack.c.h.bf16 %v5709_v10  ;;  %vm4894_vm8 = vcmp.gt.f32.partialorder %v4858_v58, 0.0 }
  0x52   : > { %v7401_v34 = vadd.f32 %v7353_v13, %v425_v25 }
  0x54   : > { %753 = vperm.xlu1 %6744, %v7176_v26   ;;  %750 = vperm.xlu0 %6743, %v7179_v27   ;;  %v7379_v26 = vsel %vm4877_vm9, 1, %v6907_v3  ;;  %v7383_v27 = vsel %vm4880_vm10, 1, %v6907_v3 }
  0x58   : > { %759 = vperm.xlu1 %6744, %v7186_v29   ;;  %756 = vperm.xlu0 %6743, %v7190_v30   ;;  %v7389_v29 = vadd.f32 %v7353_v13, %v422_v20  ;;  %v424_v30 = vmul.f32 %v5697_v21, %v7346_v11  ;;  %v5637_v20 = vunpack.c.l.bf16 %v5709_v10  ;;  %v7474_v21 = vadd.f32 %v7353_v13, %v390_v12 }
  0x59   : > { %v7614_v10 = vsel %vm4895_vm11, 1, %v6907_v3 }
  0x5a   : > { %9587 = vst [vmem:[#allocation4_spill] sm:$0xff] %v7389_v29  ;;  %v7404_v37 = vadd.f32 %v7353_v13, %v424_v30  ;;  %9588 = vst [vmem:[#allocation5_spill] sm:$0xff] %v7474_v21 }
  0x5c   : > { %765 = vperm.xlu1 %6744, %v7205_v35   ;;  %762 = vperm.xlu0 %6743, %v7215_v38   ;;  %v5702_v35 = vunpack.c.h.bf16 %v5725_v15  ;;  %v5706_v38 = vunpack.c.h.bf16 %v5726_v31  ;;  %v5633_v15 = vunpack.c.l.bf16 %v5708_v8 }
  0x5e   : > { %v427_v40 = vmul.f32 %v5702_v35, %v7346_v11  ;;  %v429_v43 = vmul.f32 %v5706_v38, %v7346_v11  ;;  %v392_v25 = vmul.f32 %v5633_v15, %v7346_v11  ;;  %v394_v35 = vmul.f32 %v5637_v20, %v7346_v11  ;;  %v4860_v15 = vld [vmem:[%s9490_s0 + $0x11b] sm:$0xff] }
  0x5f   : > { %v9499_v38 = vmax.f32 %v7474_v21, 0.0  ;;  %v7565_v20 = vsel %vm4894_vm8, 1, %v6907_v3  ;;  %vm4896_vm10 = vcmp.gt.f32.partialorder %v4860_v15, 0.0  ;;  %v4861_v15 = vld [vmem:[%s9490_s0 + $0x123] sm:$0xff] }
  0x60   : > { %771 = vperm.xlu1 %6744, %v7219_v39   ;;  %768 = vperm.xlu0 %6743, %v7230_v42   ;;  %v5705_v39 = vunpack.c.l.bf16 %v5726_v31  ;;  %v426_v42 = vmul.f32 %v5701_v36, %v7346_v11  ;;  %v7413_v46 = vadd.f32 %v7353_v13, %v427_v40  ;;  %v7419_v49 = vadd.f32 %v7353_v13, %v429_v43 }
  0x61   : > { %v5642_v36 = vunpack.c.h.bf16 %v5710_v19  ;;  %v5641_v40 = vunpack.c.l.bf16 %v5710_v19  ;;  %vm4897_vm13 = vcmp.gt.f32.partialorder %v4861_v15, 0.0 }
  0x62   : > { %v428_v45 = vmul.f32 %v5705_v39, %v7346_v11  ;;  %v7416_v47 = vadd.f32 %v7353_v13, %v426_v42  ;;  %v4855_v39 = vld [vmem:[%s9490_s0 + $0xf3] sm:$0xff] }
  0x63   : > { %vm4891_vm7 = vcmp.gt.f32.partialorder %v4855_v39, 0.0  ;;  %v397_v62 = vmul.f32 %v5642_v36, %v7346_v11 }
  0x64   : > { %4939 = vperm.xlu1 %6744, %v7236_v44   ;;  %4936 = vperm.xlu0 %6743, %v7249_v48   ;;  %v7422_v44 = vadd.f32 %v7353_v13, %v428_v45  ;;  %v7426_v48 = vsel %vm4882_vm12, 1, %v6907_v3  ;;  %v7515_v45 = vadd.f32 %v7353_v13, %v392_v25  ;;  %v5715_v25 = vld [vmem:[%s7328_s17 + $0x48] sm:$0xff]  }
  0x65   : > { %v7561_v19 = vadd.f32 %v7353_v13, %v397_v62  ;;  %v5716_v62 = vld [vmem:[%s7328_s17 + $0x50] sm:$0xff]  }
  0x66   : > { %9592 = vst [vmem:[#allocation9_spill] sm:$0xff] %v7515_v45 }
  0x67   : > { %9595 = vst [vmem:[#allocation12_spill] sm:$0xff] %v7561_v19 }
  0x68   : > { %4945 = vperm.xlu1 %6744, %v7256_v50   ;;  %4942 = vperm.xlu0 %6743, %v7259_v51   ;;  %v5624_v50 = vld [vmem:[%s7328_s17] sm:$0xff]  }
  0x69   : > { %v4852_v51 = vld [vmem:[%s9490_s0 + $0xdb] sm:$0xff]  ;;  %v5625_v0 = vunpack.c.l.bf16 %v5624_v50 }
  0x6a   : > { %vm4888_vm2 = vcmp.gt.f32.partialorder %v4852_v51, 0.0  ;;  %v7527_v51 = vadd.f32 %v7353_v13, %v394_v35 }
  0x6b   : > { %v388_v14 = vmul.f32 %v5625_v0, %v7346_v11  ;;  %v4857_v0 = vld [vmem:[%s9490_s0 + $0x103] sm:$0xff] }
  0x6c   : > { %4951 = vperm.xlu1 %6744, %v7265_v53   ;;  %4948 = vperm.xlu0 %6743, %v7281_v56   ;;  %v5630_v53 = vunpack.c.h.bf16 %v5707_v60  ;;  %v5626_v56 = vunpack.c.h.bf16 %v5624_v50  ;;  %v5711_v60 = vld [vmem:[%s7328_s17 + $0x28] sm:$0xff]   ;;  %9594 = vst [vmem:[#allocation11_spill] sm:$0xff] %v7527_v51  ;;  %vm4893_vm9 = vcmp.gt.f32.partialorder %v4857_v0, 0.0 }
  0x6d   : > { %v7579_v36 = vsel %vm4893_vm9, 1, %v6907_v3 }
  0x6e   : > { %v391_v16 = vmul.f32 %v5630_v53, %v7346_v11  ;;  %v389_v17 = vmul.f32 %v5626_v56, %v7346_v11  ;;  %v5646_v53 = vunpack.c.h.bf16 %v5711_v60  ;;  %v5712_v56 = vld [vmem:[%s7328_s17 + $0x30] sm:$0xff]  }
  0x6f   : > { %v5649_v35 = vunpack.c.l.bf16 %v5712_v56 }
  0x70   : > { %4957 = vperm.xlu1 %6744, %v7290_v59   ;;  %4954 = vperm.xlu0 %6743, %v7296_v61   ;;  %v7468_v59 = vsel %vm4888_vm2, 1, %v6907_v3  ;;  %v5634_v61 = vunpack.c.h.bf16 %v5708_v8  ;;  %v7490_v30 = vadd.f32 %v7353_v13, %v391_v16  ;;  %v7493_v31 = vadd.f32 %v7353_v13, %v389_v17  ;;  %v5713_v17 = vld [vmem:[%s7328_s17 + $0x38] sm:$0xff]  }
  0x71   : > { %v396_v8 = vmul.f32 %v5641_v40, %v7346_v11  ;;  %v4862_v40 = vld [vmem:[%s9490_s0 + $0x12b] sm:$0xff]  ;;  %v5654_v58 = vunpack.c.h.bf16 %v5713_v17  ;;  %v5666_v16 = vunpack.c.h.bf16 %v5716_v62 }
  0x72   : > { %v393_v23 = vmul.f32 %v5634_v61, %v7346_v11  ;;  %9589 = vst [vmem:[#allocation6_spill] sm:$0xff] %v7490_v30  ;;  %9590 = vst [vmem:[#allocation7_spill] sm:$0xff] %v7493_v31  ;;  %v5645_v61 = vunpack.c.l.bf16 %v5711_v60  ;;  %v5653_v60 = vunpack.c.l.bf16 %v5713_v17  ;;  %v400_v17 = vmul.f32 %v5649_v35, %v7346_v11 }
  0x73   : > { %v7570_v28 = vadd.f32 %v7353_v13, %v396_v8  ;;  %vm4898_vm12 = vcmp.gt.f32.partialorder %v4862_v40, 0.0 }
  0x74   : > { %4963 = vperm.xlu1 %6744, %v7306_v63   ;;  %4960 = vperm.xlu0 %6743, %v7312_v1   ;;  %v4854_v63 = vld [vmem:[%s9490_s0 + $0xeb] sm:$0xff]  ;;  %v7482_v1 = vadd.f32 %v7353_v13, %v388_v14  ;;  %v7512_v43 = vadd.f32 %v7353_v13, %v393_v23  ;;  %v7544_v14 = vsel %vm4889_vm5, 1, %v6907_v3  ;;  %v5714_v23 = vld [vmem:[%s7328_s17 + $0x40] sm:$0xff]   ;;  %v398_v39 = vmul.f32 %v5645_v61, %v7346_v11 }
  0x75   : > { %vm4890_vm4 = vcmp.gt.f32.partialorder %v4854_v63, 0.0  ;;  %v5650_v63 = vunpack.c.h.bf16 %v5712_v56  ;;  %9596 = vst [vmem:[#allocation13_spill] sm:$0xff] %v7570_v28  ;;  %v5658_v0 = vunpack.c.h.bf16 %v5714_v23  ;;  %v5657_v8 = vunpack.c.l.bf16 %v5714_v23 }
  0x76   : > { %v9501_v42 = vmax.f32 %v7482_v1, 0.0  ;;  %9591 = vst [vmem:[#allocation8_spill] sm:$0xff] %v7512_v43  ;;  %v7534_v5 = vsel %vm4890_vm4, 1, %v6907_v3  ;;  %v5661_v56 = vunpack.c.l.bf16 %v5715_v25  ;;  %v7610_v23 = vadd.f32 %v7353_v13, %v398_v39 }
  0x77   : > { %v401_v61 = vmul.f32 %v5650_v63, %v7346_v11  ;;  %v403_v63 = vmul.f32 %v5654_v58, %v7346_v11  ;;  %v404_v35 = vmul.f32 %v5657_v8, %v7346_v11  ;;  %v409_v39 = vmul.f32 %v5666_v16, %v7346_v11 }
  0x78   : > { %4969 = vperm.xlu1 %6744, %v7315_v2   ;;  %4966 = vperm.xlu0 %6743, %v7318_v4   ;;  %v7497_v2 = vsel %vm4887_vm3, 1, %v6907_v3  ;;  %v395_v4 = vmul.f32 %v5638_v18, %v7346_v11 }
  0x79   : > { %v7617_v58 = vadd.f32 %v7353_v13, %v401_v61  ;;  %v7631_v33 = vadd.f32 %v7353_v13, %v403_v63  ;;  %v7642_v16 = vadd.f32 %v7353_v13, %v404_v35  ;;  %v7653_v63 = vsel %vm4897_vm13, 1, %v6907_v3 }
  0x7b   : > { %9598 = vst [vmem:[#allocation15_spill] sm:$0xff] %v7617_v58  ;;  %9600 = vst [vmem:[#allocation17_spill] sm:$0xff] %v7631_v33 }
  0x7c   : > { %4975 = vperm.xlu1 %6744, %v7333_v6   ;;  %4972 = vperm.xlu0 %6743, %v7336_v7   ;;  %v7524_v7 = vadd.f32 %v7353_v13, %v395_v4  ;;  %v399_v4 = vmul.f32 %v5646_v53, %v7346_v11  ;;  %v5662_v53 = vunpack.c.h.bf16 %v5715_v25  ;;  %v402_v25 = vmul.f32 %v5653_v60, %v7346_v11  ;;  %v5719_v6 = vld [vmem:[%s7328_s17 + $0x68] sm:$0xff]  }
  0x7d   : > { %v7621_v60 = vsel %vm4898_vm12, 1, %v6907_v3  ;;  %9603 = vst [vmem:[#allocation20_spill] sm:$0xff] %v7642_v16  ;;  %v5677_v50 = vunpack.c.l.bf16 %v5719_v6 }
  0x7e   : > { %9593 = vst [vmem:[#allocation10_spill] sm:$0xff] %v7524_v7  ;;  %v7593_v18 = vadd.f32 %v7353_v13, %v399_v4  ;;  %v5665_v4 = vunpack.c.l.bf16 %v5716_v62  ;;  %v407_v12 = vmul.f32 %v5662_v53, %v7346_v11  ;;  %v7634_v8 = vadd.f32 %v7353_v13, %v402_v25 }
  0x80   : > { %4981 = vperm.xlu1 %6744, %v7366_v22   ;;  %4978 = vperm.xlu0 %6743, %v7379_v26   ;;  %v7552_v22 = vsel %vm4892_vm6, 1, %v6907_v3  ;;  %v7556_v26 = vsel %vm4891_vm7, 1, %v6907_v3  ;;  %9597 = vst [vmem:[#allocation14_spill] sm:$0xff] %v7593_v18  ;;  %9601 = vst [vmem:[#allocation18_spill] sm:$0xff] %v7634_v8  ;;  %v408_v40 = vmul.f32 %v5665_v4, %v7346_v11  ;;  %vm9551_vm7 = vsmask.f32 6400 }
  0x82   : > { %v7669_v15 = vadd.f32 %v7353_v13, %v408_v40 }
  0x84   : > { %4987 = vperm.xlu1 %6744, %v7383_v27   ;;  %4984 = vperm.xlu0 %6743, %v7395_v32   ;;  %v7589_v32 = vsel %vm4896_vm10, 1, %v6907_v3  ;;  %v405_v27 = vmul.f32 %v5658_v0, %v7346_v11  ;;  %v7625_v0 = vadd.f32 %v7353_v13, %v400_v17  ;;  %9608 = vst [vmem:[#allocation25_spill] sm:$0xff] %v7669_v15  ;;  %v7695_v3 = vld [vmem:[%s7328_s17 + $0x70] sm:$0xff]  }
  0x86   : > { %9599 = vst [vmem:[#allocation16_spill] sm:$0xff] %v7625_v0  ;;  %v7639_v61 = vadd.f32 %v7353_v13, %v405_v27 }
  0x88   : > { %4993 = vperm.xlu1 %6744, %v7426_v48   ;;  %4990 = vperm.xlu0 %6743, %v7429_v52   ;;  %v406_v48 = vmul.f32 %v5661_v56, %v7346_v11  ;;  %v5717_v52 = vld [vmem:[%s7328_s17 + $0x58] sm:$0xff]   ;;  %v5718_v56 = vld [vmem:[%s7328_s17 + $0x60] sm:$0xff]   ;;  %9602 = vst [vmem:[#allocation19_spill] sm:$0xff] %v7639_v61 }
  0x89   : > { %v5670_v53 = vunpack.c.h.bf16 %v5717_v52  ;;  %v5669_v25 = vunpack.c.l.bf16 %v5717_v52  ;;  %v5674_v62 = vunpack.c.h.bf16 %v5718_v56 }
  0x8b   : > { %v411_v17 = vmul.f32 %v5670_v53, %v7346_v11 }
  0x8c   : > { %4999 = vperm.xlu1 %6744, %v7435_v54   ;;  %4996 = vperm.xlu0 %6743, %v7438_v55   ;;  %v7645_v54 = vadd.f32 %v7353_v13, %v407_v12  ;;  %v7648_v55 = vadd.f32 %v7353_v13, %v406_v48  ;;  %v7661_v12 = vadd.f32 %v7353_v13, %v409_v39  ;;  %v5673_v48 = vunpack.c.l.bf16 %v5718_v56 }
  0x8d   : > { %v413_v39 = vmul.f32 %v5674_v62, %v7346_v11  ;;  %v7692_v35 = vadd.f32 %v7353_v13, %v411_v17  ;;  %v9612_v17 = vmax.f32 %v7493_v31, 0.0 }
  0x8e   : > { %9604 = vst [vmem:[#allocation21_spill] sm:$0xff] %v7645_v54  ;;  %9605 = vst [vmem:[#allocation22_spill] sm:$0xff] %v7648_v55  ;;  %v412_v56 = vmul.f32 %v5673_v48, %v7346_v11 }
  0x8f   : > { %v7655_v4 = vpop.permute.xlu1 %654  ;;  %v7657_v27 = vpop.permute.xlu0 %648  ;;  %9607 = vst [vmem:[#allocation24_spill] sm:$0xff] %v7661_v12  ;;  %9610 = vst [vmem:[#allocation27_spill] sm:$0xff] %v7692_v35 }
  0x90   : > { %9606 = vst [vmem:[#allocation23_spill] sm:$0xff] %v7655_v4  ;;  %5005 = vperm.xlu1 %6744, %v7441_v57   ;;  %5002 = vperm.xlu0 %6743, %v7460_v9   ;;  %vm775_vm14 = vcmp.eq.s32.totalorder %v7655_v4, 1  ;;  %vm773_vm15 = vcmp.eq.s32.totalorder %v7657_v27, 1  ;;  %v410_v57 = vmul.f32 %v5669_v25, %v7346_v11  ;;  %v5678_v9 = vunpack.c.h.bf16 %v5719_v6  ;;  %v6783_v27 = vld [vmem:[%s9494_s4 + $0x88] sm:$0xff]  }
  0x91   : > { %v817_v6 = vsel %vm775_vm14, %v9499_v38, 0.0  ;;  %v815_v62 = vsel %vm773_vm15, %v9501_v42, 0.0 }
  0x92   : > { %v7714_v21 = vadd.f32 %v7353_v13, %v410_v57  ;;  %v415_v38 = vmul.f32 %v5678_v9, %v7346_v11  ;;  %v9618_v9 = vmax.f32 %v7515_v45, 0.0 }
  0x93   : > { %v7679_v40 = vpop.permute.xlu1 %657  ;;  %v7681_v52 = vpop.permute.xlu0 %651 }
  0x94   : > { %9609 = vst [vmem:[#allocation26_spill] sm:$0xff] %v7679_v40  ;;  %vm776_vm1 = vcmp.eq.s32.totalorder %v7679_v40, 1  ;;  %vm774_vm2 = vcmp.eq.s32.totalorder %v7681_v52, 1  ;;  %5011 = vperm.xlu1 %6744, %v7468_v59   ;;  %5008 = vperm.xlu0 %6743, %v7497_v2   ;;  %v9611_v59 = vmax.f32 %v7490_v30, 0.0  ;;  %9613 = vst [vmem:[#allocation28_spill] sm:$0xff] %v7714_v21  ;;  %v7722_v30 = vadd.f32 %v7353_v13, %v413_v39 }
  0x95   : > { %v816_v48 = vsel %vm774_vm2, %v9612_v17, 0.0  ;;  %v414_v40 = vmul.f32 %v5677_v50, %v7346_v11  ;;  %v5681_v39 = vunpack.c.l.bf16 %v7695_v3  ;;  %v7751_v45 = vadd.f32 %v7353_v13, %v415_v38 }
  0x96   : > { %v818_v2 = vsel %vm776_vm1, %v9611_v59, 0.0  ;;  %v857_v53 = vpack.c.bf16 %v816_v48, %v815_v62  ;;  %9615 = vst [vmem:[#allocation30_spill] sm:$0xff] %v7722_v30  ;;  %v7725_v59 = vadd.f32 %v7353_v13, %v412_v56  ;;  %v9617_v56 = vmax.f32 %v7512_v43, 0.0 }
  0x97   : > { %v858_v25 = vpack.c.bf16 %v818_v2, %v817_v6  ;;  %v7717_v4 = vpop.permute.xlu1 %663  ;;  %v7719_v42 = vpop.permute.xlu0 %660  ;;  %v5682_v6 = vunpack.c.h.bf16 %v7695_v3  ;;  %v9619_v38 = vmax.f32 %v7524_v7, 0.0 }
  0x98   : > { %9614 = vst [vmem:[#allocation29_spill] sm:$0xff] %v7717_v4  ;;  %9616 = vst [vmem:[#allocation31_spill] sm:$0xff] %v7725_v59  ;;  %vm778_vm3 = vcmp.eq.s32.totalorder %v7717_v4, 1  ;;  %vm777_vm4 = vcmp.eq.s32.totalorder %v7719_v42, 1  ;;  %5017 = vperm.xlu1 %6744, %v7534_v5   ;;  %5014 = vperm.xlu0 %6743, %v7544_v14   ;;  %v955_v57 = vshll.u32 %v857_v53, 16  ;;  %v953_v5 = vshrl.u32 %v857_v53, 16 }
  0x99   : > { %879 = vst [vmem:[#allocation2 + $0x8] sm:$0xff] %v858_v25  ;;  %878 = vst [vmem:[#allocation2] sm:$0xff] %v857_v53  ;;  %v820_v50 = vsel %vm778_vm3, %v9617_v56, 0.0  ;;  %v819_v62 = vsel %vm777_vm4, %v9618_v9, 0.0  ;;  %v960_v2 = vshll.u32 %v858_v25, 16  ;;  %v964_v56 = vshrl.u32 %v858_v25, 16 }
  0x9a   : > { %v7743_v48 = vpack.c.bf16 %v820_v50, %v819_v62  ;;  %v957_v14 = vrot.slane %v955_v57, 1  ;;  %v7754_v9 = vmul.f32 %v5682_v6, %v7346_v11  ;;  %v9620_v6 = vmax.f32 %v7527_v51, 0.0  ;;  %v6785_v42 = vld [vmem:[%s9494_s4 + $0x90] sm:$0xff]  }
  0x9b   : > { %v7746_v3 = vpop.permute.xlu1 %669  ;;  %v7748_v43 = vpop.permute.xlu0 %666  ;;  %v962_v4 = vrot.slane %v960_v2, 1 }
  0x9c   : > { %880 = vst [vmem:[#allocation2 + $0x10] sm:$0xff] %v7743_v48  ;;  %vm780_vm5 = vcmp.eq.s32.totalorder %v7746_v3, 1  ;;  %vm779_vm6 = vcmp.eq.s32.totalorder %v7748_v43, 1  ;;  %5023 = vperm.xlu1 %6744, %v7552_v22   ;;  %5020 = vperm.xlu0 %6743, %v7556_v26   ;;  %v958_v53 = vor.u32 %v957_v14, %v953_v5  ;;  %v968_v57 = vshll.u32 %v7743_v48, 16 }
  0x9d   : > { %v822_v25 = vsel %vm780_vm5, %v9619_v38, 0.0  ;;  %v821_v50 = vsel %vm779_vm6, %v9620_v6, 0.0  ;;  %v2321_v62 = vshrl.u32 %v7743_v48, 16  ;;  %v966_v5 = vor.u32 %v964_v56, %v962_v4  ;;  %v6763_v6 = vld [vmem:[%s9494_s4 + $0x8] sm:$0xff]  }
  0x9e   : > { %v7772_v2 = vpack.c.bf16 %v822_v25, %v821_v50  ;;  %v963_v26 = vsel %vm951_vm0, %v958_v53, %v962_v4  ;;  %v970_v14 = vrot.slane %v968_v57, 1  ;;  %v2326_v51 = vrot.slane %v968_v57, 2 }
  0x9f   : > { %v7775_v31 = vpop.permute.xlu1 %675  ;;  %v7777_v17 = vpop.permute.xlu0 %672  ;;  %5977 = vmatprep.mubr.bf16.mxu1 %v963_v26  ;;  %v2323_v7 = vrot.slane %v2321_v62, 1  ;;  %v7786_v50 = vadd.f32 %v7353_v13, %v414_v40  ;;  %v9623_v53 = vmax.f32 %v7561_v19, 0.0  ;;  %v9624_v57 = vmax.f32 %v7570_v28, 0.0 }
  0xa0   : > { %9621 = vst [vmem:[#allocation32_spill] sm:$0xff] %v7775_v31  ;;  %v7779_v38 = vld [vmem:[#allocation2 + $0x8] sm:$0xfe]  ;;  %881 = vst [vmem:[#allocation2 + $0x18] sm:$0xff] %v7772_v2  ;;  %vm782_vm8 = vcmp.eq.s32.totalorder %v7775_v31, 1  ;;  %vm781_vm9 = vcmp.eq.s32.totalorder %v7777_v17, 1  ;;  %5029 = vperm.xlu1 %6744, %v7565_v20   ;;  %5026 = vperm.xlu0 %6743, %v7579_v36   ;;  %v971_v4 = vsel %vm951_vm0, %v966_v5, %v970_v14 }
  0xa1   : > { %9622 = vst [vmem:[#allocation33_spill] sm:$0xff] %v7779_v38  ;;  %v2313_v56 = vshrl.u32 %v7779_v38, 16  ;;  %v824_v40 = vsel %vm782_vm8, %v9623_v53, 0.0  ;;  %v823_v26 = vsel %vm781_vm9, %v9624_v57, 0.0  ;;  %5978 = vmatmul.mubr.bf16.vlgmr.msra.gmra.mrb[0].mxu1 %v971_v4  ;;  %v2316_v25 = vshll.u32 %v7779_v38, 16  ;;  %v6789_v17 = vld [vmem:[%s9494_s4 + $0xa0] sm:$0xff]  }
  0xa2   : > { %v7805_v20 = vmul.f32 %v5681_v39, %v7346_v11  ;;  %v7807_v36 = vpack.c.bf16 %v824_v40, %v823_v26  ;;  %6014 = vmatpush3.bf16.msra.mxu1 %v7227_v41  ;;  %v976_v22 = vshll.u32 %v7772_v2, 16  ;;  %v2327_v4 = vor.u32 %v2326_v51, %v2323_v7  ;;  %v6766_v11 = vld [vmem:[%s9494_s4 + $0x10] sm:$0xff]  }
  0xa3   : > { %v2315_v5 = vrot.slane %v2313_v56, 1  ;;  %v7812_v19 = vpop.permute.xlu1 %681  ;;  %v7814_v28 = vpop.permute.xlu0 %678  ;;  %v2318_v57 = vrot.slane %v2316_v25, 2  ;;  %v974_v31 = vor.u32 %v2321_v62, %v970_v14  ;;  %v2330_v38 = vshrl.u32 %v7772_v2, 16  ;;  %6015 = vmatprep.subr.bf16.mxu1 %v6763_v6 }
  0xa4   : > { %882 = vst [vmem:[#allocation2 + $0x20] sm:$0xff] %v7807_v36  ;;  %vm9530_vm10 = vcmp.eq.s32.totalorder %v7812_v19, 1  ;;  %vm9576_vm11 = vcmp.eq.s32.totalorder %v7814_v28, 1  ;;  %5035 = vperm.xlu1 %6744, %v7589_v32   ;;  %5032 = vperm.xlu0 %6743, %v7614_v10   ;;  %v978_v41 = vrot.slane %v976_v22, 1  ;;  %v2335_v7 = vrot.slane %v976_v22, 2 }
  0xa5   : > { %v9625_v51 = vmax.f32 %v7593_v18, 0.0  ;;  %v9626_v62 = vmax.f32 %v7610_v23, 0.0  ;;  %v2319_v25 = vor.u32 %v2318_v57, %v2315_v5  ;;  %v2332_v56 = vrot.slane %v2330_v38, 1 }
  0xa6   : > { %v979_v32 = vsel %vm951_vm0, %v974_v31, %v978_v41  ;;  %v984_v10 = vshll.u32 %v7807_v36, 16  ;;  %6016 = vmatpush3.bf16.msra.mxu1 %v6763_v6  ;;  %v7839_v22 = vadd.f32 %v7353_v13, %v7754_v9  ;;  %v982_v57 = vor.u32 %v2330_v38, %v978_v41  ;;  %v7848_v31 = vld [vmem:[%s7328_s17 + $0x78] sm:$0xff]   ;;  %v6764_v38 = vld [vmem:[%s9494_s4 + $0x148] sm:$0xff]  }
  0xa7   : > { %v826_v39 = vsel %vm9530_vm10, %v9625_v51, 0.0  ;;  %v825_v14 = vsel %vm9576_vm11, %v9626_v62, 0.0  ;;  %v7841_v26 = vpop.permute.xlu1 %687  ;;  %v7843_v51 = vpop.permute.xlu0 %684  ;;  %v2328_v62 = vsel %vm9551_vm7, %v2319_v25, %v2327_v4  ;;  %5981 = vmatprep.mubr.bf16.mxu1 %v979_v32  ;;  %v2336_v5 = vor.u32 %v2335_v7, %v2332_v56  ;;  %6017 = vmatprep.subr.bf16.mxu1 %v6766_v11  ;;  %v6769_v41 = vld [vmem:[%s9494_s4 + $0x18] sm:$0xff]  }
  0xa8   : > { %v7833_v40 = vpack.c.bf16 %v826_v39, %v825_v14  ;;  %9627 = vst [vmem:[#allocation34_spill] sm:$0xff] %v7839_v22  ;;  %9628 = vst [vmem:[#allocation35_spill] sm:$0xff] %v7841_v26  ;;  %v2339_v39 = vshrl.u32 %v7807_v36, 16  ;;  %vm9516_vm12 = vcmp.eq.s32.totalorder %v7841_v26, 1  ;;  %vm9517_vm13 = vcmp.eq.s32.totalorder %v7843_v51, 1  ;;  %5041 = vperm.xlu1 %6744, %v7621_v60   ;;  %5038 = vperm.xlu0 %6743, %v7653_v63  }
  0xa9   : > { %9629 = vst [vmem:[#allocation36_spill] sm:$0xff] %v7843_v51  ;;  %v986_v9 = vrot.slane %v984_v10, 1  ;;  %v2344_v6 = vrot.slane %v984_v10, 2  ;;  %v9630_v7 = vmax.f32 %v7617_v58, 0.0  ;;  %v9631_v25 = vmax.f32 %v7625_v0, 0.0  ;;  %6185 = vmatprep.mubr.bf16.mxu0 %v2328_v62  ;;  %v6817_v62 = vld [vmem:[%s9494_s4 + $0x140] sm:$0xff]  }
  0xaa   : > { %883 = vst [vmem:[#allocation2 + $0x28] sm:$0xff] %v7833_v40  ;;  %v2337_v63 = vsel %vm9551_vm7, %v2327_v4, %v2336_v5  ;;  %v2341_v56 = vrot.slane %v2339_v39, 1  ;;  %v992_v53 = vshll.u32 %v7833_v40, 16  ;;  %6018 = vmatpush3.bf16.msra.mxu1 %v6766_v11  ;;  %vm2781_vm10 = vcmask 1045504  }
  0xab   : > { %v828_v14 = vsel %vm9516_vm12, %v9630_v7, 0.0  ;;  %v827_v60 = vsel %vm9517_vm13, %v9631_v25, 0.0  ;;  %6186 = vmatmul.mubr.bf16.vlgmr.msra.gmra.mrb[0].mxu0 %v2337_v63  ;;  %v987_v10 = vsel %vm951_vm0, %v982_v57, %v986_v9  ;;  %v7875_v7 = vpop.permute.xlu1 %693  ;;  %v7877_v0 = vpop.permute.xlu0 %690  ;;  %v2348_v25 = vshrl.u32 %v7833_v40, 16  ;;  %v6765_v63 = vld [vmem:[%s9494_s4 + $0x150] sm:$0xff]   ;;  %6019 = vmatprep.subr.bf16.mxu1 %v6769_v41 }
  0xac   : > { %v7870_v32 = vpack.c.bf16 %v828_v14, %v827_v60  ;;  %9632 = vst [vmem:[#allocation37_spill] sm:$0xff] %v7875_v7  ;;  %9633 = vst [vmem:[#allocation38_spill] sm:$0xff] %v7877_v0  ;;  %6222 = vmatpush3.bf16.msra.mxu0 %v6817_v62  ;;  %5982 = vmatmul.mubr.bf16.gmra.mrb[4].mxu1 %v987_v10  ;;  %v2345_v4 = vor.u32 %v2344_v6, %v2341_v56  ;;  %vm9522_vm12 = vcmp.eq.s32.totalorder %v7875_v7, 1 }
  0xad   : > { %v990_v14 = vor.u32 %v2339_v39, %v986_v9  ;;  %vm9523_vm13 = vcmp.eq.s32.totalorder %v7877_v0, 1  ;;  %6223 = vmatprep.subr.bf16.mxu0 %v6764_v38  ;;  %v994_v11 = vrot.slane %v992_v53, 1  ;;  %v2353_v60 = vrot.slane %v992_v53, 2  ;;  %v6773_v39 = vld [vmem:[%s9494_s4 + $0x20] sm:$0xff]  }
  0xae   : > { %884 = vst [vmem:[#allocation2 + $0x30] sm:$0xff] %v7870_v32  ;;  %v9634_v9 = vmax.f32 %v7631_v33, 0.0  ;;  %v9635_v56 = vmax.f32 %v7634_v8, 0.0  ;;  %v2346_v53 = vsel %vm9551_vm7, %v2336_v5, %v2345_v4  ;;  %v2350_v62 = vrot.slane %v2348_v25, 1  ;;  %6020 = vmatpush3.bf16.msra.mxu1 %v6769_v41 }
  0xaf   : > { %6189 = vmatprep.mubr.bf16.mxu0 %v2346_v53  ;;  %v995_v58 = vsel %vm951_vm0, %v990_v14, %v994_v11  ;;  %v1000_v26 = vshll.u32 %v7870_v32, 16  ;;  %v7909_v8 = vpop.permute.xlu0 %696  ;;  %v998_v5 = vor.u32 %v2348_v25, %v994_v11  ;;  %v2357_v7 = vshrl.u32 %v7870_v32, 16  ;;  %v7917_v14 = vld [vmem:[%s7328_s17 + $0x80] sm:$0xff]   ;;  %6021 = vmatprep.subr.bf16.mxu1 %v6773_v39 }
  0xb0   : > { %v830_v6 = vsel %vm9522_vm12, %v9634_v9, 0.0  ;;  %v829_v10 = vsel %vm9523_vm13, %v9635_v56, 0.0  ;;  %v7907_v9 = vpop.permute.xlu1 %699  ;;  %9637 = vst [vmem:[#allocation40_spill] sm:$0xff] %v7909_v8  ;;  %6224 = vmatpush3.bf16.msra.mxu0 %v6764_v38  ;;  %5985 = vmatprep.mubr.bf16.mxu1 %v995_v58  ;;  %v2354_v56 = vor.u32 %v2353_v60, %v2350_v62  ;;  %vm9528_vm13 = vcmp.eq.s32.totalorder %v7909_v8, 1  ;;  %v6767_v58 = vld [vmem:[%s9494_s4 + $0x158] sm:$0xff]  }
  0xb1   : > { %v7902_v57 = vpack.c.bf16 %v830_v6, %v829_v10  ;;  %9636 = vst [vmem:[#allocation39_spill] sm:$0xff] %v7907_v9  ;;  %v7914_v6 = vadd.f32 %v7353_v13, %v7805_v20  ;;  %vm9527_vm12 = vcmp.eq.s32.totalorder %v7907_v9, 1  ;;  %6225 = vmatprep.subr.bf16.mxu0 %v6765_v63  ;;  %v1002_v41 = vrot.slane %v1000_v26, 1  ;;  %v6775_v13 = vld [vmem:[%s9494_s4 + $0x28] sm:$0xff]  }
  0xb2   : > { %v2362_v38 = vrot.slane %v1000_v26, 2  ;;  %v9639_v20 = vmax.f32 %v7639_v61, 0.0  ;;  %v9640_v11 = vmax.f32 %v7642_v16, 0.0  ;;  %v2355_v26 = vsel %vm9551_vm7, %v2345_v4, %v2354_v56  ;;  %6022 = vmatpush3.bf16.msra.mxu1 %v6773_v39 }
  0xb3   : > { %9638 = vst [vmem:[#allocation41_spill] sm:$0xff] %v7914_v6  ;;  %885 = vst [vmem:[#allocation2 + $0x38] sm:$0xff] %v7902_v57  ;;  %v2359_v10 = vrot.slane %v2357_v7, 1  ;;  %6190 = vmatmul.mubr.bf16.gmra.mrb[4].mxu0 %v2355_v26  ;;  %v1003_v62 = vsel %vm951_vm0, %v998_v5, %v1002_v41  ;;  %v1008_v33 = vshll.u32 %v7902_v57, 16  ;;  %v5690_v61 = vunpack.c.h.bf16 %v7917_v14  ;;  %6023 = vmatprep.subr.bf16.mxu1 %v6775_v13 }
  0xb4   : > { %v832_v25 = vsel %vm9527_vm12, %v9639_v20, 0.0  ;;  %v831_v60 = vsel %vm9528_vm13, %v9640_v11, 0.0  ;;  %v7942_v9 = vpop.permute.xlu1 %705  ;;  %v7944_v20 = vpop.permute.xlu0 %702  ;;  %6226 = vmatpush3.bf16.msra.mxu0 %v6765_v63  ;;  %5986 = vmatmul.mubr.bf16.gmra.mrb[8].mxu1 %v1003_v62  ;;  %v1006_v16 = vor.u32 %v2357_v7, %v1002_v41  ;;  %v2366_v4 = vshrl.u32 %v7902_v57, 16  ;;  %v6768_v63 = vld [vmem:[%s9494_s4 + $0x160] sm:$0xff]   ;;  %v6777_v7 = vld [vmem:[%s9494_s4 + $0x30] sm:$0xff]  }
  0xb5   : > { %v7937_v53 = vpack.c.bf16 %v832_v25, %v831_v60  ;;  %9641 = vst [vmem:[#allocation42_spill] sm:$0xff] %v7942_v9  ;;  %9642 = vst [vmem:[#allocation43_spill] sm:$0xff] %v7944_v20  ;;  %v2363_v11 = vor.u32 %v2362_v38, %v2359_v10  ;;  %vm9535_vm12 = vcmp.eq.s32.totalorder %v7942_v9, 1  ;;  %vm9536_vm13 = vcmp.eq.s32.totalorder %v7944_v20, 1  ;;  %6227 = vmatprep.subr.bf16.mxu0 %v6767_v58 }
  0xb6   : > { %v1010_v39 = vrot.slane %v1008_v33, 1  ;;  %v2371_v5 = vrot.slane %v1008_v33, 2  ;;  %v9643_v41 = vmax.f32 %v7645_v54, 0.0  ;;  %v9644_v60 = vmax.f32 %v7648_v55, 0.0  ;;  %6024 = vmatpush3.bf16.msra.mxu1 %v6775_v13 }
  0xb7   : > { %886 = vst [vmem:[#allocation2 + $0x40] sm:$0xff] %v7937_v53  ;;  %v2364_v33 = vsel %vm9551_vm7, %v2354_v56, %v2363_v11  ;;  %v2368_v10 = vrot.slane %v2366_v4, 1  ;;  %v1016_v8 = vshll.u32 %v7937_v53, 16  ;;  %v9645_v54 = vunpack.c.h.bf16 %v7848_v31  ;;  %6025 = vmatprep.subr.bf16.mxu1 %v6777_v7 }
  0xb8   : > { %v834_v38 = vsel %vm9535_vm12, %v9643_v41, 0.0  ;;  %v833_v26 = vsel %vm9536_vm13, %v9644_v60, 0.0  ;;  %6193 = vmatprep.mubr.bf16.mxu0 %v2364_v33  ;;  %v1011_v25 = vsel %vm951_vm0, %v1006_v16, %v1010_v39  ;;  %v6818_v41 = vld [vmem:[%s9491_s1] ss:$0 sm:$0xff]  ;;  %v7977_v60 = vpop.permute.xlu1 %711  ;;  %v7979_v56 = vpop.permute.xlu0 %708  ;;  %6228 = vmatpush3.bf16.msra.mxu0 %v6767_v58  ;;  %v1014_v16 = vor.u32 %v2366_v4, %v1010_v39  ;;  %v6770_v33 = vld [vmem:[%s9494_s4 + $0x168] sm:$0xff]  }
  0xb9   : > { %v7966_v62 = vpack.c.bf16 %v834_v38, %v833_v26  ;;  %v7975_v55 = vmul.f32 %v6818_v41, %v9645_v54  ;;  %9646 = vst [vmem:[#allocation44_spill] sm:$0xff] %v7977_v60  ;;  %5989 = vmatprep.mubr.bf16.mxu1 %v1011_v25  ;;  %v2372_v38 = vor.u32 %v2371_v5, %v2368_v10  ;;  %v2375_v26 = vshrl.u32 %v7937_v53, 16  ;;  %v6779_v54 = vld [vmem:[%s9494_s4 + $0x38] sm:$0xff]   ;;  %v2761_v4 = vld [vmem:[#allocation2 + $0x8] sm:$0xfc] }
  0xba   : > { %v9647_v9 = vunpack.c.l.bf16 %v7848_v31  ;;  %vm9542_vm12 = vcmp.eq.s32.totalorder %v7977_v60, 1  ;;  %vm9543_vm13 = vcmp.eq.s32.totalorder %v7979_v56, 1  ;;  %6229 = vmatprep.subr.bf16.mxu0 %v6768_v63  ;;  %v1018_v58 = vrot.slane %v1016_v8, 1  ;;  %6026 = vmatpush3.bf16.msra.mxu1 %v6777_v7 }
  0xbb   : > { %887 = vst [vmem:[#allocation2 + $0x48] sm:$0xff] %v7966_v62  ;;  %v2380_v13 = vrot.slane %v1016_v8, 2  ;;  %v9648_v25 = vmax.f32 %v7661_v12, 0.0  ;;  %v2373_v5 = vsel %vm9551_vm7, %v2363_v11, %v2372_v38  ;;  %v2377_v10 = vrot.slane %v2375_v26, 1  ;;  %6027 = vmatprep.subr.bf16.mxu1 %v6779_v54 }
  0xbc   : > { %v7987_v20 = vmul.f32 %v6818_v41, %v9647_v9  ;;  %v9649_v9 = vmax.f32 %v7669_v15, 0.0  ;;  %6194 = vmatmul.mubr.bf16.gmra.mrb[8].mxu0 %v2373_v5  ;;  %v1019_v8 = vsel %vm951_vm0, %v1014_v16, %v1018_v58  ;;  %v1024_v51 = vshll.u32 %v7966_v62, 16  ;;  %v8010_v12 = vpop.permute.xlu1 %717  ;;  %v6771_v16 = vld [vmem:[%s9494_s4 + $0x170] sm:$0xff]  }
  0xbd   : > { %v836_v31 = vsel %vm9542_vm12, %v9648_v25, 0.0  ;;  %v8008_v18 = vmul.f32 %v6818_v41, %v5690_v61  ;;  %v8012_v25 = vpop.permute.xlu0 %714  ;;  %6230 = vmatpush3.bf16.msra.mxu0 %v6768_v63  ;;  %5990 = vmatmul.mubr.bf16.gmra.mrb[12].mxu1 %v1019_v8  ;;  %v1022_v15 = vor.u32 %v2375_v26, %v1018_v58  ;;  %v2384_v11 = vshrl.u32 %v7966_v62, 16  ;;  %v8024_v63 = vld [vmem:[%s9494_s4 + $0x80] sm:$0xff]  }
  0xbe   : > { %v835_v39 = vsel %vm9543_vm13, %v9649_v9, 0.0  ;;  %v2381_v9 = vor.u32 %v2380_v13, %v2377_v10  ;;  %vm9547_vm12 = vcmp.eq.s32.totalorder %v8010_v12, 1  ;;  %vm9548_vm13 = vcmp.eq.s32.totalorder %v8012_v25, 1  ;;  %6231 = vmatprep.subr.bf16.mxu0 %v6770_v33  ;;  %6028 = vmatpush3.bf16.msra.mxu1 %v6779_v54  ;;  %v8303_v52 = vld [vmem:[#allocation2 + $0x40] sm:$0xff] }
  0xbf   : > { %v8004_v0 = vpack.c.bf16 %v836_v31, %v835_v39  ;;  %v2782_v31 = vrot.slane %v2761_v4, 2  ;;  %v1026_v61 = vrot.slane %v1024_v51, 1  ;;  %v2389_v7 = vrot.slane %v1024_v51, 2  ;;  %6065 = vmatprep.subr.bf16.mxu1 %v8024_v63 }
  0xc0   : > { %v9650_v26 = vmax.f32 %v7692_v35, 0.0  ;;  %v9651_v13 = vmax.f32 %v7714_v21, 0.0  ;;  %v2382_v4 = vsel %vm9551_vm7, %v2372_v38, %v2381_v9  ;;  %v2386_v39 = vrot.slane %v2384_v11, 1 }
  0xc1   : > { %888 = vst [vmem:[#allocation2 + $0x50] sm:$0xff] %v8004_v0  ;;  %6197 = vmatprep.mubr.bf16.mxu0 %v2382_v4  ;;  %v1027_v10 = vsel %vm951_vm0, %v1022_v15, %v1026_v61  ;;  %v1032_v8 = vshll.u32 %v8004_v0, 16  ;;  %v9652_v35 = vunpack.c.l.bf16 %v7917_v14  ;;  %v8043_v21 = vpop.permute.xlu0 %720  ;;  %6232 = vmatpush3.bf16.msra.mxu0 %v6770_v33  ;;  %v9553_v38 = vrot.slane %v7743_v48, 2 }
  0xc2   : > { %v838_v58 = vsel %vm9547_vm12, %v9650_v26, 0.0  ;;  %v837_v51 = vsel %vm9548_vm13, %v9651_v13, 0.0  ;;  %v8041_v26 = vpop.permute.xlu1 %723  ;;  %5993 = vmatprep.mubr.bf16.mxu1 %v1027_v10  ;;  %v8045_v13 = vor.u32 %v2389_v7, %v2386_v39  ;;  %vm9575_vm13 = vcmp.eq.s32.totalorder %v8043_v21, 1  ;;  %6233 = vmatprep.subr.bf16.mxu0 %v6771_v16 }
  0xc3   : > { %v8035_v5 = vpack.c.bf16 %v838_v58, %v837_v51  ;;  %v420_v60 = vmul.f32 %v6818_v41, %v9652_v35  ;;  %v1030_v58 = vor.u32 %v2384_v11, %v1026_v61  ;;  %v1036_v51 = vshrl.u32 %v8004_v0, 16  ;;  %v6772_v35 = vld [vmem:[%s9494_s4 + $0x178] sm:$0xff]  }
  0xc4   : > { %9653 = vst [vmem:[#allocation45_spill] sm:$0xff] %v8045_v13  ;;  %vm9552_vm12 = vcmp.eq.s32.totalorder %v8041_v26, 1  ;;  %v1034_v15 = vrot.slane %v1032_v8, 1  ;;  %v9654_v41 = vmax.f32 %v7722_v30, 0.0  ;;  %v9655_v54 = vmax.f32 %v7725_v59, 0.0 }
  0xc5   : > { %889 = vst [vmem:[#allocation2 + $0x58] sm:$0xff] %v8035_v5  ;;  %v1040_v14 = vshll.u32 %v8035_v5, 16  ;;  %v2391_v61 = vsel %vm9551_vm7, %v2381_v9, %v8045_v13  ;;  %v2784_v7 = vsel %vm2781_vm10, %v2782_v31, %v9553_v38  ;;  %v8075_v30 = vpop.permute.xlu0 %726  ;;  %6234 = vmatpush3.bf16.msra.mxu0 %v6771_v16  ;;  %v6819_v9 = vld [vmem:[%s9492_s2] ss:$0 sm:$0xff] }
  0xc6   : > { %v840_v33 = vsel %vm9552_vm12, %v9654_v41, 0.0  ;;  %v839_v11 = vsel %vm9575_vm13, %v9655_v54, 0.0  ;;  %6198 = vmatmul.mubr.bf16.gmra.mrb[12].mxu0 %v2391_v61  ;;  %v1035_v39 = vsel %vm951_vm0, %v1030_v58, %v1034_v15  ;;  %v1038_v10 = vor.u32 %v1036_v51, %v1034_v15  ;;  %v8073_v41 = vpop.permute.xlu1 %729  ;;  %6235 = vmatprep.subr.bf16.mxu0 %v6772_v35 }
  0xc7   : > { %v8070_v4 = vpack.c.bf16 %v840_v33, %v839_v11  ;;  %v1042_v8 = vrot.slane %v1040_v14, 1  ;;  %6237 = vmatprep.mubr.bf16.mxu0 %v2784_v7  ;;  %v8083_v31 = vadd.f32 %v6819_v9, %v7975_v55  ;;  %v8086_v58 = vadd.f32 %v6819_v9, %v7987_v20  ;;  %5994 = vmatmul.mubr.bf16.gmra.mrb[16].mxu1 %v1035_v39  ;;  %v6774_v55 = vld [vmem:[%s9494_s4 + $0x180] sm:$0xff]  }
  0xc8   : > { %vm9554_vm7 = vcmp.eq.s32.totalorder %v8073_v41, 1  ;;  %vm9555_vm12 = vcmp.eq.s32.totalorder %v8075_v30, 1  ;;  %v2785_v51 = vrot.slane %v7772_v2, 2  ;;  %v9658_v15 = vmax.f32 %v7751_v45, 0.0 }
  0xc9   : > { %9656 = vst [vmem:[#allocation46_spill] sm:$0xff] %v8083_v31  ;;  %9657 = vst [vmem:[#allocation47_spill] sm:$0xff] %v8086_v58  ;;  %v1043_v16 = vsel %vm951_vm0, %v1038_v10, %v1042_v8  ;;  %v9659_v14 = vmax.f32 %v7786_v50, 0.0  ;;  %v1044_v11 = vshrl.u32 %v8035_v5, 16  ;;  %v1048_v61 = vshll.u32 %v8070_v4, 16  ;;  %v8116_v38 = vpop.permute.xlu0 %732  ;;  %6236 = vmatpush3.bf16.msra.mxu0 %v6772_v35 }
  0xca   : > { %890 = vst [vmem:[#allocation2 + $0x60] sm:$0xff] %v8070_v4  ;;  %v842_v20 = vsel %vm9554_vm7, %v9658_v15, 0.0  ;;  %5997 = vmatprep.mubr.bf16.mxu1 %v1043_v16  ;;  %v8109_v7 = vadd.f32 %v6819_v9, %v8008_v18  ;;  %v8111_v39 = vadd.f32 %v6819_v9, %v420_v60  ;;  %v2787_v10 = vrot.slane %v7807_v36, 2  ;;  %v8114_v15 = vpop.permute.xlu1 %735  ;;  %6273 = vmatprep.subr.bf16.mxu0 %v6774_v55  ;;  %v6776_v60 = vld [vmem:[%s9494_s4 + $0x188] sm:$0xff]  }
  0xcb   : > { %v841_v33 = vsel %vm9555_vm12, %v9659_v14, 0.0  ;;  %9662 = vst [vmem:[#allocation50_spill] sm:$0xff] %v8114_v15  ;;  %v1046_v59 = vor.u32 %v1044_v11, %v1042_v8  ;;  %v1050_v54 = vrot.slane %v1048_v61, 1  ;;  %vm9560_vm7 = vcmp.eq.s32.totalorder %v8114_v15, 1 }
  0xcc   : > { %v8106_v2 = vpack.c.bf16 %v842_v20, %v841_v33  ;;  %9660 = vst [vmem:[#allocation48_spill] sm:$0xff] %v8109_v7  ;;  %9661 = vst [vmem:[#allocation49_spill] sm:$0xff] %v8111_v39  ;;  %vm9561_vm12 = vcmp.eq.s32.totalorder %v8116_v38, 1  ;;  %v1052_v18 = vshrl.u32 %v8070_v4, 16  ;;  %v9663_v9 = vmax.f32 %v7839_v22, 0.0 }
  0xcd   : > { %v9664_v8 = vmax.f32 %v7914_v6, 0.0  ;;  %v9665_v33 = vrot.slane %v7743_v48, 2  ;;  %v1051_v61 = vsel %vm951_vm0, %v1046_v59, %v1050_v54  ;;  %v2788_v14 = vsel %vm2781_vm10, %v2785_v51, %v2787_v10 }
  0xce   : > { %891 = vst [vmem:[#allocation2 + $0x68] sm:$0xff] %v8106_v2  ;;  %v1056_v36 = vshll.u32 %v8106_v2, 16  ;;  %v844_v35 = vsel %vm9560_vm7, %v9663_v9, 0.0  ;;  %v1054_v13 = vor.u32 %v1052_v18, %v1050_v54  ;;  %v8143_v15 = vpop.permute.xlu1 %741  ;;  %v8145_v9 = vpop.permute.xlu0 %738  ;;  %v2789_v54 = vrot.slane %v7833_v40, 2 }
  0xcf   : > { %v843_v20 = vsel %vm9561_vm12, %v9664_v8, 0.0  ;;  %v2786_v11 = vsel %vm2781_vm10, %v9665_v33, %v2785_v51  ;;  %vm9562_vm7 = vcmp.eq.s32.totalorder %v8143_v15, 1  ;;  %vm9563_vm12 = vcmp.eq.s32.totalorder %v8145_v9, 1  ;;  %5998 = vmatmul.mubr.bf16.gmra.mrb[20].mxu1 %v1051_v61  ;;  %v6778_v51 = vld [vmem:[%s9494_s4 + $0x190] sm:$0xff]  }
  0xd0   : > { %v8140_v16 = vpack.c.bf16 %v844_v35, %v843_v20  ;;  %6238 = vmatmul.mubr.bf16.vlgmr.msra.gmra.mrb[0].mxu0 %v2786_v11  ;;  %v1058_v22 = vrot.slane %v1056_v36, 1  ;;  %v9667_v18 = vmax.f32 %v8083_v31, 0.0  ;;  %v2791_v20 = vrot.slane %v7870_v32, 2 }
  0xd1   : > { %6241 = vmatprep.mubr.bf16.mxu0 %v2788_v14  ;;  %6274 = vmatpush3.bf16.msra.mxu0 %v6774_v55  ;;  %v9668_v14 = vmax.f32 %v8086_v58, 0.0 }
  0xd2   : > { %9666 = vst [vmem:[#allocation51_spill] sm:$0xff] %v8140_v16  ;;  %892 = vst [vmem:[#allocation2 + $0x70] sm:$0xff] %v8140_v16  ;;  %v1059_v59 = vsel %vm951_vm0, %v1054_v13, %v1058_v22  ;;  %6275 = vmatprep.subr.bf16.mxu0 %v6776_v60  ;;  %v846_v55 = vsel %vm9562_vm7, %v9667_v18, 0.0  ;;  %v1060_v13 = vshrl.u32 %v8106_v2, 16  ;;  %v1064_v40 = vshll.u32 %v8140_v16, 16  ;;  %v8170_v33 = vpop.permute.xlu1 %747  ;;  %v8172_v11 = vpop.permute.xlu0 %744 }
  0xd3   : > { %v845_v36 = vsel %vm9563_vm12, %v9668_v14, 0.0  ;;  %6001 = vmatprep.mubr.bf16.mxu1 %v1059_v59  ;;  %vm9568_vm7 = vcmp.eq.s32.totalorder %v8170_v33, 1  ;;  %vm9569_vm12 = vcmp.eq.s32.totalorder %v8172_v11, 1  ;;  %v1068_v59 = vshrl.u32 %v8140_v16, 16 }
  0xd4   : > { %v8167_v35 = vpack.c.bf16 %v846_v55, %v845_v36  ;;  %v1062_v8 = vor.u32 %v1060_v13, %v1058_v22  ;;  %v1066_v6 = vrot.slane %v1064_v40, 1  ;;  %v6780_v55 = vld [vmem:[%s9494_s4 + $0x198] sm:$0xff]   ;;  %v9670_v22 = vmax.f32 %v8109_v7, 0.0 }
  0xd5   : > { %6276 = vmatpush3.bf16.msra.mxu0 %v6776_v60  ;;  %v9671_v14 = vmax.f32 %v8111_v39, 0.0  ;;  %v2790_v13 = vsel %vm2781_vm10, %v2787_v10, %v2789_v54  ;;  %v2792_v61 = vsel %vm2781_vm10, %v2789_v54, %v2791_v20  ;;  %v516_v39 = vmax.f32 %v7401_v34, 0.0  ;;  %v6782_v34 = vld [vmem:[%s9494_s4 + $0x1a0] sm:$0xff]  }
  0xd6   : > { %9669 = vst [vmem:[#allocation52_spill] sm:$0xff] %v8167_v35  ;;  %893 = vst [vmem:[#allocation2 + $0x78] sm:$0xff] %v8167_v35  ;;  %v8181_v32 = vshll.u32 %v8167_v35, 16  ;;  %6277 = vmatprep.subr.bf16.mxu0 %v6778_v51  ;;  %v848_v60 = vsel %vm9568_vm7, %v9670_v22, 0.0  ;;  %v1067_v40 = vsel %vm951_vm0, %v1062_v8, %v1066_v6  ;;  %v1070_v31 = vor.u32 %v1068_v59, %v1066_v6  ;;  %v8200_v58 = vpop.permute.xlu1 %753  ;;  %v8202_v22 = vpop.permute.xlu0 %750 }
  0xd7   : > { %v847_v36 = vsel %vm9569_vm12, %v9671_v14, 0.0  ;;  %9672 = vst [vmem:[#allocation53_spill] sm:$0xff] %v8200_v58  ;;  %v515_v14 = vmax.f32 %v7404_v37, 0.0  ;;  %vm9570_vm7 = vcmp.eq.s32.totalorder %v8200_v58, 1  ;;  %vm9571_vm12 = vcmp.eq.s32.totalorder %v8202_v22, 1  ;;  %6002 = vmatmul.mubr.bf16.gmra.mrb[24].mxu1 %v1067_v40 }
  0xd8   : > { %v8196_v18 = vpack.c.bf16 %v848_v60, %v847_v36  ;;  %6242 = vmatmul.mubr.bf16.gmra.mrb[4].mxu0 %v2790_v13  ;;  %v1074_v7 = vrot.slane %v8181_v32, 1  ;;  %v2793_v10 = vrot.slane %v7902_v57, 2  ;;  %v9673_v37 = vmax.f32 %v7372_v24, 0.0 }
  0xd9   : > { %6245 = vmatprep.mubr.bf16.mxu0 %v2792_v61  ;;  %6278 = vmatpush3.bf16.msra.mxu0 %v6778_v51  ;;  %v9674_v54 = vmax.f32 %v7389_v29, 0.0  ;;  %v2795_v59 = vrot.slane %v7937_v53, 2  ;;  %v518_v13 = vmax.f32 %v7413_v46, 0.0  ;;  %v517_v40 = vmax.f32 %v7416_v47, 0.0  ;;  %v6784_v46 = vld [vmem:[%s9494_s4 + $0x1a8] sm:$0xff]  }
  0xda   : > { %894 = vst [vmem:[#allocation2 + $0x80] sm:$0xff] %v8196_v18  ;;  %v1075_v6 = vsel %vm951_vm0, %v1070_v31, %v1074_v7  ;;  %6279 = vmatprep.subr.bf16.mxu0 %v6780_v55  ;;  %v850_v8 = vsel %vm9570_vm7, %v9673_v37, 0.0  ;;  %v8223_v31 = vshrl.u32 %v8167_v35, 16  ;;  %v8226_v57 = vshll.u32 %v8196_v18, 16  ;;  %v760_v60 = vpop.permute.xlu1 %759  ;;  %v757_v36 = vpop.permute.xlu0 %756 }
  0xdb   : > { %v849_v51 = vsel %vm9571_vm12, %v9674_v54, 0.0  ;;  %6005 = vmatprep.mubr.bf16.mxu1 %v1075_v6  ;;  %vm810_vm7 = vcmp.eq.s32.totalorder %v760_v60, 1  ;;  %vm809_vm12 = vcmp.eq.s32.totalorder %v757_v36, 1  ;;  %v2794_v54 = vsel %vm2781_vm10, %v2791_v20, %v2793_v10 }
  0xdc   : > { %v8228_v61 = vpack.c.bf16 %v850_v8, %v849_v51  ;;  %v1078_v37 = vor.u32 %v8223_v31, %v1074_v7  ;;  %v1082_v6 = vrot.slane %v8226_v57, 1  ;;  %v8237_v8 = vshrl.u32 %v8196_v18, 16 }
  0xdd   : > { %6280 = vmatpush3.bf16.msra.mxu0 %v6780_v55  ;;  %v852_v47 = vsel %vm810_vm7, %v516_v39, 0.0  ;;  %v851_v7 = vsel %vm809_vm12, %v515_v14, 0.0  ;;  %v2796_v60 = vsel %vm2781_vm10, %v2793_v10, %v2795_v59  ;;  %v520_v39 = vmax.f32 %v7419_v49, 0.0  ;;  %v6786_v14 = vld [vmem:[%s9494_s4 + $0x1b0] sm:$0xff]  }
  0xde   : > { %895 = vst [vmem:[#allocation2 + $0x88] sm:$0xff] %v8228_v61  ;;  %v8240_v53 = vshll.u32 %v8228_v61, 16  ;;  %6281 = vmatprep.subr.bf16.mxu0 %v6782_v34  ;;  %v1083_v55 = vsel %vm951_vm0, %v1078_v37, %v1082_v6  ;;  %v8247_v51 = vpack.c.bf16 %v852_v47, %v851_v7  ;;  %v1086_v36 = vor.u32 %v8237_v8, %v1082_v6  ;;  %v766_v29 = vpop.permute.xlu1 %765  ;;  %v763_v58 = vpop.permute.xlu0 %762 }
  0xdf   : > { %vm812_vm7 = vcmp.eq.s32.totalorder %v766_v29, 1  ;;  %vm811_vm12 = vcmp.eq.s32.totalorder %v763_v58, 1  ;;  %6006 = vmatmul.mubr.bf16.gmra.mrb[28].mxu1 %v1083_v55  ;;  %v519_v6 = vmax.f32 %v7422_v44, 0.0  ;;  %v2799_v29 = vrot.slane %v8004_v0, 2 }
  0xe0   : > { %6246 = vmatmul.mubr.bf16.gmra.mrb[8].mxu0 %v2794_v54  ;;  %v1090_v24 = vrot.slane %v8240_v53, 1  ;;  %896 = vst [vmem:[#allocation2 + $0x90] sm:$0xff] %v8247_v51  ;;  %v854_v10 = vsel %vm812_vm7, %v518_v13, 0.0  ;;  %v853_v37 = vsel %vm811_vm12, %v517_v40, 0.0  ;;  %v6788_v13 = vld [vmem:[%s9494_s4 + $0x1b8] sm:$0xff]  }
  0xe1   : > { %6249 = vmatprep.mubr.bf16.mxu0 %v2796_v60  ;;  %6282 = vmatpush3.bf16.msra.mxu0 %v6782_v34  ;;  %v2797_v34 = vrot.slane %v7966_v62, 2  ;;  %v8260_v47 = vpack.c.bf16 %v854_v10, %v853_v37  ;;  %v8278_v60 = vld [vmem:[%s9494_s4 + $0x1c0] sm:$0xff]   ;;  %v9676_v37 = vld [vmem:[#allocation7_spill] sm:$0xff] }
  0xe2   : > { %v1091_v20 = vsel %vm951_vm0, %v1086_v36, %v1090_v24  ;;  %6283 = vmatprep.subr.bf16.mxu0 %v6784_v46  ;;  %v772_v49 = vpop.permute.xlu1 %771  ;;  %v769_v58 = vpop.permute.xlu0 %768 }
  0xe3   : > { %6009 = vmatprep.mubr.bf16.mxu1 %v1091_v20  ;;  %897 = vst [vmem:[#allocation2 + $0x98] sm:$0xff] %v8260_v47  ;;  %vm814_vm13 = vcmp.eq.s32.totalorder %v772_v49, 1  ;;  %vm813_vm11 = vcmp.eq.s32.totalorder %v769_v58, 1  ;;  %v2798_v62 = vsel %vm2781_vm10, %v2795_v59, %v2797_v34  ;;  %v2800_v0 = vsel %vm2781_vm10, %v2797_v34, %v2799_v29  ;;  %v8295_v34 = vld [vmem:[#allocation2 + $0x38] sm:$0xff]  ;;  %v8305_v58 = vld [vmem:[#allocation2 + $0x48] sm:$0xff] }
  0xe4   : > { %v856_v44 = vsel %vm814_vm13, %v520_v39, 0.0  ;;  %v855_v40 = vsel %vm813_vm11, %v519_v6, 0.0  ;;  %v2801_v59 = vrot.slane %v8035_v5, 2  ;;  %v2803_v20 = vrot.slane %v8070_v4, 2  ;;  %vm6845_vm11 = vmpackc.low %vm774_vm2, %vm773_vm15 }
  0xe5   : > { %6284 = vmatpush3.bf16.msra.mxu0 %v6784_v46  ;;  %v877_v7 = vpack.c.bf16 %v856_v44, %v855_v40  ;;  %v8272_v46 = vshrl.u32 %v8228_v61, 16  ;;  %v9675_v5 = vmax.f32 %v7482_v1, 0.0  ;;  %v2805_v49 = vrot.slane %v8106_v2, 2  ;;  %vm6848_vm15 = vmpackc.low %vm776_vm1, %vm775_vm14  ;;  %v9680_v40 = vld [vmem:[#allocation5_spill] sm:$0xff] }
  0xe6   : > { %6285 = vmatprep.subr.bf16.mxu0 %v6786_v14  ;;  %v2802_v10 = vsel %vm2781_vm10, %v2799_v29, %v2801_v59  ;;  %v2804_v4 = vsel %vm2781_vm10, %v2801_v59, %v2803_v20  ;;  %v2807_v29 = vrot.slane %v8140_v16, 2  ;;  %v3533_v1 = vshrl.u32 %v8295_v34, 16  ;;  %v6787_v59 = vld [vmem:[%s9494_s4 + $0x98] sm:$0xff]   ;;  %vm6854_vm2 = vmpackc.low %vm780_vm5, %vm779_vm6 }
  0xe7   : > { %v8269_v54 = vld [vmem:[#allocation2 + $0x90] sm:$0x1]  ;;  %898 = vst [vmem:[#allocation2 + $0xa0] sm:$0xff] %v877_v7  ;;  %v1094_v36 = vor.u32 %v8272_v46, %v1090_v24  ;;  %v9677_v24 = vmax.f32 %v9676_v37, 0.0  ;;  %v9682_v7 = vld [vmem:[#allocation6_spill] sm:$0xff]  ;;  %v2806_v37 = vsel %vm2781_vm10, %v2803_v20, %v2805_v49  ;;  %v3551_v44 = vshrl.u32 %v8305_v58, 16 }
  0xe8   : > { %6250 = vmatmul.mubr.bf16.gmra.mrb[12].mxu0 %v2798_v62  ;;  %v1096_v55 = vshll.u32 %v8269_v54, 16  ;;  %v9681_v62 = vmax.f32 %v9680_v40, 0.0  ;;  %v8334_v20 = vrot.slane %v8167_v35, 2  ;;  %v8337_v40 = vld [vmem:[#allocation2 + $0x50] sm:$0xff]  ;;  %vm1605_vm14 = vcmask 1046528  }
  0xe9   : > { %6253 = vmatprep.mubr.bf16.mxu0 %v2800_v0  ;;  %6286 = vmatpush3.bf16.msra.mxu0 %v6786_v14  ;;  %v6846_v6 = vpack.c.bf16 %v9677_v24, %v9675_v5  ;;  %v9683_v0 = vmax.f32 %v9682_v7, 0.0  ;;  %v2808_v24 = vsel %vm2781_vm10, %v2805_v49, %v2807_v29  ;;  %v9577_v49 = vrot.slane %v8196_v18, 2 }
  0xea   : > { %6287 = vmatprep.subr.bf16.mxu0 %v6788_v13  ;;  %v1098_v39 = vrot.slane %v1096_v55, 1  ;;  %vm3487_vm1 = vsmask.f32 5376  ;;  %v1641_v3 = vrot.slane %v8269_v54, 1  ;;  %vm9706_vm5 = vcmp.eq.s32.totalorder %v7812_v19, 1 }
  0xeb   : > { %v6849_v55 = vpack.c.bf16 %v9683_v0, %v9681_v62 }
  0xec   : > { %v1099_v14 = vsel %vm951_vm0, %v1094_v36, %v1098_v39  ;;  %vm6851_vm0 = vmpackc.low %vm778_vm3, %vm777_vm4  ;;  %v9685_v36 = vld [vmem:[#allocation9_spill] sm:$0xff]  ;;  %vm9705_vm4 = vcmp.eq.s32.totalorder %v7814_v28, 1  ;;  %v9715_v28 = vld [vmem:[#allocation16_spill] sm:$0xff] }
  0xed   : > { %6288 = vmatpush3.bf16.msra.mxu0 %v6788_v13  ;;  %6010 = vmatmul.mubr.bf16.gmra.mrb[32].mxu1 %v1099_v14  ;;  %v9686_v39 = vmax.f32 %v9685_v36, 0.0  ;;  %v9687_v14 = vld [vmem:[#allocation8_spill] sm:$0xff]  ;;  %v3545_v13 = vshll.u32 %v8303_v52, 16  ;;  %v8343_v36 = vld [vmem:[#allocation2 + $0x58] sm:$0xff]  ;;  %vm6857_vm3 = vmpackc.low %vm782_vm8, %vm781_vm9  ;;  %v9716_v19 = vmax.f32 %v9715_v28, 0.0 }
  0xee   : > { %6325 = vmatprep.subr.bf16.mxu0 %v8278_v60  ;;  %6847 = vmatprep.mubr.msk.bf16.mxu1 %vm6845_vm11, %v6846_v6  ;;  %v3536_v6 = vshll.u32 %v8295_v34, 16  ;;  %vm6860_vm6 = vmpackc.low %vm9706_vm5, %vm9705_vm4 }
  0xef   : > { %v3547_v0 = vrot.slane %v3545_v13, 3  ;;  %v9692_v13 = vld [vmem:[#allocation10_spill] sm:$0xff] }
  0xf0   : > { %6254 = vmatmul.mubr.bf16.gmra.mrb[16].mxu0 %v2802_v10  ;;  %v9688_v10 = vmax.f32 %v9687_v14, 0.0  ;;  %v3538_v62 = vrot.slane %v3536_v6, 3 }
  0xf1   : > { %6257 = vmatprep.mubr.bf16.mxu0 %v2804_v4  ;;  %v3542_v4 = vshrl.u32 %v8303_v52, 16 }
  0xf2   : > { %v6852_v5 = vpack.c.bf16 %v9688_v10, %v9686_v39  ;;  %v3560_v10 = vshrl.u32 %v8337_v40, 16 }
  0xf3   : > { %v3544_v7 = vrot.slane %v3542_v4, 2 }
  0xf4   : > { %v3562_v43 = vrot.slane %v3560_v10, 2  ;;  %v8390_v10 = vld [vmem:[#allocation2 + $0x68] sm:$0xff] }
  0xf5   : > { %6850 = vmatmul.mubr.msk.bf16.vlgmr.msra.gmra.mrb[0].mxu1 %vm6848_vm15, %v6849_v55  ;;  %v3554_v55 = vshll.u32 %v8305_v58, 16  ;;  %v3548_v14 = vor.u32 %v3547_v0, %v3544_v7  ;;  %v8375_v0 = vrot.slane %v8228_v61, 1 }
  0xf6   : > { %6066 = vmatpush3.bf16.msra.mxu1 %v8024_v63  ;;  %6853 = vmatprep.mubr.msk.bf16.mxu1 %vm6851_vm0, %v6852_v5  ;;  %v3535_v63 = vrot.slane %v3533_v1, 2  ;;  %v3553_v1 = vrot.slane %v3551_v44, 2  ;;  %v3563_v5 = vshll.u32 %v8337_v40, 16  ;;  %v9693_v44 = vmax.f32 %v9692_v13, 0.0 }
  0xf7   : > { %6067 = vmatprep.subr.bf16.mxu1 %v6783_v27  ;;  %v3556_v6 = vrot.slane %v3554_v55, 3  ;;  %v9696_v55 = vld [vmem:[#allocation13_spill] sm:$0xff] }
  0xf8   : > { %6258 = vmatmul.mubr.bf16.gmra.mrb[20].mxu0 %v2806_v37  ;;  %v8345_v39 = vor.u32 %v3538_v62, %v3535_v63  ;;  %v8355_v37 = vsel %vm2781_vm10, %v8334_v20, %v9577_v49  ;;  %v9690_v63 = vld [vmem:[#allocation11_spill] sm:$0xff]  ;;  %v8368_v62 = vrot.slane %v7743_v48, 1  ;;  %v3569_v49 = vshrl.u32 %v8343_v36, 16 }
  0xf9   : > { %6261 = vmatprep.mubr.bf16.mxu0 %v2808_v24  ;;  %v8357_v24 = vld [vmem:[#allocation2 + $0x60] sm:$0xff]  ;;  %v9691_v4 = vmax.f32 %v9690_v63, 0.0  ;;  %v9697_v63 = vmax.f32 %v9696_v55, 0.0  ;;  %v3557_v48 = vor.u32 %v3556_v6, %v3553_v1  ;;  %v9700_v55 = vld [vmem:[#allocation33_spill] sm:$0xff]  ;;  %v8401_v6 = vld [vmem:[#allocation2 + $0x70] sm:$0xff] }
  0xfa   : > { %6068 = vmatpush3.bf16.msra.mxu1 %v6783_v27  ;;  %9689 = vst [vmem:[#allocation7_spill] sm:$0xff] %v8345_v39  ;;  %v2810_v27 = vsel %vm2781_vm10, %v2807_v29, %v8334_v20  ;;  %v8372_v7 = vsel %vm3487_vm1, %v8345_v39, %v3548_v14  ;;  %v3581_v1 = vshll.u32 %v8357_v24, 16  ;;  %v3571_v54 = vrot.slane %v3569_v49, 2  ;;  %v6791_v49 = vld [vmem:[%s9494_s4 + $0xa8] sm:$0xff]  }
  0xfb   : > { %6069 = vmatprep.subr.bf16.mxu1 %v6785_v42  ;;  %v6855_v29 = vpack.c.bf16 %v9693_v44, %v9691_v4  ;;  %9694 = vst [vmem:[#allocation23_spill] sm:$0xff] %v8372_v7  ;;  %v9698_v4 = vld [vmem:[#allocation12_spill] sm:$0xff]  ;;  %v3572_v7 = vshll.u32 %v8343_v36, 16 }
  0xfc   : > { %v9699_v13 = vmax.f32 %v9698_v4, 0.0  ;;  %v8404_v4 = vsel %vm3487_vm1, %v3548_v14, %v3557_v48  ;;  %v3583_v39 = vrot.slane %v3581_v1, 3  ;;  %v3587_v14 = vshrl.u32 %v8390_v10, 16 }
  0xfd   : > { %6856 = vmatmul.mubr.msk.bf16.gmra.mrb[4].mxu1 %vm6854_vm2, %v6855_v29  ;;  %v3565_v29 = vrot.slane %v3563_v5, 3  ;;  %v2813_v5 = vrot.slane %v8228_v61, 2  ;;  %9701 = vst [vmem:[#allocation26_spill] sm:$0xff] %v8404_v4  ;;  %v9711_v4 = vld [vmem:[#allocation36_spill] sm:$0xff] }
  0xfe   : > { %v6858_v44 = vpack.c.bf16 %v9699_v13, %v9697_v63  ;;  %6070 = vmatpush3.bf16.msra.mxu1 %v6785_v42  ;;  %v1977_v63 = vrot.slane %v9700_v55, 1  ;;  %v3578_v42 = vshrl.u32 %v8357_v24, 16  ;;  %v8408_v55 = vsel %vm1605_vm14, %v8375_v0, %v1641_v3 }
  0xff   : > { %6071 = vmatprep.subr.bf16.mxu1 %v6787_v59  ;;  %v3566_v13 = vor.u32 %v3565_v29, %v3562_v43  ;;  %9702 = vst [vmem:[#allocation5_spill] sm:$0xff] %v8408_v55  ;;  %v3590_v43 = vshll.u32 %v8390_v10, 16  ;;  %v3596_v29 = vshrl.u32 %v8401_v6, 16  ;;  %v3599_v3 = vshll.u32 %v8401_v6, 16 }
 0x100   : > { %6859 = vmatprep.mubr.msk.bf16.mxu1 %vm6857_vm3, %v6858_v44  ;;  %6262 = vmatmul.mubr.bf16.gmra.mrb[24].mxu0 %v2810_v27  ;;  %v8399_v27 = vrot.slane %v8247_v51, 2  ;;  %v3574_v44 = vrot.slane %v3572_v7, 3  ;;  %v8412_v35 = vsel %vm1605_vm14, %v1977_v63, %v8368_v62  ;;  %v3580_v16 = vrot.slane %v3578_v42, 2  ;;  %v9708_v42 = vld [vmem:[#allocation14_spill] sm:$0xff] }
 0x101   : > { %6265 = vmatprep.mubr.bf16.mxu0 %v8355_v37  ;;  %9703 = vst [vmem:[#allocation6_spill] sm:$0xff] %v8412_v35  ;;  %v8415_v61 = vsel %vm3487_vm1, %v3557_v48, %v3566_v13  ;;  %v3589_v63 = vrot.slane %v3587_v14, 2  ;;  %v9707_v48 = vmax.f32 %v7610_v23, 0.0  ;;  %v9709_v1 = vmax.f32 %v9708_v42, 0.0 }
 0x102   : > { %6072 = vmatpush3.bf16.msra.mxu1 %v6787_v59  ;;  %9704 = vst [vmem:[#allocation29_spill] sm:$0xff] %v8415_v61  ;;  %v3575_v7 = vor.u32 %v3574_v44, %v3571_v54  ;;  %v3584_v59 = vor.u32 %v3583_v39, %v3580_v16  ;;  %v3592_v44 = vrot.slane %v3590_v43, 3  ;;  %v3598_v55 = vrot.slane %v3596_v29, 2  ;;  %v9713_v16 = vld [vmem:[#allocation35_spill] sm:$0xff]  ;;  %v8456_v43 = vld [vmem:[#allocation2 + $0x98] sm:$0x3] }
 0x103   : > { %6073 = vmatprep.subr.bf16.mxu1 %v6789_v17  ;;  %v6861_v35 = vpack.c.bf16 %v9709_v1, %v9707_v48  ;;  %v3601_v61 = vrot.slane %v3599_v3, 3  ;;  %vm9712_vm8 = vcmp.eq.s32.totalorder %v9711_v4, 1  ;;  %vm9714_vm9 = vcmp.eq.s32.totalorder %v9713_v16, 1  ;;  %v9717_v39 = vld [vmem:[#allocation15_spill] sm:$0xff]  ;;  %v6793_v29 = vld [vmem:[%s9494_s4 + $0xb0] sm:$0xff]  }
 0x104   : > { %v8433_v54 = vsel %vm3487_vm1, %v3566_v13, %v3575_v7  ;;  %vm6863_vm13 = vmpackc.low %vm9714_vm9, %vm9712_vm8  ;;  %v9718_v14 = vmax.f32 %v9717_v39, 0.0  ;;  %v9719_v48 = vrot.slane %v8196_v18, 2  ;;  %v8449_v13 = vsel %vm3487_vm1, %v3575_v7, %v3584_v59  ;;  %v8474_v16 = vld [vmem:[#allocation2 + $0x10] sm:$0xfc] }
 0x105   : > { %6862 = vmatmul.mubr.msk.bf16.gmra.mrb[8].mxu1 %vm6860_vm6, %v6861_v35  ;;  %9710 = vst [vmem:[#allocation9_spill] sm:$0xff] %v8433_v54  ;;  %9720 = vst [vmem:[#allocation8_spill] sm:$0xff] %v8449_v13  ;;  %v8454_v4 = vsel %vm2781_vm10, %v2813_v5, %v8399_v27  ;;  %v3593_v3 = vor.u32 %v3592_v44, %v3589_v63  ;;  %v8461_v42 = vor.u32 %v3601_v61, %v3598_v55  ;;  %v6795_v55 = vld [vmem:[%s9494_s4 + $0xb8] sm:$0xff]   ;;  %v9724_v61 = vld [vmem:[#allocation38_spill] sm:$0xff]  ;;  %vm3957_vm3 = vcmask 1044480  }
 0x106   : > { %v6864_v23 = vpack.c.bf16 %v9718_v14, %v9716_v19  ;;  %v8446_v35 = vsel %vm2781_vm10, %v9719_v48, %v2813_v5  ;;  %6074 = vmatpush3.bf16.msra.mxu1 %v6789_v17  ;;  %v8464_v17 = vld [vmem:[#allocation2 + $0x18] sm:$0xff]  ;;  %v2817_v1 = vrot.slane %v8456_v43, 2  ;;  %vm9725_vm7 = vcmp.eq.s32.totalorder %v9724_v61, 1  ;;  %v9728_v44 = vld [vmem:[#allocation18_spill] sm:$0xff]  ;;  %v9734_v48 = vld [vmem:[#allocation39_spill] sm:$0xff] }
 0x107   : > { %6075 = vmatprep.subr.bf16.mxu1 %v6791_v49  ;;  %9721 = vst [vmem:[#allocation11_spill] sm:$0xff] %v8461_v42  ;;  %v8467_v7 = vsel %vm3487_vm1, %v3584_v59, %v3593_v3  ;;  %v8471_v5 = vsel %vm3487_vm1, %v3593_v3, %v8461_v42  ;;  %v3154_v63 = vrot.slane %v8464_v17, 2  ;;  %v9726_v59 = vld [vmem:[#allocation37_spill] sm:$0xff]  ;;  %v9729_v28 = vmax.f32 %v9728_v44, 0.0  ;;  %v9736_v3 = vld [vmem:[#allocation20_spill] sm:$0xff] }
 0x108   : > { %6865 = vmatprep.mubr.msk.bf16.mxu1 %vm6863_vm13, %v6864_v23  ;;  %6266 = vmatmul.mubr.bf16.gmra.mrb[28].mxu0 %v8446_v35  ;;  %9722 = vst [vmem:[#allocation10_spill] sm:$0xff] %v8467_v7  ;;  %9723 = vst [vmem:[#allocation32_spill] sm:$0xff] %v8471_v5  ;;  %vm9727_vm12 = vcmp.eq.s32.totalorder %v9726_v59, 1  ;;  %v9730_v19 = vld [vmem:[#allocation17_spill] sm:$0xff]  ;;  %v9732_v23 = vld [vmem:[#allocation40_spill] sm:$0xff]  ;;  %vm9735_vm0 = vcmp.eq.s32.totalorder %v9734_v48, 1  ;;  %v2818_v59 = vsel %vm2781_vm10, %v8399_v27, %v2817_v1 }
 0x109   : > { %6269 = vmatprep.mubr.bf16.mxu0 %v8454_v4  ;;  %vm6866_vm11 = vmpackc.low %vm9727_vm12, %vm9725_vm7  ;;  %v9731_v39 = vmax.f32 %v9730_v19, 0.0  ;;  %vm9733_vm15 = vcmp.eq.s32.totalorder %v9732_v23, 1  ;;  %v9737_v42 = vmax.f32 %v9736_v3, 0.0  ;;  %v9738_v5 = vld [vmem:[#allocation19_spill] sm:$0xff]  ;;  %v8505_v19 = vld [vmem:[%s9494_s4 + $0xc0] sm:$0xff]   ;;  %v3971_v1 = vrot.slane %v8305_v58, 3 }
 0x10a   : > { %6076 = vmatpush3.bf16.msra.mxu1 %v6791_v49  ;;  %v3153_v49 = vrot.slane %v8474_v16, 2  ;;  %vm6869_vm2 = vmpackc.low %vm9735_vm0, %vm9733_vm15  ;;  %v9739_v61 = vmax.f32 %v9738_v5, 0.0  ;;  %v3969_v5 = vrot.slane %v8303_v52, 3  ;;  %v9744_v23 = vld [vmem:[#allocation22_spill] sm:$0xff]  ;;  %v9746_v3 = vld [vmem:[#allocation21_spill] sm:$0xff]  ;;  %vm9749_vm8 = vcmp.eq.s32.totalorder %v7979_v56, 1 }
 0x10b   : > { %6077 = vmatprep.subr.bf16.mxu1 %v6793_v29  ;;  %v6867_v14 = vpack.c.bf16 %v9731_v39, %v9729_v28  ;;  %v8500_v28 = vld [vmem:[#allocation2 + $0x20] sm:$0xff]  ;;  %v8507_v39 = vld [vmem:[#allocation2 + $0x28] sm:$0xff]  ;;  %v9745_v48 = vmax.f32 %v9744_v23, 0.0  ;;  %v9752_v23 = vld [vmem:[#allocation25_spill] sm:$0xff]  ;;  %v9583_v54 = vrot.slane %v8247_v51, 1  ;;  %vm9758_vm7 = vcmp.eq.s32.totalorder %v8012_v25, 1 }
 0x10c   : > { %v6870_v7 = vpack.c.bf16 %v9739_v61, %v9737_v42  ;;  %v3155_v44 = vsel %vm2781_vm10, %v3153_v49, %v3154_v63  ;;  %v3156_v42 = vrot.slane %v8500_v28, 2  ;;  %v9742_v49 = vld [vmem:[#allocation42_spill] sm:$0xff]  ;;  %vm9759_vm12 = vcmp.eq.s32.totalorder %v8010_v12, 1  ;;  %v9766_v12 = vld [vmem:[#allocation31_spill] sm:$0xff] }
 0x10d   : > { %6868 = vmatmul.mubr.msk.bf16.gmra.mrb[12].mxu1 %vm6866_vm11, %v6867_v14  ;;  %v9740_v14 = vld [vmem:[#allocation43_spill] sm:$0xff]  ;;  %vm9743_vm5 = vcmp.eq.s32.totalorder %v9742_v49, 1  ;;  %v9750_v49 = vld [vmem:[#allocation44_spill] sm:$0xff]  ;;  %vm6878_vm11 = vmpackc.low %vm9759_vm12, %vm9758_vm7  ;;  %vm9764_vm15 = vcmp.eq.s32.totalorder %v8043_v21, 1  ;;  %vm9765_vm0 = vcmp.eq.s32.totalorder %v8041_v26, 1  ;;  %v9767_v25 = vmax.f32 %v9766_v12, 0.0 }
 0x10e   : > { %6871 = vmatprep.mubr.msk.bf16.mxu1 %vm6869_vm2, %v6870_v7  ;;  %6078 = vmatpush3.bf16.msra.mxu1 %v6793_v29  ;;  %v3158_v7 = vrot.slane %v8507_v39, 2  ;;  %v9582_v29 = vrot.slane %v8295_v34, 3  ;;  %vm9741_vm4 = vcmp.eq.s32.totalorder %v9740_v14, 1  ;;  %v8532_v14 = vsel %vm3957_vm3, %v3969_v5, %v3971_v1  ;;  %vm6881_vm2 = vmpackc.low %vm9765_vm0, %vm9764_vm15  ;;  %v6798_v21 = vld [vmem:[%s9494_s4 + $0x1e0] sm:$0xff]  }
 0x10f   : > { %6079 = vmatprep.subr.bf16.mxu1 %v6795_v55  ;;  %vm6872_vm6 = vmpackc.low %vm9743_vm5, %vm9741_vm4  ;;  %9748 = vst [vmem:[#allocation13_spill] sm:$0xff] %v8532_v14  ;;  %vm9751_vm9 = vcmp.eq.s32.totalorder %v9750_v49, 1  ;;  %v3157_v13 = vsel %vm2781_vm10, %v3154_v63, %v3156_v42  ;;  %v8547_v14 = vld [vmem:[#allocation2 + $0x30] sm:$0xff]  ;;  %v3977_v49 = vrot.slane %v8357_v24, 3  ;;  %v8556_v63 = vsel %vm1605_vm14, %v8375_v0, %v9583_v54  ;;  %v9762_v54 = vld [vmem:[#allocation27_spill] sm:$0xff] }
 0x110   : > { %6270 = vmatmul.mubr.bf16.gmra.mrb[32].mxu0 %v2818_v59  ;;  %v6792_v59 = vld [vmem:[%s9494_s4 + $0x1c8] sm:$0xff]   ;;  %vm6875_vm13 = vmpackc.low %vm9751_vm9, %vm9749_vm8  ;;  %v3159_v56 = vsel %vm2781_vm10, %v3156_v42, %v3158_v7  ;;  %v3166_v26 = vrot.slane %v8305_v58, 2  ;;  %v3632_v12 = vshrl.u32 %v8247_v51, 16  ;;  %vm9770_vm4 = vcmp.eq.s32.totalorder %v8075_v30, 1  ;;  %v9775_v30 = vld [vmem:[#allocation50_spill] sm:$0xff] }
 0x111   : > { %6289 = vmatprep.mubr.bf16.mxu0 %v3155_v44  ;;  %v8529_v44 = vsel %vm3957_vm3, %v9582_v29, %v3969_v5  ;;  %v3973_v29 = vrot.slane %v8337_v40, 3  ;;  %v3975_v5 = vrot.slane %v8343_v36, 3  ;;  %vm9771_vm5 = vcmp.eq.s32.totalorder %v8073_v41, 1 }
 0x112   : > { %6080 = vmatpush3.bf16.msra.mxu1 %v6795_v55  ;;  %v9747_v55 = vmax.f32 %v9746_v3, 0.0  ;;  %v9754_v3 = vld [vmem:[#allocation24_spill] sm:$0xff]  ;;  %v9773_v58 = vmax.f32 %v7751_v45, 0.0  ;;  %vm9774_vm8 = vcmp.eq.s32.totalorder %v8116_v38, 1  ;;  %vm9776_vm9 = vcmp.eq.s32.totalorder %v9775_v30, 1  ;;  %v9779_v45 = vld [vmem:[#allocation34_spill] sm:$0xff] }
 0x113   : > { %6117 = vmatprep.subr.bf16.mxu1 %v8505_v19  ;;  %v8565_v42 = vsel %vm3957_vm3, %v3973_v29, %v3975_v5  ;;  %vm9781_vm7 = vsmask.f32 6400  ;;  %v6802_v30 = vld [vmem:[%s9494_s4 + $0x1f0] sm:$0xff]   ;;  %vm9784_vm15 = vcmp.eq.s32.totalorder %v8143_v15, 1  ;;  %v9792_v15 = vld [vmem:[#allocation49_spill] sm:$0xff] }
 0x114   : > { %v6873_v61 = vpack.c.bf16 %v9747_v55, %v9745_v48  ;;  %v9753_v48 = vmax.f32 %v9752_v23, 0.0  ;;  %v9755_v55 = vmax.f32 %v9754_v3, 0.0  ;;  %v3979_v23 = vrot.slane %v8390_v10, 3  ;;  %9757 = vst [vmem:[#allocation33_spill] sm:$0xff] %v8565_v42  ;;  %vm9782_vm12 = vmmov %vm9781_vm7 }
 0x115   : > { %v3160_v3 = vrot.slane %v8547_v14, 2  ;;  %v9763_v42 = vmax.f32 %v9762_v54, 0.0  ;;  %v9768_v54 = vld [vmem:[#allocation30_spill] sm:$0xff] }
 0x116   : > { %6874 = vmatmul.mubr.msk.bf16.gmra.mrb[16].mxu1 %vm6872_vm6, %v6873_v61  ;;  %v6876_v61 = vpack.c.bf16 %v9755_v55, %v9753_v48  ;;  %v8559_v48 = vsel %vm3957_vm3, %v3971_v1, %v3973_v29  ;;  %v8572_v55 = vsel %vm3957_vm3, %v3977_v49, %v3979_v23  ;;  %v9584_v1 = vrot.slane %v8401_v6, 3  ;;  %v9760_v29 = vld [vmem:[#allocation28_spill] sm:$0xff]  ;;  %vm6884_vm6 = vmpackc.low %vm9771_vm5, %vm9770_vm4 }
 0x117   : > { %9756 = vst [vmem:[#allocation12_spill] sm:$0xff] %v8559_v48  ;;  %vm9790_vm4 = vcmp.eq.s32.totalorder %v8172_v11, 1  ;;  %vm9791_vm5 = vcmp.eq.s32.totalorder %v8170_v33, 1  ;;  %v8695_v33 = vld [vmem:[%s9494_s4 + $0x200] sm:$0xff]  }
 0x118   : > { %6877 = vmatprep.mubr.msk.bf16.mxu1 %vm6875_vm13, %v6876_v61  ;;  %6290 = vmatmul.mubr.bf16.vlgmr.msra.gmra.mrb[0].mxu0 %v3157_v13  ;;  %v6794_v13 = vld [vmem:[%s9494_s4 + $0x1d0] sm:$0xff]   ;;  %v3162_v61 = vrot.slane %v8295_v34, 2  ;;  %vm6887_vm13 = vmpackc.low %vm9776_vm9, %vm9774_vm8  ;;  %vm9797_vm9 = vcmp.eq.s32.totalorder %v8202_v22, 1  ;;  %v6821_v22 = vld [vmem:[#allocation2 + $0x18] sm:$0xff] }
 0x119   : > { %6293 = vmatprep.mubr.bf16.mxu0 %v3159_v56  ;;  %6326 = vmatpush3.bf16.msra.mxu0 %v8278_v60  ;;  %v8569_v60 = vsel %vm3957_vm3, %v3975_v5, %v3977_v49  ;;  %v9761_v56 = vmax.f32 %v9760_v29, 0.0  ;;  %v6796_v5 = vld [vmem:[%s9494_s4 + $0x1d8] sm:$0xff]   ;;  %v9769_v49 = vmax.f32 %v9768_v54, 0.0  ;;  %v6800_v54 = vld [vmem:[%s9494_s4 + $0x1e8] sm:$0xff]  }
 0x11a   : > { %6327 = vmatprep.subr.bf16.mxu0 %v6792_v59  ;;  %v3163_v29 = vsel %vm2781_vm10, %v3160_v3, %v3162_v61 }
 0x11b   : > { %v6879_v48 = vpack.c.bf16 %v9763_v42, %v9761_v56  ;;  %v3161_v42 = vsel %vm2781_vm10, %v3158_v7, %v3160_v3  ;;  %v2440_v56 = vrot.slane %v8223_v31, 1  ;;  %v2443_v7 = vrot.slane %v8181_v32, 2 }
 0x11c   : > { %v2452_v3 = vrot.slane %v8226_v57, 2 }
 0x11d   : > { %6328 = vmatpush3.bf16.msra.mxu0 %v6792_v59  ;;  %v8590_v59 = vsel %vm3957_vm3, %v3979_v23, %v9584_v1  ;;  %v3164_v23 = vrot.slane %v8303_v52, 2  ;;  %v9772_v52 = vmax.f32 %v7786_v50, 0.0  ;;  %v9777_v50 = vld [vmem:[#allocation41_spill] sm:$0xff] }
 0x11e   : > { %6880 = vmatmul.mubr.msk.bf16.gmra.mrb[20].mxu1 %vm6878_vm11, %v6879_v48  ;;  %6329 = vmatprep.subr.bf16.mxu0 %v6794_v13  ;;  %v6882_v48 = vpack.c.bf16 %v9769_v49, %v9767_v25  ;;  %v2449_v25 = vrot.slane %v8237_v8, 1  ;;  %v3635_v49 = vshll.u32 %v8247_v51, 16  ;;  %v9778_v41 = vmax.f32 %v9777_v50, 0.0 }
 0x11f   : > { %v3167_v38 = vsel %vm2781_vm10, %v3164_v23, %v3166_v26  ;;  %vm9783_vm11 = vcmp.eq.s32.totalorder %v8145_v9, 1  ;;  %v9793_v9 = vmax.f32 %v9792_v15, 0.0 }
 0x120   : > { %6883 = vmatprep.mubr.msk.bf16.mxu1 %vm6881_vm2, %v6882_v48  ;;  %6294 = vmatmul.mubr.bf16.gmra.mrb[4].mxu0 %v3161_v42  ;;  %v8624_v48 = vor.u32 %v2443_v7, %v2440_v56  ;;  %v9780_v42 = vmax.f32 %v9779_v45, 0.0  ;;  %v2461_v56 = vrot.slane %v8240_v53, 2  ;;  %v2477_v45 = vshll.u32 %v8456_v43, 16  ;;  %vm6890_vm0 = vmpackc.low %vm9784_vm15, %vm9783_vm11 }
 0x121   : > { %6297 = vmatprep.mubr.bf16.mxu0 %v3163_v29  ;;  %6330 = vmatpush3.bf16.msra.mxu0 %v6794_v13  ;;  %v6885_v13 = vpack.c.bf16 %v9773_v58, %v9772_v52  ;;  %v3165_v52 = vsel %vm2781_vm10, %v3162_v61, %v3164_v23  ;;  %v8635_v58 = vld [vmem:[#allocation2 + $0xa0] sm:$0x7]  ;;  %v3991_v61 = vrot.slane %v8260_v47, 3  ;;  %v2470_v23 = vrot.slane %v3635_v49, 2  ;;  %vm9789_vm2 = vmmov %vm9781_vm7 }
 0x122   : > { %6331 = vmatprep.subr.bf16.mxu0 %v6796_v5  ;;  %v6888_v29 = vpack.c.bf16 %v9780_v42, %v9778_v41  ;;  %v3993_v50 = vrot.slane %v8635_v58, 3  ;;  %v2474_v41 = vshrl.u32 %v8456_v43, 16  ;;  %v3168_v42 = vrot.slane %v8337_v40, 2  ;;  %v9785_v40 = vld [vmem:[#allocation47_spill] sm:$0xff]  ;;  %vm9796_vm8 = vmmov %vm9789_vm2 }
 0x123   : > { %v9786_v43 = vmax.f32 %v9785_v40, 0.0  ;;  %v1568_v40 = vld [vmem:[#allocation2] sm:$0xfe] }
 0x124   : > { %v1606_v11 = vrot.slane %v1568_v40, 1 }
 0x125   : > { %6332 = vmatpush3.bf16.msra.mxu0 %v6796_v5  ;;  %v2453_v5 = vor.u32 %v2452_v3, %v2449_v25  ;;  %v2467_v25 = vrot.slane %v3632_v12, 1 }
 0x126   : > { %6886 = vmatmul.mubr.msk.bf16.gmra.mrb[24].mxu1 %vm6884_vm6, %v6885_v13  ;;  %6333 = vmatprep.subr.bf16.mxu0 %v6798_v21  ;;  %v2458_v13 = vrot.slane %v8272_v46, 1  ;;  %vm6893_vm6 = vmpackc.low %vm9791_vm5, %vm9790_vm4  ;;  %vm4781_vm5 = vcmask 1043457  }
 0x127   : > { %6889 = vmatprep.mubr.msk.bf16.mxu1 %vm6887_vm13, %v6888_v29  ;;  %v8642_v7 = vsel %vm9781_vm7, %v8624_v48, %v2453_v5 }
 0x128   : > { %6298 = vmatmul.mubr.bf16.gmra.mrb[8].mxu0 %v3165_v52  ;;  %v2462_v3 = vor.u32 %v2461_v56, %v2458_v13  ;;  %v2471_v52 = vor.u32 %v2470_v23, %v2467_v25  ;;  %v8663_v13 = vsel %vm3957_vm3, %v3991_v61, %v3993_v50  ;;  %v2476_v56 = vrot.slane %v2474_v41, 1  ;;  %v6804_v25 = vld [vmem:[%s9494_s4 + $0x1f8] sm:$0xff]   ;;  %v9794_v50 = vld [vmem:[#allocation48_spill] sm:$0xff] }
 0x129   : > { %6301 = vmatprep.mubr.bf16.mxu0 %v3167_v38  ;;  %6334 = vmatpush3.bf16.msra.mxu0 %v6798_v21  ;;  %v3170_v21 = vrot.slane %v8343_v36, 2  ;;  %v2479_v38 = vrot.slane %v2477_v45, 2  ;;  %v9787_v36 = vld [vmem:[#allocation46_spill] sm:$0xff]  ;;  %v9795_v41 = vmax.f32 %v9794_v50, 0.0  ;;  %v3169_v45 = vsel %vm2781_vm10, %v3166_v26, %v3168_v42 }
 0x12a   : > { %6335 = vmatprep.subr.bf16.mxu0 %v6800_v54  ;;  %v8658_v29 = vsel %vm9782_vm12, %v2453_v5, %v2462_v3  ;;  %v9788_v1 = vmax.f32 %v9787_v36, 0.0  ;;  %v8677_v23 = vsel %vm9789_vm2, %v2462_v3, %v2471_v52  ;;  %v3174_v36 = vrot.slane %v8390_v10, 2 }
 0x12b   : > { %v3176_v50 = vrot.slane %v8401_v6, 2 }
 0x12c   : > { %v6891_v5 = vpack.c.bf16 %v9788_v1, %v9786_v43  ;;  %v6894_v1 = vpack.c.bf16 %v9795_v41, %v9793_v9  ;;  %v3171_v43 = vsel %vm2781_vm10, %v3168_v42, %v3170_v21  ;;  %v9798_v42 = vld [vmem:[#allocation53_spill] sm:$0xff]  ;;  %v6799_v41 = vld [vmem:[%s9494_s4 + $0xc8] sm:$0xff]  }
 0x12d   : > { %6336 = vmatpush3.bf16.msra.mxu0 %v6800_v54  ;;  %v2480_v54 = vor.u32 %v2479_v38, %v2476_v56  ;;  %v3172_v56 = vrot.slane %v8357_v24, 2  ;;  %v6820_v38 = vld [vmem:[#allocation2 + $0x8] sm:$0xff]  ;;  %vm9799_vm13 = vcmp.eq.s32.totalorder %v9798_v42, 1  ;;  %v3179_v40 = vsel %vm2781_vm10, %v3176_v50, %v8334_v20  ;;  %v6824_v42 = vld [vmem:[#allocation2 + $0x30] sm:$0xff] }
 0x12e   : > { %6892 = vmatmul.mubr.msk.bf16.gmra.mrb[28].mxu1 %vm6890_vm0, %v6891_v5  ;;  %6337 = vmatprep.subr.bf16.mxu0 %v6802_v30  ;;  %v1607_v26 = vrot.slane %v6820_v38, 1  ;;  %vm6896_vm7 = vmpackc.low %vm9799_vm13, %vm9797_vm9  ;;  %v9802_v5 = vld [vmem:[#allocation3_spill] sm:$0xff]  ;;  %vm4383_vm9 = vsmask.f32 5392 }
 0x12f   : > { %6895 = vmatprep.mubr.msk.bf16.mxu1 %vm6893_vm6, %v6894_v1  ;;  %v8690_v3 = vsel %vm9796_vm8, %v2471_v52, %v2480_v54  ;;  %v9803_v54 = vmax.f32 %v9802_v5, 0.0  ;;  %v3173_v24 = vsel %vm2781_vm10, %v3170_v21, %v3172_v56  ;;  %v3175_v10 = vsel %vm2781_vm10, %v3172_v56, %v3174_v36 }
 0x130   : > { %6302 = vmatmul.mubr.bf16.gmra.mrb[12].mxu0 %v3169_v45  ;;  %v1608_v9 = vsel %vm1605_vm14, %v1606_v11, %v1607_v26  ;;  %v1610_v1 = vsel %vm1605_vm14, %v1607_v26, %v8368_v62  ;;  %v3177_v21 = vsel %vm2781_vm10, %v3174_v36, %v3176_v50  ;;  %v6822_v11 = vld [vmem:[#allocation2 + $0x20] sm:$0xff]  ;;  %vm4782_vm6 = vsmask.f32 7942 }
 0x131   : > { %6305 = vmatprep.mubr.bf16.mxu0 %v3171_v43  ;;  %6338 = vmatpush3.bf16.msra.mxu0 %v6802_v30  ;;  %v9800_v30 = vld [vmem:[#allocation4_spill] sm:$0xff]  ;;  %v1613_v56 = vrot.slane %v6822_v11, 1  ;;  %v6805_v36 = vld [vmem:[%s9494_s4 + $0xe0] sm:$0xff]   ;;  %vm4382_vm8 = vsmask.f32 1280 }
 0x132   : > { %6339 = vmatprep.subr.bf16.mxu0 %v6804_v25  ;;  %v9801_v52 = vmax.f32 %v9800_v30, 0.0  ;;  %v6801_v43 = vld [vmem:[%s9494_s4 + $0xd0] sm:$0xff]   ;;  %v1617_v30 = vrot.slane %v6824_v42, 1  ;;  %v3116_v50 = vld [vmem:[#allocation2 + $0xa0] sm:$0x3]  ;;  %v3518_v42 = vshll.u32 %v8507_v39, 16 }
 0x134   : > { %v6897_v15 = vpack.c.bf16 %v9803_v54, %v9801_v52  ;;  %v6825_v52 = vld [vmem:[#allocation2 + $0x38] sm:$0xff]  ;;  %v3186_v54 = vrot.slane %v8260_v47, 2 }
 0x135   : > { %6340 = vmatpush3.bf16.msra.mxu0 %v6804_v25  ;;  %v1611_v25 = vrot.slane %v6821_v22, 1  ;;  %v1619_v5 = vrot.slane %v6825_v52, 1  ;;  %v3492_v22 = vshll.u32 %v8474_v16, 16 }
 0x136   : > { %6898 = vmatmul.mubr.msk.bf16.gmra.mrb[32].mxu1 %vm6896_vm7, %v6897_v15  ;;  %6377 = vmatprep.subr.bf16.mxu0 %v8695_v33  ;;  %v3497_v15 = vshrl.u32 %v8464_v17, 16 }
 0x137   : > { %6081 = vmatprep.mubr.bf16.mxu1 %v1608_v9  ;;  %v8719_v45 = vsel %vm1605_vm14, %v8368_v62, %v1611_v25  ;;  %v6823_v62 = vld [vmem:[#allocation2 + $0x28] sm:$0xff]  ;;  %v8733_v26 = vsel %vm1605_vm14, %v1611_v25, %v1613_v56  ;;  %v3500_v9 = vshll.u32 %v8464_v17, 16  ;;  %v3187_v25 = vsel %vm2781_vm10, %v8399_v27, %v3186_v54 }
 0x138   : > { %6306 = vmatmul.mubr.bf16.gmra.mrb[16].mxu0 %v3173_v24  ;;  %v1615_v38 = vrot.slane %v6823_v62, 1  ;;  %v3494_v62 = vrot.slane %v3492_v22, 3  ;;  %v3509_v27 = vshll.u32 %v8500_v28, 16 }
 0x139   : > { %6309 = vmatprep.mubr.bf16.mxu0 %v3175_v10  ;;  %v3489_v10 = vshrl.u32 %v8474_v16, 16  ;;  %v6827_v16 = vld [vmem:[#allocation2 + $0x48] sm:$0xff] }
 0x13a   : > { %v8737_v20 = vsel %vm1605_vm14, %v1613_v56, %v1615_v38  ;;  %v8752_v24 = vsel %vm1605_vm14, %v1615_v38, %v1617_v30  ;;  %v1623_v11 = vrot.slane %v6827_v16, 1  ;;  %v3188_v38 = vrot.slane %v3116_v50, 2 }
 0x13b   : > { %v3491_v56 = vrot.slane %v3489_v10, 2  ;;  %v3511_v22 = vrot.slane %v3509_v27, 3  ;;  %v6808_v27 = vld [vmem:[%s9494_s4 + $0x208] sm:$0xff]  }
 0x13e   : > { %6082 = vmatmul.mubr.bf16.vlgmr.msra.gmra.mrb[0].mxu1 %v1610_v1  ;;  %v3502_v1 = vrot.slane %v3500_v9, 3  ;;  %v3495_v9 = vor.u32 %v3494_v62, %v3491_v56  ;;  %v8795_v62 = vld [vmem:[%s9494_s4 + $0x100] sm:$0xff]  }
 0x13f   : > { %6118 = vmatpush3.bf16.msra.mxu1 %v8505_v19  ;;  %6085 = vmatprep.mubr.bf16.mxu1 %v8719_v45  ;;  %v6803_v19 = vld [vmem:[%s9494_s4 + $0xd8] sm:$0xff]  }
 0x140   : > { %6310 = vmatmul.mubr.bf16.gmra.mrb[20].mxu0 %v3177_v21  ;;  %6119 = vmatprep.subr.bf16.mxu1 %v6799_v41  ;;  %v6809_v21 = vld [vmem:[%s9494_s4 + $0xf0] sm:$0xff]  }
 0x141   : > { %6313 = vmatprep.mubr.bf16.mxu0 %v3179_v40  ;;  %v6826_v40 = vld [vmem:[#allocation2 + $0x40] sm:$0xff] }
 0x143   : > { %6120 = vmatpush3.bf16.msra.mxu1 %v6799_v41  ;;  %v3499_v41 = vrot.slane %v3497_v15, 2 }
 0x144   : > { %6121 = vmatprep.subr.bf16.mxu1 %v6801_v43 }
 0x146   : > { %6086 = vmatmul.mubr.bf16.gmra.mrb[4].mxu1 %v8733_v26 }
 0x147   : > { %6089 = vmatprep.mubr.bf16.mxu1 %v8737_v20  ;;  %6122 = vmatpush3.bf16.msra.mxu1 %v6801_v43  ;;  %v1621_v43 = vrot.slane %v6826_v40, 1  ;;  %v8787_v40 = vld [vmem:[#allocation2 + $0x58] sm:$0xff] }
 0x148   : > { %6314 = vmatmul.mubr.bf16.gmra.mrb[24].mxu0 %v8355_v37  ;;  %6123 = vmatprep.subr.bf16.mxu1 %v6803_v19  ;;  %v6807_v37 = vld [vmem:[%s9494_s4 + $0xe8] sm:$0xff]  }
 0x149   : > { %6317 = vmatprep.mubr.bf16.mxu0 %v8446_v35  ;;  %v8756_v35 = vsel %vm1605_vm14, %v1617_v30, %v1619_v5  ;;  %v6811_v30 = vld [vmem:[%s9494_s4 + $0xf8] sm:$0xff]   ;;  %v8775_v52 = vsel %vm1605_vm14, %v1619_v5, %v1621_v43  ;;  %v8779_v15 = vsel %vm1605_vm14, %v1621_v43, %v1623_v11  ;;  %v8784_v5 = vld [vmem:[#allocation2 + $0x50] sm:$0xff]  ;;  %v1627_v43 = vrot.slane %v8787_v40, 1 }
 0x14b   : > { %6124 = vmatpush3.bf16.msra.mxu1 %v6803_v19  ;;  %v3503_v19 = vor.u32 %v3502_v1, %v3499_v41  ;;  %v3520_v41 = vrot.slane %v3518_v42, 3  ;;  %v1625_v1 = vrot.slane %v8784_v5, 1 }
 0x14c   : > { %6125 = vmatprep.subr.bf16.mxu1 %v6805_v36 }
 0x14e   : > { %6090 = vmatmul.mubr.bf16.gmra.mrb[8].mxu1 %v8752_v24 }
 0x14f   : > { %6093 = vmatprep.mubr.bf16.mxu1 %v8756_v35  ;;  %6126 = vmatpush3.bf16.msra.mxu1 %v6805_v36  ;;  %v3515_v36 = vshrl.u32 %v8507_v39, 16 }
 0x150   : > { %6318 = vmatmul.mubr.bf16.gmra.mrb[28].mxu0 %v8454_v4  ;;  %6127 = vmatprep.subr.bf16.mxu1 %v6807_v37  ;;  %v3506_v4 = vshrl.u32 %v8500_v28, 16 }
 0x151   : > { %6321 = vmatprep.mubr.bf16.mxu0 %v3187_v25  ;;  %v3504_v25 = vsel %vm3487_vm1, %v3495_v9, %v3503_v19  ;;  %v3517_v50 = vrot.slane %v3515_v36, 2 }
 0x152   : > { %v3508_v10 = vrot.slane %v3506_v4, 2  ;;  %v8803_v4 = vsel %vm1605_vm14, %v1625_v1, %v1627_v43 }
 0x153   : > { %6128 = vmatpush3.bf16.msra.mxu1 %v6807_v37  ;;  %v3189_v37 = vsel %vm2781_vm10, %v3186_v54, %v3188_v38  ;;  %v3524_v54 = vshrl.u32 %v8547_v14, 16  ;;  %v3521_v56 = vor.u32 %v3520_v41, %v3517_v50  ;;  %v8799_v38 = vsel %vm1605_vm14, %v1623_v11, %v1625_v1  ;;  %v8811_v11 = vld [vmem:[#allocation2 + $0x60] sm:$0xff]  ;;  %v9804_v41 = vld [vmem:[#allocation7_spill] sm:$0xff]  ;;  %vm9823_vm10 = vmmov %vm9789_vm2 }
 0x154   : > { %6129 = vmatprep.subr.bf16.mxu1 %v6809_v21  ;;  %v3512_v16 = vor.u32 %v3511_v22, %v3508_v10  ;;  %v1631_v10 = vrot.slane %v8106_v2, 1  ;;  %v6810_v22 = vld [vmem:[%s9494_s4 + $0x210] sm:$0xff]   ;;  %v6812_v2 = vld [vmem:[%s9494_s4 + $0x218] sm:$0xff]  }
 0x155   : > { %v3526_v42 = vrot.slane %v3524_v54, 2  ;;  %v9806_v54 = vld [vmem:[#allocation52_spill] sm:$0xff] }
 0x156   : > { %6094 = vmatmul.mubr.bf16.gmra.mrb[12].mxu1 %v8775_v52  ;;  %v3513_v36 = vsel %vm3487_vm1, %v3503_v19, %v3512_v16  ;;  %v3522_v9 = vsel %vm3487_vm1, %v3512_v16, %v3521_v56 }
 0x157   : > { %6097 = vmatprep.mubr.bf16.mxu1 %v8779_v15  ;;  %6130 = vmatpush3.bf16.msra.mxu1 %v6809_v21  ;;  %v3527_v21 = vshll.u32 %v8547_v14, 16 }
 0x158   : > { %6322 = vmatmul.mubr.bf16.gmra.mrb[32].mxu0 %v3189_v37  ;;  %6131 = vmatprep.subr.bf16.mxu1 %v6811_v30  ;;  %v1629_v37 = vrot.slane %v8811_v11, 1 }
 0x159   : > { %6341 = vmatprep.mubr.bf16.mxu0 %v3504_v25 }
 0x15a   : > { %v8820_v25 = vsel %vm1605_vm14, %v1627_v43, %v1629_v37  ;;  %v8824_v50 = vsel %vm1605_vm14, %v1629_v37, %v1631_v10  ;;  %v9805_v43 = vld [vmem:[#allocation51_spill] sm:$0xff]  ;;  %v1637_v37 = vrot.slane %v8196_v18, 1  ;;  %v6816_v18 = vld [vmem:[%s9494_s4 + $0x238] sm:$0xff]  }
 0x15b   : > { %6132 = vmatpush3.bf16.msra.mxu1 %v6811_v30  ;;  %v3529_v30 = vrot.slane %v3527_v21, 3  ;;  %v1633_v16 = vrot.slane %v9805_v43, 1  ;;  %v1635_v21 = vrot.slane %v9806_v54, 1  ;;  %v9814_v43 = vld [vmem:[#allocation10_spill] sm:$0xff]  ;;  %v3610_v54 = vrot.slane %v8181_v32, 3  ;;  %v6832_v32 = vld [vmem:[%s9494_s4 + $0x108] sm:$0xff]  }
 0x15c   : > { %6429 = vmatprep.subr.bf16.mxu1 %v8795_v62 }
 0x15d   : > { %v3530_v19 = vor.u32 %v3529_v30, %v3526_v42  ;;  %v6814_v42 = vld [vmem:[%s9494_s4 + $0x228] sm:$0xff]  }
 0x15e   : > { %6098 = vmatmul.mubr.bf16.gmra.mrb[16].mxu1 %v8799_v38  ;;  %v9807_v30 = vld [vmem:[#allocation23_spill] sm:$0xff] }
 0x15f   : > { %6101 = vmatprep.mubr.bf16.mxu1 %v8803_v4  ;;  %v3540_v1 = vsel %vm3487_vm1, %v3530_v19, %v9804_v41  ;;  %v9811_v41 = vld [vmem:[#allocation5_spill] sm:$0xff] }
 0x160   : > { %6342 = vmatmul.mubr.bf16.vlgmr.msra.gmra.mrb[0].mxu0 %v3513_v36  ;;  %v8839_v36 = vsel %vm1605_vm14, %v1631_v10, %v1633_v16  ;;  %v6815_v10 = vld [vmem:[%s9494_s4 + $0x230] sm:$0xff]  }
 0x161   : > { %6345 = vmatprep.mubr.bf16.mxu0 %v3522_v9  ;;  %6378 = vmatpush3.bf16.msra.mxu0 %v8695_v33  ;;  %v3531_v33 = vsel %vm3487_vm1, %v3521_v56, %v3530_v19  ;;  %v8843_v56 = vsel %vm1605_vm14, %v1633_v16, %v1635_v21  ;;  %v9808_v9 = vld [vmem:[#allocation26_spill] sm:$0xff]  ;;  %v8861_v19 = vsel %vm1605_vm14, %v1637_v37, %v8375_v0  ;;  %v9813_v0 = vld [vmem:[#allocation8_spill] sm:$0xff]  ;;  %v3607_v16 = vrot.slane %v8223_v31, 2 }
 0x162   : > { %6379 = vmatprep.subr.bf16.mxu0 %v6808_v27  ;;  %v3625_v31 = vrot.slane %v8272_v46, 2 }
 0x165   : > { %6380 = vmatpush3.bf16.msra.mxu0 %v6808_v27  ;;  %v6813_v27 = vld [vmem:[%s9494_s4 + $0x220] sm:$0xff]  }
 0x166   : > { %6102 = vmatmul.mubr.bf16.gmra.mrb[20].mxu1 %v8820_v25  ;;  %6381 = vmatprep.subr.bf16.mxu0 %v6810_v22 }
 0x167   : > { %6105 = vmatprep.mubr.bf16.mxu1 %v8824_v50 }
 0x168   : > { %6346 = vmatmul.mubr.bf16.gmra.mrb[4].mxu0 %v3531_v33  ;;  %v9810_v33 = vld [vmem:[#allocation9_spill] sm:$0xff] }
 0x169   : > { %6349 = vmatprep.mubr.bf16.mxu0 %v3540_v1  ;;  %6382 = vmatpush3.bf16.msra.mxu0 %v6810_v22  ;;  %v8856_v22 = vsel %vm1605_vm14, %v1635_v21, %v1637_v37  ;;  %v9812_v1 = vld [vmem:[#allocation6_spill] sm:$0xff]  ;;  %v3611_v21 = vor.u32 %v3610_v54, %v3607_v16 }
 0x16a   : > { %6383 = vmatprep.subr.bf16.mxu0 %v6812_v2 }
 0x16d   : > { %6384 = vmatpush3.bf16.msra.mxu0 %v6812_v2  ;;  %v9809_v2 = vld [vmem:[#allocation29_spill] sm:$0xff] }
 0x16e   : > { %6106 = vmatmul.mubr.bf16.gmra.mrb[24].mxu1 %v8839_v36  ;;  %6385 = vmatprep.subr.bf16.mxu0 %v6813_v27 }
 0x16f   : > { %6109 = vmatprep.mubr.bf16.mxu1 %v8843_v56 }
 0x170   : > { %6350 = vmatmul.mubr.bf16.gmra.mrb[8].mxu0 %v9807_v30  ;;  %v9815_v30 = vld [vmem:[#allocation32_spill] sm:$0xff] }
 0x171   : > { %6353 = vmatprep.mubr.bf16.mxu0 %v9808_v9  ;;  %6386 = vmatpush3.bf16.msra.mxu0 %v6813_v27  ;;  %v3616_v27 = vrot.slane %v8237_v8, 2  ;;  %v9816_v9 = vld [vmem:[#allocation11_spill] sm:$0xff] }
 0x172   : > { %6387 = vmatprep.subr.bf16.mxu0 %v6814_v42  ;;  %v3612_v37 = vsel %vm3487_vm1, %v9816_v9, %v3611_v21 }
 0x175   : > { %6388 = vmatpush3.bf16.msra.mxu0 %v6814_v42  ;;  %v3619_v42 = vrot.slane %v8226_v57, 3  ;;  %v6833_v57 = vld [vmem:[%s9494_s4 + $0x110] sm:$0xff]  }
 0x176   : > { %6110 = vmatmul.mubr.bf16.gmra.mrb[28].mxu1 %v8856_v22  ;;  %6389 = vmatprep.subr.bf16.mxu0 %v6815_v10 }
 0x177   : > { %6113 = vmatprep.mubr.bf16.mxu1 %v8861_v19 }
 0x178   : > { %6354 = vmatmul.mubr.bf16.gmra.mrb[12].mxu0 %v9809_v2 }
 0x179   : > { %6357 = vmatprep.mubr.bf16.mxu0 %v9810_v33  ;;  %6390 = vmatpush3.bf16.msra.mxu0 %v6815_v10  ;;  %v3644_v10 = vshll.u32 %v8260_v47, 16 }
 0x17a   : > { %6391 = vmatprep.subr.bf16.mxu0 %v6816_v18 }
 0x17d   : > { %6392 = vmatpush3.bf16.msra.mxu0 %v6816_v18  ;;  %v3637_v18 = vrot.slane %v3635_v49, 3  ;;  %v6835_v49 = vld [vmem:[%s9494_s4 + $0x120] sm:$0xff]  }
 0x17e   : > { %6114 = vmatmul.mubr.bf16.gmra.mrb[32].mxu1 %v9811_v41  ;;  %v3646_v41 = vrot.slane %v3644_v10, 3  ;;  %v2411_v10 = vshrl.u32 %v8811_v11, 16 }
 0x17f   : > { %6133 = vmatprep.mubr.bf16.mxu1 %v9812_v1  ;;  %v3650_v1 = vshrl.u32 %v8635_v58, 16 }
 0x180   : > { %6358 = vmatmul.mubr.bf16.gmra.mrb[16].mxu0 %v9813_v0 }
 0x181   : > { %6361 = vmatprep.mubr.bf16.mxu0 %v9814_v43  ;;  %v3652_v16 = vrot.slane %v3650_v1, 2  ;;  %v6840_v1 = vld [vmem:[#allocation2 + $0x70] sm:$0xff] }
 0x186   : > { %6134 = vmatmul.mubr.bf16.vlgmr.msra.gmra.mrb[0].mxu1 %v8719_v45  ;;  %v3628_v45 = vrot.slane %v8240_v53, 3  ;;  %v3634_v53 = vrot.slane %v3632_v12, 2  ;;  %v3653_v12 = vshll.u32 %v8635_v58, 16  ;;  %v6836_v58 = vld [vmem:[%s9494_s4 + $0x128] sm:$0xff]  }
 0x187   : > { %6437 = vmatpush3.bf16.msra.mxu1 %v8795_v62  ;;  %6137 = vmatprep.mubr.bf16.mxu1 %v8733_v26  ;;  %v3620_v26 = vor.u32 %v3619_v42, %v3616_v27  ;;  %v3641_v62 = vshrl.u32 %v8260_v47, 16  ;;  %v3937_v42 = vld [vmem:[#allocation2 + $0x10] sm:$0xf8] }
 0x188   : > { %6362 = vmatmul.mubr.bf16.gmra.mrb[20].mxu0 %v9815_v30  ;;  %6430 = vmatprep.subr.bf16.mxu1 %v6832_v32  ;;  %v3629_v8 = vor.u32 %v3628_v45, %v3625_v31  ;;  %v3655_v54 = vrot.slane %v3653_v12, 3  ;;  %v3958_v30 = vrot.slane %v3937_v42, 3  ;;  %v3965_v45 = vrot.slane %v8547_v14, 3 }
 0x189   : > { %6365 = vmatprep.mubr.bf16.mxu0 %v3612_v37  ;;  %v3621_v46 = vsel %vm3487_vm1, %v3611_v21, %v3620_v26  ;;  %v3643_v33 = vrot.slane %v3641_v62, 2  ;;  %v2393_v14 = vshrl.u32 %v8784_v5, 16  ;;  %v2429_v12 = vshrl.u32 %v6840_v1, 16 }
 0x18a   : > { %v3630_v2 = vsel %vm3487_vm1, %v3620_v26, %v3629_v8  ;;  %v3656_v27 = vor.u32 %v3655_v54, %v3652_v16 }
 0x18b   : > { %6438 = vmatpush3.bf16.msra.mxu1 %v6832_v32  ;;  %v3647_v0 = vor.u32 %v3646_v41, %v3643_v33  ;;  %v3961_v32 = vrot.slane %v8500_v28, 3  ;;  %v2395_v26 = vrot.slane %v2393_v14, 1  ;;  %v2413_v33 = vrot.slane %v2411_v10, 1 }
 0x18c   : > { %6431 = vmatprep.subr.bf16.mxu1 %v6833_v57 }
 0x18d   : > { %v3657_v9 = vsel %vm3487_vm1, %v3647_v0, %v3656_v27 }
 0x18e   : > { %6138 = vmatmul.mubr.bf16.gmra.mrb[4].mxu1 %v8737_v20  ;;  %v6834_v20 = vld [vmem:[%s9494_s4 + $0x118] sm:$0xff]  }
 0x18f   : > { %6141 = vmatprep.mubr.bf16.mxu1 %v8752_v24  ;;  %6439 = vmatpush3.bf16.msra.mxu1 %v6833_v57  ;;  %v3638_v24 = vor.u32 %v3637_v18, %v3634_v53  ;;  %v2405_v57 = vshll.u32 %v8787_v40, 16  ;;  %v9822_v18 = vld [vmem:[#allocation45_spill] sm:$0xff] }
 0x190   : > { %6366 = vmatmul.mubr.bf16.gmra.mrb[24].mxu0 %v3621_v46  ;;  %6432 = vmatprep.subr.bf16.mxu1 %v6834_v20 }
 0x191   : > { %6369 = vmatprep.mubr.bf16.mxu0 %v3630_v2  ;;  %v3639_v43 = vsel %vm3487_vm1, %v3629_v8, %v3638_v24  ;;  %v3648_v21 = vsel %vm3487_vm1, %v3638_v24, %v3647_v0  ;;  %v9819_v8 = vld [vmem:[#allocation12_spill] sm:$0xff]  ;;  %v2432_v0 = vshll.u32 %v6840_v1, 16  ;;  %vm9825_vm1 = vmmov %vm9789_vm2 }
 0x192   : > { %vm9827_vm12 = vmmov %vm9825_vm1 }
 0x193   : > { %6440 = vmatpush3.bf16.msra.mxu1 %v6834_v20  ;;  %v6839_v20 = vld [vmem:[#allocation2 + $0x68] sm:$0xff]  ;;  %v2434_v27 = vrot.slane %v2432_v0, 2  ;;  %vm9828_vm11 = vmmov %vm9825_vm1 }
 0x194   : > { %6433 = vmatprep.subr.bf16.mxu1 %v6835_v49  ;;  %v2423_v24 = vshll.u32 %v6839_v20, 16  ;;  %vm9829_vm15 = vmmov %vm9825_vm1 }
 0x196   : > { %6142 = vmatmul.mubr.bf16.gmra.mrb[8].mxu1 %v8756_v35  ;;  %v3959_v35 = vrot.slane %v8464_v17, 3  ;;  %v6838_v17 = vld [vmem:[%s9494_s4 + $0x138] sm:$0xff]   ;;  %v2425_v16 = vrot.slane %v2423_v24, 2 }
 0x197   : > { %6145 = vmatprep.mubr.bf16.mxu1 %v8775_v52  ;;  %6441 = vmatpush3.bf16.msra.mxu1 %v6835_v49  ;;  %v6837_v52 = vld [vmem:[%s9494_s4 + $0x130] sm:$0xff]  }
 0x198   : > { %6370 = vmatmul.mubr.bf16.gmra.mrb[28].mxu0 %v3639_v43  ;;  %6434 = vmatprep.subr.bf16.mxu1 %v6836_v58  ;;  %v3960_v37 = vsel %vm3957_vm3, %v3958_v30, %v3959_v35  ;;  %v6842_v30 = vld [vmem:[#allocation2 + $0x80] sm:$0xff] }
 0x199   : > { %6373 = vmatprep.mubr.bf16.mxu0 %v3648_v21  ;;  %v6841_v21 = vld [vmem:[#allocation2 + $0x78] sm:$0xff] }
 0x19b   : > { %6442 = vmatpush3.bf16.msra.mxu1 %v6836_v58  ;;  %v3983_v58 = vrot.slane %v6841_v21, 3 }
 0x19c   : > { %6435 = vmatprep.subr.bf16.mxu1 %v6837_v52 }
 0x19e   : > { %6146 = vmatmul.mubr.bf16.gmra.mrb[12].mxu1 %v8779_v15  ;;  %v3963_v15 = vrot.slane %v8507_v39, 3  ;;  %v9817_v39 = vrot.slane %v8295_v34, 3 }
 0x19f   : > { %6149 = vmatprep.mubr.bf16.mxu1 %v8799_v38  ;;  %6443 = vmatpush3.bf16.msra.mxu1 %v6837_v52  ;;  %v3962_v38 = vsel %vm3957_vm3, %v3959_v35, %v3961_v32 }
 0x1a0   : > { %6374 = vmatmul.mubr.bf16.gmra.mrb[32].mxu0 %v3657_v9  ;;  %6436 = vmatprep.subr.bf16.mxu1 %v6838_v17  ;;  %v3964_v31 = vsel %vm3957_vm3, %v3961_v32, %v3963_v15  ;;  %v3966_v28 = vsel %vm3957_vm3, %v3963_v15, %v3965_v45  ;;  %v3985_v9 = vrot.slane %v6842_v30, 3 }
 0x1a1   : > { %6393 = vmatprep.mubr.bf16.mxu0 %v3960_v37  ;;  %v6843_v37 = vld [vmem:[#allocation2 + $0x88] sm:$0xff] }
 0x1a3   : > { %6444 = vmatpush3.bf16.msra.mxu1 %v6838_v17  ;;  %v3987_v17 = vrot.slane %v6843_v37, 3 }
 0x1a6   : > { %6150 = vmatmul.mubr.bf16.gmra.mrb[16].mxu1 %v8803_v4  ;;  %v3968_v4 = vsel %vm3957_vm3, %v3965_v45, %v9817_v39 }
 0x1a7   : > { %6153 = vmatprep.mubr.bf16.mxu1 %v8820_v25  ;;  %v9818_v25 = vld [vmem:[#allocation13_spill] sm:$0xff] }
 0x1a8   : > { %6394 = vmatmul.mubr.bf16.vlgmr.msra.gmra.mrb[0].mxu0 %v3962_v38  ;;  %v3986_v38 = vsel %vm3957_vm3, %v3983_v58, %v3985_v9 }
 0x1a9   : > { %6397 = vmatprep.mubr.bf16.mxu0 %v3964_v31 }
 0x1ae   : > { %6154 = vmatmul.mubr.bf16.gmra.mrb[20].mxu1 %v8824_v50  ;;  %v2396_v50 = vshll.u32 %v8784_v5, 16  ;;  %v2414_v5 = vshll.u32 %v8811_v11, 16  ;;  %v2420_v11 = vshrl.u32 %v6839_v20, 16 }
 0x1af   : > { %6157 = vmatprep.mubr.bf16.mxu1 %v8839_v36  ;;  %v1940_v36 = vld [vmem:[#allocation2 + $0x98] sm:$0x1] }
 0x1b0   : > { %6398 = vmatmul.mubr.bf16.gmra.mrb[4].mxu0 %v3966_v28  ;;  %v2398_v34 = vrot.slane %v2396_v50, 2  ;;  %v2416_v41 = vrot.slane %v2414_v5, 2  ;;  %v2422_v43 = vrot.slane %v2420_v11, 1 }
 0x1b1   : > { %6401 = vmatprep.mubr.bf16.mxu0 %v3968_v4 }
 0x1b2   : > { %v2399_v62 = vor.u32 %v2398_v34, %v2395_v26  ;;  %v2426_v35 = vor.u32 %v2425_v16, %v2422_v43  ;;  %v8998_v26 = vpop.permute.xlu1 %4939 }
 0x1b4   : > { %v2400_v2 = vsel %vm9823_vm10, %v9822_v18, %v2399_v62  ;;  %vm9032_vm10 = vmand %vm4781_vm5, %vm4782_vm6 }
 0x1b6   : > { %6158 = vmatmul.mubr.bf16.gmra.mrb[24].mxu1 %v8843_v56  ;;  %v9820_v56 = vld [vmem:[#allocation33_spill] sm:$0xff] }
 0x1b7   : > { %6161 = vmatprep.mubr.bf16.mxu1 %v8856_v22  ;;  %v2012_v22 = vrot.slane %v1940_v36, 1 }
 0x1b8   : > { %6402 = vmatmul.mubr.bf16.gmra.mrb[8].mxu0 %v8529_v44  ;;  %v2402_v44 = vshrl.u32 %v8787_v40, 16 }
 0x1b9   : > { %6405 = vmatprep.mubr.bf16.mxu0 %v9818_v25 }
 0x1ba   : > { %v2404_v53 = vrot.slane %v2402_v44, 1 }
 0x1be   : > { %6162 = vmatmul.mubr.bf16.gmra.mrb[28].mxu1 %v8861_v19  ;;  %v9821_v19 = vrot.slane %v8247_v51, 1  ;;  %v2417_v51 = vor.u32 %v2416_v41, %v2413_v33 }
 0x1bf   : > { %6165 = vmatprep.mubr.bf16.mxu1 %v8556_v63  ;;  %v2407_v63 = vrot.slane %v2405_v57, 2  ;;  %v4946_v57 = vpop.permute.xlu1 %4945 }
 0x1c0   : > { %6406 = vmatmul.mubr.bf16.gmra.mrb[12].mxu0 %v9819_v8  ;;  %v2013_v46 = vsel %vm1605_vm14, %v9821_v19, %v2012_v22  ;;  %vm9824_vm14 = vmmov %vm9789_vm2  ;;  %v2427_v32 = vsel %vm9827_vm12, %v2417_v51, %v2426_v35  ;;  %vm5046_vm2 = vcmp.eq.s32.totalorder %v4946_v57, 1 }
 0x1c1   : > { %6409 = vmatprep.mubr.bf16.mxu0 %v9820_v56  ;;  %v2408_v40 = vor.u32 %v2407_v63, %v2404_v53 }
 0x1c3   : > { %v2409_v49 = vsel %vm9824_vm14, %v2399_v62, %v2408_v40  ;;  %v2418_v54 = vsel %vm9825_vm1, %v2408_v40, %v2417_v51  ;;  %vm9039_vm14 = vmor %vm4382_vm8, %vm4383_vm9 }
 0x1c6   : > { %6166 = vmatmul.mubr.bf16.gmra.mrb[32].mxu1 %v2013_v46  ;;  %v9011_v46 = vpop.permute.xlu1 %4951 }
 0x1c7   : > { %6201 = vmatprep.mubr.bf16.mxu1 %v2400_v2  ;;  %vm5048_vm12 = vcmp.eq.s32.totalorder %v9011_v46, 1 }
 0x1c8   : > { %6410 = vmatmul.mubr.bf16.gmra.mrb[16].mxu0 %v8569_v60  ;;  %v2431_v60 = vrot.slane %v2429_v12, 1 }
 0x1c9   : > { %6413 = vmatprep.mubr.bf16.mxu0 %v8572_v55  ;;  %v9826_v55 = vrot.slane %v8401_v6, 3  ;;  %v3988_v6 = vsel %vm3957_vm3, %v3985_v9, %v3987_v17 }
 0x1ca   : > { %v2435_v52 = vor.u32 %v2434_v27, %v2431_v60 }
 0x1cb   : > { %v3984_v42 = vsel %vm3957_vm3, %v9826_v55, %v3983_v58  ;;  %v9025_v55 = vpop.permute.xlu1 %4957 }
 0x1cc   : > { %v2436_v15 = vsel %vm9828_vm11, %v2426_v35, %v2435_v52  ;;  %v2445_v45 = vsel %vm9829_vm15, %v2435_v52, %v8624_v48  ;;  %vm5050_vm1 = vcmp.eq.s32.totalorder %v9025_v55, 1 }
 0x1ce   : > { %6202 = vmatmul.mubr.bf16.vlgmr.msra.gmra.mrb[16].mxu1 %v2409_v49 }
 0x1cf   : > { %6205 = vmatprep.mubr.bf16.mxu1 %v2418_v54 }
 0x1d0   : > { %6414 = vmatmul.mubr.bf16.gmra.mrb[20].mxu0 %v8590_v59  ;;  %v6844_v59 = vld [vmem:[#allocation2 + $0x90] sm:$0xff] }
 0x1d1   : > { %6417 = vmatprep.mubr.bf16.mxu0 %v3984_v42  ;;  %v3989_v31 = vrot.slane %v6844_v59, 3 }
 0x1d3   : > { %v3990_v28 = vsel %vm3957_vm3, %v3987_v17, %v3989_v31  ;;  %v3992_v39 = vsel %vm3957_vm3, %v3989_v31, %v3991_v61  ;;  %vm5044_vm3 = vcmp.eq.s32.totalorder %v8998_v26, 1 }
 0x1d6   : > { %6206 = vmatmul.mubr.bf16.gmra.mrb[20].mxu1 %v2427_v32 }
 0x1d7   : > { %6209 = vmatprep.mubr.bf16.mxu1 %v2436_v15  ;;  %v4784_v15 = vld [vmem:[%s9021_s14 + $0x8] sm:$0xe] }
 0x1d8   : > { %6418 = vmatmul.mubr.bf16.gmra.mrb[24].mxu0 %v3986_v38 }
 0x1d9   : > { %6421 = vmatprep.mubr.bf16.mxu0 %v3988_v6 }
 0x1de   : > { %6210 = vmatmul.mubr.bf16.gmra.mrb[24].mxu1 %v2445_v45 }
 0x1df   : > { %6213 = vmatprep.mubr.bf16.mxu1 %v8642_v7 }
 0x1e0   : > { %6422 = vmatmul.mubr.bf16.gmra.mrb[28].mxu0 %v3990_v28 }
 0x1e1   : > { %6425 = vmatprep.mubr.bf16.mxu0 %v3992_v39 }
 0x1e6   : > { %6214 = vmatmul.mubr.bf16.gmra.mrb[28].mxu1 %v8658_v29 }
 0x1e7   : > { %6217 = vmatprep.mubr.bf16.mxu1 %v8677_v23 }
 0x1e8   : > { %6426 = vmatmul.mubr.bf16.gmra.mrb[32].mxu0 %v8663_v13  ;;  %v4937_v13 = vpop.permute.xlu0 %4936 }
 0x1e9   : > { %vm5043_vm0 = vcmp.eq.s32.totalorder %v4937_v13, 1 }
 0x1ec   : > { %v4943_v8 = vpop.permute.xlu0 %4942 }
 0x1ed   : > { %vm5045_vm4 = vcmp.eq.s32.totalorder %v4943_v8, 1 }
 0x1ee   : > { %6218 = vmatmul.mubr.bf16.gmra.mrb[32].mxu1 %v8690_v3 }
 0x1f0   : > { %v9008_v62 = vpop.permute.xlu0 %4948 }
 0x1f1   : > { %vm5047_vm7 = vcmp.eq.s32.totalorder %v9008_v62, 1 }
 0x1f4   : > { %v9013_v18 = vpop.permute.xlu0 %4954 }
 0x1f5   : > { %vm5049_vm13 = vcmp.eq.s32.totalorder %v9013_v18, 1 }
 0x1f8   : > { %v9028_v37 = vpop.permute.xlu0 %4960 }
 0x1f9   : > { %vm5051_vm15 = vcmp.eq.s32.totalorder %v9028_v37, 1 }
 0x259   : > { %v6135_v48 = vpop.f32.mrb[0].mxu1 }
 0x25a   : > { %v2114_v4 = vpop.f32.mrb[1].mxu1 }
 0x25b   : > { %v6136_v25 = vpop.f32.mrb[2].mxu1 }
 0x25c   : > { %v2117_v7 = vpop.f32.mrb[3].mxu1 }
 0x261   : > { %v8982_v14 = vpop.f32.mrb[4].mxu1 }
 0x262   : > { %v8984_v50 = vpop.f32.mrb[5].mxu1 }
 0x263   : > { %v8986_v47 = vpop.f32.mrb[6].mxu1 }
 0x264   : > { %v8988_v61 = vpop.f32.mrb[7].mxu1 }
 0x269   : > { %v8990_v36 = vpop.f32.mrb[8].mxu1 }
 0x26a   : > { %v8992_v29 = vpop.f32.mrb[9].mxu1 }
 0x26b   : > { %v8994_v23 = vpop.f32.mrb[10].mxu1 }
 0x26c   : > { %v8996_v3 = vpop.f32.mrb[11].mxu1 }
 0x271   : > { %v9000_v34 = vpop.f32.mrb[12].mxu1 }
 0x272   : > { %v9002_v56 = vpop.f32.mrb[13].mxu1 }
 0x273   : > { %v9004_v22 = vpop.f32.mrb[14].mxu1 }
 0x274   : > { %v9006_v44 = vpop.f32.mrb[15].mxu1 }
 0x27b   : > { %v6395_v10 = vpop.f32.mrb[0].mxu0 }
 0x27c   : > { %v6445_v5 = vadd.f32 %v6395_v10, %v6135_v48  ;;  %v4095_v19 = vpop.f32.mrb[1].mxu0 }
 0x27d   : > { %v6446_v53 = vadd.f32 %v4095_v19, %v2114_v4  ;;  %v6396_v63 = vpop.f32.mrb[2].mxu0 }
 0x27e   : > { %v5589_v2 = vpack.c.bf16 %v6445_v5, %v6445_v5  ;;  %v5081_v33 = vsel %vm5045_vm4, %v6445_v5, 0.0  ;;  %v6447_v41 = vadd.f32 %v6396_v63, %v6136_v25  ;;  %v4098_v40 = vpop.f32.mrb[3].mxu0 }
 0x27f   : > { %v5587_v20 = vpack.c.bf16 %v6446_v53, %v6446_v53  ;;  %v5079_v11 = vsel %vm5043_vm0, %v6446_v53, 0.0  ;;  %v6448_v24 = vadd.f32 %v4098_v40, %v2117_v7  ;;  %v5159_v12 = vmul.f32 %v5081_v33, %v5081_v33  ;;  %v9056_v40 = vpop.permute.xlu1 %4963 }
 0x280   : > { %v4405_v51 = vshrl.u32 %v5589_v2, 16  ;;  %v4408_v1 = vshll.u32 %v5589_v2, 16  ;;  %v5590_v0 = vpack.c.bf16 %v6447_v41, %v6447_v41  ;;  %v5157_v16 = vmul.f32 %v5079_v11, %v5079_v11 }
 0x281   : > { %v4386_v49 = vshrl.u32 %v5587_v20, 16  ;;  %v4389_v43 = vshll.u32 %v5587_v20, 16  ;;  %v5588_v54 = vpack.c.bf16 %v6448_v24, %v6448_v24  ;;  %v5082_v52 = vsel %vm5046_vm2, %v6447_v41, 0.0 }
 0x282   : > { %v4407_v21 = vrot.slane %v4405_v51, 6  ;;  %v4410_v58 = vrot.slane %v4408_v1, 7  ;;  %v4415_v60 = vshrl.u32 %v5590_v0, 16  ;;  %v4418_v27 = vshll.u32 %v5590_v0, 16  ;;  %v9060_v1 = vpop.permute.xlu0 %4966 }
 0x283   : > { %v4388_v42 = vrot.slane %v4386_v49, 6  ;;  %v4391_v35 = vrot.slane %v4389_v43, 7  ;;  %v4395_v30 = vshrl.u32 %v5588_v54, 16  ;;  %v6399_v9 = vpop.f32.mrb[4].mxu0  ;;  %v4398_v59 = vshll.u32 %v5588_v54, 16 }
 0x284   : > { %v4411_v17 = vor.u32 %v4410_v58, %v4407_v21  ;;  %v4417_v38 = vrot.slane %v4415_v60, 6  ;;  %v4420_v6 = vrot.slane %v4418_v27, 7  ;;  %v4111_v31 = vpop.f32.mrb[5].mxu0  ;;  %v5080_v48 = vsel %vm5044_vm3, %v6448_v24, 0.0 }
 0x285   : > { %v4392_v45 = vor.u32 %v4391_v35, %v4388_v42  ;;  %v4397_v39 = vrot.slane %v4395_v30, 6  ;;  %v6449_v4 = vadd.f32 %v6399_v9, %v8982_v14  ;;  %v6400_v25 = vpop.f32.mrb[6].mxu0  ;;  %v4400_v8 = vrot.slane %v4398_v59, 7 }
 0x286   : > { %v4413_v7 = vrot.slane %v4411_v17, 4  ;;  %v9047_v13 = vor.u32 %v4420_v6, %v4417_v38  ;;  %v5115_v57 = vadd.f32 %v5080_v48, %v5079_v11  ;;  %v4114_v10 = vpop.f32.mrb[7].mxu0  ;;  %v5158_v53 = vmul.f32 %v5080_v48, %v5080_v48  ;;  %v9088_v48 = vpop.permute.xlu0 %4972 }
 0x287   : > { %v4393_v5 = vrot.slane %v4392_v45, 4  ;;  %v4785_v19 = vsel %vm9032_vm10, %v4392_v45, %v4784_v15  ;;  %v5593_v63 = vpack.c.bf16 %v6449_v4, %v6449_v4  ;;  %v5160_v26 = vmul.f32 %v5082_v52, %v5082_v52 }
 0x288   : > { %4786 = vst [vmem:[%s9021_s14 + $0x8] sm:$0xe] %v4785_v19  ;;  %v4422_v14 = vsel %vm9039_vm14, %v4413_v7, %v9047_v13  ;;  %v4401_v2 = vor.u32 %v4400_v8, %v4397_v39  ;;  %v5116_v41 = vadd.f32 %v5115_v57, %v5081_v33  ;;  %v4423_v20 = vrot.slane %v9047_v13, 4 }
 0x289   : > { %4789 = vst [vmem:[%s9021_s14 + $0x14] sm:$0xf] %v4422_v14  ;;  %v5193_v11 = vadd.f32 %v5158_v53, %v5157_v16  ;;  %v4445_v24 = vshrl.u32 %v5593_v63, 16  ;;  %v4448_v51 = vshll.u32 %v5593_v63, 16  ;;  %v5085_v43 = vsel %vm5049_vm13, %v6449_v4, 0.0 }
 0x28a   : > { %v4402_v0 = vsel %vm9039_vm14, %v4393_v5, %v4401_v2  ;;  %v4403_v49 = vrot.slane %v4401_v2, 4  ;;  %v6450_v33 = vadd.f32 %v4111_v31, %v8984_v50  ;;  %v5117_v60 = vadd.f32 %v5116_v41, %v5082_v52 }
 0x28b   : > { %4787 = vst [vmem:[%s9021_s14 + $0xc] sm:$0xf] %v4402_v0  ;;  %v5194_v54 = vadd.f32 %v5193_v11, %v5159_v12  ;;  %v4447_v21 = vrot.slane %v4445_v24, 6  ;;  %v4450_v58 = vrot.slane %v4448_v51, 7  ;;  %v6403_v16 = vpop.f32.mrb[8].mxu0  ;;  %v6451_v30 = vadd.f32 %v6400_v25, %v8986_v47  ;;  %v9082_v47 = vpop.permute.xlu1 %4969 }
 0x28c   : > { %v4412_v27 = vsel %vm9039_vm14, %v4403_v49, %v4411_v17  ;;  %v5591_v42 = vpack.c.bf16 %v6450_v33, %v6450_v33  ;;  %v5083_v35 = vsel %vm5047_vm7, %v6450_v33, 0.0  ;;  %v4127_v9 = vpop.f32.mrb[9].mxu0  ;;  %vm5053_vm11 = vcmp.eq.s32.totalorder %v9060_v1, 1 }
 0x28d   : > { %4788 = vst [vmem:[%s9021_s14 + $0x10] sm:$0xf] %v4412_v27  ;;  %v9074_v18 = vor.u32 %v4450_v58, %v4447_v21  ;;  %v5118_v50 = vadd.f32 %v5117_v60, %v5083_v35  ;;  %v5161_v32 = vmul.f32 %v5083_v35, %v5083_v35  ;;  %v5195_v12 = vadd.f32 %v5194_v54, %v5160_v26  ;;  %v9076_v15 = vpop.f32.mrb[10].mxu0  ;;  %v9107_v58 = vpop.permute.xlu0 %4978 }
 0x28e   : > { %v5163_v52 = vmul.f32 %v5085_v43, %v5085_v43  ;;  %v4425_v38 = vshrl.u32 %v5591_v42, 16  ;;  %v4428_v17 = vshll.u32 %v5591_v42, 16  ;;  %v5594_v6 = vpack.c.bf16 %v6451_v30, %v6451_v30  ;;  %v9079_v59 = vpop.f32.mrb[11].mxu0 }
 0x28f   : > { %v4453_v62 = vrot.slane %v9074_v18, 4  ;;  %v5196_v31 = vadd.f32 %v5195_v12, %v5161_v32  ;;  %v5086_v45 = vsel %vm5050_vm1, %v6451_v30, 0.0  ;;  %v6452_v39 = vadd.f32 %v4114_v10, %v8988_v61  ;;  %v9102_v51 = vpop.permute.xlu1 %4975 }
 0x290   : > { %v4427_v4 = vrot.slane %v4425_v38, 6  ;;  %v4430_v25 = vrot.slane %v4428_v17, 7  ;;  %v4455_v7 = vshrl.u32 %v5594_v6, 16  ;;  %v4458_v13 = vshll.u32 %v5594_v6, 16 }
 0x291   : > { %v5592_v8 = vpack.c.bf16 %v6452_v39, %v6452_v39  ;;  %v5084_v57 = vsel %vm5048_vm12, %v6452_v39, 0.0  ;;  %v6453_v5 = vadd.f32 %v6403_v16, %v8990_v36  ;;  %v6454_v19 = vadd.f32 %v4127_v9, %v8992_v29 }
 0x292   : > { %v4431_v53 = vor.u32 %v4430_v25, %v4427_v4  ;;  %v4457_v63 = vrot.slane %v4455_v7, 6  ;;  %v4460_v55 = vrot.slane %v4458_v13, 7  ;;  %v5119_v14 = vadd.f32 %v5118_v50, %v5084_v57 }
 0x293   : > { %v4435_v61 = vshrl.u32 %v5592_v8, 16  ;;  %v4438_v10 = vshll.u32 %v5592_v8, 16  ;;  %v5162_v26 = vmul.f32 %v5084_v57, %v5084_v57  ;;  %v5597_v2 = vpack.c.bf16 %v6453_v5, %v6453_v5  ;;  %v6407_v41 = vpop.f32.mrb[12].mxu0  ;;  %v9127_v37 = vpop.permute.xlu1 %4981 }
 0x294   : > { %vm5052_vm3 = vcmp.eq.s32.totalorder %v9056_v40, 1  ;;  %v4432_v46 = vsel %vm9039_vm14, %v4423_v20, %v4431_v53  ;;  %v4433_v11 = vrot.slane %v4431_v53, 4  ;;  %v9097_v24 = vor.u32 %v4460_v55, %v4457_v63  ;;  %v9099_v29 = vpop.f32.mrb[13].mxu0  ;;  %v9138_v57 = vpop.permute.xlu0 %4984 }
 0x295   : > { %v5120_v36 = vadd.f32 %v5119_v14, %v5085_v43  ;;  %vm5054_vm0 = vcmp.eq.s32.totalorder %v9082_v47, 1  ;;  %4790 = vst [vmem:[%s9021_s14 + $0x18] sm:$0xf] %v4432_v46  ;;  %v4437_v0 = vrot.slane %v4435_v61, 6  ;;  %v4440_v49 = vrot.slane %v4438_v10, 7  ;;  %v9105_v21 = vpop.f32.mrb[14].mxu0 }
 0x296   : > { %v5197_v33 = vadd.f32 %v5196_v31, %v5162_v26  ;;  %v4485_v54 = vshrl.u32 %v5597_v2, 16  ;;  %v4462_v20 = vsel %vm9039_vm14, %v4453_v62, %v9097_v24  ;;  %v4463_v43 = vrot.slane %v9097_v24, 4  ;;  %v9113_v27 = vpop.f32.mrb[15].mxu0 }
 0x297   : > { %v5164_v60 = vmul.f32 %v5086_v45, %v5086_v45  ;;  %v4488_v16 = vshll.u32 %v5597_v2, 16  ;;  %4793 = vst [vmem:[%s9021_s14 + $0x24] sm:$0xf] %v4462_v20  ;;  %v4441_v42 = vor.u32 %v4440_v49, %v4437_v0  ;;  %v5089_v9 = vsel %vm5053_vm11, %v6453_v5, 0.0  ;;  %v9155_v49 = vpop.permute.xlu1 %4987 }
 0x298   : > { %v5198_v35 = vadd.f32 %v5197_v33, %v5163_v52  ;;  %v4487_v30 = vrot.slane %v4485_v54, 6  ;;  %v5595_v32 = vpack.c.bf16 %v6454_v19, %v6454_v19  ;;  %v5087_v12 = vsel %vm5051_vm15, %v6454_v19, 0.0 }
 0x299   : > { %v4490_v50 = vrot.slane %v4488_v16, 7  ;;  %v5121_v38 = vadd.f32 %v5120_v36, %v5086_v45  ;;  %vm5057_vm2 = vcmp.eq.s32.totalorder %v9107_v58, 1  ;;  %v4442_v17 = vsel %vm9039_vm14, %v4433_v11, %v4441_v42  ;;  %v9160_v16 = vpop.permute.xlu0 %4990 }
 0x29a   : > { %v4443_v6 = vrot.slane %v4441_v42, 4  ;;  %v5165_v62 = vmul.f32 %v5087_v12, %v5087_v12  ;;  %v5199_v31 = vadd.f32 %v5198_v35, %v5164_v60  ;;  %4791 = vst [vmem:[%s9021_s14 + $0x1c] sm:$0xf] %v4442_v17  ;;  %v4465_v1 = vshrl.u32 %v5595_v32, 16 }
 0x29b   : > { %v9124_v52 = vor.u32 %v4490_v50, %v4487_v30  ;;  %v4468_v39 = vshll.u32 %v5595_v32, 16  ;;  %v5122_v4 = vadd.f32 %v5121_v38, %v5087_v12  ;;  %vm5055_vm4 = vcmp.eq.s32.totalorder %v9088_v48, 1  ;;  %v9136_v8 = vpop.f32.mrb[16].mxu0 }
 0x29c   : > { %v4452_v45 = vsel %vm9039_vm14, %v4443_v6, %v9074_v18  ;;  %v5200_v25 = vadd.f32 %v5199_v31, %v5165_v62  ;;  %v6455_v7 = vadd.f32 %v9076_v15, %v8994_v23  ;;  %v6456_v13 = vadd.f32 %v9079_v59, %v8996_v3  ;;  %v9142_v55 = vpop.f32.mrb[17].mxu0 }
 0x29d   : > { %4792 = vst [vmem:[%s9021_s14 + $0x20] sm:$0xf] %v4452_v45  ;;  %v5167_v5 = vmul.f32 %v5089_v9, %v5089_v9  ;;  %v4467_v19 = vrot.slane %v4465_v1, 6  ;;  %v4470_v53 = vrot.slane %v4468_v39, 7  ;;  %v6457_v63 = vadd.f32 %v6407_v41, %v9000_v34  ;;  %v9147_v3 = vpop.f32.mrb[18].mxu0 }
 0x29e   : > { %v4493_v18 = vrot.slane %v9124_v52, 4  ;;  %v5598_v14 = vpack.c.bf16 %v6455_v7, %v6455_v7  ;;  %v5596_v61 = vpack.c.bf16 %v6456_v13, %v6456_v13  ;;  %v5088_v23 = vsel %vm5052_vm3, %v6456_v13, 0.0  ;;  %v9151_v2 = vpop.f32.mrb[19].mxu0 }
 0x29f   : > { %v4471_v15 = vor.u32 %v4470_v53, %v4467_v19  ;;  %v5090_v59 = vsel %vm5054_vm0, %v6455_v7, 0.0  ;;  %v5123_v10 = vadd.f32 %v5122_v4, %v5088_v23  ;;  %v5166_v26 = vmul.f32 %v5088_v23, %v5088_v23 }
 0x2a0   : > { %v4495_v34 = vshrl.u32 %v5598_v14, 16  ;;  %v4498_v41 = vshll.u32 %v5598_v14, 16  ;;  %v4475_v46 = vshrl.u32 %v5596_v61, 16  ;;  %v4478_v11 = vshll.u32 %v5596_v61, 16 }
 0x2a1   : > { %v4472_v24 = vsel %vm9039_vm14, %v4463_v43, %v4471_v15  ;;  %v4473_v40 = vrot.slane %v4471_v15, 4  ;;  %v5124_v36 = vadd.f32 %v5123_v10, %v5089_v9  ;;  %v5201_v0 = vadd.f32 %v5200_v25, %v5166_v26  ;;  %v6203_v60 = vpop.f32.mrb[16].mxu1  ;;  %v9202_v26 = vpop.permute.xlu1 %4993 }
 0x2a2   : > { %4794 = vst [vmem:[%s9021_s14 + $0x28] sm:$0xf] %v4472_v24  ;;  %v4497_v33 = vrot.slane %v4495_v34, 6  ;;  %v4500_v47 = vrot.slane %v4498_v41, 7  ;;  %v4477_v54 = vrot.slane %v4475_v46, 6  ;;  %v4480_v20 = vrot.slane %v4478_v11, 7  ;;  %v9210_v24 = vpop.permute.xlu0 %4996 }
 0x2a3   : > { %vm5056_vm5 = vcmp.eq.s32.totalorder %v9102_v51, 1  ;;  %vm5058_vm6 = vcmp.eq.s32.totalorder %v9127_v37, 1  ;;  %v5202_v42 = vadd.f32 %v5201_v0, %v5167_v5  ;;  %v5601_v35 = vpack.c.bf16 %v6457_v63, %v6457_v63  ;;  %v2646_v9 = vpop.f32.mrb[17].mxu1  ;;  %v9170_v6 = vpop.f32.mrb[20].mxu0 }
 0x2a4   : > { %v9164_v43 = vsel %vm5057_vm2, %v6457_v63, 0.0  ;;  %v6458_v30 = vadd.f32 %v9099_v29, %v9002_v56  ;;  %v4501_v50 = vor.u32 %v4500_v47, %v4497_v33  ;;  %v5168_v32 = vmul.f32 %v5090_v59, %v5090_v59  ;;  %v9168_v17 = vpop.f32.mrb[18].mxu1  ;;  %v9176_v56 = vpop.f32.mrb[21].mxu0 }
 0x2a5   : > { %v4481_v12 = vor.u32 %v4480_v20, %v4477_v54  ;;  %v5125_v38 = vadd.f32 %v5124_v36, %v5090_v59  ;;  %v4525_v62 = vshrl.u32 %v5601_v35, 16  ;;  %v4528_v31 = vshll.u32 %v5601_v35, 16  ;;  %v9174_v39 = vpop.f32.mrb[19].mxu1  ;;  %v9186_v7 = vpop.f32.mrb[22].mxu0 }
 0x2a6   : > { %v5599_v1 = vpack.c.bf16 %v6458_v30, %v6458_v30  ;;  %v5091_v58 = vsel %vm5055_vm4, %v6458_v30, 0.0  ;;  %v4502_v29 = vsel %vm9039_vm14, %v4493_v18, %v4501_v50  ;;  %v9184_v25 = vmul.f32 %v9164_v43, %v9164_v43  ;;  %v9190_v53 = vpop.f32.mrb[23].mxu0 }
 0x2a7   : > { %v4482_v4 = vsel %vm9039_vm14, %v4473_v40, %v4481_v12  ;;  %v4483_v45 = vrot.slane %v4481_v12, 4  ;;  %4797 = vst [vmem:[%s9021_s14 + $0x34] sm:$0xf] %v4502_v29  ;;  %v4527_v48 = vrot.slane %v4525_v62, 6  ;;  %v4530_v13 = vrot.slane %v4528_v31, 7 }
 0x2a8   : > { %4795 = vst [vmem:[%s9021_s14 + $0x2c] sm:$0xf] %v4482_v4  ;;  %v4505_v5 = vshrl.u32 %v5599_v1, 16  ;;  %v4508_v19 = vshll.u32 %v5599_v1, 16  ;;  %vm5061_vm9 = vcmp.eq.s32.totalorder %v9160_v16, 1  ;;  %v5126_v18 = vadd.f32 %v5125_v38, %v5091_v58 }
 0x2a9   : > { %v4492_v63 = vsel %vm9039_vm14, %v4483_v45, %v9124_v52  ;;  %v5169_v14 = vmul.f32 %v5091_v58, %v5091_v58  ;;  %v5203_v61 = vadd.f32 %v5202_v42, %v5168_v32  ;;  %v9197_v23 = vor.u32 %v4530_v13, %v4527_v48  ;;  %v9208_v11 = vpop.f32.mrb[20].mxu1 }
 0x2aa   : > { %4796 = vst [vmem:[%s9021_s14 + $0x30] sm:$0xf] %v4492_v63  ;;  %v4507_v15 = vrot.slane %v4505_v5, 6  ;;  %v4510_v59 = vrot.slane %v4508_v19, 7  ;;  %v6459_v10 = vadd.f32 %v9105_v21, %v9004_v22  ;;  %vm5059_vm13 = vcmp.eq.s32.totalorder %v9138_v57, 1  ;;  %v9213_v0 = vpop.f32.mrb[21].mxu1  ;;  %v9241_v63 = vpop.permute.xlu0 %5002 }
 0x2ab   : > { %v5204_v34 = vadd.f32 %v5203_v61, %v5169_v14  ;;  %v6460_v41 = vadd.f32 %v9113_v27, %v9006_v44  ;;  %v6461_v52 = vadd.f32 %v9136_v8, %v6203_v60  ;;  %v6462_v46 = vadd.f32 %v9142_v55, %v2646_v9  ;;  %v9219_v55 = vpop.f32.mrb[22].mxu1  ;;  %v9221_v47 = vpop.f32.mrb[24].mxu0 }
 0x2ac   : > { %v4503_v40 = vrot.slane %v4501_v50, 4  ;;  %v4533_v36 = vrot.slane %v9197_v23, 4  ;;  %v4511_v22 = vor.u32 %v4510_v59, %v4507_v15  ;;  %v5602_v21 = vpack.c.bf16 %v6459_v10, %v6459_v10  ;;  %v9225_v35 = vpop.f32.mrb[23].mxu1  ;;  %v9227_v30 = vpop.f32.mrb[25].mxu0 }
 0x2ad   : > { %v5094_v33 = vsel %vm5058_vm6, %v6459_v10, 0.0  ;;  %v5600_v44 = vpack.c.bf16 %v6460_v41, %v6460_v41  ;;  %v5092_v27 = vsel %vm5056_vm5, %v6460_v41, 0.0  ;;  %v5605_v8 = vpack.c.bf16 %v6461_v52, %v6461_v52  ;;  %v9230_v32 = vpop.f32.mrb[26].mxu0 }
 0x2ae   : > { %v4512_v54 = vsel %vm9039_vm14, %v4503_v40, %v4511_v22  ;;  %v4513_v20 = vrot.slane %v4511_v22, 4  ;;  %v4535_v60 = vshrl.u32 %v5602_v21, 16  ;;  %v4538_v42 = vshll.u32 %v5602_v21, 16  ;;  %v9232_v1 = vpop.f32.mrb[27].mxu0 }
 0x2af   : > { %4798 = vst [vmem:[%s9021_s14 + $0x38] sm:$0xf] %v4512_v54  ;;  %v4515_v37 = vshrl.u32 %v5600_v44, 16  ;;  %v4518_v9 = vshll.u32 %v5600_v44, 16  ;;  %v5127_v51 = vadd.f32 %v5126_v18, %v5092_v27  ;;  %v5170_v50 = vmul.f32 %v5092_v27, %v5092_v27 }
 0x2b0   : > { %v4537_v12 = vrot.slane %v4535_v60, 6  ;;  %v4540_v38 = vrot.slane %v4538_v42, 7  ;;  %v4565_v62 = vshrl.u32 %v5605_v8, 16  ;;  %v4568_v31 = vshll.u32 %v5605_v8, 16 }
 0x2b1   : > { %vm5060_vm7 = vcmp.eq.s32.totalorder %v9155_v49, 1  ;;  %vm5062_vm10 = vcmp.eq.s32.totalorder %v9202_v26, 1  ;;  %v4517_v58 = vrot.slane %v4515_v37, 6  ;;  %v4520_v29 = vrot.slane %v4518_v9, 7  ;;  %v9244_v59 = vpop.f32.mrb[24].mxu1 }
 0x2b2   : > { %v5128_v4 = vadd.f32 %v5127_v51, %v9164_v43  ;;  %v5205_v45 = vadd.f32 %v5204_v34, %v5170_v50  ;;  %v4541_v48 = vor.u32 %v4540_v38, %v4537_v12  ;;  %v4567_v13 = vrot.slane %v4565_v62, 6  ;;  %v9246_v43 = vpop.permute.xlu1 %4999 }
 0x2b3   : > { %v4570_v5 = vrot.slane %v4568_v31, 7  ;;  %v9239_v19 = vsel %vm5061_vm9, %v6461_v52, 0.0  ;;  %v5172_v18 = vmul.f32 %v5094_v33, %v5094_v33  ;;  %v4521_v14 = vor.u32 %v4520_v29, %v4517_v58  ;;  %v9258_v52 = vpop.f32.mrb[25].mxu1  ;;  %v9291_v58 = vpop.permute.xlu0 %5008 }
 0x2b4   : > { %v5206_v61 = vadd.f32 %v5205_v45, %v9184_v25  ;;  %v5603_v15 = vpack.c.bf16 %v6462_v46, %v6462_v46  ;;  %v4542_v10 = vsel %vm9039_vm14, %v4533_v36, %v4541_v48  ;;  %v9254_v16 = vmul.f32 %v9239_v19, %v9239_v19  ;;  %v9263_v44 = vpop.f32.mrb[26].mxu1  ;;  %v9265_v36 = vpop.f32.mrb[28].mxu0 }
 0x2b5   : > { %v9250_v34 = vor.u32 %v4570_v5, %v4567_v13  ;;  %v5095_v41 = vsel %vm5059_vm13, %v6462_v46, 0.0  ;;  %4801 = vst [vmem:[%s9021_s14 + $0x44] sm:$0xf] %v4542_v10  ;;  %v4522_v25 = vsel %vm9039_vm14, %v4513_v20, %v4521_v14  ;;  %v4523_v40 = vrot.slane %v4521_v14, 4  ;;  %v9269_v54 = vpop.f32.mrb[27].mxu1  ;;  %v9271_v60 = vpop.f32.mrb[29].mxu0 }
 0x2b6   : > { %v4545_v22 = vshrl.u32 %v5603_v15, 16  ;;  %v4548_v21 = vshll.u32 %v5603_v15, 16  ;;  %vm5065_vm1 = vcmp.eq.s32.totalorder %v9241_v63, 1  ;;  %v4543_v27 = vrot.slane %v4541_v48, 4  ;;  %4799 = vst [vmem:[%s9021_s14 + $0x3c] sm:$0xf] %v4522_v25 }
 0x2b7   : > { %v5129_v57 = vadd.f32 %v5128_v4, %v5094_v33  ;;  %v5173_v46 = vmul.f32 %v5095_v41, %v5095_v41  ;;  %v5207_v8 = vadd.f32 %v5206_v61, %v5172_v18  ;;  %v4532_v20 = vsel %vm9039_vm14, %v4523_v40, %v9197_v23  ;;  %v9278_v51 = vpop.f32.mrb[30].mxu0 }
 0x2b8   : > { %v4547_v42 = vrot.slane %v4545_v22, 6  ;;  %v4550_v37 = vrot.slane %v4548_v21, 7  ;;  %v6463_v9 = vadd.f32 %v9147_v3, %v9168_v17  ;;  %vm5063_vm12 = vcmp.eq.s32.totalorder %v9210_v24, 1  ;;  %4800 = vst [vmem:[%s9021_s14 + $0x40] sm:$0xf] %v4532_v20  ;;  %v9286_v62 = vpop.f32.mrb[31].mxu0 }
 0x2b9   : > { %v5130_v33 = vadd.f32 %v5129_v57, %v5095_v41  ;;  %v5208_v50 = vadd.f32 %v5207_v8, %v5173_v46  ;;  %v6464_v12 = vadd.f32 %v9151_v2, %v9174_v39  ;;  %v6465_v38 = vadd.f32 %v9170_v6, %v9208_v11  ;;  %v9297_v39 = vpop.permute.xlu1 %5005  ;;  %v9301_v5 = vpop.f32.mrb[28].mxu1 }
 0x2ba   : > { %v4573_v23 = vrot.slane %v9250_v34, 4  ;;  %v4551_v31 = vor.u32 %v4550_v37, %v4547_v42  ;;  %v5606_v3 = vpack.c.bf16 %v6463_v9, %v6463_v9  ;;  %v6466_v17 = vadd.f32 %v9176_v56, %v9213_v0  ;;  %v9304_v14 = vpop.f32.mrb[29].mxu1 }
 0x2bb   : > { %v5098_v29 = vsel %vm5062_vm10, %v6463_v9, 0.0  ;;  %v5604_v4 = vpack.c.bf16 %v6464_v12, %v6464_v12  ;;  %v5096_v2 = vsel %vm5060_vm7, %v6464_v12, 0.0  ;;  %v5609_v6 = vpack.c.bf16 %v6465_v38, %v6465_v38  ;;  %v9306_v41 = vpop.f32.mrb[30].mxu1  ;;  %v9308_v25 = vpop.f32.mrb[32].mxu0 }
 0x2bc   : > { %v4552_v11 = vsel %vm9039_vm14, %v4543_v27, %v4551_v31  ;;  %v4553_v45 = vrot.slane %v4551_v31, 4  ;;  %v4575_v48 = vshrl.u32 %v5606_v3, 16  ;;  %v4578_v13 = vshll.u32 %v5606_v3, 16  ;;  %v9313_v57 = vpop.f32.mrb[31].mxu1  ;;  %v9315_v46 = vpop.f32.mrb[33].mxu0 }
 0x2bd   : > { %4802 = vst [vmem:[%s9021_s14 + $0x48] sm:$0xf] %v4552_v11  ;;  %v4555_v56 = vshrl.u32 %v5604_v4, 16  ;;  %v4558_v0 = vshll.u32 %v5604_v4, 16  ;;  %v5131_v26 = vadd.f32 %v5130_v33, %v5096_v2  ;;  %v5174_v18 = vmul.f32 %v5096_v2, %v5096_v2  ;;  %v9321_v9 = vpop.f32.mrb[34].mxu0  ;;  %v9323_v33 = vpop.permute.xlu0 %5014 }
 0x2be   : > { %v4577_v49 = vrot.slane %v4575_v48, 6  ;;  %v4580_v61 = vrot.slane %v4578_v13, 7  ;;  %v4605_v15 = vshrl.u32 %v5609_v6, 16  ;;  %v4608_v10 = vshll.u32 %v5609_v6, 16  ;;  %v9326_v3 = vpop.f32.mrb[35].mxu0  ;;  %v9338_v6 = vpop.permute.xlu1 %5011 }
 0x2bf   : > { %vm5064_vm11 = vcmp.eq.s32.totalorder %v9246_v43, 1  ;;  %vm5066_vm15 = vcmp.eq.s32.totalorder %v9297_v39, 1  ;;  %v4557_v40 = vrot.slane %v4555_v56, 6  ;;  %v4560_v22 = vrot.slane %v4558_v0, 7 }
 0x2c0   : > { %v5132_v21 = vadd.f32 %v5131_v26, %v9239_v19  ;;  %v5209_v27 = vadd.f32 %v5208_v50, %v5174_v18  ;;  %v4581_v8 = vor.u32 %v4580_v61, %v4577_v49  ;;  %v4607_v20 = vrot.slane %v4605_v15, 6 }
 0x2c1   : > { %v4610_v42 = vrot.slane %v4608_v10, 7  ;;  %v9319_v37 = vsel %vm5065_vm1, %v6465_v38, 0.0  ;;  %v5176_v12 = vmul.f32 %v5098_v29, %v5098_v29  ;;  %v4561_v31 = vor.u32 %v4560_v22, %v4557_v40  ;;  %v9345_v18 = vpop.f32.mrb[32].mxu1 }
 0x2c2   : > { %v5210_v19 = vadd.f32 %v5209_v27, %v9254_v16  ;;  %v5607_v50 = vpack.c.bf16 %v6466_v17, %v6466_v17  ;;  %v4582_v4 = vsel %vm9039_vm14, %v4573_v23, %v4581_v8  ;;  %v9334_v63 = vmul.f32 %v9319_v37, %v9319_v37  ;;  %v9352_v61 = vpop.f32.mrb[33].mxu1 }
 0x2c3   : > { %v9330_v2 = vor.u32 %v4610_v42, %v4607_v20  ;;  %v5099_v38 = vsel %vm5063_vm12, %v6466_v17, 0.0  ;;  %4805 = vst [vmem:[%s9021_s14 + $0x54] sm:$0xf] %v4582_v4  ;;  %v4562_v16 = vsel %vm9039_vm14, %v4553_v45, %v4561_v31  ;;  %v4563_v11 = vrot.slane %v4561_v31, 4  ;;  %v9360_v22 = vpop.f32.mrb[34].mxu1  ;;  %v5018_v20 = vpop.permute.xlu1 %5017 }
 0x2c4   : > { %v4585_v48 = vshrl.u32 %v5607_v50, 16  ;;  %v4588_v13 = vshll.u32 %v5607_v50, 16  ;;  %vm5069_vm3 = vcmp.eq.s32.totalorder %v9323_v33, 1  ;;  %v4583_v23 = vrot.slane %v4581_v8, 4  ;;  %4803 = vst [vmem:[%s9021_s14 + $0x4c] sm:$0xf] %v4562_v16  ;;  %v9367_v8 = vpop.permute.xlu0 %5020 }
 0x2c5   : > { %v5133_v56 = vadd.f32 %v5132_v21, %v5098_v29  ;;  %v5177_v0 = vmul.f32 %v5099_v38, %v5099_v38  ;;  %v5211_v26 = vadd.f32 %v5210_v19, %v5176_v12  ;;  %v4572_v24 = vsel %vm9039_vm14, %v4563_v11, %v9250_v34  ;;  %v9365_v27 = vpop.f32.mrb[35].mxu1 }
 0x2c6   : > { %v4587_v17 = vrot.slane %v4585_v48, 6  ;;  %v4590_v49 = vrot.slane %v4588_v13, 7  ;;  %v6467_v45 = vadd.f32 %v9186_v7, %v9219_v55  ;;  %vm5067_vm0 = vcmp.eq.s32.totalorder %v9291_v58, 1  ;;  %4804 = vst [vmem:[%s9021_s14 + $0x50] sm:$0xf] %v4572_v24 }
 0x2c7   : > { %v5134_v15 = vadd.f32 %v5133_v56, %v5099_v38  ;;  %v5212_v29 = vadd.f32 %v5211_v26, %v5177_v0  ;;  %v6468_v10 = vadd.f32 %v9190_v53, %v9225_v35  ;;  %v6469_v40 = vadd.f32 %v9221_v47, %v9244_v59 }
 0x2c8   : > { %v4613_v34 = vrot.slane %v9330_v2, 4  ;;  %v4591_v21 = vor.u32 %v4590_v49, %v4587_v17  ;;  %v5610_v7 = vpack.c.bf16 %v6467_v45, %v6467_v45  ;;  %v6470_v55 = vadd.f32 %v9227_v30, %v9258_v52  ;;  %v9380_v17 = vpop.permute.xlu0 %5026 }
 0x2c9   : > { %v5102_v53 = vsel %vm5066_vm15, %v6467_v45, 0.0  ;;  %v5608_v35 = vpack.c.bf16 %v6468_v10, %v6468_v10  ;;  %v5100_v47 = vsel %vm5064_vm11, %v6468_v10, 0.0  ;;  %v5613_v59 = vpack.c.bf16 %v6469_v40, %v6469_v40 }
 0x2ca   : > { %v4592_v42 = vsel %vm9039_vm14, %v4583_v23, %v4591_v21  ;;  %v4593_v12 = vrot.slane %v4591_v21, 4  ;;  %v4615_v31 = vshrl.u32 %v5610_v7, 16  ;;  %v4618_v19 = vshll.u32 %v5610_v7, 16 }
 0x2cb   : > { %4806 = vst [vmem:[%s9021_s14 + $0x58] sm:$0xf] %v4592_v42  ;;  %v4595_v30 = vshrl.u32 %v5608_v35, 16  ;;  %v4598_v52 = vshll.u32 %v5608_v35, 16  ;;  %v5135_v50 = vadd.f32 %v5134_v15, %v5100_v47  ;;  %v5178_v4 = vmul.f32 %v5100_v47, %v5100_v47  ;;  %v9389_v35 = vpop.permute.xlu1 %5023 }
 0x2cc   : > { %v4617_v38 = vrot.slane %v4615_v31, 6  ;;  %v4620_v39 = vrot.slane %v4618_v19, 7  ;;  %v4645_v16 = vshrl.u32 %v5613_v59, 16  ;;  %v4648_v11 = vshll.u32 %v5613_v59, 16 }
 0x2cd   : > { %vm5068_vm2 = vcmp.eq.s32.totalorder %v9338_v6, 1  ;;  %vm5070_vm4 = vcmp.eq.s32.totalorder %v5018_v20, 1  ;;  %v4597_v43 = vrot.slane %v4595_v30, 6  ;;  %v4600_v48 = vrot.slane %v4598_v52, 7 }
 0x2ce   : > { %v5136_v13 = vadd.f32 %v5135_v50, %v9319_v37  ;;  %v5213_v23 = vadd.f32 %v5212_v29, %v5178_v4  ;;  %v4621_v56 = vor.u32 %v4620_v39, %v4617_v38  ;;  %v4647_v0 = vrot.slane %v4645_v16, 6 }
 0x2cf   : > { %v4650_v26 = vrot.slane %v4648_v11, 7  ;;  %v5105_v24 = vsel %vm5069_vm3, %v6469_v40, 0.0  ;;  %v5180_v49 = vmul.f32 %v5102_v53, %v5102_v53  ;;  %v4601_v45 = vor.u32 %v4600_v48, %v4597_v43  ;;  %v5030_v43 = vpop.permute.xlu1 %5029 }
 0x2d0   : > { %v5214_v15 = vadd.f32 %v5213_v23, %v9334_v63  ;;  %v5611_v10 = vpack.c.bf16 %v6470_v55, %v6470_v55  ;;  %v4622_v21 = vsel %vm9039_vm14, %v4613_v34, %v4621_v56  ;;  %v5183_v29 = vmul.f32 %v5105_v24, %v5105_v24 }
 0x2d1   : > { %v9385_v37 = vor.u32 %v4650_v26, %v4647_v0  ;;  %v5103_v7 = vsel %vm5067_vm0, %v6470_v55, 0.0  ;;  %4809 = vst [vmem:[%s9021_s14 + $0x64] sm:$0xf] %v4622_v21  ;;  %v4602_v33 = vsel %vm9039_vm14, %v4593_v12, %v4601_v45  ;;  %v4603_v40 = vrot.slane %v4601_v45, 4 }
 0x2d2   : > { %v4625_v47 = vshrl.u32 %v5611_v10, 16  ;;  %v4628_v63 = vshll.u32 %v5611_v10, 16  ;;  %vm5073_vm5 = vcmp.eq.s32.totalorder %v9380_v17, 1  ;;  %v4623_v59 = vrot.slane %v4621_v56, 4  ;;  %4807 = vst [vmem:[%s9021_s14 + $0x5c] sm:$0xf] %v4602_v33 }
 0x2d3   : > { %v5137_v34 = vadd.f32 %v5136_v13, %v5102_v53  ;;  %v5181_v42 = vmul.f32 %v5103_v7, %v5103_v7  ;;  %v5215_v31 = vadd.f32 %v5214_v15, %v5180_v49  ;;  %v4612_v58 = vsel %vm9039_vm14, %v4603_v40, %v9330_v2 }
 0x2d4   : > { %v4627_v55 = vrot.slane %v4625_v47, 6  ;;  %v4630_v19 = vrot.slane %v4628_v63, 7  ;;  %v6471_v30 = vadd.f32 %v9230_v32, %v9263_v44  ;;  %vm5071_vm6 = vcmp.eq.s32.totalorder %v9367_v8, 1  ;;  %4808 = vst [vmem:[%s9021_s14 + $0x60] sm:$0xf] %v4612_v58 }
 0x2d5   : > { %v5138_v12 = vadd.f32 %v5137_v34, %v5103_v7  ;;  %v5216_v52 = vadd.f32 %v5215_v31, %v5181_v42  ;;  %v6472_v53 = vadd.f32 %v9232_v1, %v9269_v54  ;;  %v6473_v50 = vadd.f32 %v9265_v36, %v9301_v5 }
 0x2d6   : > { %v4653_v4 = vrot.slane %v9385_v37, 4  ;;  %v4631_v2 = vor.u32 %v4630_v19, %v4627_v55  ;;  %v5614_v38 = vpack.c.bf16 %v6471_v30, %v6471_v30  ;;  %v6474_v39 = vadd.f32 %v9271_v60, %v9304_v14 }
 0x2d7   : > { %v5106_v32 = vsel %vm5070_vm4, %v6471_v30, 0.0  ;;  %v5612_v44 = vpack.c.bf16 %v6472_v53, %v6472_v53  ;;  %v5104_v16 = vsel %vm5068_vm2, %v6472_v53, 0.0  ;;  %v5617_v11 = vpack.c.bf16 %v6473_v50, %v6473_v50 }
 0x2d8   : > { %v4632_v1 = vsel %vm9039_vm14, %v4623_v59, %v4631_v2  ;;  %v4633_v54 = vrot.slane %v4631_v2, 4  ;;  %v4655_v36 = vshrl.u32 %v5614_v38, 16  ;;  %v4658_v5 = vshll.u32 %v5614_v38, 16 }
 0x2d9   : > { %4810 = vst [vmem:[%s9021_s14 + $0x68] sm:$0xf] %v4632_v1  ;;  %v4635_v48 = vshrl.u32 %v5612_v44, 16  ;;  %v4638_v13 = vshll.u32 %v5612_v44, 16  ;;  %v5139_v23 = vadd.f32 %v5138_v12, %v5104_v16  ;;  %v5182_v56 = vmul.f32 %v5104_v16, %v5104_v16 }
 0x2da   : > { %v4657_v60 = vrot.slane %v4655_v36, 6  ;;  %v4660_v14 = vrot.slane %v4658_v5, 7  ;;  %v4685_v20 = vshrl.u32 %v5617_v11, 16  ;;  %v4688_v0 = vshll.u32 %v5617_v11, 16 }
 0x2db   : > { %vm5072_vm9 = vcmp.eq.s32.totalorder %v9389_v35, 1  ;;  %vm5074_vm13 = vcmp.eq.s32.totalorder %v5030_v43, 1  ;;  %v4637_v6 = vrot.slane %v4635_v48, 6  ;;  %v4640_v26 = vrot.slane %v4638_v13, 7 }
 0x2dc   : > { %v5140_v49 = vadd.f32 %v5139_v23, %v5105_v24  ;;  %v5217_v45 = vadd.f32 %v5216_v52, %v5182_v56  ;;  %v4661_v15 = vor.u32 %v4660_v14, %v4657_v60  ;;  %v4687_v10 = vrot.slane %v4685_v20, 6  ;;  %v5033_v52 = vpop.permute.xlu0 %5032  ;;  %v5036_v23 = vpop.permute.xlu1 %5035 }
 0x2dd   : > { %v4690_v21 = vrot.slane %v4688_v0, 7  ;;  %v5109_v7 = vsel %vm5073_vm5, %v6473_v50, 0.0  ;;  %v5184_v33 = vmul.f32 %v5106_v32, %v5106_v32  ;;  %v4641_v40 = vor.u32 %v4640_v26, %v4637_v6 }
 0x2de   : > { %v5218_v47 = vadd.f32 %v5217_v45, %v5183_v29  ;;  %v5615_v63 = vpack.c.bf16 %v6474_v39, %v6474_v39  ;;  %v4662_v59 = vsel %vm9039_vm14, %v4653_v4, %v4661_v15  ;;  %v5187_v42 = vmul.f32 %v5109_v7, %v5109_v7 }
 0x2df   : > { %v9421_v34 = vor.u32 %v4690_v21, %v4687_v10  ;;  %v5107_v24 = vsel %vm5071_vm6, %v6474_v39, 0.0  ;;  %4813 = vst [vmem:[%s9021_s14 + $0x74] sm:$0xf] %v4662_v59  ;;  %v4642_v17 = vsel %vm9039_vm14, %v4633_v54, %v4641_v40  ;;  %v4643_v31 = vrot.slane %v4641_v40, 4 }
 0x2e0   : > { %v4665_v58 = vshrl.u32 %v5615_v63, 16  ;;  %v4668_v55 = vshll.u32 %v5615_v63, 16  ;;  %v4663_v19 = vrot.slane %v4661_v15, 4  ;;  %4811 = vst [vmem:[%s9021_s14 + $0x6c] sm:$0xf] %v4642_v17  ;;  %v5141_v29 = vadd.f32 %v5140_v49, %v5106_v32  ;;  %v5042_v17 = vpop.permute.xlu1 %5041 }
 0x2e1   : > { %v5185_v30 = vmul.f32 %v5107_v24, %v5107_v24  ;;  %v5219_v12 = vadd.f32 %v5218_v47, %v5184_v33  ;;  %v4652_v53 = vsel %vm9039_vm14, %v4643_v31, %v9385_v37  ;;  %v6475_v4 = vadd.f32 %v9278_v51, %v9306_v41 }
 0x2e2   : > { %v4667_v8 = vrot.slane %v4665_v58, 6  ;;  %v4670_v50 = vrot.slane %v4668_v55, 7  ;;  %4812 = vst [vmem:[%s9021_s14 + $0x70] sm:$0xf] %v4652_v53  ;;  %v5142_v2 = vadd.f32 %v5141_v29, %v5107_v24  ;;  %v6476_v39 = vadd.f32 %v9286_v62, %v9313_v57 }
 0x2e3   : > { %v5220_v38 = vadd.f32 %v5219_v12, %v5185_v30  ;;  %v6477_v32 = vadd.f32 %v9308_v25, %v9345_v18  ;;  %v4693_v44 = vrot.slane %v9421_v34, 4  ;;  %v5618_v11 = vpack.c.bf16 %v6475_v4, %v6475_v4 }
 0x2e4   : > { %v4671_v16 = vor.u32 %v4670_v50, %v4667_v8  ;;  %v6478_v37 = vadd.f32 %v9315_v46, %v9352_v61  ;;  %v5110_v1 = vsel %vm5074_vm13, %v6475_v4, 0.0  ;;  %v5616_v51 = vpack.c.bf16 %v6476_v39, %v6476_v39  ;;  %v5039_v46 = vpop.permute.xlu0 %5038 }
 0x2e5   : > { %v5108_v41 = vsel %vm5072_vm9, %v6476_v39, 0.0  ;;  %v5621_v54 = vpack.c.bf16 %v6477_v32, %v6477_v32  ;;  %v4695_v36 = vshrl.u32 %v5618_v11, 16  ;;  %v4698_v25 = vshll.u32 %v5618_v11, 16 }
 0x2e6   : > { %v4672_v62 = vsel %vm9039_vm14, %v4663_v19, %v4671_v16  ;;  %v4673_v57 = vrot.slane %v4671_v16, 4  ;;  %v4675_v18 = vshrl.u32 %v5616_v51, 16  ;;  %v4678_v5 = vshll.u32 %v5616_v51, 16 }
 0x2e7   : > { %4814 = vst [vmem:[%s9021_s14 + $0x78] sm:$0xf] %v4672_v62  ;;  %v5143_v48 = vadd.f32 %v5142_v2, %v5108_v41  ;;  %v5186_v13 = vmul.f32 %v5108_v41, %v5108_v41  ;;  %v4697_v61 = vrot.slane %v4695_v36, 6  ;;  %v4700_v43 = vrot.slane %v4698_v25, 7 }
 0x2e8   : > { %v4725_v56 = vshrl.u32 %v5621_v54, 16  ;;  %v4728_v60 = vshll.u32 %v5621_v54, 16  ;;  %v4677_v35 = vrot.slane %v4675_v18, 6  ;;  %v4680_v14 = vrot.slane %v4678_v5, 7  ;;  %v4824_v18 = vld [vmem:[%s9021_s14 + $0x98] sm:$0x3] }
 0x2e9   : > { %v5144_v20 = vadd.f32 %v5143_v48, %v5109_v7  ;;  %v5221_v0 = vadd.f32 %v5220_v38, %v5186_v13  ;;  %vm5075_vm7 = vcmp.eq.s32.totalorder %v5033_v52, 1  ;;  %v4701_v6 = vor.u32 %v4700_v43, %v4697_v61 }
 0x2ea   : > { %v4727_v26 = vrot.slane %v4725_v56, 6  ;;  %v4730_v49 = vrot.slane %v4728_v60, 7  ;;  %vm5077_vm10 = vcmp.eq.s32.totalorder %v5039_v46, 1  ;;  %v4681_v45 = vor.u32 %v4680_v14, %v4677_v35 }
 0x2eb   : > { %v5222_v15 = vadd.f32 %v5221_v0, %v5187_v42  ;;  %v5619_v10 = vpack.c.bf16 %v6478_v37, %v6478_v37  ;;  %v4702_v21 = vsel %vm9039_vm14, %v4693_v44, %v4701_v6  ;;  %v5188_v33 = vmul.f32 %v5110_v1, %v5110_v1 }
 0x2ec   : > { %v5113_v40 = vsel %vm5077_vm10, %v6477_v32, 0.0  ;;  %v5111_v47 = vsel %vm5075_vm7, %v6478_v37, 0.0  ;;  %4817 = vst [vmem:[%s9021_s14 + $0x84] sm:$0xf] %v4702_v21  ;;  %v4682_v7 = vsel %vm9039_vm14, %v4673_v57, %v4681_v45  ;;  %v4683_v63 = vrot.slane %v4681_v45, 4 }
 0x2ed   : > { %v4705_v59 = vshrl.u32 %v5619_v10, 16  ;;  %v4708_v24 = vshll.u32 %v5619_v10, 16  ;;  %4815 = vst [vmem:[%s9021_s14 + $0x7c] sm:$0xf] %v4682_v7  ;;  %v4731_v31 = vor.u32 %v4730_v49, %v4727_v26  ;;  %v5145_v58 = vadd.f32 %v5144_v20, %v5110_v1 }
 0x2ee   : > { %v5189_v42 = vmul.f32 %v5111_v47, %v5111_v47  ;;  %v5223_v55 = vadd.f32 %v5222_v15, %v5188_v33  ;;  %v4692_v19 = vsel %vm9039_vm14, %v4683_v63, %v9421_v34  ;;  %v6479_v12 = vadd.f32 %v9321_v9, %v9360_v22 }
 0x2ef   : > { %v4707_v29 = vrot.slane %v4705_v59, 6  ;;  %v4710_v30 = vrot.slane %v4708_v24, 7  ;;  %vm5076_vm1 = vcmp.eq.s32.totalorder %v5036_v23, 1  ;;  %4816 = vst [vmem:[%s9021_s14 + $0x80] sm:$0xf] %v4692_v19  ;;  %v5146_v52 = vadd.f32 %v5145_v58, %v5111_v47 }
 0x2f0   : > { %v5224_v53 = vadd.f32 %v5223_v55, %v5189_v42  ;;  %v6480_v8 = vadd.f32 %v9326_v3, %v9365_v27  ;;  %vm5078_vm12 = vcmp.eq.s32.totalorder %v5042_v17, 1  ;;  %v4703_v50 = vrot.slane %v4701_v6, 4 }
 0x2f1   : > { %v4711_v4 = vor.u32 %v4710_v30, %v4707_v29  ;;  %v5622_v2 = vpack.c.bf16 %v6479_v12, %v6479_v12  ;;  %v5191_v38 = vmul.f32 %v5113_v40, %v5113_v40  ;;  %vm4822_vm11 = vcmask 1041408  }
 0x2f2   : > { %v5620_v34 = vpack.c.bf16 %v6480_v8, %v6480_v8  ;;  %v5112_v39 = vsel %vm5076_vm1, %v6480_v8, 0.0  ;;  %v4733_v32 = vrot.slane %v4731_v31, 4  ;;  %v5114_v41 = vsel %vm5078_vm12, %v6479_v12, 0.0  ;;  %vm4823_vm15 = vmand %vm4822_vm11, %vm4382_vm8 }
 0x2f3   : > { %v4712_v9 = vsel %vm9039_vm14, %v4703_v50, %v4711_v4  ;;  %v4735_v22 = vshrl.u32 %v5622_v2, 16  ;;  %v4738_v44 = vshll.u32 %v5622_v2, 16  ;;  %v5147_v37 = vadd.f32 %v5146_v52, %v5112_v39 }
 0x2f4   : > { %4818 = vst [vmem:[%s9021_s14 + $0x88] sm:$0xf] %v4712_v9  ;;  %v4715_v16 = vshrl.u32 %v5620_v34, 16  ;;  %v4718_v11 = vshll.u32 %v5620_v34, 16  ;;  %v5190_v3 = vmul.f32 %v5112_v39, %v5112_v39  ;;  %v4713_v27 = vrot.slane %v4711_v4, 4 }
 0x2f5   : > { %v4737_v1 = vrot.slane %v4735_v22, 6  ;;  %v4740_v51 = vrot.slane %v4738_v44, 7  ;;  %v5148_v57 = vadd.f32 %v5147_v37, %v5113_v40  ;;  %v5192_v5 = vmul.f32 %v5114_v41, %v5114_v41 }
 0x2f6   : > { %v4717_v54 = vrot.slane %v4715_v16, 6  ;;  %v4720_v62 = vrot.slane %v4718_v11, 7  ;;  %v5225_v36 = vadd.f32 %v5224_v53, %v5190_v3 }
 0x2f7   : > { %v4741_v25 = vor.u32 %v4740_v51, %v4737_v1  ;;  %v5149_v13 = vadd.f32 %v5148_v57, %v5114_v41 }
 0x2f8   : > { %v4721_v48 = vor.u32 %v4720_v62, %v4717_v54  ;;  %v5226_v23 = vadd.f32 %v5225_v36, %v5191_v38 }
 0x2f9   : > { %v4742_v46 = vsel %vm9039_vm14, %v4733_v32, %v4741_v25  ;;  %v4743_v61 = vrot.slane %v4741_v25, 4  ;;  %v5150_v60 = vrot.slane %v5149_v13, 4 }
 0x2fa   : > { %4821 = vst [vmem:[%s9021_s14 + $0x94] sm:$0xf] %v4742_v46  ;;  %v4722_v43 = vsel %vm9039_vm14, %v4713_v27, %v4721_v48  ;;  %v4723_v56 = vrot.slane %v4721_v48, 4  ;;  %v5227_v35 = vadd.f32 %v5226_v23, %v5192_v5 }
 0x2fb   : > { %v4825_v14 = vsel %vm4823_vm15, %v4743_v61, %v4824_v18  ;;  %4819 = vst [vmem:[%s9021_s14 + $0x8c] sm:$0xf] %v4722_v43  ;;  %v5151_v0 = vadd.f32 %v5150_v60, %v5149_v13 }
 0x2fc   : > { %4826 = vst [vmem:[%s9021_s14 + $0x98] sm:$0x3] %v4825_v14  ;;  %v4732_v20 = vsel %vm9039_vm14, %v4723_v56, %v4731_v31  ;;  %v5228_v6 = vrot.slane %v5227_v35, 4 }
 0x2fd   : > { %4820 = vst [vmem:[%s9021_s14 + $0x90] sm:$0xf] %v4732_v20  ;;  %v5152_v26 = vrot.slane %v5151_v0, 2 }
 0x2fe   : > { %v5229_v49 = vadd.f32 %v5228_v6, %v5227_v35 }
 0x2ff   : > { %v5153_v45 = vadd.f32 %v5152_v26, %v5151_v0 }
 0x300   : > { %v5230_v15 = vrot.slane %v5229_v49, 2 }
 0x301   : > { %v5154_v10 = vrot.slane %v5153_v45, 1 }
 0x302   : > { %v5231_v21 = vadd.f32 %v5230_v15, %v5229_v49 }
 0x303   : > { %v5155_v33 = vadd.f32 %v5154_v10, %v5153_v45 }
 0x304   : > { %v5232_v40 = vrot.slane %v5231_v21, 1 }
 0x305   : > { %5156 = vst [vmem:[%s292_s16] sm:$0x1] %v5155_v33 }
 0x306   : > { %v5233_v28 = vadd.f32 %v5232_v40, %v5231_v21 }
 0x308   : > { %5234 = vst [vmem:[%s295_s20] sm:$0x1] %v5233_v28 }
 0x309 PF: > { %s18_s24 = sadd.s32 1, %s6905_s24  }
 0x30a   : > { %p15_p4 = scmp.ge.s32.totalorder %s18_s24, 4  }
 0x30c   :  { %17 = sbr.rel (!%p15_p4) target bundleno = 1 (0x1), region = 102 }

</bundles_post_ra>
